<compile_context>
chip_gen: v6e
topology: v6e:2x2x1
jax: 0.10.0
libtpu: 0.0.40
codegen_flags: <defaults>
</compile_context>

<pallas_src>
import functools

import jax
import jax.numpy as jnp
import numpy as np
from jax.experimental import pallas as pl
from jax.experimental.pallas import tpu as pltpu

K = 4
STRIDE = 2
PAD = 1
EPS = 1e-5

_PHASES = ((0, 0), (0, 1), (1, 0), (1, 1))   # (oy % 2, ox % 2); p = 2*ph + pw
_TAPS = ((0, 0), (0, 1), (1, 0), (1, 1))     # (a, b) row/col tap offsets per phase


def _phase_conv(x_ref, w_ref, phase, *, h, w, cin):
    """Conv result for one output phase: (H*W, Cout) f32.

    x_ref: (1, H+2, W+2, Cin) bf16 VMEM block (pad-1 NHWC input of one sample)
    w_ref: (4, 4*Cin, Cout)  bf16 per-phase weights, tap-major contraction dim.

    out[n, co, 2m+ph, 2l+pw] = sum_{a,b,ci} xpad[n, m+ph+a, l+pw+b, ci]
                                            * w[ci, co, 3-ph-2a, 3-pw-2b]
    """
    ph, pw = _PHASES[phase]
    x = x_ref[0]                                               # (H+2, W+2, Cin) bf16
    patch = jnp.concatenate(
        [x[ph + a:ph + a + h, pw + b:pw + b + w, :] for a, b in _TAPS],
        axis=-1).reshape(h * w, 4 * cin)                       # (H*W, 4*Cin) bf16
    return jnp.dot(patch, w_ref[phase],
                   preferred_element_type=jnp.float32)         # (H*W, Cout) f32


def _stats_kernel(x_ref, w_ref, stat_ref, *, h, w, cin):
    """Per-sample partial BN statistics: row 0 = sum, row 1 = sum of squares."""
    cout = w_ref.shape[-1]
    ssum = jnp.zeros((1, cout), jnp.float32)
    ssq = jnp.zeros((1, cout), jnp.float32)
    for p in range(4):                      # consume each phase result immediately
        y = _phase_conv(x_ref, w_ref, p, h=h, w=w, cin=cin)
        ssum = ssum + y.sum(axis=0, keepdims=True)
        ssq = ssq + (y * y).sum(axis=0, keepdims=True)
    stat_ref[0, 0:1, :] = ssum
    stat_ref[0, 1:2, :] = ssq


def _apply_kernel(x_ref, w_ref, ss_ref, out_ref, *, h, w, cin):
    """Recompute the conv and fuse BN affine (scale/shift) + ReLU; phase-major stores."""
    scale = ss_ref[0:1, :]                  # (1, Cout) f32
    shift = ss_ref[1:2, :]
    for p in range(4):
        y = _phase_conv(x_ref, w_ref, p, h=h, w=w, cin=cin)
        out_ref[p, 0] = jnp.maximum(y * scale + shift, 0.0)


def decoder_layer_2d(x_nchw, w, gamma, beta):
    """Forward of DecoderLayer2D.  x_nchw: (N, Cin, H, W), w: (Cin, Cout, 4, 4)."""
    n, cin, h, wdt = x_nchw.shape
    cout = w.shape[1]
    hp, wp = h + 2, wdt + 2
    hw = h * wdt

    # NHWC (channels on lanes), bf16 MXU operands, spatial pad 1 (ConvT halo).
    x_nhwc = jnp.transpose(x_nchw, (0, 2, 3, 1)).astype(jnp.bfloat16)
    xpad = jnp.pad(x_nhwc, ((0, 0), (1, 1), (1, 1), (0, 0)))

    # Per-phase weight matrices (4, 4*Cin, Cout); contraction dim is tap-major to
    # match the in-kernel patch concat order.
    wph = jnp.stack([
        jnp.stack([w[:, :, 3 - ph - 2 * a, 3 - pw - 2 * b] for a, b in _TAPS],
                  axis=0).reshape(4 * cin, cout)
        for ph, pw in _PHASES], axis=0).astype(jnp.bfloat16)

    cparams = pltpu.CompilerParams(dimension_semantics=("parallel",),
                                   vmem_limit_bytes=48 * 1024 * 1024)
    x_spec = pl.BlockSpec((1, hp, wp, cin), lambda i: (i, 0, 0, 0))
    w_spec = pl.BlockSpec((4, 4 * cin, cout), lambda i: (0, 0, 0))

    # Pass 1: per-sample partial sum / sum-of-squares (BN needs full-batch stats
    # before any output element can be normalized).
    partial = pl.pallas_call(
        functools.partial(_stats_kernel, h=h, w=wdt, cin=cin),
        out_shape=jax.ShapeDtypeStruct((n, 2, cout), jnp.float32),
        grid=(n,),
        in_specs=[x_spec, w_spec],
        out_specs=pl.BlockSpec((1, 2, cout), lambda i: (i, 0, 0)),
        compiler_params=cparams,
    )(xpad, wph)

    # O(Cout) finalization in XLA: mean / biased var -> fused scale & shift.
    count = float(n * STRIDE * h * STRIDE * wdt)
    sums = jnp.sum(partial, axis=0)                        # (2, Cout) f32
    mean = sums[0] / count
    var = jnp.maximum(sums[1] / count - mean * mean, 0.0)  # f32 accumulation throughout
    scale = gamma.astype(jnp.float32) * jax.lax.rsqrt(var + EPS)
    shift = beta.astype(jnp.float32) - mean * scale
    ss = jnp.stack([scale, shift], axis=0)                 # packed (2, Cout)

    # Pass 2: recompute conv and apply affine + ReLU; phase-major, channels-last out.
    y_ph = pl.pallas_call(
        functools.partial(_apply_kernel, h=h, w=wdt, cin=cin),
        out_shape=jax.ShapeDtypeStruct((4, n, hw, cout), jnp.float32),
        grid=(n,),
        in_specs=[x_spec, w_spec, pl.BlockSpec((2, cout), lambda i: (0, 0))],
        out_specs=pl.BlockSpec((4, 1, hw, cout), lambda i: (0, i, 0, 0)),
        compiler_params=cparams,
    )(xpad, wph, ss)

    # Phase de-interleave back to NCHW: out[n, co, 2m+ph, 2l+pw] = y_ph[2*ph+pw, n, m*W+l, co].
    y = y_ph.reshape(2, 2, n, h, wdt, cout)                # (ph, pw, n, m, l, co)
    y = jnp.transpose(y, (2, 5, 3, 0, 4, 1)).reshape(n, cout, STRIDE * h, STRIDE * wdt)
    return y


def _reference(x_nchw, w, gamma, beta):
    """Pure-JAX reference (lax.conv_general_dilated), PyTorch semantics, on the same
    bf16-rounded operands the kernel uses (f32 accumulation on both sides)."""
    x = jnp.transpose(x_nchw, (0, 2, 3, 1)).astype(jnp.bfloat16).astype(jnp.float32)
    wf = jnp.transpose(w[:, :, ::-1, ::-1], (2, 3, 0, 1))
    wf = wf.astype(jnp.bfloat16).astype(jnp.float32)
    pad_edge = K - 1 - PAD
    conv = jax.lax.conv_general_dilated(
        x, wf, window_strides=(1, 1),
        padding=[(pad_edge, pad_edge), (pad_edge, pad_edge)],
        lhs_dilation=(STRIDE, STRIDE), rhs_dilation=(1, 1),
        dimension_numbers=("NHWC", "HWIO", "NHWC"),
        precision=jax.lax.Precision.HIGHEST)
    mean = conv.mean(axis=(0, 1, 2))
    var = conv.var(axis=(0, 1, 2))      # biased, as BatchNorm uses for normalization
    y = (conv - mean) / jnp.sqrt(var + EPS) * gamma + beta
    y = jnp.maximum(y, 0.0)
    return jnp.transpose(y, (0, 3, 1, 2))


if __name__ == "__main__":
    N, CIN, COUT, H, W = 2, 4, 8, 16, 16

    key = jax.random.PRNGKey(0)
    kx, kw, kg, kb = jax.random.split(key, 4)
    x = jax.random.normal(kx, (N, CIN, H, W), jnp.float32)
    # ConvTranspose2d weight layout: (in_channels, out_channels, kH, kW)
    weight = 0.1 * jax.random.normal(kw, (CIN, COUT, K, K), jnp.float32)
    gamma = 1.0 + 0.1 * jax.random.normal(kg, (COUT,), jnp.float32)
    beta = 0.1 * jax.random.normal(kb, (COUT,), jnp.float32)

    out = jax.jit(decoder_layer_2d)(x, weight, gamma, beta)
    out = jax.block_until_ready(out)
    assert out.shape == (N, COUT, STRIDE * H, STRIDE * W)

    ref = _reference(x, weight, gamma, beta)
    np.testing.assert_allclose(np.asarray(out), np.asarray(ref), rtol=1e-3, atol=1e-3)
    print("KERNEL_OK")
</pallas_src>

<mosaic_0001>
module attributes {stable_mosaic.version = 11 : i64} {
  func.func @_stats_kernel(%arg0: i32, %arg1: memref<1x18x18x4xbf16, #tpu.memory_space<vmem>>, %arg2: memref<4x16x8xbf16, #tpu.memory_space<vmem>>, %arg3: memref<1x2x8xf32, #tpu.memory_space<vmem>>) attributes {dimension_semantics = [#tpu.dimension_semantics<parallel>], iteration_bounds = array<i64: 2>, scalar_prefetch = 0 : i64, scratch_operands = 0 : i64, tpu.core_type = #tpu.core_type<tc>, window_params = [{transform_indices = @transform_0, window_bounds = array<i64: 1, 18, 18, 4>}, {pipeline_mode = #tpu.pipeline_mode<synchronous>, transform_indices = @transform_1, window_bounds = array<i64: 4, 16, 8>}, {transform_indices = @transform_2, window_bounds = array<i64: 1, 2, 8>}]} {
    %cst = arith.constant 0.000000e+00 : f32
    %0 = vector.broadcast %cst : f32 to vector<1x8xf32>
    %cst_0 = arith.constant 0.000000e+00 : f32
    %1 = vector.broadcast %cst_0 : f32 to vector<1x8xf32>
    %c0 = arith.constant 0 : index
    %c0_1 = arith.constant 0 : index
    %c0_2 = arith.constant 0 : index
    %c0_3 = arith.constant 0 : index
    %2 = vector.load %arg1[%c0, %c0_1, %c0_2, %c0_3] : memref<1x18x18x4xbf16, #tpu.memory_space<vmem>>, vector<1x18x18x4xbf16>
    %3 = vector.shape_cast %2 : vector<1x18x18x4xbf16> to vector<18x18x4xbf16>
    %4 = vector.extract_strided_slice %3 {offsets = [0, 0, 0], sizes = [16, 16, 4], strides = [1, 1, 1]} : vector<18x18x4xbf16> to vector<16x16x4xbf16>
    %5 = vector.extract_strided_slice %3 {offsets = [0, 1, 0], sizes = [16, 16, 4], strides = [1, 1, 1]} : vector<18x18x4xbf16> to vector<16x16x4xbf16>
    %6 = vector.extract_strided_slice %3 {offsets = [1, 0, 0], sizes = [16, 16, 4], strides = [1, 1, 1]} : vector<18x18x4xbf16> to vector<16x16x4xbf16>
    %7 = vector.extract_strided_slice %3 {offsets = [1, 1, 0], sizes = [16, 16, 4], strides = [1, 1, 1]} : vector<18x18x4xbf16> to vector<16x16x4xbf16>
    %8 = tpu.concatenate %4, %5, %6, %7 in 2 : vector<16x16x4xbf16>, vector<16x16x4xbf16>, vector<16x16x4xbf16>, vector<16x16x4xbf16> -> vector<16x16x16xbf16>
    %9 = vector.shape_cast %8 : vector<16x16x16xbf16> to vector<256x16xbf16>
    %c0_4 = arith.constant 0 : index
    %c0_5 = arith.constant 0 : index
    %c0_6 = arith.constant 0 : index
    %10 = vector.load %arg2[%c0_4, %c0_5, %c0_6] : memref<4x16x8xbf16, #tpu.memory_space<vmem>>, vector<1x16x8xbf16>
    %11 = vector.shape_cast %10 : vector<1x16x8xbf16> to vector<16x8xbf16>
    %cst_7 = arith.constant dense<0.000000e+00> : vector<256x8xf32>
    %12 = tpu.matmul %9, %11, %cst_7 {dimension_numbers = #tpu.dot_dimension_numbers<[1], [0], [0], [1], [0, 0, 1, 1], [], []>} : vector<256x16xbf16>, vector<16x8xbf16>, vector<256x8xf32> -> vector<256x8xf32>
    %cst_8 = arith.constant dense<0.000000e+00> : vector<8xf32>
    %13 = vector.multi_reduction <add>, %12, %cst_8 [0] : vector<256x8xf32> to vector<8xf32>
    %14 = vector.shape_cast %13 : vector<8xf32> to vector<1x8xf32>
    %15 = arith.addf %0, %14 : vector<1x8xf32>
    %16 = arith.mulf %12, %12 : vector<256x8xf32>
    %cst_9 = arith.constant dense<0.000000e+00> : vector<8xf32>
    %17 = vector.multi_reduction <add>, %16, %cst_9 [0] : vector<256x8xf32> to vector<8xf32>
    %18 = vector.shape_cast %17 : vector<8xf32> to vector<1x8xf32>
    %19 = arith.addf %1, %18 : vector<1x8xf32>
    %c0_10 = arith.constant 0 : index
    %c0_11 = arith.constant 0 : index
    %c0_12 = arith.constant 0 : index
    %c0_13 = arith.constant 0 : index
    %20 = vector.load %arg1[%c0_10, %c0_11, %c0_12, %c0_13] : memref<1x18x18x4xbf16, #tpu.memory_space<vmem>>, vector<1x18x18x4xbf16>
    %21 = vector.shape_cast %20 : vector<1x18x18x4xbf16> to vector<18x18x4xbf16>
    %22 = vector.extract_strided_slice %21 {offsets = [0, 1, 0], sizes = [16, 16, 4], strides = [1, 1, 1]} : vector<18x18x4xbf16> to vector<16x16x4xbf16>
    %23 = vector.extract_strided_slice %21 {offsets = [0, 2, 0], sizes = [16, 16, 4], strides = [1, 1, 1]} : vector<18x18x4xbf16> to vector<16x16x4xbf16>
    %24 = vector.extract_strided_slice %21 {offsets = [1, 1, 0], sizes = [16, 16, 4], strides = [1, 1, 1]} : vector<18x18x4xbf16> to vector<16x16x4xbf16>
    %25 = vector.extract_strided_slice %21 {offsets = [1, 2, 0], sizes = [16, 16, 4], strides = [1, 1, 1]} : vector<18x18x4xbf16> to vector<16x16x4xbf16>
    %26 = tpu.concatenate %22, %23, %24, %25 in 2 : vector<16x16x4xbf16>, vector<16x16x4xbf16>, vector<16x16x4xbf16>, vector<16x16x4xbf16> -> vector<16x16x16xbf16>
    %27 = vector.shape_cast %26 : vector<16x16x16xbf16> to vector<256x16xbf16>
    %c1 = arith.constant 1 : index
    %c0_14 = arith.constant 0 : index
    %c0_15 = arith.constant 0 : index
    %28 = vector.load %arg2[%c1, %c0_14, %c0_15] : memref<4x16x8xbf16, #tpu.memory_space<vmem>>, vector<1x16x8xbf16>
    %29 = vector.shape_cast %28 : vector<1x16x8xbf16> to vector<16x8xbf16>
    %cst_16 = arith.constant dense<0.000000e+00> : vector<256x8xf32>
    %30 = tpu.matmul %27, %29, %cst_16 {dimension_numbers = #tpu.dot_dimension_numbers<[1], [0], [0], [1], [0, 0, 1, 1], [], []>} : vector<256x16xbf16>, vector<16x8xbf16>, vector<256x8xf32> -> vector<256x8xf32>
    %cst_17 = arith.constant dense<0.000000e+00> : vector<8xf32>
    %31 = vector.multi_reduction <add>, %30, %cst_17 [0] : vector<256x8xf32> to vector<8xf32>
    %32 = vector.shape_cast %31 : vector<8xf32> to vector<1x8xf32>
    %33 = arith.addf %15, %32 : vector<1x8xf32>
    %34 = arith.mulf %30, %30 : vector<256x8xf32>
    %cst_18 = arith.constant dense<0.000000e+00> : vector<8xf32>
    %35 = vector.multi_reduction <add>, %34, %cst_18 [0] : vector<256x8xf32> to vector<8xf32>
    %36 = vector.shape_cast %35 : vector<8xf32> to vector<1x8xf32>
    %37 = arith.addf %19, %36 : vector<1x8xf32>
    %c0_19 = arith.constant 0 : index
    %c0_20 = arith.constant 0 : index
    %c0_21 = arith.constant 0 : index
    %c0_22 = arith.constant 0 : index
    %38 = vector.load %arg1[%c0_19, %c0_20, %c0_21, %c0_22] : memref<1x18x18x4xbf16, #tpu.memory_space<vmem>>, vector<1x18x18x4xbf16>
    %39 = vector.shape_cast %38 : vector<1x18x18x4xbf16> to vector<18x18x4xbf16>
    %40 = vector.extract_strided_slice %39 {offsets = [1, 0, 0], sizes = [16, 16, 4], strides = [1, 1, 1]} : vector<18x18x4xbf16> to vector<16x16x4xbf16>
    %41 = vector.extract_strided_slice %39 {offsets = [1, 1, 0], sizes = [16, 16, 4], strides = [1, 1, 1]} : vector<18x18x4xbf16> to vector<16x16x4xbf16>
    %42 = vector.extract_strided_slice %39 {offsets = [2, 0, 0], sizes = [16, 16, 4], strides = [1, 1, 1]} : vector<18x18x4xbf16> to vector<16x16x4xbf16>
    %43 = vector.extract_strided_slice %39 {offsets = [2, 1, 0], sizes = [16, 16, 4], strides = [1, 1, 1]} : vector<18x18x4xbf16> to vector<16x16x4xbf16>
    %44 = tpu.concatenate %40, %41, %42, %43 in 2 : vector<16x16x4xbf16>, vector<16x16x4xbf16>, vector<16x16x4xbf16>, vector<16x16x4xbf16> -> vector<16x16x16xbf16>
    %45 = vector.shape_cast %44 : vector<16x16x16xbf16> to vector<256x16xbf16>
    %c2 = arith.constant 2 : index
    %c0_23 = arith.constant 0 : index
    %c0_24 = arith.constant 0 : index
    %46 = vector.load %arg2[%c2, %c0_23, %c0_24] : memref<4x16x8xbf16, #tpu.memory_space<vmem>>, vector<1x16x8xbf16>
    %47 = vector.shape_cast %46 : vector<1x16x8xbf16> to vector<16x8xbf16>
    %cst_25 = arith.constant dense<0.000000e+00> : vector<256x8xf32>
    %48 = tpu.matmul %45, %47, %cst_25 {dimension_numbers = #tpu.dot_dimension_numbers<[1], [0], [0], [1], [0, 0, 1, 1], [], []>} : vector<256x16xbf16>, vector<16x8xbf16>, vector<256x8xf32> -> vector<256x8xf32>
    %cst_26 = arith.constant dense<0.000000e+00> : vector<8xf32>
    %49 = vector.multi_reduction <add>, %48, %cst_26 [0] : vector<256x8xf32> to vector<8xf32>
    %50 = vector.shape_cast %49 : vector<8xf32> to vector<1x8xf32>
    %51 = arith.addf %33, %50 : vector<1x8xf32>
    %52 = arith.mulf %48, %48 : vector<256x8xf32>
    %cst_27 = arith.constant dense<0.000000e+00> : vector<8xf32>
    %53 = vector.multi_reduction <add>, %52, %cst_27 [0] : vector<256x8xf32> to vector<8xf32>
    %54 = vector.shape_cast %53 : vector<8xf32> to vector<1x8xf32>
    %55 = arith.addf %37, %54 : vector<1x8xf32>
    %c0_28 = arith.constant 0 : index
    %c0_29 = arith.constant 0 : index
    %c0_30 = arith.constant 0 : index
    %c0_31 = arith.constant 0 : index
    %56 = vector.load %arg1[%c0_28, %c0_29, %c0_30, %c0_31] : memref<1x18x18x4xbf16, #tpu.memory_space<vmem>>, vector<1x18x18x4xbf16>
    %57 = vector.shape_cast %56 : vector<1x18x18x4xbf16> to vector<18x18x4xbf16>
    %58 = vector.extract_strided_slice %57 {offsets = [1, 1, 0], sizes = [16, 16, 4], strides = [1, 1, 1]} : vector<18x18x4xbf16> to vector<16x16x4xbf16>
    %59 = vector.extract_strided_slice %57 {offsets = [1, 2, 0], sizes = [16, 16, 4], strides = [1, 1, 1]} : vector<18x18x4xbf16> to vector<16x16x4xbf16>
    %60 = vector.extract_strided_slice %57 {offsets = [2, 1, 0], sizes = [16, 16, 4], strides = [1, 1, 1]} : vector<18x18x4xbf16> to vector<16x16x4xbf16>
    %61 = vector.extract_strided_slice %57 {offsets = [2, 2, 0], sizes = [16, 16, 4], strides = [1, 1, 1]} : vector<18x18x4xbf16> to vector<16x16x4xbf16>
    %62 = tpu.concatenate %58, %59, %60, %61 in 2 : vector<16x16x4xbf16>, vector<16x16x4xbf16>, vector<16x16x4xbf16>, vector<16x16x4xbf16> -> vector<16x16x16xbf16>
    %63 = vector.shape_cast %62 : vector<16x16x16xbf16> to vector<256x16xbf16>
    %c3 = arith.constant 3 : index
    %c0_32 = arith.constant 0 : index
    %c0_33 = arith.constant 0 : index
    %64 = vector.load %arg2[%c3, %c0_32, %c0_33] : memref<4x16x8xbf16, #tpu.memory_space<vmem>>, vector<1x16x8xbf16>
    %65 = vector.shape_cast %64 : vector<1x16x8xbf16> to vector<16x8xbf16>
    %cst_34 = arith.constant dense<0.000000e+00> : vector<256x8xf32>
    %66 = tpu.matmul %63, %65, %cst_34 {dimension_numbers = #tpu.dot_dimension_numbers<[1], [0], [0], [1], [0, 0, 1, 1], [], []>} : vector<256x16xbf16>, vector<16x8xbf16>, vector<256x8xf32> -> vector<256x8xf32>
    %cst_35 = arith.constant dense<0.000000e+00> : vector<8xf32>
    %67 = vector.multi_reduction <add>, %66, %cst_35 [0] : vector<256x8xf32> to vector<8xf32>
    %68 = vector.shape_cast %67 : vector<8xf32> to vector<1x8xf32>
    %69 = arith.addf %51, %68 : vector<1x8xf32>
    %70 = arith.mulf %66, %66 : vector<256x8xf32>
    %cst_36 = arith.constant dense<0.000000e+00> : vector<8xf32>
    %71 = vector.multi_reduction <add>, %70, %cst_36 [0] : vector<256x8xf32> to vector<8xf32>
    %72 = vector.shape_cast %71 : vector<8xf32> to vector<1x8xf32>
    %73 = arith.addf %55, %72 : vector<1x8xf32>
    %c0_37 = arith.constant 0 : index
    %c0_38 = arith.constant 0 : index
    %c0_39 = arith.constant 0 : index
    %74 = vector.load %arg3[%c0_37, %c0_38, %c0_39] : memref<1x2x8xf32, #tpu.memory_space<vmem>>, vector<1x1x8xf32>
    %75 = vector.shape_cast %74 : vector<1x1x8xf32> to vector<1x8xf32>
    %76 = vector.shape_cast %69 : vector<1x8xf32> to vector<1x1x8xf32>
    tpu.vector_store %arg3[%c0_37, %c0_38, %c0_39], %76 {strides = array<i32>} : memref<1x2x8xf32, #tpu.memory_space<vmem>>, vector<1x1x8xf32>,
    %c0_40 = arith.constant 0 : index
    %c1_41 = arith.constant 1 : index
    %c0_42 = arith.constant 0 : index
    %77 = vector.load %arg3[%c0_40, %c1_41, %c0_42] : memref<1x2x8xf32, #tpu.memory_space<vmem>>, vector<1x1x8xf32>
    %78 = vector.shape_cast %77 : vector<1x1x8xf32> to vector<1x8xf32>
    %79 = vector.shape_cast %73 : vector<1x8xf32> to vector<1x1x8xf32>
    tpu.vector_store %arg3[%c0_40, %c1_41, %c0_42], %79 {strides = array<i32>} : memref<1x2x8xf32, #tpu.memory_space<vmem>>, vector<1x1x8xf32>,
    return
  }
  func.func @transform_0(%arg0: i32) -> (i32, i32, i32, i32) {
    %c0_i32 = arith.constant 0 : i32
    %c0_i32_0 = arith.constant 0 : i32
    %c0_i32_1 = arith.constant 0 : i32
    %c0_i32_2 = arith.constant 0 : i32
    return %arg0, %c0_i32, %c0_i32_0, %c0_i32_1 : i32, i32, i32, i32
  }
  func.func @transform_1(%arg0: i32) -> (i32, i32, i32) {
    %c0_i32 = arith.constant 0 : i32
    %c0_i32_0 = arith.constant 0 : i32
    %c0_i32_1 = arith.constant 0 : i32
    %c0_i32_2 = arith.constant 0 : i32
    return %c0_i32, %c0_i32_0, %c0_i32_1 : i32, i32, i32
  }
  func.func @transform_2(%arg0: i32) -> (i32, i32, i32) {
    %c0_i32 = arith.constant 0 : i32
    %c0_i32_0 = arith.constant 0 : i32
    %c0_i32_1 = arith.constant 0 : i32
    return %arg0, %c0_i32, %c0_i32_0 : i32, i32, i32
  }
}

module attributes {stable_mosaic.version = 11 : i64} {
  func.func @_apply_kernel(%arg0: i32, %arg1: memref<1x18x18x4xbf16, #tpu.memory_space<vmem>>, %arg2: memref<4x16x8xbf16, #tpu.memory_space<vmem>>, %arg3: memref<2x8xf32, #tpu.memory_space<vmem>>, %arg4: memref<4x1x256x8xf32, #tpu.memory_space<vmem>>) attributes {dimension_semantics = [#tpu.dimension_semantics<parallel>], iteration_bounds = array<i64: 2>, scalar_prefetch = 0 : i64, scratch_operands = 0 : i64, tpu.core_type = #tpu.core_type<tc>, window_params = [{transform_indices = @transform_0, window_bounds = array<i64: 1, 18, 18, 4>}, {pipeline_mode = #tpu.pipeline_mode<synchronous>, transform_indices = @transform_1, window_bounds = array<i64: 4, 16, 8>}, {pipeline_mode = #tpu.pipeline_mode<synchronous>, transform_indices = @transform_2, window_bounds = array<i64: 2, 8>}, {transform_indices = @transform_3, window_bounds = array<i64: 4, 1, 256, 8>}]} {
    %c0 = arith.constant 0 : index
    %c0_0 = arith.constant 0 : index
    %0 = vector.load %arg3[%c0, %c0_0] : memref<2x8xf32, #tpu.memory_space<vmem>>, vector<1x8xf32>
    %c1 = arith.constant 1 : index
    %c0_1 = arith.constant 0 : index
    %1 = vector.load %arg3[%c1, %c0_1] : memref<2x8xf32, #tpu.memory_space<vmem>>, vector<1x8xf32>
    %c0_2 = arith.constant 0 : index
    %c0_3 = arith.constant 0 : index
    %c0_4 = arith.constant 0 : index
    %c0_5 = arith.constant 0 : index
    %2 = vector.load %arg1[%c0_2, %c0_3, %c0_4, %c0_5] : memref<1x18x18x4xbf16, #tpu.memory_space<vmem>>, vector<1x18x18x4xbf16>
    %3 = vector.shape_cast %2 : vector<1x18x18x4xbf16> to vector<18x18x4xbf16>
    %4 = vector.extract_strided_slice %3 {offsets = [0, 0, 0], sizes = [16, 16, 4], strides = [1, 1, 1]} : vector<18x18x4xbf16> to vector<16x16x4xbf16>
    %5 = vector.extract_strided_slice %3 {offsets = [0, 1, 0], sizes = [16, 16, 4], strides = [1, 1, 1]} : vector<18x18x4xbf16> to vector<16x16x4xbf16>
    %6 = vector.extract_strided_slice %3 {offsets = [1, 0, 0], sizes = [16, 16, 4], strides = [1, 1, 1]} : vector<18x18x4xbf16> to vector<16x16x4xbf16>
    %7 = vector.extract_strided_slice %3 {offsets = [1, 1, 0], sizes = [16, 16, 4], strides = [1, 1, 1]} : vector<18x18x4xbf16> to vector<16x16x4xbf16>
    %8 = tpu.concatenate %4, %5, %6, %7 in 2 : vector<16x16x4xbf16>, vector<16x16x4xbf16>, vector<16x16x4xbf16>, vector<16x16x4xbf16> -> vector<16x16x16xbf16>
    %9 = vector.shape_cast %8 : vector<16x16x16xbf16> to vector<256x16xbf16>
    %c0_6 = arith.constant 0 : index
    %c0_7 = arith.constant 0 : index
    %c0_8 = arith.constant 0 : index
    %10 = vector.load %arg2[%c0_6, %c0_7, %c0_8] : memref<4x16x8xbf16, #tpu.memory_space<vmem>>, vector<1x16x8xbf16>
    %11 = vector.shape_cast %10 : vector<1x16x8xbf16> to vector<16x8xbf16>
    %cst = arith.constant dense<0.000000e+00> : vector<256x8xf32>
    %12 = tpu.matmul %9, %11, %cst {dimension_numbers = #tpu.dot_dimension_numbers<[1], [0], [0], [1], [0, 0, 1, 1], [], []>} : vector<256x16xbf16>, vector<16x8xbf16>, vector<256x8xf32> -> vector<256x8xf32>
    %13 = vector.broadcast %0 : vector<1x8xf32> to vector<256x8xf32>
    %14 = arith.mulf %12, %13 : vector<256x8xf32>
    %15 = vector.broadcast %1 : vector<1x8xf32> to vector<256x8xf32>
    %16 = arith.addf %14, %15 : vector<256x8xf32>
    %cst_9 = arith.constant 0.000000e+00 : f32
    %17 = vector.broadcast %cst_9 : f32 to vector<256x8xf32>
    %18 = arith.maximumf %16, %17 : vector<256x8xf32>
    %c0_10 = arith.constant 0 : index
    %c0_11 = arith.constant 0 : index
    %c0_12 = arith.constant 0 : index
    %c0_13 = arith.constant 0 : index
    %19 = vector.load %arg4[%c0_10, %c0_11, %c0_12, %c0_13] : memref<4x1x256x8xf32, #tpu.memory_space<vmem>>, vector<1x1x256x8xf32>
    %20 = vector.shape_cast %19 : vector<1x1x256x8xf32> to vector<256x8xf32>
    %21 = vector.shape_cast %18 : vector<256x8xf32> to vector<1x1x256x8xf32>
    tpu.vector_store %arg4[%c0_10, %c0_11, %c0_12, %c0_13], %21 {strides = array<i32>} : memref<4x1x256x8xf32, #tpu.memory_space<vmem>>, vector<1x1x256x8xf32>,
    %c0_14 = arith.constant 0 : index
    %c0_15 = arith.constant 0 : index
    %c0_16 = arith.constant 0 : index
    %c0_17 = arith.constant 0 : index
    %22 = vector.load %arg1[%c0_14, %c0_15, %c0_16, %c0_17] : memref<1x18x18x4xbf16, #tpu.memory_space<vmem>>, vector<1x18x18x4xbf16>
    %23 = vector.shape_cast %22 : vector<1x18x18x4xbf16> to vector<18x18x4xbf16>
    %24 = vector.extract_strided_slice %23 {offsets = [0, 1, 0], sizes = [16, 16, 4], strides = [1, 1, 1]} : vector<18x18x4xbf16> to vector<16x16x4xbf16>
    %25 = vector.extract_strided_slice %23 {offsets = [0, 2, 0], sizes = [16, 16, 4], strides = [1, 1, 1]} : vector<18x18x4xbf16> to vector<16x16x4xbf16>
    %26 = vector.extract_strided_slice %23 {offsets = [1, 1, 0], sizes = [16, 16, 4], strides = [1, 1, 1]} : vector<18x18x4xbf16> to vector<16x16x4xbf16>
    %27 = vector.extract_strided_slice %23 {offsets = [1, 2, 0], sizes = [16, 16, 4], strides = [1, 1, 1]} : vector<18x18x4xbf16> to vector<16x16x4xbf16>
    %28 = tpu.concatenate %24, %25, %26, %27 in 2 : vector<16x16x4xbf16>, vector<16x16x4xbf16>, vector<16x16x4xbf16>, vector<16x16x4xbf16> -> vector<16x16x16xbf16>
    %29 = vector.shape_cast %28 : vector<16x16x16xbf16> to vector<256x16xbf16>
    %c1_18 = arith.constant 1 : index
    %c0_19 = arith.constant 0 : index
    %c0_20 = arith.constant 0 : index
    %30 = vector.load %arg2[%c1_18, %c0_19, %c0_20] : memref<4x16x8xbf16, #tpu.memory_space<vmem>>, vector<1x16x8xbf16>
    %31 = vector.shape_cast %30 : vector<1x16x8xbf16> to vector<16x8xbf16>
    %cst_21 = arith.constant dense<0.000000e+00> : vector<256x8xf32>
    %32 = tpu.matmul %29, %31, %cst_21 {dimension_numbers = #tpu.dot_dimension_numbers<[1], [0], [0], [1], [0, 0, 1, 1], [], []>} : vector<256x16xbf16>, vector<16x8xbf16>, vector<256x8xf32> -> vector<256x8xf32>
    %33 = vector.broadcast %0 : vector<1x8xf32> to vector<256x8xf32>
    %34 = arith.mulf %32, %33 : vector<256x8xf32>
    %35 = vector.broadcast %1 : vector<1x8xf32> to vector<256x8xf32>
    %36 = arith.addf %34, %35 : vector<256x8xf32>
    %cst_22 = arith.constant 0.000000e+00 : f32
    %37 = vector.broadcast %cst_22 : f32 to vector<256x8xf32>
    %38 = arith.maximumf %36, %37 : vector<256x8xf32>
    %c1_23 = arith.constant 1 : index
    %c0_24 = arith.constant 0 : index
    %c0_25 = arith.constant 0 : index
    %c0_26 = arith.constant 0 : index
    %39 = vector.load %arg4[%c1_23, %c0_24, %c0_25, %c0_26] : memref<4x1x256x8xf32, #tpu.memory_space<vmem>>, vector<1x1x256x8xf32>
    %40 = vector.shape_cast %39 : vector<1x1x256x8xf32> to vector<256x8xf32>
    %41 = vector.shape_cast %38 : vector<256x8xf32> to vector<1x1x256x8xf32>
    tpu.vector_store %arg4[%c1_23, %c0_24, %c0_25, %c0_26], %41 {strides = array<i32>} : memref<4x1x256x8xf32, #tpu.memory_space<vmem>>, vector<1x1x256x8xf32>,
    %c0_27 = arith.constant 0 : index
    %c0_28 = arith.constant 0 : index
    %c0_29 = arith.constant 0 : index
    %c0_30 = arith.constant 0 : index
    %42 = vector.load %arg1[%c0_27, %c0_28, %c0_29, %c0_30] : memref<1x18x18x4xbf16, #tpu.memory_space<vmem>>, vector<1x18x18x4xbf16>
    %43 = vector.shape_cast %42 : vector<1x18x18x4xbf16> to vector<18x18x4xbf16>
    %44 = vector.extract_strided_slice %43 {offsets = [1, 0, 0], sizes = [16, 16, 4], strides = [1, 1, 1]} : vector<18x18x4xbf16> to vector<16x16x4xbf16>
    %45 = vector.extract_strided_slice %43 {offsets = [1, 1, 0], sizes = [16, 16, 4], strides = [1, 1, 1]} : vector<18x18x4xbf16> to vector<16x16x4xbf16>
    %46 = vector.extract_strided_slice %43 {offsets = [2, 0, 0], sizes = [16, 16, 4], strides = [1, 1, 1]} : vector<18x18x4xbf16> to vector<16x16x4xbf16>
    %47 = vector.extract_strided_slice %43 {offsets = [2, 1, 0], sizes = [16, 16, 4], strides = [1, 1, 1]} : vector<18x18x4xbf16> to vector<16x16x4xbf16>
    %48 = tpu.concatenate %44, %45, %46, %47 in 2 : vector<16x16x4xbf16>, vector<16x16x4xbf16>, vector<16x16x4xbf16>, vector<16x16x4xbf16> -> vector<16x16x16xbf16>
    %49 = vector.shape_cast %48 : vector<16x16x16xbf16> to vector<256x16xbf16>
    %c2 = arith.constant 2 : index
    %c0_31 = arith.constant 0 : index
    %c0_32 = arith.constant 0 : index
    %50 = vector.load %arg2[%c2, %c0_31, %c0_32] : memref<4x16x8xbf16, #tpu.memory_space<vmem>>, vector<1x16x8xbf16>
    %51 = vector.shape_cast %50 : vector<1x16x8xbf16> to vector<16x8xbf16>
    %cst_33 = arith.constant dense<0.000000e+00> : vector<256x8xf32>
    %52 = tpu.matmul %49, %51, %cst_33 {dimension_numbers = #tpu.dot_dimension_numbers<[1], [0], [0], [1], [0, 0, 1, 1], [], []>} : vector<256x16xbf16>, vector<16x8xbf16>, vector<256x8xf32> -> vector<256x8xf32>
    %53 = vector.broadcast %0 : vector<1x8xf32> to vector<256x8xf32>
    %54 = arith.mulf %52, %53 : vector<256x8xf32>
    %55 = vector.broadcast %1 : vector<1x8xf32> to vector<256x8xf32>
    %56 = arith.addf %54, %55 : vector<256x8xf32>
    %cst_34 = arith.constant 0.000000e+00 : f32
    %57 = vector.broadcast %cst_34 : f32 to vector<256x8xf32>
    %58 = arith.maximumf %56, %57 : vector<256x8xf32>
    %c2_35 = arith.constant 2 : index
    %c0_36 = arith.constant 0 : index
    %c0_37 = arith.constant 0 : index
    %c0_38 = arith.constant 0 : index
    %59 = vector.load %arg4[%c2_35, %c0_36, %c0_37, %c0_38] : memref<4x1x256x8xf32, #tpu.memory_space<vmem>>, vector<1x1x256x8xf32>
    %60 = vector.shape_cast %59 : vector<1x1x256x8xf32> to vector<256x8xf32>
    %61 = vector.shape_cast %58 : vector<256x8xf32> to vector<1x1x256x8xf32>
    tpu.vector_store %arg4[%c2_35, %c0_36, %c0_37, %c0_38], %61 {strides = array<i32>} : memref<4x1x256x8xf32, #tpu.memory_space<vmem>>, vector<1x1x256x8xf32>,
    %c0_39 = arith.constant 0 : index
    %c0_40 = arith.constant 0 : index
    %c0_41 = arith.constant 0 : index
    %c0_42 = arith.constant 0 : index
    %62 = vector.load %arg1[%c0_39, %c0_40, %c0_41, %c0_42] : memref<1x18x18x4xbf16, #tpu.memory_space<vmem>>, vector<1x18x18x4xbf16>
    %63 = vector.shape_cast %62 : vector<1x18x18x4xbf16> to vector<18x18x4xbf16>
    %64 = vector.extract_strided_slice %63 {offsets = [1, 1, 0], sizes = [16, 16, 4], strides = [1, 1, 1]} : vector<18x18x4xbf16> to vector<16x16x4xbf16>
    %65 = vector.extract_strided_slice %63 {offsets = [1, 2, 0], sizes = [16, 16, 4], strides = [1, 1, 1]} : vector<18x18x4xbf16> to vector<16x16x4xbf16>
    %66 = vector.extract_strided_slice %63 {offsets = [2, 1, 0], sizes = [16, 16, 4], strides = [1, 1, 1]} : vector<18x18x4xbf16> to vector<16x16x4xbf16>
    %67 = vector.extract_strided_slice %63 {offsets = [2, 2, 0], sizes = [16, 16, 4], strides = [1, 1, 1]} : vector<18x18x4xbf16> to vector<16x16x4xbf16>
    %68 = tpu.concatenate %64, %65, %66, %67 in 2 : vector<16x16x4xbf16>, vector<16x16x4xbf16>, vector<16x16x4xbf16>, vector<16x16x4xbf16> -> vector<16x16x16xbf16>
    %69 = vector.shape_cast %68 : vector<16x16x16xbf16> to vector<256x16xbf16>
    %c3 = arith.constant 3 : index
    %c0_43 = arith.constant 0 : index
    %c0_44 = arith.constant 0 : index
    %70 = vector.load %arg2[%c3, %c0_43, %c0_44] : memref<4x16x8xbf16, #tpu.memory_space<vmem>>, vector<1x16x8xbf16>
    %71 = vector.shape_cast %70 : vector<1x16x8xbf16> to vector<16x8xbf16>
    %cst_45 = arith.constant dense<0.000000e+00> : vector<256x8xf32>
    %72 = tpu.matmul %69, %71, %cst_45 {dimension_numbers = #tpu.dot_dimension_numbers<[1], [0], [0], [1], [0, 0, 1, 1], [], []>} : vector<256x16xbf16>, vector<16x8xbf16>, vector<256x8xf32> -> vector<256x8xf32>
    %73 = vector.broadcast %0 : vector<1x8xf32> to vector<256x8xf32>
    %74 = arith.mulf %72, %73 : vector<256x8xf32>
    %75 = vector.broadcast %1 : vector<1x8xf32> to vector<256x8xf32>
    %76 = arith.addf %74, %75 : vector<256x8xf32>
    %cst_46 = arith.constant 0.000000e+00 : f32
    %77 = vector.broadcast %cst_46 : f32 to vector<256x8xf32>
    %78 = arith.maximumf %76, %77 : vector<256x8xf32>
    %c3_47 = arith.constant 3 : index
    %c0_48 = arith.constant 0 : index
    %c0_49 = arith.constant 0 : index
    %c0_50 = arith.constant 0 : index
    %79 = vector.load %arg4[%c3_47, %c0_48, %c0_49, %c0_50] : memref<4x1x256x8xf32, #tpu.memory_space<vmem>>, vector<1x1x256x8xf32>
    %80 = vector.shape_cast %79 : vector<1x1x256x8xf32> to vector<256x8xf32>
    %81 = vector.shape_cast %78 : vector<256x8xf32> to vector<1x1x256x8xf32>
    tpu.vector_store %arg4[%c3_47, %c0_48, %c0_49, %c0_50], %81 {strides = array<i32>} : memref<4x1x256x8xf32, #tpu.memory_space<vmem>>, vector<1x1x256x8xf32>,
    return
  }
  func.func @transform_0(%arg0: i32) -> (i32, i32, i32, i32) {
    %c0_i32 = arith.constant 0 : i32
    %c0_i32_0 = arith.constant 0 : i32
    %c0_i32_1 = arith.constant 0 : i32
    %c0_i32_2 = arith.constant 0 : i32
    return %arg0, %c0_i32, %c0_i32_0, %c0_i32_1 : i32, i32, i32, i32
  }
  func.func @transform_1(%arg0: i32) -> (i32, i32, i32) {
    %c0_i32 = arith.constant 0 : i32
    %c0_i32_0 = arith.constant 0 : i32
    %c0_i32_1 = arith.constant 0 : i32
    %c0_i32_2 = arith.constant 0 : i32
    return %c0_i32, %c0_i32_0, %c0_i32_1 : i32, i32, i32
  }
  func.func @transform_2(%arg0: i32) -> (i32, i32) {
    %c0_i32 = arith.constant 0 : i32
    %c0_i32_0 = arith.constant 0 : i32
    %c0_i32_1 = arith.constant 0 : i32
    return %c0_i32, %c0_i32_0 : i32, i32
  }
  func.func @transform_3(%arg0: i32) -> (i32, i32, i32, i32) {
    %c0_i32 = arith.constant 0 : i32
    %c0_i32_0 = arith.constant 0 : i32
    %c0_i32_1 = arith.constant 0 : i32
    %c0_i32_2 = arith.constant 0 : i32
    return %c0_i32, %arg0, %c0_i32_0, %c0_i32_1 : i32, i32, i32, i32
  }
}

</mosaic_0001>

<bundles_post_ra>
// kernel: decoder_layer_2d.2
= control target key start
LH: loop header
LB: loop body
LE: loop exit
PB: predicated region body
PF: predicated region fallthrough
CT: control target
= control target key end

     0   :  { %s3085_s9 = smov 0   ;;  %s4281_s0 = inlined_call_operand.vmem [shape: bf16[2,18,18,4], index: 0, kind: input, shape index: {}]   ;;  %s4282_s1 = inlined_call_operand.vmem [shape: bf16[4,16,8], index: 1, kind: input, shape index: {}]   ;;  %s4283_s2 = inlined_call_operand.vmem [shape: f32[2,2,8], index: 2, kind: output, shape index: {}]  }
   0x1 LB: > { %s2684_s10 = sadd.s32 4294967295, %s3065_s9   ;;  %p2688_p0 = scmp.ge.s32.totalorder %s3065_s9, 1  ;;  %s3065_s9 = sphi %s3085_s9, %s12_s9  }
   0x2   : > { %p112_p1 = scmp.lt.s32.totalorder %s3065_s9, 3 }
   0x4   : > { %p113_p2 = pnand %p2688_p0, %p112_p1 }
   0x5   : > { %p133_p3 = scmp.lt.s32.totalorder (!%p113_p2), %s2684_s10, 1  ;;  %s3067_s15 = smov (!%p113_p2), 8  }
   0x6   : > { %116 = sbr.rel (%p113_p2) target bundleno = 634 (0x27a), region = 28  ;;  %s3068_s16 = smov (!%p113_p2), 4  }
   0x7   : > { %s3069_s17 = smov (!%p113_p2), 12  }
   0xb   : > { %s4285_s10 = smov (!%p133_p3, %s2684_s10), 1  ;;  %vm325_vm0 = vsmask.f32 7424  ;;  %v3044_v42 = vld [vmem:[%s4282_s1] sm:$0xff]   ;;  %v3046_v47 = vld [vmem:[%s4282_s1 + $0x8] sm:$0xff]   ;;  %vm634_vm1 = vcmask 31744  }
   0xc   : > { %s3007_s11 = smul.u32 216, %s4285_s10  ;;  %2871 = vmatprep.subr.bf16.mxu0 %v3044_v42  ;;  %2905 = vmatprep.subr.bf16.mxu1 %v3046_v47  ;;  %vm667_vm2 = vcmask 64512   ;;  %vm700_vm3 = vcmask 97280   ;;  %vm741_vm4 = vcmask 130048   ;;  %s2690_s26 = sshll.u32 %s4285_s10, 1  ;;  %vm2628_vm5 = vcmask 57344  }
   0xd   : > { %2872 = vmatpush3.bf16.msra.mxu0 %v3044_v42  ;;  %2906 = vmatpush3.bf16.msra.mxu1 %v3046_v47  ;;  %s141_s29 = scalar_lea.vmem %s4283_s2, %s2690_s26 }
   0xe   : > { %s3099_s14 = scalar_lea.vmem %s4281_s0, %s3007_s11 }
   0xf   : > { %v3102_v0 = vld [vmem:[%s3099_s14 + $0xc] sm:$0xff]   ;;  %v3105_v1 = vld [vmem:[%s3099_s14 + $0x14] ss:$0 sps:$4 sm:$0x11]   ;;  %v3108_v2 = vld [vmem:[%s3099_s14 + $0x18] sm:$0xff]  }
  0x10   : > { %555 = vrot.lane.b32.xlu1 %v3102_v0, %s3067_s15  ;;  %1171 = vrot.lane.b32.xlu0 %v3105_v1, %s3067_s15  ;;  %v3115_v3 = vld [vmem:[%s3099_s14] sm:$0xff]   ;;  %v3118_v4 = vld [vmem:[%s3099_s14 + $0x8] ss:$0 sps:$4 sm:$0x11]   ;;  %v341_v5 = vshll.u32 %v3102_v0, 16  ;;  %v339_v8 = vshrl.u32 %v3102_v0, 16 }
  0x11   : > { %v327_v6 = vshrl.u32 %v3115_v3, 16  ;;  %v329_v7 = vshll.u32 %v3115_v3, 16  ;;  %v346_v9 = vshll.u32 %v3105_v1, 16  ;;  %v334_v10 = vshll.u32 %v3118_v4, 16  ;;  %v3130_v14 = vld [vmem:[%s3099_s14 + $0x24] sm:$0xff]   ;;  %v3161_v39 = vld [vmem:[%s3099_s14 + $0x30] sm:$0xff]  }
  0x12   : > { %v1107_v11 = vshrl.u32 %v3118_v4, 16  ;;  %v343_v12 = vrot.slane %v341_v5, 1  ;;  %v3133_v19 = vld [vmem:[%s3099_s14 + $0x20] ss:$0 sps:$4 sm:$0x11]   ;;  %v353_v20 = vshll.u32 %v3108_v2, 16 }
  0x13   : > { %v331_v13 = vrot.slane %v329_v7, 1  ;;  %v336_v15 = vrot.slane %v334_v10, 1  ;;  %v348_v18 = vrot.slane %v346_v9, 1  ;;  %v1109_v21 = vshrl.u32 %v3105_v1, 16  ;;  %v3174_v43 = vld [vmem:[%s3099_s14 + $0x3c] sm:$0xff]   ;;  %v3205_v61 = vld [vmem:[%s3099_s14 + $0x48] sm:$0xff]  }
  0x14   : > { %557 = vrot.lane.b32.xlu1 %v3108_v2, %s3067_s15  ;;  %v344_v17 = vor.u32 %v343_v12, %v339_v8  ;;  %v3140_v23 = vld [vmem:[%s3099_s14 + $0x2c] ss:$0 sps:$4 sm:$0x11]   ;;  %v365_v24 = vshll.u32 %v3130_v14, 16  ;;  %v351_v25 = vshrl.u32 %v3108_v2, 16  ;;  %v355_v27 = vrot.slane %v353_v20, 1 }
  0x15   : > { %v332_v16 = vor.u32 %v331_v13, %v327_v6  ;;  %v358_v28 = vshll.u32 %v3133_v19, 16  ;;  %v363_v29 = vshrl.u32 %v3130_v14, 16  ;;  %v370_v31 = vshll.u32 %v3140_v23, 16  ;;  %v3165_v40 = vld [vmem:[%s3099_s14 + $0x38] ss:$0 sps:$4 sm:$0x11]  }
  0x16   : > { %v349_v26 = vsel %vm325_vm0, %v344_v17, %v348_v18  ;;  %v367_v30 = vrot.slane %v365_v24, 1  ;;  %v356_v32 = vor.u32 %v355_v27, %v351_v25  ;;  %v1111_v34 = vshrl.u32 %v3133_v19, 16  ;;  %v3185_v49 = vld [vmem:[%s3099_s14 + $0x44] ss:$0 sps:$4 sm:$0x11]   ;;  %v3215_v5 = vld [vmem:[%s3099_s14 + $0x54] sm:$0xff]  }
  0x17   : > { %v337_v22 = vsel %vm325_vm0, %v332_v16, %v336_v15  ;;  %v360_v33 = vrot.slane %v358_v28, 1  ;;  %v372_v36 = vrot.slane %v370_v31, 1  ;;  %v377_v41 = vshll.u32 %v3161_v39, 16  ;;  %v3209_v62 = vld [vmem:[%s3099_s14 + $0x50] ss:$0 sps:$4 sm:$0x11]  }
  0x18   : > { %1139 = vrot.lane.b32.xlu1 %v1107_v11, %s3068_s16  ;;  %518 = vrot.lane.b32.xlu0 %v337_v22, %s3068_s16  ;;  %v368_v35 = vor.u32 %v367_v30, %v363_v29  ;;  %v375_v44 = vshrl.u32 %v3161_v39, 16  ;;  %v382_v46 = vshll.u32 %v3165_v40, 16  ;;  %v1113_v48 = vshrl.u32 %v3140_v23, 16  ;;  %v3223_v10 = vld [vmem:[%s3099_s14 + $0x5c] ss:$0 sps:$4 sm:$0x11]  }
  0x19   : > { %v361_v37 = vsel %vm325_vm0, %v356_v32, %v360_v33  ;;  %v379_v45 = vrot.slane %v377_v41, 1  ;;  %v389_v50 = vshll.u32 %v3174_v43, 16  ;;  %v387_v53 = vshrl.u32 %v3174_v43, 16  ;;  %v3243_v25 = vld [vmem:[%s3099_s14 + $0x60] sm:$0xff]   ;;  %v3253_v28 = vld [vmem:[%s3099_s14 + $0x6c] sm:$0xff]  }
  0x1a   : > { %v373_v38 = vsel %vm325_vm0, %v368_v35, %v372_v36  ;;  %v384_v52 = vrot.slane %v382_v46, 1  ;;  %v394_v55 = vshll.u32 %v3185_v49, 16  ;;  %v1115_v57 = vshrl.u32 %v3165_v40, 16  ;;  %v3261_v33 = vld [vmem:[%s3099_s14 + $0x74] ss:$0 sps:$4 sm:$0x11]  }
  0x1b   : > { %v380_v51 = vor.u32 %v379_v45, %v375_v44  ;;  %v391_v54 = vrot.slane %v389_v50, 1  ;;  %v401_v63 = vshll.u32 %v3205_v61, 16  ;;  %v399_v6 = vshrl.u32 %v3205_v61, 16  ;;  %v3285_v50 = vld [vmem:[%s3099_s14 + $0x80] ss:$0 sps:$4 sm:$0x11]  }
  0x1c   : > { %1141 = vrot.lane.b32.xlu1 %v1109_v21, %s3068_s16  ;;  %520 = vrot.lane.b32.xlu0 %v349_v26, %s3068_s16  ;;  %v396_v59 = vrot.slane %v394_v55, 1  ;;  %v406_v8 = vshll.u32 %v3209_v62, 16  ;;  %v1117_v9 = vshrl.u32 %v3185_v49, 16  ;;  %v413_v11 = vshll.u32 %v3215_v5, 16 }
  0x1d   : > { %v385_v56 = vsel %vm325_vm0, %v380_v51, %v384_v52  ;;  %v392_v58 = vor.u32 %v391_v54, %v387_v53  ;;  %v403_v7 = vrot.slane %v401_v63, 1  ;;  %v411_v15 = vshrl.u32 %v3215_v5, 16  ;;  %v3291_v52 = vld [vmem:[%s3099_s14 + $0x84] sm:$0xff]  }
  0x1e   : > { %v408_v13 = vrot.slane %v406_v8, 1  ;;  %v415_v16 = vrot.slane %v413_v11, 1  ;;  %v418_v17 = vshll.u32 %v3223_v10, 16  ;;  %v1119_v20 = vshrl.u32 %v3209_v62, 16 }
  0x1f   : > { %v397_v60 = vsel %vm325_vm0, %v392_v58, %v396_v59  ;;  %v404_v12 = vor.u32 %v403_v7, %v399_v6  ;;  %v425_v27 = vshll.u32 %v3243_v25, 16  ;;  %v423_v29 = vshrl.u32 %v3243_v25, 16 }
  0x20   : > { %1173 = vrot.lane.b32.xlu1 %v3133_v19, %s3067_s15  ;;  %602 = vrot.lane.b32.xlu0 %v349_v26, %s3069_s17  ;;  %v420_v22 = vrot.slane %v418_v17, 1  ;;  %v3247_v26 = vld [vmem:[%s3099_s14 + $0x68] ss:$0 sps:$4 sm:$0x11]   ;;  %v1121_v32 = vshrl.u32 %v3223_v10, 16  ;;  %v442_v41 = vshll.u32 %v3261_v33, 16 }
  0x21   : > { %v409_v18 = vsel %vm325_vm0, %v404_v12, %v408_v13  ;;  %v427_v30 = vrot.slane %v425_v27, 1  ;;  %v430_v31 = vshll.u32 %v3247_v26, 16  ;;  %v1123_v44 = vshrl.u32 %v3247_v26, 16  ;;  %v3331_v27 = vld [vmem:[%s3099_s14 + $0x9c] sm:$0xff]  }
  0x22   : > { %v444_v46 = vrot.slane %v442_v41, 1  ;;  %v454_v55 = vshll.u32 %v3285_v50, 16  ;;  %v461_v58 = vshll.u32 %v3291_v52, 16  ;;  %v459_v63 = vshrl.u32 %v3291_v52, 16 }
  0x23   : > { %v428_v35 = vor.u32 %v427_v30, %v423_v29  ;;  %v432_v36 = vrot.slane %v430_v31, 1 }
  0x24   : > { %1207 = vrot.lane.b32.xlu1 %v1111_v34, %s3069_s17  ;;  %604 = vrot.lane.b32.xlu0 %v361_v37, %s3069_s17  ;;  %v463_v6 = vrot.slane %v461_v58, 1 }
  0x25   : > { %v433_v42 = vsel %vm325_vm0, %v428_v35, %v432_v36 }
  0x26   : > { %v464_v11 = vor.u32 %v463_v6, %v459_v63 }
  0x28   : > { %524 = vrot.lane.b32.xlu1 %v373_v38, %s3068_s16  ;;  %1205 = vrot.lane.b32.xlu0 %v1109_v21, %s3069_s17  ;;  %v416_v21 = vor.u32 %v415_v16, %v411_v15 }
  0x2a   : > { %v421_v24 = vsel %vm325_vm0, %v416_v21, %v420_v22  ;;  %v3325_v21 = vld [vmem:[%s3099_s14 + $0x98] ss:$0 sps:$4 sm:$0x11]  }
  0x2c   : > { %561 = vrot.lane.b32.xlu1 %v3161_v39, %s3067_s15  ;;  %522 = vrot.lane.b32.xlu0 %v361_v37, %s3068_s16  ;;  %v435_v37 = vshrl.u32 %v3253_v28, 16 }
  0x30   : > { %1143 = vrot.lane.b32.xlu1 %v1111_v34, %s3068_s16  ;;  %559 = vrot.lane.b32.xlu0 %v3130_v14, %s3067_s15  ;;  %v437_v34 = vshll.u32 %v3253_v28, 16 }
  0x34   : > { %1145 = vrot.lane.b32.xlu1 %v1113_v48, %s3068_s16  ;;  %606 = vrot.lane.b32.xlu0 %v373_v38, %s3069_s17  ;;  %v439_v38 = vrot.slane %v437_v34, 1 }
  0x36   : > { %v440_v45 = vor.u32 %v439_v38, %v435_v37  ;;  %v3341_v37 = vld [vmem:[%s3099_s14 + $0xa4] ss:$0 sps:$4 sm:$0x11]   ;;  %v485_v38 = vshll.u32 %v3331_v27, 16 }
  0x37   : > { %v490_v58 = vshll.u32 %v3341_v37, 16 }
  0x38   : > { %1177 = vrot.lane.b32.xlu1 %v3165_v40, %s3067_s15  ;;  %608 = vrot.lane.b32.xlu0 %v385_v56, %s3069_s17  ;;  %v445_v47 = vsel %vm325_vm0, %v440_v45, %v444_v46 }
  0x3c   : > { %1211 = vrot.lane.b32.xlu1 %v1115_v57, %s3069_s17  ;;  %1175 = vrot.lane.b32.xlu0 %v3140_v23, %s3067_s15 }
  0x40   : > { %528 = vrot.lane.b32.xlu1 %v397_v60, %s3068_s16  ;;  %1209 = vrot.lane.b32.xlu0 %v1113_v48, %s3069_s17  ;;  %v3281_v48 = vld [vmem:[%s3099_s14 + $0x78] sm:$0xff]  }
  0x41   : > { %v449_v51 = vshll.u32 %v3281_v48, 16  ;;  %v447_v53 = vshrl.u32 %v3281_v48, 16 }
  0x43   : > { %v451_v54 = vrot.slane %v449_v51, 1 }
  0x44   : > { %565 = vrot.lane.b32.xlu1 %v3205_v61, %s3067_s15  ;;  %526 = vrot.lane.b32.xlu0 %v385_v56, %s3068_s16  ;;  %v1125_v56 = vshrl.u32 %v3261_v33, 16 }
  0x45   : > { %v452_v59 = vor.u32 %v451_v54, %v447_v53  ;;  %v483_v53 = vshrl.u32 %v3331_v27, 16 }
  0x48   : > { %1147 = vrot.lane.b32.xlu1 %v1115_v57, %s3068_s16  ;;  %563 = vrot.lane.b32.xlu0 %v3174_v43, %s3067_s15  ;;  %v3299_v57 = vld [vmem:[%s3099_s14 + $0x8c] ss:$0 sps:$4 sm:$0x11]  }
  0x49   : > { %v466_v7 = vshll.u32 %v3299_v57, 16  ;;  %v1129_v35 = vshrl.u32 %v3299_v57, 16 }
  0x4b   : > { %v468_v12 = vrot.slane %v466_v7, 1 }
  0x4c   : > { %1149 = vrot.lane.b32.xlu1 %v1117_v9, %s3068_s16  ;;  %610 = vrot.lane.b32.xlu0 %v397_v60, %s3069_s17  ;;  %v456_v60 = vrot.slane %v454_v55, 1 }
  0x4d   : > { %v469_v15 = vsel %vm325_vm0, %v464_v11, %v468_v12 }
  0x4e   : > { %v457_v8 = vsel %vm325_vm0, %v452_v59, %v456_v60 }
  0x50   : > { %1181 = vrot.lane.b32.xlu1 %v3209_v62, %s3067_s15  ;;  %612 = vrot.lane.b32.xlu0 %v409_v18, %s3069_s17 }
  0x54   : > { %1215 = vrot.lane.b32.xlu1 %v1119_v20, %s3069_s17  ;;  %1179 = vrot.lane.b32.xlu0 %v3185_v49, %s3067_s15 }
  0x58   : > { %532 = vrot.lane.b32.xlu1 %v421_v24, %s3068_s16  ;;  %1213 = vrot.lane.b32.xlu0 %v1117_v9, %s3069_s17  ;;  %v1127_v9 = vshrl.u32 %v3285_v50, 16 }
  0x5c   : > { %569 = vrot.lane.b32.xlu1 %v3243_v25, %s3067_s15  ;;  %530 = vrot.lane.b32.xlu0 %v409_v18, %s3068_s16  ;;  %v3321_v18 = vld [vmem:[%s3099_s14 + $0x90] sm:$0xff]  }
  0x5d   : > { %v473_v22 = vshll.u32 %v3321_v18, 16  ;;  %v471_v30 = vshrl.u32 %v3321_v18, 16 }
  0x5f   : > { %v475_v31 = vrot.slane %v473_v22, 1 }
  0x60   : > { %1151 = vrot.lane.b32.xlu1 %v1119_v20, %s3068_s16  ;;  %567 = vrot.lane.b32.xlu0 %v3215_v5, %s3067_s15 }
  0x64   : > { %1153 = vrot.lane.b32.xlu1 %v1121_v32, %s3068_s16  ;;  %614 = vrot.lane.b32.xlu0 %v421_v24, %s3069_s17 }
  0x68   : > { %1185 = vrot.lane.b32.xlu1 %v3247_v26, %s3067_s15  ;;  %616 = vrot.lane.b32.xlu0 %v433_v42, %s3069_s17 }
  0x6c   : > { %1219 = vrot.lane.b32.xlu1 %v1123_v44, %s3069_s17  ;;  %1183 = vrot.lane.b32.xlu0 %v3223_v10, %s3067_s15 }
  0x70   : > { %536 = vrot.lane.b32.xlu1 %v445_v47, %s3068_s16  ;;  %1217 = vrot.lane.b32.xlu0 %v1121_v32, %s3069_s17  ;;  %v478_v32 = vshll.u32 %v3325_v21, 16 }
  0x72   : > { %v480_v45 = vrot.slane %v478_v32, 1 }
  0x74   : > { %573 = vrot.lane.b32.xlu1 %v3281_v48, %s3067_s15  ;;  %534 = vrot.lane.b32.xlu0 %v433_v42, %s3068_s16  ;;  %v3057_v42 = vld [vmem:[%s4282_s1 + $0x10] sm:$0xff]  }
  0x75   : > { %2939 = vmatprep.subr.bf16.mxu0 %v3057_v42 }
  0x78   : > { %1155 = vrot.lane.b32.xlu1 %v1123_v44, %s3068_s16  ;;  %571 = vrot.lane.b32.xlu0 %v3253_v28, %s3067_s15  ;;  %v3352_v44 = vld [vmem:[%s4282_s1 + $0x18] sm:$0xff]  }
  0x79   : > { %2973 = vmatprep.subr.bf16.mxu1 %v3352_v44 }
  0x7c   : > { %1157 = vrot.lane.b32.xlu1 %v1125_v56, %s3068_s16  ;;  %618 = vrot.lane.b32.xlu0 %v445_v47, %s3069_s17 }
  0x80   : > { %1189 = vrot.lane.b32.xlu1 %v3285_v50, %s3067_s15  ;;  %620 = vrot.lane.b32.xlu0 %v457_v8, %s3069_s17 }
  0x82   : > { %v556_v13 = vpop.permute.xlu1 %555  ;;  %v3317_v16 = vpop.permute.xlu0 %1171 }
  0x84   : > { %1223 = vrot.lane.b32.xlu1 %v1127_v9, %s3069_s17  ;;  %1187 = vrot.lane.b32.xlu0 %v3261_v33, %s3067_s15 }
  0x86   : > { %v558_v17 = vpop.permute.xlu1 %557 }
  0x88   : > { %540 = vrot.lane.b32.xlu1 %v469_v15, %s3068_s16  ;;  %1221 = vrot.lane.b32.xlu0 %v1125_v56, %s3069_s17  ;;  %v487_v56 = vrot.slane %v485_v38, 1 }
  0x8a   : > { %v1140_v20 = vpop.permute.xlu1 %1139  ;;  %v519_v24 = vpop.permute.xlu0 %518  ;;  %v488_v12 = vor.u32 %v487_v56, %v483_v53 }
  0x8b   : > { %v636_v36 = vsel %vm634_vm1, %v3115_v3, %v519_v24  ;;  %v476_v3 = vor.u32 %v475_v31, %v471_v30 }
  0x8c   : > { %577 = vrot.lane.b32.xlu1 %v3321_v18, %s3067_s15  ;;  %538 = vrot.lane.b32.xlu0 %v457_v8, %s3068_s16  ;;  %v669_v51 = vsel %vm667_vm2, %v636_v36, %v556_v13  ;;  %v1131_v8 = vshrl.u32 %v3325_v21, 16  ;;  %v492_v13 = vrot.slane %v490_v58, 1 }
  0x8d   : > { %v481_v60 = vsel %vm325_vm0, %v476_v3, %v480_v45 }
  0x8e   : > { %v1142_v29 = vpop.permute.xlu1 %1141  ;;  %v521_v34 = vpop.permute.xlu0 %520  ;;  %v493_v32 = vsel %vm325_vm0, %v488_v12, %v492_v13  ;;  %v3430_v12 = vld [vmem:[%s3099_s14 + $0xbc] ss:$0 sps:$4 sm:$0x11]  }
  0x8f   : > { %v1240_v46 = vsel %vm634_vm1, %v3105_v1, %v1142_v29  ;;  %v638_v54 = vsel %vm634_vm1, %v3102_v0, %v521_v34 }
  0x90   : > { %1159 = vrot.lane.b32.xlu1 %v1127_v9, %s3068_s16  ;;  %575 = vrot.lane.b32.xlu0 %v3291_v52, %s3067_s15  ;;  %v671_v6 = vsel %vm667_vm2, %v638_v54, %v558_v17  ;;  %v1238_v9 = vsel %vm634_vm1, %v3118_v4, %v1140_v20  ;;  %v3405_v54 = vld [vmem:[%s3099_s14 + $0xb0] ss:$0 sps:$4 sm:$0x11]  }
  0x91   : > { %v1270_v4 = vsel %vm667_vm2, %v1238_v9, %v3317_v16  ;;  %v1133_v9 = vshrl.u32 %v3341_v37, 16 }
  0x92   : > { %v1174_v41 = vpop.permute.xlu1 %1173  ;;  %v603_v47 = vpop.permute.xlu0 %602 }
  0x93   : > { %v702_v55 = vsel %vm700_vm3, %v669_v51, %v603_v47  ;;  %v1272_v59 = vsel %vm667_vm2, %v1240_v46, %v1174_v41  ;;  %v3394_v46 = vld [vmem:[%s3099_s14 + $0xa8] sm:$0xff]  }
  0x94   : > { %1161 = vrot.lane.b32.xlu1 %v1129_v35, %s3068_s16  ;;  %622 = vrot.lane.b32.xlu0 %v469_v15, %s3069_s17  ;;  %v1335_v63 = vshll.u32 %v702_v55, 16  ;;  %v1333_v34 = vshrl.u32 %v702_v55, 16 }
  0x95   : > { %2873 = vmatprep.mubr.msk.bf16.mxu0 %vm741_vm4, %v702_v55  ;;  %v497_v55 = vshll.u32 %v3394_v46, 16 }
  0x96   : > { %v1208_v1 = vpop.permute.xlu1 %1207  ;;  %v605_v0 = vpop.permute.xlu0 %604  ;;  %v1337_v24 = vrot.slane %v1335_v63, 1 }
  0x97   : > { %v1304_v7 = vsel %vm700_vm3, %v1272_v59, %v1208_v1  ;;  %v3378_v11 = vsel %vm700_vm3, %v671_v6, %v605_v0  ;;  %v495_v59 = vshrl.u32 %v3394_v46, 16  ;;  %v499_v63 = vrot.slane %v497_v55, 1 }
  0x98   : > { %1193 = vrot.lane.b32.xlu1 %v3325_v21, %s3067_s15  ;;  %v1345_v15 = vshll.u32 %v3378_v11, 16  ;;  %624 = vrot.lane.b32.xlu0 %v481_v60, %s3069_s17  ;;  %v1349_v22 = vshll.u32 %v1304_v7, 16  ;;  %v1343_v30 = vshrl.u32 %v3378_v11, 16  ;;  %v1338_v45 = vor.u32 %v1337_v24, %v1333_v34 }
  0x99   : > { %2874 = vmatmul.mubr.msk.bf16.vlgmr.msra.gmra.mxu0 %vm741_vm4, %v3378_v11  ;;  %v502_v6 = vshll.u32 %v3405_v54, 16 }
  0x9a   : > { %v525_v17 = vpop.permute.xlu1 %524  ;;  %2940 = vmatpush3.bf16.msra.mxu0 %v3057_v42  ;;  %v1347_v29 = vrot.slane %v1345_v15, 1  ;;  %v1206_v20 = vpop.permute.xlu0 %1205  ;;  %v1351_v42 = vrot.slane %v1349_v22, 1 }
  0x9b   : > { %v1302_v31 = vsel %vm700_vm3, %v1270_v4, %v1206_v20  ;;  %v504_v15 = vrot.slane %v502_v6, 1  ;;  %v514_v20 = vshll.u32 %v3430_v12, 16 }
  0x9c   : > { %1227 = vrot.lane.b32.xlu1 %v1131_v8, %s3069_s17  ;;  %v1339_v36 = vshll.u32 %v1302_v31, 16  ;;  %1191 = vrot.lane.b32.xlu0 %v3299_v57, %s3067_s15  ;;  %v1348_v41 = vor.u32 %v1347_v29, %v1343_v30 }
  0x9e   : > { %v562_v38 = vpop.permute.xlu1 %561  ;;  %v1341_v16 = vrot.slane %v1339_v36, 1  ;;  %v523_v3 = vpop.permute.xlu0 %522  ;;  %v3402_v53 = vsel %vm325_vm0, %v1348_v41, %v1351_v42  ;;  %v1135_v41 = vshrl.u32 %v3405_v54, 16 }
  0x9f   : > { %v640_v1 = vsel %vm634_vm1, %v3108_v2, %v523_v3 }
  0xa0   : > { %544 = vrot.lane.b32.xlu1 %v493_v32, %s3068_s16  ;;  %1225 = vrot.lane.b32.xlu0 %v1129_v35, %s3069_s17  ;;  %v1342_v47 = vsel %vm325_vm0, %v1338_v45, %v1341_v16  ;;  %v3413_v35 = vld [vmem:[%s3099_s14 + $0xb4] sm:$0xff]   ;;  %v516_v16 = vrot.slane %v514_v20, 1 }
  0xa1   : > { %2907 = vmatprep.mubr.msk.bf16.mxu1 %vm741_vm4, %v1342_v47  ;;  %v509_v2 = vshll.u32 %v3413_v35, 16  ;;  %v507_v29 = vshrl.u32 %v3413_v35, 16 }
  0xa2   : > { %v1144_v51 = vpop.permute.xlu1 %1143  ;;  %2908 = vmatmul.mubr.msk.bf16.vlgmr.msra.gmra.mxu1 %vm741_vm4, %v3402_v53  ;;  %v560_v56 = vpop.permute.xlu0 %559 }
  0xa3   : > { %2974 = vmatpush3.bf16.msra.mxu1 %v3352_v44  ;;  %v673_v0 = vsel %vm667_vm2, %v640_v1, %v560_v56  ;;  %v642_v44 = vsel %vm634_vm1, %v3130_v14, %v525_v17  ;;  %v511_v4 = vrot.slane %v509_v2, 1  ;;  %v1242_v45 = vsel %vm634_vm1, %v3133_v19, %v1144_v51 }
  0xa4   : > { %581 = vrot.lane.b32.xlu1 %v3394_v46, %s3067_s15  ;;  %542 = vrot.lane.b32.xlu0 %v481_v60, %s3068_s16  ;;  %v675_v22 = vsel %vm667_vm2, %v642_v44, %v562_v38 }
  0xa5   : > { %v512_v42 = vor.u32 %v511_v4, %v507_v29  ;;  %v3482_v29 = vld [vmem:[%s3099_s14 + $0xc8] ss:$0 sps:$4 sm:$0x11]  }
  0xa6   : > { %v1146_v58 = vpop.permute.xlu1 %1145  ;;  %v607_v7 = vpop.permute.xlu0 %606 }
  0xa7   : > { %v3427_v60 = vsel %vm700_vm3, %v673_v0, %v607_v7  ;;  %v1244_v14 = vsel %vm634_vm1, %v3140_v23, %v1146_v58 }
  0xa8   : > { %1163 = vrot.lane.b32.xlu1 %v1131_v8, %s3068_s16  ;;  %579 = vrot.lane.b32.xlu0 %v3331_v27, %s3067_s15  ;;  %v500_v8 = vor.u32 %v499_v63, %v495_v59  ;;  %v1355_v34 = vshll.u32 %v3427_v60, 16  ;;  %v517_v63 = vsel %vm325_vm0, %v512_v42, %v516_v16  ;;  %v1353_v6 = vshrl.u32 %v3427_v60, 16 }
  0xa9   : > { %2877 = vmatprep.mubr.msk.bf16.mxu0 %vm741_vm4, %v3427_v60  ;;  %v1137_v42 = vshrl.u32 %v3430_v12, 16 }
  0xaa   : > { %v1178_v13 = vpop.permute.xlu1 %1177  ;;  %v609_v17 = vpop.permute.xlu0 %608  ;;  %v505_v23 = vsel %vm325_vm0, %v500_v8, %v504_v15  ;;  %v1357_v55 = vrot.slane %v1355_v34, 1  ;;  %v3470_v8 = vld [vmem:[%s3099_s14 + $0xc0] sm:$0xff]  }
  0xab   : > { %v3442_v24 = vsel %vm700_vm3, %v675_v22, %v609_v17  ;;  %v1276_v31 = vsel %vm667_vm2, %v1244_v14, %v1178_v13  ;;  %v593_v4 = vshll.u32 %v3470_v8, 16 }
  0xac   : > { %1165 = vrot.lane.b32.xlu1 %v1133_v9, %s3068_s16  ;;  %626 = vrot.lane.b32.xlu0 %v493_v32, %s3069_s17  ;;  %v1365_v32 = vshll.u32 %v3442_v24, 16  ;;  %v1363_v51 = vshrl.u32 %v3442_v24, 16  ;;  %v1358_v44 = vor.u32 %v1357_v55, %v1353_v6 }
  0xad   : > { %2878 = vmatmul.mubr.msk.bf16.gmra.mxu0 %vm741_vm4, %v3442_v24  ;;  %v595_v34 = vrot.slane %v593_v4, 1 }
  0xae   : > { %v1212_v30 = vpop.permute.xlu1 %1211  ;;  %v1176_v36 = vpop.permute.xlu0 %1175  ;;  %v1367_v1 = vrot.slane %v1365_v32, 1 }
  0xaf   : > { %v1308_v38 = vsel %vm700_vm3, %v1276_v31, %v1212_v30  ;;  %v1274_v56 = vsel %vm667_vm2, %v1242_v45, %v1176_v36  ;;  %v591_v31 = vshrl.u32 %v3470_v8, 16  ;;  %v598_v36 = vshll.u32 %v3482_v29, 16 }
  0xb0   : > { %1197 = vrot.lane.b32.xlu1 %v3405_v54, %s3067_s15  ;;  %628 = vrot.lane.b32.xlu0 %v505_v23, %s3069_s17  ;;  %v1369_v47 = vshll.u32 %v1308_v38, 16  ;;  %v1368_v15 = vor.u32 %v1367_v1, %v1363_v51 }
  0xb1   : > { %v596_v45 = vor.u32 %v595_v34, %v591_v31 }
  0xb2   : > { %v529_v3 = vpop.permute.xlu1 %528  ;;  %v1210_v58 = vpop.permute.xlu0 %1209  ;;  %v1371_v7 = vrot.slane %v1369_v47, 1  ;;  %v600_v47 = vrot.slane %v598_v36, 1 }
  0xb3   : > { %v1306_v59 = vsel %vm700_vm3, %v1274_v56, %v1210_v58  ;;  %v646_v16 = vsel %vm634_vm1, %v3174_v43, %v529_v3 }
  0xb4   : > { %1231 = vrot.lane.b32.xlu1 %v1135_v41, %s3069_s17  ;;  %v1359_v0 = vshll.u32 %v1306_v59, 16  ;;  %1195 = vrot.lane.b32.xlu0 %v3341_v37, %s3067_s15  ;;  %v3479_v17 = vsel %vm325_vm0, %v1368_v15, %v1371_v7  ;;  %v601_v1 = vsel %vm325_vm0, %v596_v45, %v600_v47  ;;  %v3055_v59 = vld [vmem:[%s3099_s14 + $0xcc] sm:$0xff]  }
  0xb6   : > { %v566_v19 = vpop.permute.xlu1 %565  ;;  %v1361_v2 = vrot.slane %v1359_v0, 1  ;;  %v527_v13 = vpop.permute.xlu0 %526 }
  0xb7   : > { %v644_v30 = vsel %vm634_vm1, %v3161_v39, %v527_v13  ;;  %v3056_v13 = vld [vmem:[%s3099_s14 + $0xd4] ss:$0 sps:$4 sm:$0x11]  }
  0xb8   : > { %548 = vrot.lane.b32.xlu1 %v517_v63, %s3068_s16  ;;  %1229 = vrot.lane.b32.xlu0 %v1133_v9, %s3069_s17  ;;  %v3474_v22 = vsel %vm325_vm0, %v1358_v44, %v1361_v2  ;;  %v1898_v2 = vshll.u32 %v3055_v59, 16 }
  0xb9   : > { %2911 = vmatprep.mubr.msk.bf16.mxu1 %vm741_vm4, %v3474_v22 }
  0xba   : > { %v1148_v14 = vpop.permute.xlu1 %1147  ;;  %2912 = vmatmul.mubr.msk.bf16.gmra.mxu1 %vm741_vm4, %v3479_v17  ;;  %v564_v20 = vpop.permute.xlu0 %563 }
  0xbb   : > { %v677_v38 = vsel %vm667_vm2, %v644_v30, %v564_v20  ;;  %v1246_v7 = vsel %vm634_vm1, %v3165_v40, %v1148_v14  ;;  %v1896_v40 = vshrl.u32 %v3055_v59, 16 }
  0xbc   : > { %585 = vrot.lane.b32.xlu1 %v3470_v8, %s3067_s15  ;;  %546 = vrot.lane.b32.xlu0 %v505_v23, %s3068_s16 }
  0xbe   : > { %v1150_v9 = vpop.permute.xlu1 %1149  ;;  %v611_v32 = vpop.permute.xlu0 %610 }
  0xbf   : > { %v3500_v23 = vsel %vm700_vm3, %v677_v38, %v611_v32  ;;  %v1248_v55 = vsel %vm634_vm1, %v3185_v49, %v1150_v9  ;;  %v1900_v32 = vrot.slane %v1898_v2, 1 }
  0xc0   : > { %1167 = vrot.lane.b32.xlu1 %v1135_v41, %s3068_s16  ;;  %583 = vrot.lane.b32.xlu0 %v3413_v35, %s3067_s15  ;;  %v679_v41 = vsel %vm667_vm2, %v646_v16, %v566_v19  ;;  %v1375_v49 = vshll.u32 %v3500_v23, 16  ;;  %v1373_v31 = vshrl.u32 %v3500_v23, 16  ;;  %v1903_v16 = vshll.u32 %v3056_v13, 16 }
  0xc1   : > { %2881 = vmatprep.mubr.msk.bf16.mxu0 %vm741_vm4, %v3500_v23 }
  0xc2   : > { %v1182_v39 = vpop.permute.xlu1 %1181  ;;  %v613_v56 = vpop.permute.xlu0 %612  ;;  %v1377_v15 = vrot.slane %v1375_v49, 1  ;;  %v1905_v49 = vrot.slane %v1903_v16, 1 }
  0xc3   : > { %v3511_v43 = vsel %vm700_vm3, %v679_v41, %v613_v56  ;;  %v1280_v58 = vsel %vm667_vm2, %v1248_v55, %v1182_v39 }
  0xc4   : > { %1169 = vrot.lane.b32.xlu1 %v1137_v42, %s3068_s16  ;;  %630 = vrot.lane.b32.xlu0 %v517_v63, %s3069_s17  ;;  %v1203_v63 = vshrl.u32 %v3482_v29, 16  ;;  %v1385_v19 = vshll.u32 %v3511_v43, 16  ;;  %v1383_v14 = vshrl.u32 %v3511_v43, 16  ;;  %v1378_v39 = vor.u32 %v1377_v15, %v1373_v31 }
  0xc5   : > { %2882 = vmatmul.mubr.msk.bf16.gmra.mxu0 %vm741_vm4, %v3511_v43 }
  0xc6   : > { %v1216_v3 = vpop.permute.xlu1 %1215  ;;  %v1180_v6 = vpop.permute.xlu0 %1179  ;;  %v1387_v9 = vrot.slane %v1385_v19, 1 }
  0xc7   : > { %v1312_v0 = vsel %vm700_vm3, %v1280_v58, %v1216_v3  ;;  %v1278_v4 = vsel %vm667_vm2, %v1246_v7, %v1180_v6  ;;  %v1901_v58 = vor.u32 %v1900_v32, %v1896_v40 }
  0xc8   : > { %1201 = vrot.lane.b32.xlu1 %v3482_v29, %s3067_s15  ;;  %632 = vrot.lane.b32.xlu0 %v601_v1, %s3069_s17  ;;  %v1389_v44 = vshll.u32 %v1312_v0, 16  ;;  %v1388_v41 = vor.u32 %v1387_v9, %v1383_v14 }
  0xc9   : > { %v1906_v19 = vsel %vm325_vm0, %v1901_v58, %v1905_v49 }
  0xca   : > { %v533_v51 = vpop.permute.xlu1 %532  ;;  %v1214_v20 = vpop.permute.xlu0 %1213  ;;  %v1391_v38 = vrot.slane %v1389_v44, 1 }
  0xcb   : > { %v1310_v30 = vsel %vm700_vm3, %v1278_v4, %v1214_v20  ;;  %v650_v2 = vsel %vm634_vm1, %v3215_v5, %v533_v51 }
  0xcc   : > { %1235 = vrot.lane.b32.xlu1 %v1203_v63, %s3069_s17  ;;  %v1379_v34 = vshll.u32 %v1310_v30, 16  ;;  %1199 = vrot.lane.b32.xlu0 %v3430_v12, %s3067_s15  ;;  %v3544_v3 = vsel %vm325_vm0, %v1388_v41, %v1391_v38 }
  0xce   : > { %v570_v36 = vpop.permute.xlu1 %569  ;;  %v1381_v45 = vrot.slane %v1379_v34, 1  ;;  %v531_v47 = vpop.permute.xlu0 %530 }
  0xcf   : > { %v648_v0 = vsel %vm634_vm1, %v3205_v61, %v531_v47  ;;  %v683_v61 = vsel %vm667_vm2, %v650_v2, %v570_v36 }
  0xd0   : > { %1890 = vrot.lane.b32.xlu1 %v3055_v59, %s3067_s15  ;;  %1233 = vrot.lane.b32.xlu0 %v1137_v42, %s3069_s17  ;;  %v3539_v55 = vsel %vm325_vm0, %v1378_v39, %v1381_v45  ;;  %v2263_v59 = vshrl.u32 %v3056_v13, 16 }
  0xd1   : > { %2915 = vmatprep.mubr.msk.bf16.mxu1 %vm741_vm4, %v3539_v55 }
  0xd2   : > { %v1152_v56 = vpop.permute.xlu1 %1151  ;;  %2916 = vmatmul.mubr.msk.bf16.gmra.mxu1 %vm741_vm4, %v3544_v3  ;;  %v568_v6 = vpop.permute.xlu0 %567 }
  0xd3   : > { %v681_v7 = vsel %vm667_vm2, %v648_v0, %v568_v6  ;;  %v1250_v36 = vsel %vm634_vm1, %v3209_v62, %v1152_v56 }
  0xd4   : > { %2259 = vrot.lane.b32.xlu1 %v1203_v63, %s3068_s16  ;;  %1883 = vrot.lane.b32.xlu0 %v601_v1, %s3068_s16 }
  0xd6   : > { %v1154_v42 = vpop.permute.xlu1 %1153  ;;  %v615_v44 = vpop.permute.xlu0 %614 }
  0xd7   : > { %v3558_v15 = vsel %vm700_vm3, %v681_v7, %v615_v44  ;;  %v1252_v63 = vsel %vm634_vm1, %v3223_v10, %v1154_v42 }
  0xd8   : > { %2265 = vrot.lane.b32.xlu1 %v2263_v59, %s3069_s17  ;;  %2885 = vmatprep.mubr.msk.bf16.mxu0 %vm741_vm4, %v3558_v15  ;;  %v1395_v9 = vshll.u32 %v3558_v15, 16  ;;  %v1393_v39 = vshrl.u32 %v3558_v15, 16 }
  0xd9   : > { %1907 = vrot.lane.b32.xlu0 %v1906_v19, %s3069_s17 }
  0xda   : > { %v1186_v1 = vpop.permute.xlu1 %1185  ;;  %v617_v4 = vpop.permute.xlu0 %616  ;;  %v1397_v14 = vrot.slane %v1395_v9, 1 }
  0xdb   : > { %v3567_v20 = vsel %vm700_vm3, %v683_v61, %v617_v4  ;;  %v1284_v51 = vsel %vm667_vm2, %v1252_v63, %v1186_v1 }
  0xdc   : > { %2886 = vmatmul.mubr.msk.bf16.gmra.mxu0 %vm741_vm4, %v3567_v20  ;;  %v1405_v34 = vshll.u32 %v3567_v20, 16  ;;  %v1403_v41 = vshrl.u32 %v3567_v20, 16  ;;  %v1398_v49 = vor.u32 %v1397_v14, %v1393_v39 }
  0xdd   : > { %2261 = vrot.lane.b32.xlu0 %v3056_v13, %s3067_s15 }
  0xde   : > { %v1220_v5 = vpop.permute.xlu1 %1219  ;;  %v1184_v30 = vpop.permute.xlu0 %1183  ;;  %v1407_v16 = vrot.slane %v1405_v34, 1 }
  0xdf   : > { %v1316_v31 = vsel %vm700_vm3, %v1284_v51, %v1220_v5  ;;  %v1282_v38 = vsel %vm667_vm2, %v1250_v36, %v1184_v30 }
  0xe0   : > { %v1409_v40 = vshll.u32 %v1316_v31, 16  ;;  %v1408_v42 = vor.u32 %v1407_v16, %v1403_v41 }
  0xe2   : > { %v537_v10 = vpop.permute.xlu1 %536  ;;  %v1218_v32 = vpop.permute.xlu0 %1217  ;;  %v1411_v58 = vrot.slane %v1409_v40, 1 }
  0xe3   : > { %v1314_v13 = vsel %vm700_vm3, %v1282_v38, %v1218_v32  ;;  %v654_v61 = vsel %vm634_vm1, %v3253_v28, %v537_v10 }
  0xe4   : > { %v1399_v45 = vshll.u32 %v1314_v13, 16  ;;  %v3588_v0 = vsel %vm325_vm0, %v1408_v42, %v1411_v58 }
  0xe6   : > { %v574_v47 = vpop.permute.xlu1 %573  ;;  %v1401_v6 = vrot.slane %v1399_v45, 1  ;;  %v535_v59 = vpop.permute.xlu0 %534 }
  0xe7   : > { %v652_v44 = vsel %vm634_vm1, %v3243_v25, %v535_v59  ;;  %v687_v5 = vsel %vm667_vm2, %v654_v61, %v574_v47 }
  0xe8   : > { %v3583_v62 = vsel %vm325_vm0, %v1398_v49, %v1401_v6 }
  0xe9   : > { %2919 = vmatprep.mubr.msk.bf16.mxu1 %vm741_vm4, %v3583_v62 }
  0xea   : > { %v1156_v56 = vpop.permute.xlu1 %1155  ;;  %2920 = vmatmul.mubr.msk.bf16.gmra.mxu1 %vm741_vm4, %v3588_v0  ;;  %v572_v19 = vpop.permute.xlu0 %571 }
  0xeb   : > { %v685_v2 = vsel %vm667_vm2, %v652_v44, %v572_v19 }
  0xee   : > { %v1158_v7 = vpop.permute.xlu1 %1157  ;;  %v619_v1 = vpop.permute.xlu0 %618 }
  0xef   : > { %v3598_v63 = vsel %vm700_vm3, %v685_v2, %v619_v1  ;;  %v1256_v51 = vsel %vm634_vm1, %v3261_v33, %v1158_v7  ;;  %v1254_v33 = vsel %vm634_vm1, %v3247_v26, %v1156_v56 }
  0xf0   : > { %2889 = vmatprep.mubr.msk.bf16.mxu0 %vm741_vm4, %v3598_v63  ;;  %v1415_v31 = vshll.u32 %v3598_v63, 16  ;;  %v1413_v45 = vshrl.u32 %v3598_v63, 16 }
  0xf2   : > { %v1190_v4 = vpop.permute.xlu1 %1189  ;;  %v621_v9 = vpop.permute.xlu0 %620  ;;  %v1417_v38 = vrot.slane %v1415_v31, 1 }
  0xf3   : > { %v3606_v25 = vsel %vm700_vm3, %v687_v5, %v621_v9  ;;  %v1288_v30 = vsel %vm667_vm2, %v1256_v51, %v1190_v4 }
  0xf4   : > { %2890 = vmatmul.mubr.msk.bf16.gmra.mxu0 %vm741_vm4, %v3606_v25  ;;  %v1425_v36 = vshll.u32 %v3606_v25, 16  ;;  %v1423_v58 = vshrl.u32 %v3606_v25, 16  ;;  %v1418_v6 = vor.u32 %v1417_v38, %v1413_v45 }
  0xf6   : > { %v1224_v28 = vpop.permute.xlu1 %1223  ;;  %v1188_v34 = vpop.permute.xlu0 %1187  ;;  %v1427_v13 = vrot.slane %v1425_v36, 1 }
  0xf7   : > { %v1320_v10 = vsel %vm700_vm3, %v1288_v30, %v1224_v28  ;;  %v1286_v32 = vsel %vm667_vm2, %v1254_v33, %v1188_v34 }
  0xf8   : > { %v1429_v14 = vshll.u32 %v1320_v10, 16  ;;  %v1428_v19 = vor.u32 %v1427_v13, %v1423_v58 }
  0xfa   : > { %v541_v40 = vpop.permute.xlu1 %540  ;;  %v1222_v16 = vpop.permute.xlu0 %1221  ;;  %v1431_v49 = vrot.slane %v1429_v14, 1 }
  0xfb   : > { %v1318_v39 = vsel %vm700_vm3, %v1286_v32, %v1222_v16  ;;  %v658_v5 = vsel %vm634_vm1, %v3291_v52, %v541_v40 }
  0xfc   : > { %v1419_v47 = vshll.u32 %v1318_v39, 16  ;;  %v3626_v7 = vsel %vm325_vm0, %v1428_v19, %v1431_v49 }
  0xfe   : > { %v578_v41 = vpop.permute.xlu1 %577  ;;  %v1421_v59 = vrot.slane %v1419_v47, 1  ;;  %v539_v42 = vpop.permute.xlu0 %538 }
  0xff   : > { %v656_v1 = vsel %vm634_vm1, %v3281_v48, %v539_v42  ;;  %v691_v28 = vsel %vm667_vm2, %v658_v5, %v578_v41 }
 0x100   : > { %v3621_v26 = vsel %vm325_vm0, %v1418_v6, %v1421_v59 }
 0x101   : > { %2923 = vmatprep.mubr.msk.bf16.mxu1 %vm741_vm4, %v3621_v26 }
 0x102   : > { %v1160_v56 = vpop.permute.xlu1 %1159  ;;  %2924 = vmatmul.mubr.msk.bf16.gmra.mxu1 %vm741_vm4, %v3626_v7  ;;  %v576_v44 = vpop.permute.xlu0 %575 }
 0x103   : > { %v689_v61 = vsel %vm667_vm2, %v656_v1, %v576_v44 }
 0x106   : > { %v1162_v2 = vpop.permute.xlu1 %1161  ;;  %v623_v4 = vpop.permute.xlu0 %622 }
 0x107   : > { %v3636_v51 = vsel %vm700_vm3, %v689_v61, %v623_v4  ;;  %v1260_v30 = vsel %vm634_vm1, %v3299_v57, %v1162_v2  ;;  %v1258_v57 = vsel %vm634_vm1, %v3285_v50, %v1160_v56 }
 0x108   : > { %2893 = vmatprep.mubr.msk.bf16.mxu0 %vm741_vm4, %v3636_v51  ;;  %v1435_v10 = vshll.u32 %v3636_v51, 16  ;;  %v1433_v47 = vshrl.u32 %v3636_v51, 16 }
 0x10a   : > { %v1194_v9 = vpop.permute.xlu1 %1193  ;;  %v625_v31 = vpop.permute.xlu0 %624  ;;  %v1437_v32 = vrot.slane %v1435_v10, 1 }
 0x10b   : > { %v3644_v48 = vsel %vm700_vm3, %v691_v28, %v625_v31  ;;  %v1292_v34 = vsel %vm667_vm2, %v1260_v30, %v1194_v9 }
 0x10c   : > { %2894 = vmatmul.mubr.msk.bf16.gmra.mxu0 %vm741_vm4, %v3644_v48  ;;  %v1445_v33 = vshll.u32 %v3644_v48, 16  ;;  %v1443_v49 = vshrl.u32 %v3644_v48, 16  ;;  %v1438_v59 = vor.u32 %v1437_v32, %v1433_v47 }
 0x10e   : > { %v1228_v52 = vpop.permute.xlu1 %1227  ;;  %v1192_v36 = vpop.permute.xlu0 %1191  ;;  %v1447_v39 = vrot.slane %v1445_v33, 1 }
 0x10f   : > { %v1324_v40 = vsel %vm700_vm3, %v1292_v34, %v1228_v52  ;;  %v1290_v16 = vsel %vm667_vm2, %v1258_v57, %v1192_v36 }
 0x110   : > { %v1449_v38 = vshll.u32 %v1324_v40, 16  ;;  %v1448_v44 = vor.u32 %v1447_v39, %v1443_v49 }
 0x112   : > { %v545_v14 = vpop.permute.xlu1 %544  ;;  %v1226_v13 = vpop.permute.xlu0 %1225  ;;  %v1451_v6 = vrot.slane %v1449_v38, 1 }
 0x113   : > { %v1322_v45 = vsel %vm700_vm3, %v1290_v16, %v1226_v13  ;;  %v662_v28 = vsel %vm634_vm1, %v3331_v27, %v545_v14 }
 0x114   : > { %v1439_v41 = vshll.u32 %v1322_v45, 16  ;;  %v3664_v2 = vsel %vm325_vm0, %v1448_v44, %v1451_v6 }
 0x116   : > { %v582_v58 = vpop.permute.xlu1 %581  ;;  %v1441_v42 = vrot.slane %v1439_v41, 1  ;;  %v543_v19 = vpop.permute.xlu0 %542 }
 0x117   : > { %v660_v4 = vsel %vm634_vm1, %v3321_v18, %v543_v19  ;;  %v695_v52 = vsel %vm667_vm2, %v662_v28, %v582_v58 }
 0x118   : > { %v3659_v50 = vsel %vm325_vm0, %v1438_v59, %v1441_v42 }
 0x119   : > { %2927 = vmatprep.mubr.msk.bf16.mxu1 %vm741_vm4, %v3659_v50 }
 0x11a   : > { %v1164_v56 = vpop.permute.xlu1 %1163  ;;  %2928 = vmatmul.mubr.msk.bf16.gmra.mxu1 %vm741_vm4, %v3664_v2  ;;  %v580_v1 = vpop.permute.xlu0 %579 }
 0x11b   : > { %v693_v5 = vsel %vm667_vm2, %v660_v4, %v580_v1 }
 0x11e   : > { %v1166_v61 = vpop.permute.xlu1 %1165  ;;  %v627_v9 = vpop.permute.xlu0 %626 }
 0x11f   : > { %v3674_v30 = vsel %vm700_vm3, %v693_v5, %v627_v9  ;;  %v1264_v34 = vsel %vm634_vm1, %v3341_v37, %v1166_v61  ;;  %v1262_v37 = vsel %vm634_vm1, %v3325_v21, %v1164_v56 }
 0x120   : > { %2897 = vmatprep.mubr.msk.bf16.mxu0 %vm741_vm4, %v3674_v30  ;;  %v1455_v40 = vshll.u32 %v3674_v30, 16  ;;  %v1453_v41 = vshrl.u32 %v3674_v30, 16 }
 0x122   : > { %v1198_v31 = vpop.permute.xlu1 %1197  ;;  %v629_v10 = vpop.permute.xlu0 %628  ;;  %v1457_v16 = vrot.slane %v1455_v40, 1 }
 0x123   : > { %v3682_v18 = vsel %vm700_vm3, %v695_v52, %v629_v10  ;;  %v1296_v36 = vsel %vm667_vm2, %v1264_v34, %v1198_v31 }
 0x124   : > { %2898 = vmatmul.mubr.msk.bf16.gmra.mxu0 %vm741_vm4, %v3682_v18  ;;  %v1465_v57 = vshll.u32 %v3682_v18, 16  ;;  %v1463_v6 = vshrl.u32 %v3682_v18, 16  ;;  %v1458_v42 = vor.u32 %v1457_v16, %v1453_v41 }
 0x126   : > { %v1232_v27 = vpop.permute.xlu1 %1231  ;;  %v1196_v33 = vpop.permute.xlu0 %1195  ;;  %v1467_v45 = vrot.slane %v1465_v57, 1 }
 0x127   : > { %v1328_v14 = vsel %vm700_vm3, %v1296_v36, %v1232_v27  ;;  %v1294_v13 = vsel %vm667_vm2, %v1262_v37, %v1196_v33 }
 0x128   : > { %v1469_v32 = vshll.u32 %v1328_v14, 16  ;;  %v1468_v1 = vor.u32 %v1467_v45, %v1463_v6 }
 0x12a   : > { %v549_v38 = vpop.permute.xlu1 %548  ;;  %v1230_v39 = vpop.permute.xlu0 %1229  ;;  %v1471_v59 = vrot.slane %v1469_v32, 1 }
 0x12b   : > { %v1326_v47 = vsel %vm700_vm3, %v1294_v13, %v1230_v39  ;;  %v666_v52 = vsel %vm634_vm1, %v3413_v35, %v549_v38 }
 0x12c   : > { %v1459_v58 = vshll.u32 %v1326_v47, 16  ;;  %v3702_v61 = vsel %vm325_vm0, %v1468_v1, %v1471_v59 }
 0x12e   : > { %v586_v49 = vpop.permute.xlu1 %585  ;;  %v1461_v19 = vrot.slane %v1459_v58, 1  ;;  %v547_v44 = vpop.permute.xlu0 %546 }
 0x12f   : > { %v664_v9 = vsel %vm634_vm1, %v3394_v46, %v547_v44  ;;  %v699_v27 = vsel %vm667_vm2, %v666_v52, %v586_v49 }
 0x130   : > { %v3697_v21 = vsel %vm325_vm0, %v1458_v42, %v1461_v19 }
 0x131   : > { %2931 = vmatprep.mubr.msk.bf16.mxu1 %vm741_vm4, %v3697_v21 }
 0x132   : > { %v1168_v56 = vpop.permute.xlu1 %1167  ;;  %2932 = vmatmul.mubr.msk.bf16.gmra.mxu1 %vm741_vm4, %v3702_v61  ;;  %v584_v4 = vpop.permute.xlu0 %583 }
 0x133   : > { %v697_v28 = vsel %vm667_vm2, %v664_v9, %v584_v4  ;;  %v1266_v37 = vsel %vm634_vm1, %v3405_v54, %v1168_v56 }
 0x136   : > { %v1170_v5 = vpop.permute.xlu1 %1169  ;;  %v631_v31 = vpop.permute.xlu0 %630 }
 0x137   : > { %v3712_v34 = vsel %vm700_vm3, %v697_v28, %v631_v31  ;;  %v1268_v36 = vsel %vm634_vm1, %v3430_v12, %v1170_v5 }
 0x138   : > { %2901 = vmatprep.mubr.msk.bf16.mxu0 %vm741_vm4, %v3712_v34  ;;  %v1475_v14 = vshll.u32 %v3712_v34, 16 }
 0x13a   : > { %v1202_v10 = vpop.permute.xlu1 %1201  ;;  %v633_v40 = vpop.permute.xlu0 %632  ;;  %v1477_v16 = vrot.slane %v1475_v14, 1 }
 0x13b   : > { %v3720_v46 = vsel %vm700_vm3, %v699_v27, %v633_v40  ;;  %v1300_v33 = vsel %vm667_vm2, %v1268_v36, %v1202_v10 }
 0x13c   : > { %2902 = vmatmul.mubr.msk.bf16.gmra.mxu0 %vm741_vm4, %v3720_v46  ;;  %v1485_v12 = vshll.u32 %v3720_v46, 16  ;;  %v1483_v58 = vshrl.u32 %v3720_v46, 16 }
 0x13d   : > { %2941 = vmatprep.mubr.msk.bf16.mxu0 %vm741_vm4, %v3378_v11  ;;  %v1473_v11 = vshrl.u32 %v3712_v34, 16 }
 0x13e   : > { %v1236_v35 = vpop.permute.xlu1 %1235  ;;  %v1200_v57 = vpop.permute.xlu0 %1199  ;;  %v1487_v45 = vrot.slane %v1485_v12, 1 }
 0x13f   : > { %v1332_v38 = vsel %vm700_vm3, %v1300_v33, %v1236_v35  ;;  %v1298_v13 = vsel %vm667_vm2, %v1266_v37, %v1200_v57  ;;  %v1478_v54 = vor.u32 %v1477_v16, %v1473_v11 }
 0x140   : > { %v1489_v32 = vshll.u32 %v1332_v38, 16  ;;  %v1488_v59 = vor.u32 %v1487_v45, %v1483_v58 }
 0x142   : > { %v1234_v39 = vpop.permute.xlu0 %1233  ;;  %v1491_v49 = vrot.slane %v1489_v32, 1 }
 0x143   : > { %v1330_v47 = vsel %vm700_vm3, %v1298_v13, %v1234_v39 }
 0x144   : > { %v1479_v41 = vshll.u32 %v1330_v47, 16  ;;  %2942 = vmatmul.mubr.msk.bf16.vlgmr.msra.gmra.mxu0 %vm741_vm4, %v3427_v60  ;;  %v3746_v19 = vsel %vm325_vm0, %v1488_v59, %v1491_v49  ;;  %v1891_v49 = vpop.permute.xlu1 %1890 }
 0x145   : > { %2945 = vmatprep.mubr.msk.bf16.mxu0 %vm741_vm4, %v3442_v24 }
 0x146   : > { %v1481_v6 = vrot.slane %v1479_v41, 1  ;;  %v1884_v13 = vpop.permute.xlu0 %1883 }
 0x148   : > { %v3741_v42 = vsel %vm325_vm0, %v1478_v54, %v1481_v6 }
 0x149   : > { %2935 = vmatprep.mubr.msk.bf16.mxu1 %vm741_vm4, %v3741_v42 }
 0x14a   : > { %2936 = vmatmul.mubr.msk.bf16.gmra.mxu1 %vm741_vm4, %v3746_v19 }
 0x14b   : > { %2975 = vmatprep.mubr.msk.bf16.mxu1 %vm741_vm4, %v3402_v53 }
 0x14c   : > { %2946 = vmatmul.mubr.msk.bf16.gmra.mxu0 %vm741_vm4, %v3500_v23 }
 0x14d   : > { %2949 = vmatprep.mubr.msk.bf16.mxu0 %vm741_vm4, %v3511_v43 }
 0x152   : > { %2976 = vmatmul.mubr.msk.bf16.vlgmr.msra.gmra.mxu1 %vm741_vm4, %v3474_v22 }
 0x153   : > { %2979 = vmatprep.mubr.msk.bf16.mxu1 %vm741_vm4, %v3479_v17 }
 0x154   : > { %2950 = vmatmul.mubr.msk.bf16.gmra.mxu0 %vm741_vm4, %v3558_v15 }
 0x155   : > { %2953 = vmatprep.mubr.msk.bf16.mxu0 %vm741_vm4, %v3567_v20 }
 0x159   : > { %v2875_v60 = vpop.f32.mrf.mxu0 }
 0x15a   : > { %2980 = vmatmul.mubr.msk.bf16.gmra.mxu1 %vm741_vm4, %v3539_v55  ;;  %v1007_v23 = vmul.f32 %v2875_v60, %v2875_v60  ;;  %v938_v55 = vsel %vm667_vm2, %v2875_v60, 0.0 }
 0x15b   : > { %v808_v53 = vpop.f32.mrf.mxu0  ;;  %2983 = vmatprep.mubr.msk.bf16.mxu1 %vm741_vm4, %v3544_v3 }
 0x15c   : > { %2954 = vmatmul.mubr.msk.bf16.gmra.mxu0 %vm741_vm4, %v3598_v63  ;;  %v1005_v22 = vmul.f32 %v808_v53, %v808_v53  ;;  %v935_v43 = vsel %vm667_vm2, %v808_v53, 0.0 }
 0x15d   : > { %v2876_v24 = vpop.f32.mrf.mxu0  ;;  %2957 = vmatprep.mubr.msk.bf16.mxu0 %vm741_vm4, %v3606_v25  ;;  %v1040_v25 = vsel %vm667_vm2, %v1007_v23, 0.0  ;;  %v1910_v23 = vsel %vm634_vm1, %v3470_v8, %v1884_v13 }
 0x15e   : > { %v1037_v3 = vsel %vm667_vm2, %v1005_v22, 0.0  ;;  %v1008_v1 = vmul.f32 %v2876_v24, %v2876_v24  ;;  %v940_v9 = vsel %vm667_vm2, %v2876_v24, 0.0 }
 0x15f   : > { %v811_v17 = vpop.f32.mrf.mxu0 }
 0x160   : > { %v936_v15 = vsel %vm667_vm2, %v811_v17, 0.0  ;;  %v1006_v20 = vmul.f32 %v811_v17, %v811_v17  ;;  %v1042_v10 = vsel %vm667_vm2, %v1008_v1, 0.0 }
 0x161   : > { %v937_v44 = vadd.f32 %v936_v15, %v935_v43 }
 0x162   : > { %v1038_v56 = vsel %vm667_vm2, %v1006_v20, 0.0  ;;  %v2909_v5 = vpop.f32.mrf.mxu1  ;;  %2984 = vmatmul.mubr.msk.bf16.gmra.mxu1 %vm741_vm4, %v3583_v62 }
 0x163   : > { %v939_v63 = vadd.f32 %v938_v55, %v937_v44  ;;  %v1039_v4 = vadd.f32 %v1038_v56, %v1037_v3  ;;  %2987 = vmatprep.mubr.msk.bf16.mxu1 %vm741_vm4, %v3588_v0  ;;  %v1783_v35 = vmul.f32 %v2909_v5, %v2909_v5  ;;  %v2260_v44 = vpop.permute.xlu1 %2259 }
 0x164   : > { %v1584_v31 = vpop.f32.mrf.mxu1  ;;  %2958 = vmatmul.mubr.msk.bf16.gmra.mxu0 %vm741_vm4, %v3636_v51  ;;  %v1714_v51 = vsel %vm667_vm2, %v2909_v5, 0.0 }
 0x165   : > { %v1041_v28 = vadd.f32 %v1040_v25, %v1039_v4  ;;  %v941_v52 = vadd.f32 %v940_v9, %v939_v63  ;;  %2961 = vmatprep.mubr.msk.bf16.mxu0 %vm741_vm4, %v3644_v48  ;;  %v1781_v36 = vmul.f32 %v1584_v31, %v1584_v31  ;;  %v1711_v33 = vsel %vm667_vm2, %v1584_v31, 0.0 }
 0x166   : > { %v2910_v27 = vpop.f32.mrf.mxu1  ;;  %v1816_v39 = vsel %vm667_vm2, %v1783_v35, 0.0 }
 0x167   : > { %v1043_v62 = vadd.f32 %v1042_v10, %v1041_v28  ;;  %v1813_v38 = vsel %vm667_vm2, %v1781_v36, 0.0  ;;  %v1784_v12 = vmul.f32 %v2910_v27, %v2910_v27  ;;  %v2266_v31 = vpop.permute.xlu1 %2265 }
 0x168   : > { %v1587_v40 = vpop.f32.mrf.mxu1 }
 0x169   : > { %v1712_v0 = vsel %vm667_vm2, %v1587_v40, 0.0  ;;  %v1782_v14 = vmul.f32 %v1587_v40, %v1587_v40  ;;  %v1818_v41 = vsel %vm667_vm2, %v1784_v12, 0.0 }
 0x16a   : > { %v1713_v57 = vadd.f32 %v1712_v0, %v1711_v33  ;;  %2988 = vmatmul.mubr.msk.bf16.gmra.mxu1 %vm741_vm4, %v3621_v26  ;;  %v1716_v26 = vsel %vm667_vm2, %v2910_v27, 0.0 }
 0x16b   : > { %v1814_v48 = vsel %vm667_vm2, %v1782_v14, 0.0  ;;  %2991 = vmatprep.mubr.msk.bf16.mxu1 %vm741_vm4, %v3626_v7 }
 0x16c   : > { %v1715_v37 = vadd.f32 %v1714_v51, %v1713_v57  ;;  %v1815_v32 = vadd.f32 %v1814_v48, %v1813_v38  ;;  %2962 = vmatmul.mubr.msk.bf16.gmra.mxu0 %vm741_vm4, %v3674_v30 }
 0x16d   : > { %v2879_v16 = vpop.f32.mrf.mxu0  ;;  %2965 = vmatprep.mubr.msk.bf16.mxu0 %vm741_vm4, %v3682_v18  ;;  %v1908_v18 = vpop.permute.xlu0 %1907 }
 0x16e   : > { %v1817_v45 = vadd.f32 %v1816_v39, %v1815_v32  ;;  %v1717_v11 = vadd.f32 %v1716_v26, %v1715_v37  ;;  %v1011_v24 = vmul.f32 %v2879_v16, %v2879_v16  ;;  %v946_v15 = vsel %vm667_vm2, %v2879_v16, 0.0 }
 0x16f   : > { %v824_v47 = vpop.f32.mrf.mxu0 }
 0x170   : > { %v942_v7 = vsel %vm667_vm2, %v824_v47, 0.0  ;;  %v1009_v58 = vmul.f32 %v824_v47, %v824_v47  ;;  %v1819_v30 = vadd.f32 %v1818_v41, %v1817_v45  ;;  %v1048_v1 = vsel %vm667_vm2, %v1011_v24, 0.0 }
 0x171   : > { %v943_v54 = vadd.f32 %v942_v7, %v941_v52  ;;  %v2880_v6 = vpop.f32.mrf.mxu0  ;;  %v2262_v63 = vpop.permute.xlu0 %2261 }
 0x172   : > { %v1044_v59 = vsel %vm667_vm2, %v1009_v58, 0.0  ;;  %2992 = vmatmul.mubr.msk.bf16.gmra.mxu1 %vm741_vm4, %v3659_v50  ;;  %v1012_v20 = vmul.f32 %v2880_v6, %v2880_v6  ;;  %v948_v8 = vsel %vm667_vm2, %v2880_v6, 0.0 }
 0x173   : > { %v1045_v60 = vadd.f32 %v1044_v59, %v1043_v62  ;;  %v827_v53 = vpop.f32.mrf.mxu0  ;;  %2995 = vmatprep.mubr.msk.bf16.mxu1 %vm741_vm4, %v3664_v2  ;;  %v1912_v2 = vsel %vm667_vm2, %v1910_v23, %v1891_v49 }
 0x174   : > { %v944_v22 = vsel %vm667_vm2, %v827_v53, 0.0  ;;  %v1010_v17 = vmul.f32 %v827_v53, %v827_v53  ;;  %2966 = vmatmul.mubr.msk.bf16.gmra.mxu0 %vm741_vm4, %v3712_v34  ;;  %v2268_v34 = vsel %vm634_vm1, %v3482_v29, %v2260_v44  ;;  %v1050_v5 = vsel %vm667_vm2, %v1012_v20, 0.0 }
 0x175   : > { %v945_v43 = vadd.f32 %v944_v22, %v943_v54  ;;  %2969 = vmatprep.mubr.msk.bf16.mxu0 %vm741_vm4, %v3720_v46  ;;  %v1914_v25 = vsel %vm700_vm3, %v1912_v2, %v1908_v18  ;;  %v2270_v28 = vsel %vm667_vm2, %v2268_v34, %v2262_v63 }
 0x176   : > { %v1046_v50 = vsel %vm667_vm2, %v1010_v17, 0.0  ;;  %v2275_v52 = vshll.u32 %v1914_v25, 16  ;;  %v2272_v62 = vsel %vm700_vm3, %v2270_v28, %v2266_v31 }
 0x177   : > { %v947_v55 = vadd.f32 %v946_v15, %v945_v43  ;;  %v1047_v3 = vadd.f32 %v1046_v50, %v1045_v60  ;;  %v2279_v14 = vshll.u32 %v2272_v62, 16 }
 0x178   : > { %v2277_v35 = vrot.slane %v2275_v52, 1 }
 0x179   : > { %v1049_v56 = vadd.f32 %v1048_v1, %v1047_v3  ;;  %v949_v4 = vadd.f32 %v948_v8, %v947_v55  ;;  %v2281_v47 = vrot.slane %v2279_v14, 1 }
 0x17a   : > { %v2913_v46 = vpop.f32.mrf.mxu1  ;;  %2996 = vmatmul.mubr.msk.bf16.gmra.mxu1 %vm741_vm4, %v3697_v21  ;;  %v2273_v21 = vshrl.u32 %v1914_v25, 16 }
 0x17b   : > { %v1051_v9 = vadd.f32 %v1050_v5, %v1049_v56  ;;  %2999 = vmatprep.mubr.msk.bf16.mxu1 %vm741_vm4, %v3702_v61  ;;  %v1787_v61 = vmul.f32 %v2913_v46, %v2913_v46  ;;  %v1722_v48 = vsel %vm667_vm2, %v2913_v46, 0.0 }
 0x17c   : > { %v1600_v10 = vpop.f32.mrf.mxu1  ;;  %2970 = vmatmul.mubr.msk.bf16.gmra.mxu0 %vm741_vm4, %v1914_v25  ;;  %v2278_v26 = vor.u32 %v2277_v35, %v2273_v21 }
 0x17d   : > { %v1718_v29 = vsel %vm667_vm2, %v1600_v10, 0.0  ;;  %v1785_v27 = vmul.f32 %v1600_v10, %v1600_v10  ;;  %v1824_v45 = vsel %vm667_vm2, %v1787_v61, 0.0 }
 0x17e   : > { %v2914_v36 = vpop.f32.mrf.mxu1  ;;  %v1719_v33 = vadd.f32 %v1718_v29, %v1717_v11  ;;  %v2282_v60 = vsel %vm325_vm0, %v2278_v26, %v2281_v47 }
 0x17f   : > { %v1820_v40 = vsel %vm667_vm2, %v1785_v27, 0.0  ;;  %v1788_v37 = vmul.f32 %v2914_v36, %v2914_v36  ;;  %v1724_v11 = vsel %vm667_vm2, %v2914_v36, 0.0 }
 0x180   : > { %v1603_v0 = vpop.f32.mrf.mxu1  ;;  %v1821_v38 = vadd.f32 %v1820_v40, %v1819_v30 }
 0x181   : > { %v1720_v57 = vsel %vm667_vm2, %v1603_v0, 0.0  ;;  %v1786_v51 = vmul.f32 %v1603_v0, %v1603_v0  ;;  %v1826_v58 = vsel %vm667_vm2, %v1788_v37, 0.0 }
 0x182   : > { %v1721_v12 = vadd.f32 %v1720_v57, %v1719_v33  ;;  %3000 = vmatmul.mubr.msk.bf16.gmra.mxu1 %vm741_vm4, %v3741_v42 }
 0x183   : > { %v1822_v32 = vsel %vm667_vm2, %v1786_v51, 0.0  ;;  %3003 = vmatprep.mubr.msk.bf16.mxu1 %vm741_vm4, %v3746_v19 }
 0x184   : > { %v1723_v16 = vadd.f32 %v1722_v48, %v1721_v12  ;;  %v1823_v13 = vadd.f32 %v1822_v32, %v1821_v38 }
 0x185   : > { %v2883_v39 = vpop.f32.mrf.mxu0 }
 0x186   : > { %v1825_v41 = vadd.f32 %v1824_v45, %v1823_v13  ;;  %v1725_v42 = vadd.f32 %v1724_v11, %v1723_v16  ;;  %v1015_v24 = vmul.f32 %v2883_v39, %v2883_v39  ;;  %v954_v43 = vsel %vm667_vm2, %v2883_v39, 0.0 }
 0x187   : > { %v840_v7 = vpop.f32.mrf.mxu0 }
 0x188   : > { %v950_v49 = vsel %vm667_vm2, %v840_v7, 0.0  ;;  %v1013_v54 = vmul.f32 %v840_v7, %v840_v7  ;;  %v1827_v19 = vadd.f32 %v1826_v58, %v1825_v41  ;;  %v1056_v55 = vsel %vm667_vm2, %v1015_v24, 0.0 }
 0x189   : > { %v951_v6 = vadd.f32 %v950_v49, %v949_v4  ;;  %v2884_v30 = vpop.f32.mrf.mxu0 }
 0x18a   : > { %v1052_v59 = vsel %vm667_vm2, %v1013_v54, 0.0  ;;  %3004 = vmatmul.mubr.msk.bf16.gmra.mxu1 %vm741_vm4, %v2282_v60  ;;  %v1016_v15 = vmul.f32 %v2884_v30, %v2884_v30  ;;  %v956_v3 = vsel %vm667_vm2, %v2884_v30, 0.0 }
 0x18b   : > { %v1053_v53 = vadd.f32 %v1052_v59, %v1051_v9  ;;  %v843_v18 = vpop.f32.mrf.mxu0 }
 0x18c   : > { %v952_v22 = vsel %vm667_vm2, %v843_v18, 0.0  ;;  %v1014_v17 = vmul.f32 %v843_v18, %v843_v18  ;;  %v1058_v8 = vsel %vm667_vm2, %v1016_v15, 0.0 }
 0x18d   : > { %v953_v23 = vadd.f32 %v952_v22, %v951_v6 }
 0x18e   : > { %v1054_v20 = vsel %vm667_vm2, %v1014_v17, 0.0 }
 0x18f   : > { %v955_v50 = vadd.f32 %v954_v43, %v953_v23  ;;  %v1055_v44 = vadd.f32 %v1054_v20, %v1053_v53 }
 0x191   : > { %v1057_v2 = vadd.f32 %v1056_v55, %v1055_v44  ;;  %v957_v1 = vadd.f32 %v956_v3, %v955_v50 }
 0x192   : > { %v2917_v56 = vpop.f32.mrf.mxu1 }
 0x193   : > { %v1059_v34 = vadd.f32 %v1058_v8, %v1057_v2  ;;  %v1791_v31 = vmul.f32 %v2917_v56, %v2917_v56  ;;  %v1730_v62 = vsel %vm667_vm2, %v2917_v56, 0.0 }
 0x194   : > { %v1616_v63 = vpop.f32.mrf.mxu1 }
 0x195   : > { %v1726_v4 = vsel %vm667_vm2, %v1616_v63, 0.0  ;;  %v1789_v5 = vmul.f32 %v1616_v63, %v1616_v63  ;;  %v1832_v0 = vsel %vm667_vm2, %v1791_v31, 0.0 }
 0x196   : > { %v2918_v25 = vpop.f32.mrf.mxu1  ;;  %v1727_v9 = vadd.f32 %v1726_v4, %v1725_v42 }
 0x197   : > { %v1828_v46 = vsel %vm667_vm2, %v1789_v5, 0.0  ;;  %v1792_v36 = vmul.f32 %v2918_v25, %v2918_v25  ;;  %v1732_v61 = vsel %vm667_vm2, %v2918_v25, 0.0 }
 0x198   : > { %v1619_v28 = vpop.f32.mrf.mxu1  ;;  %v1829_v29 = vadd.f32 %v1828_v46, %v1827_v19 }
 0x199   : > { %v1728_v52 = vsel %vm667_vm2, %v1619_v28, 0.0  ;;  %v1790_v10 = vmul.f32 %v1619_v28, %v1619_v28  ;;  %v1834_v38 = vsel %vm667_vm2, %v1792_v36, 0.0 }
 0x19a   : > { %v1729_v27 = vadd.f32 %v1728_v52, %v1727_v9 }
 0x19b   : > { %v1830_v40 = vsel %vm667_vm2, %v1790_v10, 0.0 }
 0x19c   : > { %v1731_v21 = vadd.f32 %v1730_v62, %v1729_v27  ;;  %v1831_v35 = vadd.f32 %v1830_v40, %v1829_v29  ;;  %v2887_v33 = vpop.f32.mrf.mxu0 }
 0x19d   : > { %v1019_v45 = vmul.f32 %v2887_v33, %v2887_v33  ;;  %v962_v7 = vsel %vm667_vm2, %v2887_v33, 0.0 }
 0x19e   : > { %v1833_v14 = vadd.f32 %v1832_v0, %v1831_v35  ;;  %v856_v57 = vpop.f32.mrf.mxu0  ;;  %v1733_v51 = vadd.f32 %v1732_v61, %v1731_v21 }
 0x19f   : > { %v958_v12 = vsel %vm667_vm2, %v856_v57, 0.0  ;;  %v1017_v48 = vmul.f32 %v856_v57, %v856_v57  ;;  %v1064_v6 = vsel %vm667_vm2, %v1019_v45, 0.0 }
 0x1a0   : > { %v959_v37 = vadd.f32 %v958_v12, %v957_v1  ;;  %v2888_v32 = vpop.f32.mrf.mxu0  ;;  %v1835_v16 = vadd.f32 %v1834_v38, %v1833_v14 }
 0x1a1   : > { %v1060_v13 = vsel %vm667_vm2, %v1017_v48, 0.0  ;;  %v1020_v42 = vmul.f32 %v2888_v32, %v2888_v32  ;;  %v964_v30 = vsel %vm667_vm2, %v2888_v32, 0.0 }
 0x1a2   : > { %v1061_v39 = vadd.f32 %v1060_v13, %v1059_v34  ;;  %v859_v26 = vpop.f32.mrf.mxu0 }
 0x1a3   : > { %v960_v47 = vsel %vm667_vm2, %v859_v26, 0.0  ;;  %v1018_v11 = vmul.f32 %v859_v26, %v859_v26  ;;  %v1066_v60 = vsel %vm667_vm2, %v1020_v42, 0.0 }
 0x1a4   : > { %v961_v41 = vadd.f32 %v960_v47, %v959_v37 }
 0x1a5   : > { %v1062_v58 = vsel %vm667_vm2, %v1018_v11, 0.0 }
 0x1a6   : > { %v963_v49 = vadd.f32 %v962_v7, %v961_v41  ;;  %v1063_v54 = vadd.f32 %v1062_v58, %v1061_v39 }
 0x1a8   : > { %v1065_v19 = vadd.f32 %v1064_v6, %v1063_v54  ;;  %v965_v59 = vadd.f32 %v964_v30, %v963_v49 }
 0x1aa   : > { %v2921_v53 = vpop.f32.mrf.mxu1  ;;  %v1067_v18 = vadd.f32 %v1066_v60, %v1065_v19 }
 0x1ab   : > { %v1795_v50 = vmul.f32 %v2921_v53, %v2921_v53  ;;  %v1738_v1 = vsel %vm667_vm2, %v2921_v53, 0.0 }
 0x1ac   : > { %v1632_v24 = vpop.f32.mrf.mxu1 }
 0x1ad   : > { %v1734_v22 = vsel %vm667_vm2, %v1632_v24, 0.0  ;;  %v1793_v17 = vmul.f32 %v1632_v24, %v1632_v24  ;;  %v1840_v5 = vsel %vm667_vm2, %v1795_v50, 0.0 }
 0x1ae   : > { %v2922_v23 = vpop.f32.mrf.mxu1  ;;  %v1735_v15 = vadd.f32 %v1734_v22, %v1733_v51 }
 0x1af   : > { %v1836_v43 = vsel %vm667_vm2, %v1793_v17, 0.0  ;;  %v1796_v8 = vmul.f32 %v2922_v23, %v2922_v23  ;;  %v1740_v25 = vsel %vm667_vm2, %v2922_v23, 0.0 }
 0x1b0   : > { %v1635_v20 = vpop.f32.mrf.mxu1  ;;  %v1837_v3 = vadd.f32 %v1836_v43, %v1835_v16 }
 0x1b1   : > { %v1736_v44 = vsel %vm667_vm2, %v1635_v20, 0.0  ;;  %v1794_v55 = vmul.f32 %v1635_v20, %v1635_v20  ;;  %v1842_v31 = vsel %vm667_vm2, %v1796_v8, 0.0 }
 0x1b2   : > { %v1737_v2 = vadd.f32 %v1736_v44, %v1735_v15 }
 0x1b3   : > { %v1838_v56 = vsel %vm667_vm2, %v1794_v55, 0.0 }
 0x1b4   : > { %v1739_v34 = vadd.f32 %v1738_v1, %v1737_v2  ;;  %v1839_v63 = vadd.f32 %v1838_v56, %v1837_v3  ;;  %v2891_v4 = vpop.f32.mrf.mxu0 }
 0x1b5   : > { %v1023_v35 = vmul.f32 %v2891_v4, %v2891_v4  ;;  %v970_v14 = vsel %vm667_vm2, %v2891_v4, 0.0 }
 0x1b6   : > { %v1841_v46 = vadd.f32 %v1840_v5, %v1839_v63  ;;  %v872_v9 = vpop.f32.mrf.mxu0  ;;  %v1741_v28 = vadd.f32 %v1740_v25, %v1739_v34 }
 0x1b7   : > { %v966_v52 = vsel %vm667_vm2, %v872_v9, 0.0  ;;  %v1021_v10 = vmul.f32 %v872_v9, %v872_v9  ;;  %v1072_v48 = vsel %vm667_vm2, %v1023_v35, 0.0 }
 0x1b8   : > { %v967_v29 = vadd.f32 %v966_v52, %v965_v59  ;;  %v2892_v27 = vpop.f32.mrf.mxu0  ;;  %v1843_v62 = vadd.f32 %v1842_v31, %v1841_v46 }
 0x1b9   : > { %v1068_v36 = vsel %vm667_vm2, %v1021_v10, 0.0  ;;  %v1024_v57 = vmul.f32 %v2892_v27, %v2892_v27  ;;  %v972_v37 = vsel %vm667_vm2, %v2892_v27, 0.0 }
 0x1ba   : > { %v1069_v40 = vadd.f32 %v1068_v36, %v1067_v18  ;;  %v875_v21 = vpop.f32.mrf.mxu0 }
 0x1bb   : > { %v968_v33 = vsel %vm667_vm2, %v875_v21, 0.0  ;;  %v1022_v0 = vmul.f32 %v875_v21, %v875_v21  ;;  %v1074_v13 = vsel %vm667_vm2, %v1024_v57, 0.0 }
 0x1bc   : > { %v969_v61 = vadd.f32 %v968_v33, %v967_v29 }
 0x1bd   : > { %v1070_v51 = vsel %vm667_vm2, %v1022_v0, 0.0 }
 0x1be   : > { %v971_v38 = vadd.f32 %v970_v14, %v969_v61  ;;  %v1071_v12 = vadd.f32 %v1070_v51, %v1069_v40 }
 0x1c0   : > { %v1073_v32 = vadd.f32 %v1072_v48, %v1071_v12  ;;  %v973_v16 = vadd.f32 %v972_v37, %v971_v38 }
 0x1c2   : > { %v2925_v39 = vpop.f32.mrf.mxu1  ;;  %v1075_v26 = vadd.f32 %v1074_v13, %v1073_v32 }
 0x1c3   : > { %v1799_v49 = vmul.f32 %v2925_v39, %v2925_v39  ;;  %v1746_v59 = vsel %vm667_vm2, %v2925_v39, 0.0 }
 0x1c4   : > { %v1648_v45 = vpop.f32.mrf.mxu1 }
 0x1c5   : > { %v1742_v47 = vsel %vm667_vm2, %v1648_v45, 0.0  ;;  %v1797_v11 = vmul.f32 %v1648_v45, %v1648_v45  ;;  %v1848_v17 = vsel %vm667_vm2, %v1799_v49, 0.0 }
 0x1c6   : > { %v2926_v41 = vpop.f32.mrf.mxu1  ;;  %v1743_v42 = vadd.f32 %v1742_v47, %v1741_v28 }
 0x1c7   : > { %v1844_v7 = vsel %vm667_vm2, %v1797_v11, 0.0  ;;  %v1800_v60 = vmul.f32 %v2926_v41, %v2926_v41  ;;  %v1748_v23 = vsel %vm667_vm2, %v2926_v41, 0.0 }
 0x1c8   : > { %v1651_v58 = vpop.f32.mrf.mxu1  ;;  %v1845_v30 = vadd.f32 %v1844_v7, %v1843_v62 }
 0x1c9   : > { %v1744_v54 = vsel %vm667_vm2, %v1651_v58, 0.0  ;;  %v1798_v6 = vmul.f32 %v1651_v58, %v1651_v58  ;;  %v1850_v50 = vsel %vm667_vm2, %v1800_v60, 0.0 }
 0x1ca   : > { %v1745_v19 = vadd.f32 %v1744_v54, %v1743_v42 }
 0x1cb   : > { %v1846_v53 = vsel %vm667_vm2, %v1798_v6, 0.0 }
 0x1cc   : > { %v1747_v18 = vadd.f32 %v1746_v59, %v1745_v19  ;;  %v1847_v24 = vadd.f32 %v1846_v53, %v1845_v30  ;;  %v2895_v22 = vpop.f32.mrf.mxu0 }
 0x1cd   : > { %v1027_v63 = vmul.f32 %v2895_v22, %v2895_v22  ;;  %v978_v46 = vsel %vm667_vm2, %v2895_v22, 0.0 }
 0x1ce   : > { %v1849_v43 = vadd.f32 %v1848_v17, %v1847_v24  ;;  %v888_v15 = vpop.f32.mrf.mxu0  ;;  %v1749_v20 = vadd.f32 %v1748_v23, %v1747_v18 }
 0x1cf   : > { %v974_v44 = vsel %vm667_vm2, %v888_v15, 0.0  ;;  %v1025_v55 = vmul.f32 %v888_v15, %v888_v15  ;;  %v1080_v10 = vsel %vm667_vm2, %v1027_v63, 0.0 }
 0x1d0   : > { %v975_v3 = vadd.f32 %v974_v44, %v973_v16  ;;  %v2896_v2 = vpop.f32.mrf.mxu0  ;;  %v1851_v1 = vadd.f32 %v1850_v50, %v1849_v43 }
 0x1d1   : > { %v1076_v8 = vsel %vm667_vm2, %v1025_v55, 0.0  ;;  %v1028_v9 = vmul.f32 %v2896_v2, %v2896_v2  ;;  %v980_v29 = vsel %vm667_vm2, %v2896_v2, 0.0 }
 0x1d2   : > { %v1077_v56 = vadd.f32 %v1076_v8, %v1075_v26  ;;  %v891_v34 = vpop.f32.mrf.mxu0 }
 0x1d3   : > { %v976_v4 = vsel %vm667_vm2, %v891_v34, 0.0  ;;  %v1026_v5 = vmul.f32 %v891_v34, %v891_v34  ;;  %v1082_v36 = vsel %vm667_vm2, %v1028_v9, 0.0 }
 0x1d4   : > { %v977_v25 = vadd.f32 %v976_v4, %v975_v3 }
 0x1d5   : > { %v1078_v28 = vsel %vm667_vm2, %v1026_v5, 0.0 }
 0x1d6   : > { %v979_v31 = vadd.f32 %v978_v46, %v977_v25  ;;  %v1079_v52 = vadd.f32 %v1078_v28, %v1077_v56 }
 0x1d8   : > { %v1081_v27 = vadd.f32 %v1080_v10, %v1079_v52  ;;  %v981_v62 = vadd.f32 %v980_v29, %v979_v31 }
 0x1da   : > { %v2929_v40 = vpop.f32.mrf.mxu1  ;;  %v1083_v21 = vadd.f32 %v1082_v36, %v1081_v27 }
 0x1db   : > { %v1803_v38 = vmul.f32 %v2929_v40, %v2929_v40  ;;  %v1754_v16 = vsel %vm667_vm2, %v2929_v40, 0.0 }
 0x1dc   : > { %v1664_v35 = vpop.f32.mrf.mxu1 }
 0x1dd   : > { %v1750_v33 = vsel %vm667_vm2, %v1664_v35, 0.0  ;;  %v1801_v0 = vmul.f32 %v1664_v35, %v1664_v35  ;;  %v1856_v11 = vsel %vm667_vm2, %v1803_v38, 0.0 }
 0x1de   : > { %v2930_v61 = vpop.f32.mrf.mxu1  ;;  %v1751_v57 = vadd.f32 %v1750_v33, %v1749_v20 }
 0x1df   : > { %v1852_v14 = vsel %vm667_vm2, %v1801_v0, 0.0  ;;  %v1804_v13 = vmul.f32 %v2930_v61, %v2930_v61  ;;  %v1756_v41 = vsel %vm667_vm2, %v2930_v61, 0.0 }
 0x1e0   : > { %v1667_v51 = vpop.f32.mrf.mxu1  ;;  %v1853_v37 = vadd.f32 %v1852_v14, %v1851_v1 }
 0x1e1   : > { %v1752_v12 = vsel %vm667_vm2, %v1667_v51, 0.0  ;;  %v1802_v48 = vmul.f32 %v1667_v51, %v1667_v51  ;;  %v1858_v49 = vsel %vm667_vm2, %v1804_v13, 0.0 }
 0x1e2   : > { %v1753_v32 = vadd.f32 %v1752_v12, %v1751_v57 }
 0x1e3   : > { %v1854_v39 = vsel %vm667_vm2, %v1802_v48, 0.0 }
 0x1e4   : > { %v1755_v26 = vadd.f32 %v1754_v16, %v1753_v32  ;;  %v1855_v45 = vadd.f32 %v1854_v39, %v1853_v37  ;;  %v2899_v47 = vpop.f32.mrf.mxu0 }
 0x1e5   : > { %v1031_v24 = vmul.f32 %v2899_v47, %v2899_v47  ;;  %v986_v43 = vsel %vm667_vm2, %v2899_v47, 0.0 }
 0x1e6   : > { %v1857_v7 = vadd.f32 %v1856_v11, %v1855_v45  ;;  %v904_v42 = vpop.f32.mrf.mxu0  ;;  %v1757_v58 = vadd.f32 %v1756_v41, %v1755_v26 }
 0x1e7   : > { %v982_v54 = vsel %vm667_vm2, %v904_v42, 0.0  ;;  %v1029_v6 = vmul.f32 %v904_v42, %v904_v42  ;;  %v1088_v55 = vsel %vm667_vm2, %v1031_v24, 0.0 }
 0x1e8   : > { %v983_v30 = vadd.f32 %v982_v54, %v981_v62  ;;  %v2900_v19 = vpop.f32.mrf.mxu0  ;;  %v1859_v59 = vadd.f32 %v1858_v49, %v1857_v7 }
 0x1e9   : > { %v1084_v60 = vsel %vm667_vm2, %v1029_v6, 0.0  ;;  %v1032_v15 = vmul.f32 %v2900_v19, %v2900_v19  ;;  %v988_v3 = vsel %vm667_vm2, %v2900_v19, 0.0 }
 0x1ea   : > { %v1085_v53 = vadd.f32 %v1084_v60, %v1083_v21  ;;  %v907_v18 = vpop.f32.mrf.mxu0 }
 0x1eb   : > { %v984_v22 = vsel %vm667_vm2, %v907_v18, 0.0  ;;  %v1030_v17 = vmul.f32 %v907_v18, %v907_v18  ;;  %v1090_v8 = vsel %vm667_vm2, %v1032_v15, 0.0 }
 0x1ec   : > { %v985_v23 = vadd.f32 %v984_v22, %v983_v30 }
 0x1ed   : > { %v1086_v20 = vsel %vm667_vm2, %v1030_v17, 0.0 }
 0x1ee   : > { %v987_v50 = vadd.f32 %v986_v43, %v985_v23  ;;  %v1087_v44 = vadd.f32 %v1086_v20, %v1085_v53 }
 0x1f0   : > { %v1089_v2 = vadd.f32 %v1088_v55, %v1087_v44  ;;  %v989_v1 = vadd.f32 %v988_v3, %v987_v50 }
 0x1f2   : > { %v2933_v56 = vpop.f32.mrf.mxu1  ;;  %v1091_v34 = vadd.f32 %v1090_v8, %v1089_v2 }
 0x1f3   : > { %v1807_v31 = vmul.f32 %v2933_v56, %v2933_v56  ;;  %v1762_v62 = vsel %vm667_vm2, %v2933_v56, 0.0 }
 0x1f4   : > { %v1680_v63 = vpop.f32.mrf.mxu1 }
 0x1f5   : > { %v1758_v4 = vsel %vm667_vm2, %v1680_v63, 0.0  ;;  %v1805_v5 = vmul.f32 %v1680_v63, %v1680_v63  ;;  %v1864_v0 = vsel %vm667_vm2, %v1807_v31, 0.0 }
 0x1f6   : > { %v2934_v25 = vpop.f32.mrf.mxu1  ;;  %v1759_v9 = vadd.f32 %v1758_v4, %v1757_v58 }
 0x1f7   : > { %v1860_v46 = vsel %vm667_vm2, %v1805_v5, 0.0  ;;  %v1808_v36 = vmul.f32 %v2934_v25, %v2934_v25  ;;  %v1764_v61 = vsel %vm667_vm2, %v2934_v25, 0.0 }
 0x1f8   : > { %v1683_v28 = vpop.f32.mrf.mxu1  ;;  %v1861_v29 = vadd.f32 %v1860_v46, %v1859_v59 }
 0x1f9   : > { %v1760_v52 = vsel %vm667_vm2, %v1683_v28, 0.0  ;;  %v1806_v10 = vmul.f32 %v1683_v28, %v1683_v28  ;;  %v1866_v38 = vsel %vm667_vm2, %v1808_v36, 0.0 }
 0x1fa   : > { %v1761_v27 = vadd.f32 %v1760_v52, %v1759_v9 }
 0x1fb   : > { %v1862_v40 = vsel %vm667_vm2, %v1806_v10, 0.0 }
 0x1fc   : > { %v1763_v21 = vadd.f32 %v1762_v62, %v1761_v27  ;;  %v1863_v35 = vadd.f32 %v1862_v40, %v1861_v29  ;;  %v2903_v33 = vpop.f32.mrf.mxu0 }
 0x1fd   : > { %v1035_v45 = vmul.f32 %v2903_v33, %v2903_v33  ;;  %v994_v42 = vsel %vm667_vm2, %v2903_v33, 0.0 }
 0x1fe   : > { %v1865_v14 = vadd.f32 %v1864_v0, %v1863_v35  ;;  %v920_v57 = vpop.f32.mrf.mxu0  ;;  %v3926_v51 = vadd.f32 %v1764_v61, %v1763_v21 }
 0x1ff   : > { %v990_v12 = vsel %vm667_vm2, %v920_v57, 0.0  ;;  %v1033_v48 = vmul.f32 %v920_v57, %v920_v57  ;;  %v1096_v19 = vsel %vm667_vm2, %v1035_v45, 0.0 }
 0x200   : > { %v991_v37 = vadd.f32 %v990_v12, %v989_v1  ;;  %v2904_v32 = vpop.f32.mrf.mxu0  ;;  %v3930_v16 = vadd.f32 %v1866_v38, %v1865_v14 }
 0x201   : > { %v1092_v13 = vsel %vm667_vm2, %v1033_v48, 0.0  ;;  %v1036_v58 = vmul.f32 %v2904_v32, %v2904_v32  ;;  %v996_v59 = vsel %vm667_vm2, %v2904_v32, 0.0 }
 0x202   : > { %v1093_v39 = vadd.f32 %v1092_v13, %v1091_v34  ;;  %v923_v26 = vpop.f32.mrf.mxu0 }
 0x203   : > { %v992_v47 = vsel %vm667_vm2, %v923_v26, 0.0  ;;  %v1034_v11 = vmul.f32 %v923_v26, %v923_v26  ;;  %v1098_v24 = vsel %vm667_vm2, %v1036_v58, 0.0 }
 0x204   : > { %v993_v41 = vadd.f32 %v992_v47, %v991_v37  ;;  %v2943_v7 = vpop.f32.mrf.mxu0 }
 0x205   : > { %v1094_v49 = vsel %vm667_vm2, %v1034_v11, 0.0  ;;  %v2159_v22 = vmul.f32 %v2943_v7, %v2943_v7  ;;  %v2090_v4 = vsel %vm667_vm2, %v2943_v7, 0.0 }
 0x206   : > { %v995_v54 = vadd.f32 %v994_v42, %v993_v41  ;;  %v1095_v6 = vadd.f32 %v1094_v49, %v1093_v39  ;;  %v1960_v30 = vpop.f32.mrf.mxu0 }
 0x207   : > { %v2157_v17 = vmul.f32 %v1960_v30, %v1960_v30  ;;  %v2087_v50 = vsel %vm667_vm2, %v1960_v30, 0.0  ;;  %v2192_v5 = vsel %vm667_vm2, %v2159_v22, 0.0 }
 0x208   : > { %v997_v60 = vadd.f32 %v996_v59, %v995_v54  ;;  %v1097_v53 = vadd.f32 %v1096_v19, %v1095_v6  ;;  %v2944_v18 = vpop.f32.mrf.mxu0 }
 0x209   : > { %v2160_v44 = vmul.f32 %v2944_v18, %v2944_v18  ;;  %v2189_v25 = vsel %vm667_vm2, %v2157_v17, 0.0  ;;  %v2092_v27 = vsel %vm667_vm2, %v2944_v18, 0.0 }
 0x20a   : > { %v998_v23 = vrot.slane %v997_v60, 4  ;;  %v1099_v43 = vadd.f32 %v1098_v24, %v1097_v53  ;;  %v2937_v15 = vpop.f32.mrf.mxu1  ;;  %v1963_v20 = vpop.f32.mrf.mxu0 }
 0x20b   : > { %v1811_v55 = vmul.f32 %v2937_v15, %v2937_v15  ;;  %v2088_v3 = vsel %vm667_vm2, %v1963_v20, 0.0  ;;  %v2158_v56 = vmul.f32 %v1963_v20, %v1963_v20  ;;  %v2194_v62 = vsel %vm667_vm2, %v2160_v44, 0.0 }
 0x20c   : > { %v999_v2 = vadd.f32 %v998_v23, %v997_v60  ;;  %v1100_v1 = vrot.slane %v1099_v43, 4  ;;  %v2089_v8 = vadd.f32 %v2088_v3, %v2087_v50  ;;  %v1696_v34 = vpop.f32.mrf.mxu1  ;;  %v2947_v63 = vpop.f32.mrf.mxu0  ;;  %v1770_v35 = vsel %vm667_vm2, %v2937_v15, 0.0 }
 0x20d   : > { %v1809_v46 = vmul.f32 %v1696_v34, %v1696_v34  ;;  %v2190_v52 = vsel %vm667_vm2, %v2158_v56, 0.0  ;;  %v1766_v40 = vsel %vm667_vm2, %v1696_v34, 0.0  ;;  %v1872_v33 = vsel %vm667_vm2, %v1811_v55, 0.0 }
 0x20e   : > { %v1000_v9 = vrot.slane %v999_v2, 2  ;;  %v1101_v28 = vadd.f32 %v1100_v1, %v1099_v43  ;;  %v2091_v31 = vadd.f32 %v2090_v4, %v2089_v8  ;;  %v2938_v10 = vpop.f32.mrf.mxu1  ;;  %v1976_v29 = vpop.f32.mrf.mxu0  ;;  %v2191_v36 = vadd.f32 %v2190_v52, %v2189_v25 }
 0x20f   : > { %v2098_v0 = vsel %vm667_vm2, %v2947_v63, 0.0  ;;  %v1868_v12 = vsel %vm667_vm2, %v1809_v46, 0.0  ;;  %v1767_v32 = vadd.f32 %v1766_v40, %v3926_v51  ;;  %v2094_v13 = vsel %vm667_vm2, %v1976_v29, 0.0 }
 0x210   : > { %v1102_v21 = vrot.slane %v1101_v28, 2  ;;  %v1699_v61 = vpop.f32.mrf.mxu1  ;;  %v2948_v14 = vpop.f32.mrf.mxu0  ;;  %v1001_v57 = vadd.f32 %v1000_v9, %v999_v2  ;;  %v2193_v38 = vadd.f32 %v2192_v5, %v2191_v36  ;;  %v2093_v48 = vadd.f32 %v2092_v27, %v2091_v31 }
 0x211   : > { %v2161_v39 = vmul.f32 %v1976_v29, %v1976_v29  ;;  %v2163_v47 = vmul.f32 %v2947_v63, %v2947_v63  ;;  %v1768_v7 = vsel %vm667_vm2, %v1699_v61, 0.0  ;;  %v1869_v42 = vadd.f32 %v1868_v12, %v3930_v16 }
 0x212   : > { %v1103_v37 = vadd.f32 %v1102_v21, %v1101_v28  ;;  %v1979_v26 = vpop.f32.mrf.mxu0  ;;  %v2977_v45 = vpop.f32.mrf.mxu1  ;;  %v2095_v11 = vadd.f32 %v2094_v13, %v2093_v48  ;;  %v2195_v41 = vadd.f32 %v2194_v62, %v2193_v38  ;;  %v1812_v58 = vmul.f32 %v2938_v10, %v2938_v10 }
 0x213   : > { %v2196_v49 = vsel %vm667_vm2, %v2161_v39, 0.0  ;;  %v1769_v54 = vadd.f32 %v1768_v7, %v1767_v32  ;;  %v1002_v19 = vrot.slane %v1001_v57, 1  ;;  %v1772_v51 = vsel %vm667_vm2, %v2938_v10, 0.0 }
 0x214   : > { %v2951_v6 = vpop.f32.mrf.mxu0  ;;  %v2329_v30 = vpop.f32.mrf.mxu1  ;;  %v2197_v59 = vadd.f32 %v2196_v49, %v2195_v41  ;;  %v1810_v60 = vmul.f32 %v1699_v61, %v1699_v61  ;;  %v1104_v53 = vrot.slane %v1103_v37, 1  ;;  %v2096_v24 = vsel %vm667_vm2, %v1979_v26, 0.0 }
 0x215   : > { %v1771_v18 = vadd.f32 %v1770_v35, %v1769_v54  ;;  %v2162_v22 = vmul.f32 %v1979_v26, %v1979_v26  ;;  %v2200_v16 = vsel %vm667_vm2, %v2163_v47, 0.0  ;;  %v2164_v15 = vmul.f32 %v2948_v14, %v2948_v14 }
 0x216   : > { %v1992_v17 = vpop.f32.mrf.mxu0  ;;  %v3959_v23 = vpop.f32.mrf.mxu1  ;;  %v1870_v43 = vsel %vm667_vm2, %v1810_v60, 0.0  ;;  %v2097_v20 = vadd.f32 %v2096_v24, %v2095_v11  ;;  %v1874_v50 = vsel %vm667_vm2, %v1812_v58, 0.0  ;;  %v3967_v8 = vadd.f32 %v1002_v19, %v1001_v57 }
 0x217   : > { %v1773_v44 = vadd.f32 %v1772_v51, %v1771_v18  ;;  %v1871_v55 = vadd.f32 %v1870_v43, %v1869_v42  ;;  %v2198_v3 = vsel %vm667_vm2, %v2162_v22, 0.0  ;;  %v2528_v63 = vmul.f32 %v2977_v45, %v2977_v45 }
 0x218   : > { %v3965_v2 = vpop.f32.mrf.mxu0  ;;  %v2332_v1 = vpop.f32.mrf.mxu1  ;;  %v2099_v56 = vadd.f32 %v2098_v0, %v2097_v20  ;;  %v2199_v34 = vadd.f32 %v2198_v3, %v2197_v59  ;;  %v3969_v4 = vadd.f32 %v1104_v53, %v1103_v37  ;;  %v2100_v46 = vsel %vm667_vm2, %v2948_v14, 0.0 }
 0x219   : > { %v1774_v5 = vrot.slane %v1773_v44, 4  ;;  %v1873_v25 = vadd.f32 %v1872_v33, %v1871_v55  ;;  %v2202_v31 = vsel %vm667_vm2, %v2164_v15, 0.0  ;;  %v2167_v10 = vmul.f32 %v2951_v6, %v2951_v6 }
 0x21a   : > { %v1995_v9 = vpop.f32.mrf.mxu0  ;;  %v3972_v28 = vpop.f32.mrf.mxu1  ;;  %v2201_v52 = vadd.f32 %v2200_v16, %v2199_v34  ;;  %v2101_v29 = vadd.f32 %v2100_v46, %v2099_v56  ;;  %v2459_v36 = vsel %vm667_vm2, %v2977_v45, 0.0  ;;  %v2165_v40 = vmul.f32 %v1992_v17, %v1992_v17 }
 0x21b   : > { %v1775_v27 = vadd.f32 %v1774_v5, %v1773_v44  ;;  %v1875_v62 = vadd.f32 %v1874_v50, %v1873_v25  ;;  %v2561_v33 = vsel %vm667_vm2, %v2528_v63, 0.0  ;;  %v2106_v0 = vsel %vm667_vm2, %v2951_v6, 0.0 }
 0x21c   : > { %v3976_v21 = vpop.f32.mrf.mxu0  ;;  %v2345_v35 = vpop.f32.mrf.mxu1  ;;  %v2102_v61 = vsel %vm667_vm2, %v1992_v17, 0.0  ;;  %v2203_v14 = vadd.f32 %v2202_v31, %v2201_v52  ;;  %v2456_v12 = vsel %vm667_vm2, %v2329_v30, 0.0  ;;  %v2208_v13 = vsel %vm667_vm2, %v2167_v10, 0.0 }
 0x21d   : > { %v1776_v57 = vrot.slane %v1775_v27, 2  ;;  %v1876_v38 = vrot.slane %v1875_v62, 4  ;;  %v2103_v48 = vadd.f32 %v2102_v61, %v2101_v29  ;;  %v2526_v39 = vmul.f32 %v2329_v30, %v2329_v30 }
 0x21e   : > { %v2008_v37 = vpop.f32.mrf.mxu0  ;;  %v3982_v32 = vpop.f32.mrf.mxu1  ;;  %v2204_v26 = vsel %vm667_vm2, %v2165_v40, 0.0  ;;  %v2457_v45 = vsel %vm667_vm2, %v2332_v1, 0.0  ;;  %v2529_v41 = vmul.f32 %v3959_v23, %v3959_v23  ;;  %v2527_v54 = vmul.f32 %v2332_v1, %v2332_v1 }
 0x21f   : > { %v1777_v47 = vadd.f32 %v1776_v57, %v1775_v27  ;;  %v1877_v11 = vadd.f32 %v1876_v38, %v1875_v62  ;;  %v2458_v7 = vadd.f32 %v2457_v45, %v2456_v12  ;;  %v2205_v49 = vadd.f32 %v2204_v26, %v2203_v14 }
 0x220   : > { %v3989_v42 = vpop.f32.mrf.mxu0  ;;  %v2348_v58 = vpop.f32.mrf.mxu1  ;;  %v2104_v6 = vsel %vm667_vm2, %v1995_v9, 0.0  ;;  %v2166_v19 = vmul.f32 %v1995_v9, %v1995_v9  ;;  %v2558_v24 = vsel %vm667_vm2, %v2526_v39, 0.0  ;;  %v2168_v22 = vmul.f32 %v3965_v2, %v3965_v2 }
 0x221   : > { %v1778_v51 = vrot.slane %v1777_v47, 1  ;;  %v1878_v30 = vrot.slane %v1877_v11, 2  ;;  %v2460_v59 = vadd.f32 %v2459_v36, %v2458_v7  ;;  %v2105_v60 = vadd.f32 %v2104_v6, %v2103_v48 }
 0x222   : > { %v2011_v53 = vpop.f32.mrf.mxu0  ;;  %v3992_v18 = vpop.f32.mrf.mxu1  ;;  %v2559_v17 = vsel %vm667_vm2, %v2527_v54, 0.0  ;;  %v2206_v16 = vsel %vm667_vm2, %v2166_v19, 0.0  ;;  %v2461_v3 = vsel %vm667_vm2, %v3959_v23, 0.0  ;;  %v2563_v1 = vsel %vm667_vm2, %v2529_v41, 0.0 }
 0x223   : > { %v1779_v43 = vadd.f32 %v1778_v51, %v1777_v47  ;;  %v1879_v15 = vadd.f32 %v1878_v30, %v1877_v11  ;;  %v2560_v20 = vadd.f32 %v2559_v17, %v2558_v24  ;;  %v2107_v50 = vadd.f32 %v2106_v0, %v2105_v60 }
 0x224   : > { %v3999_v44 = vpop.f32.mrf.mxu0  ;;  %v4001_v55 = vpop.f32.mrf.mxu1  ;;  %v2108_v56 = vsel %vm667_vm2, %v3965_v2, 0.0  ;;  %v2207_v34 = vadd.f32 %v2206_v16, %v2205_v49  ;;  %v2462_v46 = vadd.f32 %v2461_v3, %v2460_v59  ;;  %v2210_v52 = vsel %vm667_vm2, %v2168_v22, 0.0 }
 0x225   : > { %v4009_v63 = vadd.f32 %v1779_v43, %v3967_v8  ;;  %v1880_v5 = vrot.slane %v1879_v15, 1  ;;  %v2562_v25 = vadd.f32 %v2561_v33, %v2560_v20  ;;  %v2532_v23 = vmul.f32 %v3972_v28, %v3972_v28 }
 0x226   : > { %v4011_v9 = vpop.f32.mrf.mxu0  ;;  %v4013_v31 = vpop.f32.mrf.mxu1  ;;  %v2209_v10 = vadd.f32 %v2208_v13, %v2207_v34  ;;  %v2530_v29 = vmul.f32 %v2345_v35, %v2345_v35  ;;  %v2463_v2 = vsel %vm667_vm2, %v2345_v35, 0.0  ;;  %v2109_v8 = vadd.f32 %v2108_v56, %v2107_v50 }
 0x227   : > { %v1881_v27 = vadd.f32 %v1880_v5, %v1879_v15  ;;  %v2564_v62 = vadd.f32 %v2563_v1, %v2562_v25  ;;  %v2464_v33 = vadd.f32 %v2463_v2, %v2462_v46  ;;  %v2110_v0 = vsel %vm667_vm2, %v2008_v37, 0.0 }
 0x228   : > { %v4019_v36 = vpop.f32.mrf.mxu0  ;;  %v4021_v40 = vpop.f32.mrf.mxu1  ;;  %v2169_v61 = vmul.f32 %v2008_v37, %v2008_v37  ;;  %v2211_v14 = vadd.f32 %v2210_v52, %v2209_v10  ;;  %v2565_v38 = vsel %vm667_vm2, %v2530_v29, 0.0  ;;  %v2111_v12 = vadd.f32 %v2110_v0, %v2109_v8 }
 0x229   : > { %v4025_v57 = vadd.f32 %v1881_v27, %v3969_v4  ;;  %v2467_v13 = vsel %vm667_vm2, %v3972_v28, 0.0  ;;  %v2171_v39 = vmul.f32 %v3976_v21, %v3976_v21  ;;  %v2566_v26 = vadd.f32 %v2565_v38, %v2564_v62 }
 0x22a   : > { %v4028_v48 = vpop.f32.mrf.mxu0  ;;  %v4030_v35 = vpop.f32.mrf.mxu1  ;;  %v2212_v37 = vsel %vm667_vm2, %v2169_v61, 0.0  ;;  %v2533_v4 = vmul.f32 %v3982_v32, %v3982_v32  ;;  %v2465_v45 = vsel %vm667_vm2, %v2348_v58, 0.0  ;;  %v2531_v47 = vmul.f32 %v2348_v58, %v2348_v58 }
 0x22b   : > { %v2112_v11 = vsel %vm667_vm2, %v2011_v53, 0.0  ;;  %v2569_v28 = vsel %vm667_vm2, %v2532_v23, 0.0  ;;  %v2213_v49 = vadd.f32 %v2212_v37, %v2211_v14  ;;  %v2466_v54 = vadd.f32 %v2465_v45, %v2464_v33 }
 0x22c   : > { %v4041_v41 = vpop.f32.mrf.mxu0  ;;  %v4043_v7 = vpop.f32.mrf.mxu1  ;;  %v2113_v6 = vadd.f32 %v2112_v11, %v2111_v12  ;;  %v2114_v19 = vsel %vm667_vm2, %v3976_v21, 0.0  ;;  %v2172_v51 = vmul.f32 %v3989_v42, %v3989_v42  ;;  %v2567_v30 = vsel %vm667_vm2, %v2531_v47, 0.0 }
 0x22d   : > { %v2170_v58 = vmul.f32 %v2011_v53, %v2011_v53  ;;  %v2216_v24 = vsel %vm667_vm2, %v2171_v39, 0.0  ;;  %v2468_v22 = vadd.f32 %v2467_v13, %v2466_v54  ;;  %v2568_v17 = vadd.f32 %v2567_v30, %v2566_v26 }
 0x22e   : > { %v4051_v59 = vpop.f32.mrf.mxu0  ;;  %v4053_v60 = vpop.f32.mrf.mxu1  ;;  %v2115_v16 = vadd.f32 %v2114_v19, %v2113_v6  ;;  %v2469_v43 = vsel %vm667_vm2, %v3982_v32, 0.0  ;;  %v2571_v21 = vsel %vm667_vm2, %v2533_v4, 0.0  ;;  %v2116_v15 = vsel %vm667_vm2, %v3989_v42, 0.0 }
 0x22f   : > { %v2214_v20 = vsel %vm667_vm2, %v2170_v58, 0.0  ;;  %v2570_v3 = vadd.f32 %v2569_v28, %v2568_v17  ;;  %v2470_v56 = vadd.f32 %v2469_v43, %v2468_v22  ;;  %v2534_v34 = vmul.f32 %v4001_v55, %v4001_v55 }
 0x230   : > { %v4062_v53 = vpop.f32.mrf.mxu0  ;;  %v4064_v50 = vpop.f32.mrf.mxu1  ;;  %v2215_v1 = vadd.f32 %v2214_v20, %v2213_v49  ;;  %v2218_v5 = vsel %vm667_vm2, %v2172_v51, 0.0  ;;  %v2471_v32 = vsel %vm667_vm2, %v4001_v55, 0.0  ;;  %v2117_v25 = vadd.f32 %v2116_v15, %v2115_v16 }
 0x231   : > { %v2173_v42 = vmul.f32 %v4011_v9, %v4011_v9  ;;  %v2472_v23 = vadd.f32 %v2471_v32, %v2470_v56  ;;  %v2572_v29 = vadd.f32 %v2571_v21, %v2570_v3  ;;  %v2118_v27 = vsel %vm667_vm2, %v4011_v9, 0.0 }
 0x232   : > { %v4073_v46 = vpop.f32.mrf.mxu0  ;;  %v4075_v52 = vpop.f32.mrf.mxu1  ;;  %v2217_v10 = vadd.f32 %v2216_v24, %v2215_v1  ;;  %v2475_v2 = vsel %vm667_vm2, %v3992_v18, 0.0  ;;  %v2536_v55 = vmul.f32 %v3992_v18, %v3992_v18  ;;  %v2573_v62 = vsel %vm667_vm2, %v2534_v34, 0.0 }
 0x233   : > { %v2119_v8 = vadd.f32 %v2118_v27, %v2117_v25  ;;  %v2175_v0 = vmul.f32 %v3999_v44, %v3999_v44  ;;  %v2574_v61 = vadd.f32 %v2573_v62, %v2572_v29  ;;  %v2220_v38 = vsel %vm667_vm2, %v2173_v42, 0.0 }
 0x234   : > { %v4084_v33 = vpop.f32.mrf.mxu1  ;;  %v2219_v14 = vadd.f32 %v2218_v5, %v2217_v10  ;;  %v4089_v12 = vpop.f32.mrf.mxu0  ;;  %v2537_v9 = vmul.f32 %v4013_v31, %v4013_v31  ;;  %v2473_v18 = vsel %vm667_vm2, %v4021_v40, 0.0  ;;  %v2535_v13 = vmul.f32 %v4021_v40, %v4021_v40 }
 0x235   : > { %v2120_v39 = vsel %vm667_vm2, %v4028_v48, 0.0  ;;  %v2122_v37 = vsel %vm667_vm2, %v3999_v44, 0.0  ;;  %v2474_v45 = vadd.f32 %v2473_v18, %v2472_v23  ;;  %v2577_v11 = vsel %vm667_vm2, %v2536_v55, 0.0 }
 0x236   : > { %v4099_v26 = vpop.f32.mrf.mxu1  ;;  %v2221_v4 = vadd.f32 %v2220_v38, %v2219_v14  ;;  %v2121_v47 = vadd.f32 %v2120_v39, %v2119_v8  ;;  %v2176_v28 = vmul.f32 %v4019_v36, %v4019_v36  ;;  %v2575_v49 = vsel %vm667_vm2, %v2535_v13, 0.0  ;;  %v4112_v30 = vpop.f32.mrf.mxu0 }
 0x237   : > { %v2174_v40 = vmul.f32 %v4028_v48, %v4028_v48  ;;  %v2224_v6 = vsel %vm667_vm2, %v2175_v0, 0.0  ;;  %v2476_v19 = vadd.f32 %v2475_v2, %v2474_v45  ;;  %v2576_v51 = vadd.f32 %v2575_v49, %v2574_v61 }
 0x238   : > { %v4109_v54 = vpop.f32.mrf.mxu1  ;;  %v2123_v44 = vadd.f32 %v2122_v37, %v2121_v47  ;;  %v2477_v58 = vsel %vm667_vm2, %v4013_v31, 0.0  ;;  %v2579_v24 = vsel %vm667_vm2, %v2537_v9, 0.0  ;;  %v2124_v22 = vsel %vm667_vm2, %v4019_v36, 0.0  ;;  %v4133_v25 = vpop.f32.mrf.mxu0 }
 0x239   : > { %v2222_v17 = vsel %vm667_vm2, %v2174_v40, 0.0  ;;  %v2578_v16 = vadd.f32 %v2577_v11, %v2576_v51  ;;  %v2478_v21 = vadd.f32 %v2477_v58, %v2476_v19  ;;  %v2538_v15 = vmul.f32 %v4043_v7, %v4043_v7 }
 0x23a   : > { %v4120_v48 = vpop.f32.mrf.mxu1  ;;  %v2223_v43 = vadd.f32 %v2222_v17, %v2221_v4  ;;  %v2226_v20 = vsel %vm667_vm2, %v2176_v28, 0.0  ;;  %v2479_v31 = vsel %vm667_vm2, %v4043_v7, 0.0  ;;  %v2125_v3 = vadd.f32 %v2124_v22, %v2123_v44  ;;  %v2059_v13 = vpop.f32.mrf.mxu0 }
 0x23b   : > { %v2177_v1 = vmul.f32 %v4051_v59, %v4051_v59  ;;  %v2480_v34 = vadd.f32 %v2479_v31, %v2478_v21  ;;  %v2580_v5 = vadd.f32 %v2579_v24, %v2578_v16  ;;  %v2126_v32 = vsel %vm667_vm2, %v4051_v59, 0.0 }
 0x23c   : > { %v4129_v36 = vpop.f32.mrf.mxu1  ;;  %v2225_v56 = vadd.f32 %v2224_v6, %v2223_v43  ;;  %v2483_v42 = vsel %vm667_vm2, %v4030_v35, 0.0  ;;  %v2540_v7 = vmul.f32 %v4030_v35, %v4030_v35  ;;  %v2581_v10 = vsel %vm667_vm2, %v2538_v15, 0.0  ;;  %v2971_v24 = vpop.f32.mrf.mxu0 }
 0x23d   : > { %v2127_v23 = vadd.f32 %v2126_v32, %v2125_v3  ;;  %v2179_v27 = vmul.f32 %v4041_v41, %v4041_v41  ;;  %v2582_v2 = vadd.f32 %v2581_v10, %v2580_v5  ;;  %v2228_v59 = vsel %vm667_vm2, %v2177_v1, 0.0 }
 0x23e   : > { %v4140_v29 = vpop.f32.mrf.mxu1  ;;  %v2227_v55 = vadd.f32 %v2226_v20, %v2225_v56  ;;  %v2541_v62 = vmul.f32 %v4053_v60, %v4053_v60  ;;  %v2481_v8 = vsel %vm667_vm2, %v4064_v50, 0.0  ;;  %v2539_v35 = vmul.f32 %v4064_v50, %v4064_v50 }
 0x23f   : > { %v2128_v0 = vsel %vm667_vm2, %v4073_v46, 0.0  ;;  %v2130_v14 = vsel %vm667_vm2, %v4041_v41, 0.0  ;;  %v2482_v9 = vadd.f32 %v2481_v8, %v2480_v34  ;;  %v2585_v39 = vsel %vm667_vm2, %v2540_v7, 0.0 }
 0x240   : > { %v4153_v61 = vpop.f32.mrf.mxu1  ;;  %v2229_v38 = vadd.f32 %v2228_v59, %v2227_v55  ;;  %v2129_v18 = vadd.f32 %v2128_v0, %v2127_v23  ;;  %v2180_v37 = vmul.f32 %v4062_v53, %v4062_v53  ;;  %v2583_v4 = vsel %vm667_vm2, %v2539_v35, 0.0 }
 0x241   : > { %v2178_v50 = vmul.f32 %v4073_v46, %v4073_v46  ;;  %v2232_v47 = vsel %vm667_vm2, %v2179_v27, 0.0  ;;  %v2484_v11 = vadd.f32 %v2483_v42, %v2482_v9  ;;  %v2584_v41 = vadd.f32 %v2583_v4, %v2582_v2  ;;  %v2072_v42 = vpop.f32.mrf.mxu0 }
 0x242   : > { %v4163_v45 = vpop.f32.mrf.mxu1  ;;  %v2131_v28 = vadd.f32 %v2130_v14, %v2129_v18  ;;  %v2485_v49 = vsel %vm667_vm2, %v4053_v60, 0.0  ;;  %v2587_v40 = vsel %vm667_vm2, %v2541_v62, 0.0  ;;  %v2132_v6 = vsel %vm667_vm2, %v4062_v53, 0.0 }
 0x243   : > { %v2230_v19 = vsel %vm667_vm2, %v2178_v50, 0.0  ;;  %v2586_v51 = vadd.f32 %v2585_v39, %v2584_v41  ;;  %v2486_v46 = vadd.f32 %v2485_v49, %v2484_v11  ;;  %v2542_v58 = vmul.f32 %v4084_v33, %v4084_v33  ;;  %v2972_v18 = vpop.f32.mrf.mxu0 }
 0x244   : > { %v2231_v44 = vadd.f32 %v2230_v19, %v2229_v38  ;;  %v4174_v22 = vpop.f32.mrf.mxu1  ;;  %v2234_v17 = vsel %vm667_vm2, %v2180_v37, 0.0  ;;  %v2487_v60 = vsel %vm667_vm2, %v4084_v33, 0.0  ;;  %v2133_v16 = vadd.f32 %v2132_v6, %v2131_v28 }
 0x245   : > { %v2181_v53 = vmul.f32 %v4112_v30, %v4112_v30  ;;  %v2488_v21 = vadd.f32 %v2487_v60, %v2486_v46  ;;  %v2588_v15 = vadd.f32 %v2587_v40, %v2586_v51  ;;  %v2134_v20 = vsel %vm667_vm2, %v4112_v30, 0.0 }
 0x246   : > { %v2233_v43 = vadd.f32 %v2232_v47, %v2231_v44  ;;  %v2544_v31 = vmul.f32 %v4075_v52, %v4075_v52  ;;  %v2183_v3 = vmul.f32 %v4089_v12, %v4089_v12  ;;  %v2589_v1 = vsel %vm667_vm2, %v2542_v58, 0.0  ;;  %v4191_v7 = vpop.f32.mrf.mxu1  ;;  %v2075_v44 = vpop.f32.mrf.mxu0 }
 0x247   : > { %v2135_v56 = vadd.f32 %v2134_v20, %v2133_v16  ;;  %v2491_v33 = vsel %vm667_vm2, %v4075_v52, 0.0  ;;  %v2590_v34 = vadd.f32 %v2589_v1, %v2588_v15  ;;  %v2236_v32 = vsel %vm667_vm2, %v2181_v53, 0.0 }
 0x248   : > { %v2235_v5 = vadd.f32 %v2234_v17, %v2233_v43  ;;  %v2545_v30 = vmul.f32 %v4099_v26, %v4099_v26  ;;  %v2489_v10 = vsel %vm667_vm2, %v4109_v54, 0.0  ;;  %v2543_v23 = vmul.f32 %v4109_v54, %v4109_v54  ;;  %v2428_v39 = vpop.f32.mrf.mxu1 }
 0x249   : > { %v2136_v27 = vsel %vm667_vm2, %v2059_v13, 0.0  ;;  %v2138_v52 = vsel %vm667_vm2, %v4089_v12, 0.0  ;;  %v2490_v55 = vadd.f32 %v2489_v10, %v2488_v21  ;;  %v2593_v62 = vsel %vm667_vm2, %v2544_v31, 0.0 }
 0x24a   : > { %v2237_v2 = vadd.f32 %v2236_v32, %v2235_v5  ;;  %v2137_v59 = vadd.f32 %v2136_v27, %v2135_v56  ;;  %v2240_v8 = vsel %vm667_vm2, %v2183_v3, 0.0  ;;  %v2591_v35 = vsel %vm667_vm2, %v2543_v23, 0.0  ;;  %v4220_v46 = vpop.f32.mrf.mxu1 }
 0x24b   : > { %v2182_v0 = vmul.f32 %v2059_v13, %v2059_v13  ;;  %v2493_v14 = vsel %vm667_vm2, %v4099_v26, 0.0  ;;  %v2492_v38 = vadd.f32 %v2491_v33, %v2490_v55  ;;  %v2592_v54 = vadd.f32 %v2591_v35, %v2590_v34 }
 0x24c   : > { %v2139_v9 = vadd.f32 %v2138_v52, %v2137_v59  ;;  %v2595_v12 = vsel %vm667_vm2, %v2545_v30, 0.0  ;;  %v2140_v37 = vsel %vm667_vm2, %v4133_v25, 0.0  ;;  %v2184_v4 = vmul.f32 %v4133_v25, %v4133_v25 }
 0x24d   : > { %v2238_v50 = vsel %vm667_vm2, %v2182_v0, 0.0  ;;  %v2594_v47 = vadd.f32 %v2593_v62, %v2592_v54  ;;  %v2494_v11 = vadd.f32 %v2493_v14, %v2492_v38  ;;  %v2546_v26 = vmul.f32 %v4129_v36, %v4129_v36 }
 0x24e   : > { %v2239_v13 = vadd.f32 %v2238_v50, %v2237_v2  ;;  %v2548_v41 = vmul.f32 %v4120_v48, %v4120_v48  ;;  %v2495_v28 = vsel %vm667_vm2, %v4129_v36, 0.0  ;;  %v2141_v49 = vadd.f32 %v2140_v37, %v2139_v9 }
 0x24f   : > { %v2185_v40 = vmul.f32 %v2072_v42, %v2072_v42  ;;  %v2496_v19 = vadd.f32 %v2495_v28, %v2494_v11  ;;  %v2596_v51 = vadd.f32 %v2595_v12, %v2594_v47  ;;  %v2142_v25 = vsel %vm667_vm2, %v2072_v42, 0.0 }
 0x250   : > { %v2241_v6 = vadd.f32 %v2240_v8, %v2239_v13  ;;  %v2242_v58 = vsel %vm667_vm2, %v2184_v4, 0.0  ;;  %v2187_v17 = vmul.f32 %v2971_v24, %v2971_v24  ;;  %v2597_v60 = vsel %vm667_vm2, %v2546_v26, 0.0 }
 0x251   : > { %v2143_v16 = vadd.f32 %v2142_v25, %v2141_v49  ;;  %v2499_v53 = vsel %vm667_vm2, %v4120_v48, 0.0  ;;  %v2146_v36 = vsel %vm667_vm2, %v2971_v24, 0.0  ;;  %v2598_v43 = vadd.f32 %v2597_v60, %v2596_v51  ;;  %v2441_v48 = vpop.f32.mrf.mxu1 }
 0x252   : > { %v2243_v21 = vadd.f32 %v2242_v58, %v2241_v6  ;;  %v2244_v15 = vsel %vm667_vm2, %v2185_v40, 0.0  ;;  %v2497_v20 = vsel %vm667_vm2, %v4153_v61, 0.0  ;;  %v2547_v31 = vmul.f32 %v4153_v61, %v4153_v61 }
 0x253   : > { %v2144_v3 = vsel %vm667_vm2, %v2075_v44, 0.0  ;;  %v2601_v1 = vsel %vm667_vm2, %v2548_v41, 0.0  ;;  %v2498_v33 = vadd.f32 %v2497_v20, %v2496_v19  ;;  %v2248_v24 = vsel %vm667_vm2, %v2187_v17, 0.0  ;;  %v3006_v0 = vpop.f32.mrf.mxu1 }
 0x254   : > { %v2245_v56 = vadd.f32 %v2244_v15, %v2243_v21  ;;  %v2145_v34 = vadd.f32 %v2144_v3, %v2143_v16  ;;  %v2549_v5 = vmul.f32 %v4140_v29, %v4140_v29  ;;  %v2599_v32 = vsel %vm667_vm2, %v2547_v31, 0.0 }
 0x255   : > { %v2186_v42 = vmul.f32 %v2075_v44, %v2075_v44  ;;  %v2501_v30 = vsel %vm667_vm2, %v4140_v29, 0.0  ;;  %v2500_v61 = vadd.f32 %v2499_v53, %v2498_v33  ;;  %v2600_v10 = vadd.f32 %v2599_v32, %v2598_v43 }
 0x256   : > { %v2147_v23 = vadd.f32 %v2146_v36, %v2145_v34  ;;  %v2148_v27 = vsel %vm667_vm2, %v2972_v18, 0.0  ;;  %v2188_v52 = vmul.f32 %v2972_v18, %v2972_v18  ;;  %v2550_v55 = vmul.f32 %v4174_v22, %v4174_v22 }
 0x257   : > { %v2246_v2 = vsel %vm667_vm2, %v2186_v42, 0.0  ;;  %v2602_v59 = vadd.f32 %v2601_v1, %v2600_v10  ;;  %v2502_v35 = vadd.f32 %v2501_v30, %v2500_v61  ;;  %v2603_v14 = vsel %vm667_vm2, %v2549_v5, 0.0 }
 0x258   : > { %v2149_v62 = vadd.f32 %v2148_v27, %v2147_v23  ;;  %v2247_v8 = vadd.f32 %v2246_v2, %v2245_v56  ;;  %v2503_v29 = vsel %vm667_vm2, %v4174_v22, 0.0  ;;  %v2505_v38 = vsel %vm667_vm2, %v2428_v39, 0.0  ;;  %v2444_v22 = vpop.f32.mrf.mxu1 }
 0x259   : > { %v2551_v54 = vmul.f32 %v2428_v39, %v2428_v39  ;;  %v2504_v18 = vadd.f32 %v2503_v29, %v2502_v35  ;;  %v2604_v12 = vadd.f32 %v2603_v14, %v2602_v59  ;;  %v2250_v37 = vsel %vm667_vm2, %v2188_v52, 0.0 }
 0x25a   : > { %v2249_v9 = vadd.f32 %v2248_v24, %v2247_v8  ;;  %v2552_v4 = vmul.f32 %v4163_v45, %v4163_v45  ;;  %v2605_v50 = vsel %vm667_vm2, %v2550_v55, 0.0  ;;  %v2150_v13 = vrot.slane %v2149_v62, 4 }
 0x25b   : > { %v2607_v47 = vsel %vm667_vm2, %v2551_v54, 0.0  ;;  %v2606_v26 = vadd.f32 %v2605_v50, %v2604_v12  ;;  %v2506_v41 = vadd.f32 %v2505_v38, %v2504_v18  ;;  %v2507_v39 = vsel %vm667_vm2, %v4163_v45, 0.0 }
 0x25c   : > { %v2251_v11 = vadd.f32 %v2250_v37, %v2249_v9  ;;  %v2553_v28 = vmul.f32 %v4191_v7, %v4191_v7  ;;  %v2609_v19 = vsel %vm667_vm2, %v2552_v4, 0.0  ;;  %v2509_v51 = vsel %vm667_vm2, %v4191_v7, 0.0 }
 0x25d   : > { %v2508_v40 = vadd.f32 %v2507_v39, %v2506_v41  ;;  %v2608_v6 = vadd.f32 %v2607_v47, %v2606_v26  ;;  %v2554_v25 = vmul.f32 %v2441_v48, %v2441_v48  ;;  %v2555_v44 = vmul.f32 %v2444_v22, %v2444_v22 }
 0x25e   : > { %v2252_v49 = vrot.slane %v2251_v11, 4  ;;  %v2151_v58 = vadd.f32 %v2150_v13, %v2149_v62  ;;  %v2611_v16 = vsel %vm667_vm2, %v2553_v28, 0.0  ;;  %v2511_v45 = vsel %vm667_vm2, %v2441_v48, 0.0 }
 0x25f   : > { %v2610_v17 = vadd.f32 %v2609_v19, %v2608_v6  ;;  %v2510_v60 = vadd.f32 %v2509_v51, %v2508_v40  ;;  %v2513_v53 = vsel %vm667_vm2, %v2444_v22, 0.0  ;;  %v2556_v15 = vmul.f32 %v4220_v46, %v4220_v46 }
 0x260   : > { %v2253_v36 = vadd.f32 %v2252_v49, %v2251_v11  ;;  %v2613_v20 = vsel %vm667_vm2, %v2554_v25, 0.0  ;;  %v2615_v7 = vsel %vm667_vm2, %v2555_v44, 0.0  ;;  %v2152_v31 = vrot.slane %v2151_v58, 2 }
 0x261   : > { %v2512_v43 = vadd.f32 %v2511_v45, %v2510_v60  ;;  %v2612_v21 = vadd.f32 %v2611_v16, %v2610_v17  ;;  %v2515_v56 = vsel %vm667_vm2, %v4220_v46, 0.0  ;;  %v2557_v33 = vmul.f32 %v3006_v0, %v3006_v0 }
 0x262   : > { %v2254_v34 = vrot.slane %v2253_v36, 2  ;;  %v2617_v5 = vsel %vm667_vm2, %v2556_v15, 0.0  ;;  %v2517_v32 = vsel %vm667_vm2, %v3006_v0, 0.0  ;;  %v2153_v42 = vadd.f32 %v2152_v31, %v2151_v58 }
 0x263   : > { %v2614_v3 = vadd.f32 %v2613_v20, %v2612_v21  ;;  %v2514_v1 = vadd.f32 %v2513_v53, %v2512_v43  ;;  %v2619_v10 = vsel %vm667_vm2, %v2557_v33, 0.0 }
 0x264   : > { %v2255_v23 = vadd.f32 %v2254_v34, %v2253_v36  ;;  %v2154_v2 = vrot.slane %v2153_v42, 1 }
 0x265   : > { %v2516_v48 = vadd.f32 %v2515_v56, %v2514_v1  ;;  %v2616_v24 = vadd.f32 %v2615_v7, %v2614_v3 }
 0x266   : > { %v2256_v59 = vrot.slane %v2255_v23, 1  ;;  %v2155_v35 = vadd.f32 %v2154_v2, %v2153_v42 }
 0x267   : > { %v2518_v30 = vadd.f32 %v2517_v32, %v2516_v48  ;;  %v2618_v61 = vadd.f32 %v2617_v5, %v2616_v24 }
 0x268   : > { %v2257_v38 = vadd.f32 %v2256_v59, %v2255_v23  ;;  %v2156_v9 = vadd.f32 %v2155_v35, %v4009_v63 }
 0x269   : > { %v2519_v27 = vrot.slane %v2518_v30, 4  ;;  %v2620_v52 = vadd.f32 %v2619_v10, %v2618_v61 }
 0x26a   : > { %v2258_v37 = vadd.f32 %v2257_v38, %v4025_v57 }
 0x26b   : > { %v2520_v55 = vadd.f32 %v2519_v27, %v2518_v30  ;;  %v2621_v46 = vrot.slane %v2620_v52, 4 }
 0x26d   : > { %v2521_v62 = vrot.slane %v2520_v55, 2  ;;  %v2622_v8 = vadd.f32 %v2621_v46, %v2620_v52 }
 0x26f   : > { %v2522_v14 = vadd.f32 %v2521_v62, %v2520_v55  ;;  %v2623_v29 = vrot.slane %v2622_v8, 2 }
 0x271   : > { %v2523_v0 = vrot.slane %v2522_v14, 1  ;;  %v2624_v54 = vadd.f32 %v2623_v29, %v2622_v8 }
 0x273   : > { %v2524_v18 = vadd.f32 %v2523_v0, %v2522_v14  ;;  %v2625_v12 = vrot.slane %v2624_v54, 1 }
 0x275   : > { %v2525_v4 = vadd.f32 %v2524_v18, %v2156_v9  ;;  %v2626_v50 = vadd.f32 %v2625_v12, %v2624_v54 }
 0x277   : > { %v2627_v47 = vadd.f32 %v2626_v50, %v2258_v37  ;;  %2629 = vst.msk [vmem:[%s141_s29] sm:$0x1] %vm2628_vm5, %v2525_v4 }
 0x279   : > { %2630 = vst.msk [vmem:[%s141_s29 + $0x1] sm:$0x1] %vm2628_vm5, %v2627_v47 }
 0x27a PF: > { %s12_s9 = sadd.s32 1, %s3065_s9  }
 0x27b   : > { %p9_p4 = scmp.ge.s32.totalorder %s12_s9, 4  }
 0x27d   :  { %11 = sbr.rel (!%p9_p4) target bundleno = 1 (0x1), region = 61 }

// kernel: decoder_layer_2d.3
= control target key start
LH: loop header
LB: loop body
LE: loop exit
PB: predicated region body
PF: predicated region fallthrough
CT: control target
= control target key end

     0   :  { %s6075_s12 = smov 0   ;;  %s6077_s13 = smov 0   ;;  %s8885_s0 = inlined_call_operand.vmem [shape: bf16[2,18,18,4], index: 0, kind: input, shape index: {}]   ;;  %s8886_s1 = inlined_call_operand.vmem [shape: bf16[4,16,8], index: 1, kind: input, shape index: {}]   ;;  %s8887_s2 = inlined_call_operand.vmem [shape: f32[2,8], index: 2, kind: input, shape index: {}]   ;;  %s8888_s3 = inlined_call_operand.vmem [shape: f32[4,2,256,8], index: 3, kind: output, shape index: {}]  }
   0x1   :  { %s6079_s14 = smov 0  }
   0x2 LB: > { %s6088_s15 = sadd.s32 4294967295, %s6050_s14   ;;  %s6090_s16 = sadd.s32 1, %s6050_s14   ;;  %s6050_s14 = sphi %s6079_s14, %s8985_s14   ;;  %s6046_s13 = sphi %s6077_s13, %s8984_s13   ;;  %s6042_s12 = sphi %s6075_s12, %s8983_s12  }
   0x3   : > { %s85_s17 = ssub.s32 %s6050_s14, %s6090_s16  ;;  %s88_s18 = sadd.s32 1, %s6046_s13 }
   0x4   : > { %p86_p0 = scmp.eq.s32.totalorder %s85_s17, 0  ;;  %p98_p1 = scmp.ne.s32.totalorder %s6046_s13, %s6042_s12 }
   0x5   : > { %p99_p2 = scmp.eq.s32.totalorder %s6088_s15, 1  ;;  %p5244_p3 = scmp.ge.s32.totalorder %s6050_s14, 1 }
   0x6   : > { %s6098_s19 = scalar_select %p86_p0, %s6046_s13, %s88_s18  }
   0x7   : > { %p6100_p4 = por %p99_p2, %p98_p1  ;;  %p137_p5 = scmp.lt.s32.totalorder %s6050_s14, 3 }
   0x9   : > { %p138_p6 = pnand %p5244_p3, %p137_p5 }
   0xb   : > { %141 = sbr.rel (%p138_p6) target bundleno = 950 (0x3b6), region = 32 }
  0x10   : > { %p160_p7 = scmp.lt.s32.totalorder %s6088_s15, 1  ;;  %vm347_vm0 = vsmask.f32 7424  ;;  %s6052_s26 = smov 4   ;;  %vm656_vm1 = vcmask 31744   ;;  %vm689_vm2 = vcmask 64512  }
  0x11   : > { %s6053_s27 = smov 8   ;;  %s6054_s28 = smov 12   ;;  %vm722_vm3 = vcmask 97280   ;;  %vm763_vm4 = vcmask 130048  }
  0x12   : > { %s161_s21 = scalar_select %p160_p7, %s6088_s15, 1 }
  0x13   : > { %s157_s10 = sand.u32 1, %s6042_s12  }
  0x14   : > { %s5765_s22 = smul.u32 216, %s161_s21  ;;  %s7378_s18 = sshll.u32 %s157_s10, 10 }
  0x15   : > { %s7420_s21 = scalar_lea.vmem [#allocation2], %s7378_s18 }
  0x16   : > { %s6109_s25 = scalar_lea.vmem %s8885_s0, %s5765_s22 }
  0x17   : > { %v6112_v0 = vld [vmem:[%s6109_s25 + $0x18] sm:$0xff]   ;;  %v5794_v1 = vld [vmem:[%s6109_s25 + $0x20] ss:$0 sps:$4 sm:$0x11]   ;;  %v6120_v12 = vld [vmem:[%s6109_s25 + $0x24] sm:$0xff]  }
  0x18   : > { %v5795_v2 = vld [vmem:[%s6109_s25] sm:$0xff]   ;;  %v373_v3 = vshrl.u32 %v6112_v0, 16  ;;  %v375_v4 = vshll.u32 %v6112_v0, 16  ;;  %v380_v5 = vshll.u32 %v5794_v1, 16  ;;  %v385_v17 = vshrl.u32 %v6120_v12, 16  ;;  %v6126_v19 = vld [vmem:[%s6109_s25 + $0xc] sm:$0xff]  }
  0x19   : > { %v5796_v6 = vld [vmem:[%s6109_s25 + $0x8] ss:$0 sps:$4 sm:$0x11]   ;;  %v349_v7 = vshrl.u32 %v5795_v2, 16  ;;  %v351_v8 = vshll.u32 %v5795_v2, 16  ;;  %v387_v18 = vshll.u32 %v6120_v12, 16 }
  0x1a   : > { %v377_v9 = vrot.slane %v375_v4, 1  ;;  %v382_v10 = vrot.slane %v380_v5, 1  ;;  %v356_v11 = vshll.u32 %v5796_v6, 16  ;;  %v5798_v14 = vld [vmem:[%s6109_s25 + $0x2c] ss:$0 sps:$4 sm:$0x11]  }
  0x1b   : > { %v353_v13 = vrot.slane %v351_v8, 1  ;;  %v392_v21 = vshll.u32 %v5798_v14, 16  ;;  %v5800_v22 = vld [vmem:[%s6109_s25 + $0x14] ss:$0 sps:$4 sm:$0x11]   ;;  %v389_v24 = vrot.slane %v387_v18, 1 }
  0x1c   : > { %v378_v15 = vor.u32 %v377_v9, %v373_v3  ;;  %v358_v16 = vrot.slane %v356_v11, 1  ;;  %v361_v25 = vshrl.u32 %v6126_v19, 16  ;;  %v363_v26 = vshll.u32 %v6126_v19, 16  ;;  %v6135_v27 = vld [vmem:[%s6109_s25 + $0x3c] sm:$0xff]   ;;  %v6145_v37 = vld [vmem:[%s6109_s25 + $0x30] sm:$0xff]   ;;  %v6162_v49 = vld [vmem:[%s6109_s25 + $0x48] sm:$0xff]  }
  0x1d   : > { %v354_v20 = vor.u32 %v353_v13, %v349_v7  ;;  %v394_v29 = vrot.slane %v392_v21, 1  ;;  %v368_v30 = vshll.u32 %v5800_v22, 16  ;;  %v390_v31 = vor.u32 %v389_v24, %v385_v17  ;;  %v5802_v33 = vld [vmem:[%s6109_s25 + $0x44] ss:$0 sps:$4 sm:$0x11]   ;;  %v6156_v45 = vld [vmem:[%s6109_s25 + $0x54] sm:$0xff]  }
  0x1e   : > { %v6130_v23 = vsel %vm347_vm0, %v378_v15, %v382_v10  ;;  %v365_v32 = vrot.slane %v363_v26, 1  ;;  %v409_v34 = vshrl.u32 %v6135_v27, 16  ;;  %v411_v35 = vshll.u32 %v6135_v27, 16  ;;  %v5804_v42 = vld [vmem:[%s6109_s25 + $0x38] ss:$0 sps:$4 sm:$0x11]  }
  0x1f   : > { %544 = vrot.lane.b32.xlu1 %v6130_v23, %s6052_s26  ;;  %v359_v28 = vsel %vm347_vm0, %v354_v20, %v358_v16  ;;  %v370_v36 = vrot.slane %v368_v30, 1  ;;  %v6148_v38 = vsel %vm347_vm0, %v390_v31, %v394_v29  ;;  %v416_v41 = vshll.u32 %v5802_v33, 16  ;;  %v5806_v52 = vld [vmem:[%s6109_s25 + $0x5c] ss:$0 sps:$4 sm:$0x11]   ;;  %v6177_v61 = vld [vmem:[%s6109_s25 + $0x6c] sm:$0xff]  }
  0x20   : > { %540 = vrot.lane.b32.xlu0 %v359_v28, %s6052_s26  ;;  %v366_v39 = vor.u32 %v365_v32, %v361_v25  ;;  %v413_v40 = vrot.slane %v411_v35, 1  ;;  %v397_v43 = vshrl.u32 %v6145_v37, 16  ;;  %v399_v44 = vshll.u32 %v6145_v37, 16  ;;  %v5808_v63 = vld [vmem:[%s6109_s25 + $0x50] ss:$0 sps:$4 sm:$0x11]  }
  0x21   : > { %v418_v48 = vrot.slane %v416_v41, 1  ;;  %v404_v51 = vshll.u32 %v5804_v42, 16  ;;  %v433_v53 = vshrl.u32 %v6156_v45, 16  ;;  %v435_v55 = vshll.u32 %v6156_v45, 16  ;;  %v6192_v15 = vld [vmem:[%s6109_s25 + $0x60] sm:$0xff]   ;;  %v6214_v31 = vld [vmem:[%s6109_s25 + $0x78] sm:$0xff]  }
  0x22   : > { %v6159_v46 = vsel %vm347_vm0, %v366_v39, %v370_v36  ;;  %v414_v47 = vor.u32 %v413_v40, %v409_v34  ;;  %v401_v50 = vrot.slane %v399_v44, 1  ;;  %v421_v56 = vshrl.u32 %v6162_v49, 16  ;;  %v5810_v6 = vld [vmem:[%s6109_s25 + $0x74] ss:$0 sps:$4 sm:$0x11]   ;;  %v6198_v17 = vld [vmem:[%s6109_s25 + $0x84] sm:$0xff]  }
  0x23   : > { %546 = vrot.lane.b32.xlu1 %v6148_v38, %s6052_s26  ;;  %v406_v58 = vrot.slane %v404_v51, 1  ;;  %v440_v59 = vshll.u32 %v5806_v52, 16  ;;  %v423_v60 = vshll.u32 %v6162_v49, 16  ;;  %v437_v62 = vrot.slane %v435_v55, 1  ;;  %v6222_v41 = vld [vmem:[%s6109_s25 + $0x9c] sm:$0xff]  }
  0x24   : > { %542 = vrot.lane.b32.xlu0 %v6159_v46, %s6052_s26  ;;  %v6169_v54 = vsel %vm347_vm0, %v414_v47, %v418_v48  ;;  %v402_v57 = vor.u32 %v401_v50, %v397_v43  ;;  %v428_v5 = vshll.u32 %v5808_v63, 16  ;;  %v457_v7 = vshrl.u32 %v6177_v61, 16  ;;  %v5812_v16 = vld [vmem:[%s6109_s25 + $0x68] ss:$0 sps:$4 sm:$0x11]  }
  0x25   : > { %v442_v2 = vrot.slane %v440_v59, 1  ;;  %v425_v3 = vrot.slane %v423_v60, 1  ;;  %v438_v4 = vor.u32 %v437_v62, %v433_v53  ;;  %v459_v8 = vshll.u32 %v6177_v61, 16  ;;  %v5814_v26 = vld [vmem:[%s6109_s25 + $0x8c] ss:$0 sps:$4 sm:$0x11]  }
  0x26   : > { %v6181_v1 = vsel %vm347_vm0, %v402_v57, %v406_v58  ;;  %v430_v11 = vrot.slane %v428_v5, 1  ;;  %v464_v14 = vshll.u32 %v5810_v6, 16  ;;  %v445_v22 = vshrl.u32 %v6192_v15, 16  ;;  %v5816_v35 = vld [vmem:[%s6109_s25 + $0x80] ss:$0 sps:$4 sm:$0x11]  }
  0x27   : > { %550 = vrot.lane.b32.xlu1 %v6169_v54, %s6052_s26  ;;  %v426_v9 = vor.u32 %v425_v3, %v421_v56  ;;  %v6189_v10 = vsel %vm347_vm0, %v438_v4, %v442_v2  ;;  %v461_v13 = vrot.slane %v459_v8, 1  ;;  %v447_v24 = vshll.u32 %v6192_v15, 16  ;;  %v5818_v50 = vld [vmem:[%s6109_s25 + $0xa4] ss:$0 sps:$4 sm:$0x11]   ;;  %v5819_v56 = vld [vmem:[%s6109_s25 + $0x90] sm:$0xff]  }
  0x28   : > { %548 = vrot.lane.b32.xlu0 %v6181_v1, %s6052_s26  ;;  %v466_v21 = vrot.slane %v464_v14, 1  ;;  %v452_v25 = vshll.u32 %v5812_v16, 16  ;;  %v481_v28 = vshrl.u32 %v6198_v17, 16  ;;  %v483_v30 = vshll.u32 %v6198_v17, 16  ;;  %v5821_v3 = vld [vmem:[%s6109_s25 + $0xb4] sm:$0xff]  }
  0x29   : > { %v6201_v18 = vsel %vm347_vm0, %v426_v9, %v430_v11  ;;  %v462_v20 = vor.u32 %v461_v13, %v457_v7  ;;  %v449_v32 = vrot.slane %v447_v24, 1  ;;  %v488_v34 = vshll.u32 %v5814_v26, 16  ;;  %v5820_v62 = vld [vmem:[%s6109_s25 + $0x98] ss:$0 sps:$4 sm:$0x11]   ;;  %v5823_v7 = vld [vmem:[%s6109_s25 + $0xa8] sm:$0xff]  }
  0x2a   : > { %v454_v33 = vrot.slane %v452_v25, 1  ;;  %v485_v36 = vrot.slane %v483_v30, 1  ;;  %v469_v39 = vshrl.u32 %v6214_v31, 16  ;;  %v471_v40 = vshll.u32 %v6214_v31, 16 }
  0x2b   : > { %554 = vrot.lane.b32.xlu1 %v6189_v10, %s6052_s26  ;;  %v6210_v29 = vsel %vm347_vm0, %v462_v20, %v466_v21  ;;  %v450_v42 = vor.u32 %v449_v32, %v445_v22  ;;  %v490_v43 = vrot.slane %v488_v34, 1  ;;  %v476_v44 = vshll.u32 %v5816_v35, 16  ;;  %v5822_v11 = vld [vmem:[%s6109_s25 + $0xbc] ss:$0 sps:$4 sm:$0x11]  }
  0x2c   : > { %552 = vrot.lane.b32.xlu0 %v6201_v18, %s6052_s26  ;;  %v486_v47 = vor.u32 %v485_v36, %v481_v28  ;;  %v473_v48 = vrot.slane %v471_v40, 1  ;;  %v505_v51 = vshrl.u32 %v6222_v41, 16  ;;  %v507_v52 = vshll.u32 %v6222_v41, 16  ;;  %v5824_v28 = vld [vmem:[%s6109_s25 + $0xb0] ss:$0 sps:$4 sm:$0x11]  }
  0x2d   : > { %v6228_v53 = vsel %vm347_vm0, %v450_v42, %v454_v33  ;;  %v478_v55 = vrot.slane %v476_v44, 1  ;;  %v512_v60 = vshll.u32 %v5818_v50, 16  ;;  %v493_v63 = vshrl.u32 %v5819_v56, 16  ;;  %v6323_v44 = vld [vmem:[%s6109_s25 + $0x2c] ss:$0 sps:$4 sm:$0x11]  }
  0x2e   : > { %v6234_v57 = vsel %vm347_vm0, %v486_v47, %v490_v43  ;;  %v474_v58 = vor.u32 %v473_v48, %v469_v39  ;;  %v509_v59 = vrot.slane %v507_v52, 1  ;;  %v495_v2 = vshll.u32 %v5819_v56, 16  ;;  %v6326_v47 = vld [vmem:[%s6109_s25 + $0x24] sm:$0xff]  }
  0x2f   : > { %558 = vrot.lane.b32.xlu1 %v6210_v29, %s6052_s26  ;;  %v514_v6 = vrot.slane %v512_v60, 1  ;;  %v500_v9 = vshll.u32 %v5820_v62, 16  ;;  %v529_v13 = vshrl.u32 %v5821_v3, 16  ;;  %v531_v16 = vshll.u32 %v5821_v3, 16 }
  0x30   : > { %556 = vrot.lane.b32.xlu0 %v6228_v53, %s6052_s26  ;;  %v6241_v4 = vsel %vm347_vm0, %v474_v58, %v478_v55  ;;  %v510_v5 = vor.u32 %v509_v59, %v505_v51  ;;  %v497_v8 = vrot.slane %v495_v2, 1  ;;  %v517_v20 = vshrl.u32 %v5823_v7, 16 }
  0x31   : > { %v502_v22 = vrot.slane %v500_v9, 1  ;;  %v536_v24 = vshll.u32 %v5822_v11, 16  ;;  %v519_v25 = vshll.u32 %v5823_v7, 16  ;;  %v533_v26 = vrot.slane %v531_v16, 1 }
  0x32   : > { %v6248_v14 = vsel %vm347_vm0, %v510_v5, %v514_v6  ;;  %v498_v21 = vor.u32 %v497_v8, %v493_v63  ;;  %v524_v35 = vshll.u32 %v5824_v28, 16  ;;  %v5859_v5 = vld [vmem:[%s8886_s1] sm:$0xff]   ;;  %v6349_v6 = vld [vmem:[%s6109_s25 + $0x38] ss:$0 sps:$4 sm:$0x11]  }
  0x33   : > { %562 = vrot.lane.b32.xlu1 %v6234_v57, %s6052_s26  ;;  %v538_v32 = vrot.slane %v536_v24, 1  ;;  %v521_v33 = vrot.slane %v519_v25, 1  ;;  %v534_v34 = vor.u32 %v533_v26, %v529_v13  ;;  %v6355_v13 = vld [vmem:[%s6109_s25 + $0x3c] sm:$0xff]   ;;  %5629 = vmatprep.subr.bf16.mxu0 %v5859_v5  ;;  %v8894_v25 = vshrl.u32 %v6323_v44, 16 }
  0x34   : > { %560 = vrot.lane.b32.xlu0 %v6241_v4, %s6052_s26  ;;  %v6254_v30 = vsel %vm347_vm0, %v498_v21, %v502_v22  ;;  %v526_v40 = vrot.slane %v524_v35, 1  ;;  %5630 = vmatpush3.bf16.msra.mxu0 %v5859_v5  ;;  %v1315_v22 = vshrl.u32 %v6326_v47, 16 }
  0x35   : > { %v522_v36 = vor.u32 %v521_v33, %v517_v20  ;;  %v6259_v39 = vsel %vm347_vm0, %v534_v34, %v538_v32  ;;  %v1336_v32 = vshll.u32 %v6349_v6, 16  ;;  %v1345_v33 = vshll.u32 %v6355_v13, 16 }
  0x37   : > { %566 = vrot.lane.b32.xlu1 %v6248_v14, %s6052_s26  ;;  %v6264_v42 = vsel %vm347_vm0, %v522_v36, %v526_v40  ;;  %v1338_v36 = vrot.slane %v1336_v32, 1 }
  0x38   : > { %564 = vrot.lane.b32.xlu0 %v6254_v30, %s6052_s26 }
  0x3b   : > { %570 = vrot.lane.b32.xlu1 %v6259_v39, %s6052_s26 }
  0x3c   : > { %568 = vrot.lane.b32.xlu0 %v6264_v42, %s6052_s26 }
  0x3f   : > { %579 = vrot.lane.b32.xlu1 %v6112_v0, %s6053_s27  ;;  %v5826_v0 = vld [vmem:[%s6109_s25 + $0xc8] ss:$0 sps:$4 sm:$0x11]  }
  0x40   : > { %577 = vrot.lane.b32.xlu0 %v6126_v19, %s6053_s27  ;;  %v6297_v19 = vld [vmem:[%s6109_s25 + $0xc0] sm:$0xff]  }
  0x41   : > { %v613_v43 = vshrl.u32 %v6297_v19, 16 }
  0x43   : > { %583 = vrot.lane.b32.xlu1 %v6145_v37, %s6053_s27  ;;  %v615_v37 = vshll.u32 %v6297_v19, 16 }
  0x44   : > { %581 = vrot.lane.b32.xlu0 %v6120_v12, %s6053_s27  ;;  %v6293_v12 = vld [vmem:[%s6109_s25] sm:$0xff]  }
  0x45   : > { %v617_v48 = vrot.slane %v615_v37, 1  ;;  %v1273_v50 = vshrl.u32 %v6293_v12, 16  ;;  %v8895_v37 = vshrl.u32 %v6349_v6, 16 }
  0x47   : > { %587 = vrot.lane.b32.xlu1 %v6162_v49, %s6053_s27  ;;  %v6306_v49 = vld [vmem:[%s6109_s25 + $0x14] ss:$0 sps:$4 sm:$0x11]  }
  0x48   : > { %585 = vrot.lane.b32.xlu0 %v6135_v27, %s6053_s27  ;;  %v6300_v27 = vld [vmem:[%s6109_s25 + $0x8] ss:$0 sps:$4 sm:$0x11]   ;;  %v1294_v62 = vshll.u32 %v6306_v49, 16 }
  0x49   : > { %v1284_v52 = vshrl.u32 %v6300_v27, 16 }
  0x4a   : > { %v1296_v16 = vrot.slane %v1294_v62, 1 }
  0x4b   : > { %591 = vrot.lane.b32.xlu1 %v6192_v15, %s6053_s27  ;;  %v6310_v15 = vld [vmem:[%s6109_s25 + $0xc] sm:$0xff]  }
  0x4c   : > { %589 = vrot.lane.b32.xlu0 %v6156_v45, %s6053_s27  ;;  %v620_v45 = vshll.u32 %v5826_v0, 16  ;;  %v1289_v55 = vshll.u32 %v6310_v15, 16  ;;  %v1287_v60 = vshrl.u32 %v6310_v15, 16  ;;  %v1343_v0 = vshrl.u32 %v6355_v13, 16 }
  0x4e   : > { %v622_v51 = vrot.slane %v620_v45, 1  ;;  %v1291_v8 = vrot.slane %v1289_v55, 1  ;;  %v6444_v55 = vld [vmem:[%s6109_s25 + $0x5c] ss:$0 sps:$4 sm:$0x11]  }
  0x4f   : > { %595 = vrot.lane.b32.xlu1 %v6214_v31, %s6053_s27  ;;  %v6316_v31 = vld [vmem:[%s6109_s25 + $0x20] ss:$0 sps:$4 sm:$0x11]  }
  0x50   : > { %593 = vrot.lane.b32.xlu0 %v6177_v61, %s6053_s27  ;;  %v1275_v61 = vshll.u32 %v6293_v12, 16  ;;  %v1308_v2 = vshll.u32 %v6316_v31, 16  ;;  %v1347_v12 = vrot.slane %v1345_v33, 1 }
  0x52   : > { %v1277_v58 = vrot.slane %v1275_v61, 1  ;;  %v1310_v21 = vrot.slane %v1308_v2, 1 }
  0x53   : > { %599 = vrot.lane.b32.xlu1 %v5819_v56, %s6053_s27  ;;  %v6333_v56 = vld [vmem:[%s6109_s25 + $0x30] sm:$0xff]  }
  0x54   : > { %597 = vrot.lane.b32.xlu0 %v6198_v17, %s6053_s27  ;;  %v1280_v17 = vshll.u32 %v6300_v27, 16  ;;  %v1331_v11 = vshll.u32 %v6333_v56, 16  ;;  %v1329_v24 = vshrl.u32 %v6333_v56, 16  ;;  %v6426_v27 = vld [vmem:[%s6109_s25 + $0x54] sm:$0xff]  }
  0x55   : > { %v1371_v5 = vshrl.u32 %v6426_v27, 16 }
  0x56   : > { %v1282_v59 = vrot.slane %v1280_v17, 1 }
  0x57   : > { %603 = vrot.lane.b32.xlu1 %v5823_v7, %s6053_s27  ;;  %v8896_v7 = vshrl.u32 %v6306_v49, 16 }
  0x58   : > { %601 = vrot.lane.b32.xlu0 %v6222_v41, %s6053_s27  ;;  %v6320_v41 = vld [vmem:[%s6109_s25 + $0x18] sm:$0xff]  }
  0x59   : > { %v1303_v63 = vshll.u32 %v6320_v41, 16  ;;  %v1301_v9 = vshrl.u32 %v6320_v41, 16 }
  0x5b   : > { %607 = vrot.lane.b32.xlu1 %v6297_v19, %s6053_s27  ;;  %v1305_v20 = vrot.slane %v1303_v63, 1 }
  0x5c   : > { %605 = vrot.lane.b32.xlu0 %v5821_v3, %s6053_s27  ;;  %v1317_v3 = vshll.u32 %v6326_v47, 16 }
  0x5e   : > { %v1319_v26 = vrot.slane %v1317_v3, 1 }
  0x5f   : > { %626 = vrot.lane.b32.xlu1 %v6130_v23, %s6054_s28  ;;  %v1322_v23 = vshll.u32 %v6323_v44, 16 }
  0x60   : > { %624 = vrot.lane.b32.xlu0 %v6159_v46, %s6054_s28  ;;  %v8897_v46 = vshrl.u32 %v6316_v31, 16 }
  0x61   : > { %v1324_v28 = vrot.slane %v1322_v23, 1  ;;  %v6462_v23 = vld [vmem:[%s6109_s25 + $0x6c] sm:$0xff]  }
  0x62   : > { %v1401_v32 = vshll.u32 %v6462_v23, 16 }
  0x63   : > { %630 = vrot.lane.b32.xlu1 %v6181_v1, %s6054_s28  ;;  %v1333_v1 = vrot.slane %v1331_v11, 1  ;;  %v1378_v11 = vshll.u32 %v6444_v55, 16 }
  0x64   : > { %628 = vrot.lane.b32.xlu0 %v6148_v38, %s6054_s28  ;;  %v618_v38 = vor.u32 %v617_v48, %v613_v43 }
  0x67   : > { %634 = vrot.lane.b32.xlu1 %v6201_v18, %s6054_s28 }
  0x68   : > { %632 = vrot.lane.b32.xlu0 %v6169_v54, %s6054_s28  ;;  %v623_v54 = vsel %vm347_vm0, %v618_v38, %v622_v51  ;;  %v1348_v51 = vor.u32 %v1347_v12, %v1343_v0  ;;  %v1380_v38 = vrot.slane %v1378_v11, 1 }
  0x6b   : > { %638 = vrot.lane.b32.xlu1 %v6228_v53, %s6054_s28 }
  0x6c   : > { %636 = vrot.lane.b32.xlu0 %v6189_v10, %s6054_s28  ;;  %v1278_v10 = vor.u32 %v1277_v58, %v1273_v50  ;;  %v1373_v58 = vshll.u32 %v6426_v27, 16 }
  0x6e   : > { %v1283_v18 = vsel %vm347_vm0, %v1278_v10, %v1282_v59  ;;  %v6448_v59 = vld [vmem:[%s6109_s25 + $0x60] sm:$0xff]  }
  0x6f   : > { %642 = vrot.lane.b32.xlu1 %v6241_v4, %s6054_s28  ;;  %v6401_v4 = vld [vmem:[%s6109_s25 + $0x48] sm:$0xff]  }
  0x70   : > { %640 = vrot.lane.b32.xlu0 %v6210_v29, %s6054_s28  ;;  %v1292_v29 = vor.u32 %v1291_v8, %v1287_v60  ;;  %v1359_v40 = vshll.u32 %v6401_v4, 16  ;;  %v1357_v17 = vshrl.u32 %v6401_v4, 16 }
  0x72   : > { %v6395_v53 = vsel %vm347_vm0, %v1292_v29, %v1296_v16  ;;  %v1361_v43 = vrot.slane %v1359_v40, 1  ;;  %v6469_v16 = vld [vmem:[%s6109_s25 + $0x68] ss:$0 sps:$4 sm:$0x11]   ;;  %v8889_v29 = vshrl.u32 %v6444_v55, 16 }
  0x73   : > { %646 = vrot.lane.b32.xlu1 %v6254_v30, %s6054_s28  ;;  %v1320_v30 = vor.u32 %v1319_v26, %v1315_v22  ;;  %v1385_v26 = vshrl.u32 %v6448_v59, 16  ;;  %v1392_v10 = vshll.u32 %v6469_v16, 16 }
  0x74   : > { %644 = vrot.lane.b32.xlu0 %v6234_v57, %s6054_s28  ;;  %v1306_v57 = vor.u32 %v1305_v20, %v1301_v9  ;;  %v1362_v2 = vor.u32 %v1361_v43, %v1357_v17  ;;  %v1375_v9 = vrot.slane %v1373_v58, 1  ;;  %v1387_v20 = vshll.u32 %v6448_v59, 16  ;;  %v6512_v43 = vld [vmem:[%s6109_s25 + $0x84] sm:$0xff]  }
  0x75   : > { %v6417_v35 = vsel %vm347_vm0, %v1320_v30, %v1324_v28  ;;  %v6485_v28 = vld [vmem:[%s6109_s25 + $0x74] ss:$0 sps:$4 sm:$0x11]   ;;  %v1399_v30 = vshrl.u32 %v6462_v23, 16  ;;  %8925 = vst [vmem:[#allocation4_spill] sm:$0xff] %v6512_v43 }
  0x76   : > { %v6409_v34 = vsel %vm347_vm0, %v1306_v57, %v1310_v21  ;;  %v1376_v33 = vor.u32 %v1375_v9, %v1371_v5  ;;  %v1406_v40 = vshll.u32 %v6485_v28, 16  ;;  %v6526_v5 = vld [vmem:[%s6109_s25 + $0x90] sm:$0xff]  }
  0x77   : > { %650 = vrot.lane.b32.xlu1 %v6264_v42, %s6054_s28  ;;  %v1334_v42 = vor.u32 %v1333_v1, %v1329_v24  ;;  %8926 = vst [vmem:[#allocation5_spill] sm:$0xff] %v6526_v5 }
  0x78   : > { %648 = vrot.lane.b32.xlu0 %v6248_v14, %s6054_s28  ;;  %v6404_v14 = vld [vmem:[%s6109_s25 + $0x44] ss:$0 sps:$4 sm:$0x11]   ;;  %v6508_v0 = vsel %vm347_vm0, %v1376_v33, %v1380_v38  ;;  %v8892_v33 = vshrl.u32 %v6485_v28, 16 }
  0x79   : > { %v1350_v19 = vshll.u32 %v6404_v14, 16  ;;  %v6441_v50 = vsel %vm347_vm0, %v1334_v42, %v1338_v36  ;;  %v8891_v60 = vshrl.u32 %v6404_v14, 16  ;;  %v1403_v36 = vrot.slane %v1401_v32, 1  ;;  %v6505_v42 = vld [vmem:[%s6109_s25 + $0x80] ss:$0 sps:$4 sm:$0x11]  }
  0x7a   : > { %8924 = vst [vmem:[#allocation3_spill] sm:$0xff] %v6505_v42  ;;  %v1429_v32 = vshll.u32 %v6512_v43, 16 }
  0x7b   : > { %654 = vrot.lane.b32.xlu1 %v623_v54, %s6054_s28  ;;  %v1389_v54 = vrot.slane %v1387_v20, 1  ;;  %v1404_v58 = vor.u32 %v1403_v36, %v1399_v30  ;;  %v1443_v30 = vshll.u32 %v6526_v5, 16 }
  0x7c   : > { %652 = vrot.lane.b32.xlu0 %v6259_v39, %s6054_s28  ;;  %v6420_v39 = vld [vmem:[%s6109_s25 + $0x50] ss:$0 sps:$4 sm:$0x11]  }
  0x7d   : > { %v1364_v48 = vshll.u32 %v6420_v39, 16  ;;  %v8893_v21 = vshrl.u32 %v6420_v39, 16  ;;  %v1390_v12 = vor.u32 %v1389_v54, %v1385_v26  ;;  %v6533_v26 = vld [vmem:[%s6109_s25 + $0x8c] ss:$0 sps:$4 sm:$0x11]  }
  0x7e   : > { %8927 = vst [vmem:[#allocation6_spill] sm:$0xff] %v6533_v26 }
  0x7f   : > { %1498 = vrot.lane.b32.xlu1 %v1284_v52, %s6052_s26  ;;  %v1352_v52 = vrot.slane %v1350_v19, 1  ;;  %v1366_v3 = vrot.slane %v1364_v48, 1  ;;  %v1394_v19 = vrot.slane %v1392_v10, 1  ;;  %v8890_v48 = vshrl.u32 %v6469_v16, 16 }
  0x80   : > { %1496 = vrot.lane.b32.xlu0 %v1283_v18, %s6052_s26  ;;  %v6492_v18 = vld [vmem:[%s6109_s25 + $0x78] sm:$0xff]  }
  0x81   : > { %v6465_v8 = vsel %vm347_vm0, %v1348_v51, %v1352_v52  ;;  %v6481_v24 = vsel %vm347_vm0, %v1362_v2, %v1366_v3  ;;  %v1415_v17 = vshll.u32 %v6492_v18, 16  ;;  %v1408_v2 = vrot.slane %v1406_v40, 1  ;;  %v6546_v10 = vld [vmem:[%s6109_s25 + $0x98] ss:$0 sps:$4 sm:$0x11]  }
  0x82   : > { %v1420_v3 = vshll.u32 %v6505_v42, 16  ;;  %v6529_v9 = vsel %vm347_vm0, %v1390_v12, %v1394_v19  ;;  %v1413_v11 = vshrl.u32 %v6492_v18, 16  ;;  %v1427_v12 = vshrl.u32 %v6512_v43, 16 }
  0x83   : > { %1502 = vrot.lane.b32.xlu1 %v8896_v7, %s6052_s26  ;;  %v1417_v20 = vrot.slane %v1415_v17, 1  ;;  %v6543_v38 = vsel %vm347_vm0, %v1404_v58, %v1408_v2  ;;  %v1431_v19 = vrot.slane %v1429_v32, 1  ;;  %v1434_v17 = vshll.u32 %v6533_v26, 16  ;;  %v6567_v32 = vld [vmem:[%s6109_s25 + $0xa4] ss:$0 sps:$4 sm:$0x11]  }
  0x84   : > { %1500 = vrot.lane.b32.xlu0 %v6395_v53, %s6052_s26  ;;  %8928 = vst [vmem:[#allocation7_spill] sm:$0xff] %v6543_v38  ;;  %v1422_v54 = vrot.slane %v1420_v3, 1  ;;  %v8898_v2 = vshrl.u32 %v6505_v42, 16  ;;  %v1441_v3 = vshrl.u32 %v6526_v5, 16  ;;  %8930 = vst [vmem:[#allocation9_spill] sm:$0xff] %v6567_v32  ;;  %v6598_v5 = vld [vmem:[%s6109_s25 + $0xb4] sm:$0xff]  }
  0x85   : > { %v1418_v40 = vor.u32 %v1417_v20, %v1413_v11  ;;  %v1445_v11 = vrot.slane %v1443_v30, 1  ;;  %v1448_v20 = vshll.u32 %v6546_v10, 16  ;;  %8935 = vst [vmem:[#allocation14_spill] sm:$0xff] %v6598_v5 }
  0x87   : > { %1506 = vrot.lane.b32.xlu1 %v8897_v46, %s6052_s26 }
  0x88   : > { %1504 = vrot.lane.b32.xlu0 %v6409_v34, %s6052_s26 }
  0x8b   : > { %1510 = vrot.lane.b32.xlu1 %v8894_v25, %s6052_s26 }
  0x8c   : > { %1508 = vrot.lane.b32.xlu0 %v6417_v35, %s6052_s26 }
  0x8f   : > { %1514 = vrot.lane.b32.xlu1 %v8895_v37, %s6052_s26  ;;  %v6576_v37 = vld [vmem:[%s6109_s25 + $0xa8] sm:$0xff]  }
  0x90   : > { %1512 = vrot.lane.b32.xlu0 %v6441_v50, %s6052_s26  ;;  %8932 = vst [vmem:[#allocation11_spill] sm:$0xff] %v6576_v37  ;;  %v1471_v7 = vshll.u32 %v6576_v37, 16 }
  0x91   : > { %v6432_v45 = vpop.permute.xlu1 %544 }
  0x92   : > { %v6434_v61 = vpop.permute.xlu0 %540  ;;  %v1473_v42 = vrot.slane %v1471_v7, 1 }
  0x93   : > { %1518 = vrot.lane.b32.xlu1 %v8891_v60, %s6052_s26  ;;  %v6572_v60 = vsel %vm347_vm0, %v1418_v40, %v1422_v54  ;;  %v1446_v54 = vor.u32 %v1445_v11, %v1441_v3  ;;  %v1450_v40 = vrot.slane %v1448_v20, 1  ;;  %v8936_v3 = vshrl.u32 %v6533_v26, 16 }
  0x94   : > { %1516 = vrot.lane.b32.xlu0 %v6465_v8, %s6052_s26  ;;  %8931 = vst [vmem:[#allocation10_spill] sm:$0xff] %v6572_v60 }
  0x95   : > { %v6454_v62 = vpop.permute.xlu1 %546 }
  0x96   : > { %v6458_v63 = vpop.permute.xlu0 %542 }
  0x97   : > { %1522 = vrot.lane.b32.xlu1 %v8893_v21, %s6052_s26  ;;  %v1436_v21 = vrot.slane %v1434_v17, 1 }
  0x98   : > { %1520 = vrot.lane.b32.xlu0 %v6481_v24, %s6052_s26 }
  0x99   : > { %v6476_v22 = vpop.permute.xlu1 %550 }
  0x9a   : > { %v6488_v1 = vpop.permute.xlu0 %548 }
  0x9b   : > { %1526 = vrot.lane.b32.xlu1 %v8889_v29, %s6052_s26  ;;  %v6554_v29 = vld [vmem:[%s6109_s25 + $0x9c] sm:$0xff]  }
  0x9c   : > { %1524 = vrot.lane.b32.xlu0 %v6508_v0, %s6052_s26  ;;  %8929 = vst [vmem:[#allocation8_spill] sm:$0xff] %v6554_v29  ;;  %v1457_v25 = vshll.u32 %v6554_v29, 16 }
  0x9d   : > { %v6500_v57 = vpop.permute.xlu1 %554 }
  0x9e   : > { %v6518_v51 = vpop.permute.xlu0 %552  ;;  %v1459_v43 = vrot.slane %v1457_v25, 1 }
  0x9f   : > { %1530 = vrot.lane.b32.xlu1 %v8890_v48, %s6052_s26 }
  0xa0   : > { %1528 = vrot.lane.b32.xlu0 %v6529_v9, %s6052_s26 }
  0xa1   : > { %v6522_v52 = vpop.permute.xlu1 %558 }
  0xa2   : > { %v6549_v36 = vpop.permute.xlu0 %556 }
  0xa3   : > { %1534 = vrot.lane.b32.xlu1 %v8892_v33, %s6052_s26  ;;  %v1432_v33 = vor.u32 %v1431_v19, %v1427_v12  ;;  %v1462_v12 = vshll.u32 %v6567_v32, 16  ;;  %v6588_v19 = vld [vmem:[%s6109_s25 + $0xb0] ss:$0 sps:$4 sm:$0x11]  }
  0xa4   : > { %1532 = vrot.lane.b32.xlu0 %v6543_v38, %s6052_s26  ;;  %8933 = vst [vmem:[#allocation12_spill] sm:$0xff] %v6588_v19  ;;  %v1476_v25 = vshll.u32 %v6588_v19, 16  ;;  %v6614_v38 = vld [vmem:[%s6109_s25 + $0xbc] ss:$0 sps:$4 sm:$0x11]  }
  0xa5   : > { %v6559_v58 = vpop.permute.xlu1 %562  ;;  %v6593_v46 = vsel %vm347_vm0, %v1432_v33, %v1436_v21  ;;  %v6609_v21 = vsel %vm347_vm0, %v1446_v54, %v1450_v40  ;;  %v1464_v33 = vrot.slane %v1462_v12, 1  ;;  %8938 = vst [vmem:[#allocation16_spill] sm:$0xff] %v6614_v38  ;;  %v8911_v54 = vshrl.u32 %v6567_v32, 16 }
  0xa6   : > { %v6569_v48 = vpop.permute.xlu0 %560  ;;  %8934 = vst [vmem:[#allocation13_spill] sm:$0xff] %v6593_v46  ;;  %v1490_v26 = vshll.u32 %v6614_v38, 16 }
  0xa7   : > { %1538 = vrot.lane.b32.xlu1 %v8898_v2, %s6052_s26  ;;  %v1455_v2 = vshrl.u32 %v6554_v29, 16 }
  0xa8   : > { %1536 = vrot.lane.b32.xlu0 %v6572_v60, %s6052_s26  ;;  %v1469_v60 = vshrl.u32 %v6576_v37, 16 }
  0xa9   : > { %v6581_v30 = vpop.permute.xlu1 %566  ;;  %v1460_v29 = vor.u32 %v1459_v43, %v1455_v2  ;;  %v1478_v43 = vrot.slane %v1476_v25, 1  ;;  %v1483_v2 = vshrl.u32 %v6598_v5, 16 }
  0xaa   : > { %v6590_v17 = vpop.permute.xlu0 %564  ;;  %v1474_v12 = vor.u32 %v1473_v42, %v1469_v60  ;;  %v1492_v60 = vrot.slane %v1490_v26, 1 }
  0xab   : > { %1542 = vrot.lane.b32.xlu1 %v8936_v3, %s6052_s26  ;;  %v1485_v3 = vshll.u32 %v6598_v5, 16  ;;  %v6627_v7 = vsel %vm347_vm0, %v1460_v29, %v1464_v33  ;;  %v8913_v33 = vshrl.u32 %v6614_v38, 16  ;;  %v5934_v38 = vld [vmem:[%s6109_s25] sm:$0xff]  }
  0xac   : > { %1540 = vrot.lane.b32.xlu0 %v6593_v46, %s6052_s26  ;;  %v8939_v46 = vshrl.u32 %v6546_v10, 16  ;;  %8940 = vst [vmem:[#allocation17_spill] sm:$0xff] %v6627_v7  ;;  %v6639_v5 = vsel %vm347_vm0, %v1474_v12, %v1478_v43 }
  0xad   : > { %v6606_v20 = vpop.permute.xlu1 %570  ;;  %v1487_v37 = vrot.slane %v1485_v3, 1  ;;  %8941 = vst [vmem:[#allocation18_spill] sm:$0xff] %v6639_v5 }
  0xae   : > { %8937 = vst [vmem:[#allocation15_spill] sm:$0xff] %v6606_v20  ;;  %v6617_v11 = vpop.permute.xlu0 %568 }
  0xaf   : > { %1546 = vrot.lane.b32.xlu1 %v8939_v46, %s6052_s26  ;;  %v8914_v46 = vshrl.u32 %v6588_v19, 16  ;;  %v1488_v29 = vor.u32 %v1487_v37, %v1483_v2 }
  0xb0   : > { %1544 = vrot.lane.b32.xlu0 %v6609_v21, %s6052_s26 }
  0xb1   : > { %v580_v40 = vpop.permute.xlu1 %579 }
  0xb2   : > { %v578_v20 = vpop.permute.xlu0 %577 }
  0xb3   : > { %1550 = vrot.lane.b32.xlu1 %v8911_v54, %s6052_s26  ;;  %v6650_v54 = vsel %vm347_vm0, %v1488_v29, %v1492_v60 }
  0xb4   : > { %1548 = vrot.lane.b32.xlu0 %v6627_v7, %s6052_s26  ;;  %8942 = vst [vmem:[#allocation19_spill] sm:$0xff] %v6650_v54 }
  0xb5   : > { %v6636_v25 = vpop.permute.xlu1 %583 }
  0xb6   : > { %v582_v42 = vpop.permute.xlu0 %581 }
  0xb7   : > { %1554 = vrot.lane.b32.xlu1 %v8914_v46, %s6052_s26 }
  0xb8   : > { %1552 = vrot.lane.b32.xlu0 %v6639_v5, %s6052_s26  ;;  %v658_v5 = vsel %vm656_vm1, %v5934_v38, %v6434_v61  ;;  %v5935_v38 = vld [vmem:[%s6109_s25 + $0x18] sm:$0xff]  }
  0xb9   : > { %v6647_v3 = vpop.permute.xlu1 %587  ;;  %v691_v32 = vsel %vm689_vm2, %v658_v5, %v578_v20  ;;  %v662_v5 = vsel %vm656_vm1, %v5935_v38, %v6432_v45  ;;  %v5939_v38 = vld [vmem:[%s6109_s25 + $0x48] sm:$0xff]  }
  0xba   : > { %v586_v7 = vpop.permute.xlu0 %585 }
  0xbb   : > { %1558 = vrot.lane.b32.xlu1 %v8913_v33, %s6052_s26 }
  0xbc   : > { %1556 = vrot.lane.b32.xlu0 %v6650_v54, %s6052_s26 }
  0xbd   : > { %v6657_v37 = vpop.permute.xlu1 %591 }
  0xbe   : > { %v6659_v26 = vpop.permute.xlu0 %589 }
  0xbf   : > { %1570 = vrot.lane.b32.xlu1 %v6306_v49, %s6053_s27 }
  0xc0   : > { %1568 = vrot.lane.b32.xlu0 %v6310_v15, %s6053_s27 }
  0xc1   : > { %v6665_v43 = vpop.permute.xlu1 %595 }
  0xc2   : > { %v6667_v2 = vpop.permute.xlu0 %593 }
  0xc3   : > { %1574 = vrot.lane.b32.xlu1 %v6316_v31, %s6053_s27 }
  0xc4   : > { %1572 = vrot.lane.b32.xlu0 %v6320_v41, %s6053_s27 }
  0xc5   : > { %v6673_v12 = vpop.permute.xlu1 %599 }
  0xc6   : > { %v6675_v29 = vpop.permute.xlu0 %597 }
  0xc7   : > { %1578 = vrot.lane.b32.xlu1 %v6323_v44, %s6053_s27 }
  0xc8   : > { %1576 = vrot.lane.b32.xlu0 %v6326_v47, %s6053_s27  ;;  %v5933_v47 = vld [vmem:[%s6109_s25 + $0xc] sm:$0xff]  }
  0xc9   : > { %v6681_v15 = vpop.permute.xlu1 %603  ;;  %v660_v46 = vsel %vm656_vm1, %v5933_v47, %v6458_v63 }
  0xca   : > { %v6683_v60 = vpop.permute.xlu0 %601  ;;  %v693_v19 = vsel %vm689_vm2, %v660_v46, %v580_v40  ;;  %v8943_v46 = vshrl.u32 %v6316_v31, 16 }
  0xcb   : > { %1582 = vrot.lane.b32.xlu1 %v6349_v6, %s6053_s27 }
  0xcc   : > { %1580 = vrot.lane.b32.xlu0 %v6333_v56, %s6053_s27  ;;  %v5868_v56 = vld [vmem:[%s8886_s1 + $0x8] sm:$0xff]  }
  0xcd   : > { %v6689_v41 = vpop.permute.xlu1 %607  ;;  %5663 = vmatprep.subr.bf16.mxu1 %v5868_v56 }
  0xce   : > { %v6691_v33 = vpop.permute.xlu0 %605  ;;  %5664 = vmatpush3.bf16.msra.mxu1 %v5868_v56 }
  0xcf   : > { %1586 = vrot.lane.b32.xlu1 %v6404_v14, %s6053_s27 }
  0xd0   : > { %1584 = vrot.lane.b32.xlu0 %v6355_v13, %s6053_s27 }
  0xd1   : > { %v627_v54 = vpop.permute.xlu1 %626 }
  0xd2   : > { %v726_v63 = vsel %vm722_vm3, %v693_v19, %v627_v54  ;;  %v625_v47 = vpop.permute.xlu0 %624  ;;  %v695_v19 = vsel %vm689_vm2, %v662_v5, %v582_v42  ;;  %v5936_v54 = vld [vmem:[%s6109_s25 + $0x24] sm:$0xff]   ;;  %v5937_v42 = vld [vmem:[%s6109_s25 + $0x30] sm:$0xff]   ;;  %v670_v5 = vsel %vm656_vm1, %v5939_v38, %v6518_v51 }
  0xd3   : > { %1590 = vrot.lane.b32.xlu1 %v6420_v39, %s6053_s27  ;;  %v724_v13 = vsel %vm722_vm3, %v691_v32, %v625_v47  ;;  %v664_v45 = vsel %vm656_vm1, %v5936_v54, %v6454_v62  ;;  %v8944_v62 = vshrl.u32 %v6306_v49, 16  ;;  %v5941_v54 = vld [vmem:[%s6109_s25 + $0x60] sm:$0xff]  }
  0xd4   : > { %1588 = vrot.lane.b32.xlu0 %v6401_v4, %s6053_s27  ;;  %5631 = vmatprep.mubr.msk.bf16.mxu0 %vm763_vm4, %v724_v13 }
  0xd5   : > { %v631_v61 = vpop.permute.xlu1 %630  ;;  %5632 = vmatmul.mubr.msk.bf16.vlgmr.msra.gmra.mxu0 %vm763_vm4, %v726_v63 }
  0xd6   : > { %v629_v20 = vpop.permute.xlu0 %628 }
  0xd7   : > { %1650 = vrot.lane.b32.xlu1 %v6409_v34, %s6054_s28  ;;  %v728_v32 = vsel %vm722_vm3, %v695_v19, %v629_v20  ;;  %v666_v34 = vsel %vm656_vm1, %v5937_v42, %v6488_v1 }
  0xd8   : > { %1646 = vrot.lane.b32.xlu0 %v6395_v53, %s6054_s28  ;;  %5635 = vmatprep.mubr.msk.bf16.mxu0 %vm763_vm4, %v728_v32  ;;  %v697_v53 = vsel %vm689_vm2, %v664_v45, %v6636_v25  ;;  %v699_v56 = vsel %vm689_vm2, %v666_v34, %v586_v7  ;;  %v5938_v25 = vld [vmem:[%s6109_s25 + $0x3c] sm:$0xff]   ;;  %v674_v45 = vsel %vm656_vm1, %v5941_v54, %v6549_v36 }
  0xd9   : > { %v635_v4 = vpop.permute.xlu1 %634  ;;  %v730_v63 = vsel %vm722_vm3, %v697_v53, %v631_v61  ;;  %v668_v49 = vsel %vm656_vm1, %v5938_v25, %v6476_v22  ;;  %v8945_v61 = vshrl.u32 %v6349_v6, 16  ;;  %v8946_v22 = vshrl.u32 %v6323_v44, 16  ;;  %v5943_v34 = vld [vmem:[%s6109_s25 + $0x78] sm:$0xff]  }
  0xda   : > { %v633_v40 = vpop.permute.xlu0 %632  ;;  %v678_v53 = vsel %vm656_vm1, %v5943_v34, %v6569_v48  ;;  %v8950_v25 = vshrl.u32 %v6444_v55, 16 }
  0xdb   : > { %1652 = vrot.lane.b32.xlu1 %v8943_v46, %s6054_s28  ;;  %v732_v31 = vsel %vm722_vm3, %v699_v56, %v633_v40 }
  0xdc   : > { %1648 = vrot.lane.b32.xlu0 %v8944_v62, %s6054_s28 }
  0xdd   : > { %v639_v47 = vpop.permute.xlu1 %638  ;;  %5636 = vmatmul.mubr.msk.bf16.gmra.mxu0 %vm763_vm4, %v730_v63 }
  0xde   : > { %5639 = vmatprep.mubr.msk.bf16.mxu0 %vm763_vm4, %v732_v31  ;;  %v637_v1 = vpop.permute.xlu0 %636  ;;  %v5945_v31 = vld [vmem:[%s6109_s25 + $0x90] sm:$0xff]  }
  0xdf   : > { %1658 = vrot.lane.b32.xlu1 %v6441_v50, %s6054_s28  ;;  %v701_v50 = vsel %vm689_vm2, %v668_v49, %v6647_v3 }
  0xe0   : > { %1654 = vrot.lane.b32.xlu0 %v6417_v35, %s6054_s28  ;;  %v703_v35 = vsel %vm689_vm2, %v670_v5, %v6659_v26  ;;  %v734_v19 = vsel %vm722_vm3, %v701_v50, %v635_v4  ;;  %v5940_v26 = vld [vmem:[%s6109_s25 + $0x54] sm:$0xff]   ;;  %v8947_v4 = vshrl.u32 %v6420_v39, 16 }
  0xe1   : > { %v643_v7 = vpop.permute.xlu1 %642  ;;  %v736_v20 = vsel %vm722_vm3, %v703_v35, %v637_v1  ;;  %v672_v44 = vsel %vm656_vm1, %v5940_v26, %v6500_v57  ;;  %v8948_v57 = vshrl.u32 %v6404_v14, 16  ;;  %v682_v1 = vsel %vm656_vm1, %v5945_v31, %v6590_v17  ;;  %v8967_v31 = vld [vmem:[#allocation12_spill] sm:$0xff] }
  0xe2   : > { %v641_v13 = vpop.permute.xlu0 %640 }
  0xe3   : > { %1660 = vrot.lane.b32.xlu1 %v8945_v61, %s6054_s28  ;;  %v5947_v61 = vld [vmem:[%s6109_s25 + $0xa8] sm:$0xff]  }
  0xe4   : > { %1656 = vrot.lane.b32.xlu0 %v8946_v22, %s6054_s28  ;;  %v686_v38 = vsel %vm656_vm1, %v5947_v61, %v6617_v11  ;;  %v5948_v22 = vld [vmem:[%s6109_s25 + $0xb4] sm:$0xff]  }
  0xe5   : > { %v647_v6 = vpop.permute.xlu1 %646  ;;  %5640 = vmatmul.mubr.msk.bf16.gmra.mxu0 %vm763_vm4, %v734_v19 }
  0xe6   : > { %5643 = vmatprep.mubr.msk.bf16.mxu0 %vm763_vm4, %v736_v20  ;;  %v645_v51 = vpop.permute.xlu0 %644 }
  0xe7   : > { %1666 = vrot.lane.b32.xlu1 %v6481_v24, %s6054_s28  ;;  %v705_v24 = vsel %vm689_vm2, %v672_v44, %v6657_v37 }
  0xe8   : > { %1662 = vrot.lane.b32.xlu0 %v6465_v8, %s6054_s28  ;;  %v707_v8 = vsel %vm689_vm2, %v674_v45, %v6667_v2  ;;  %v738_v40 = vsel %vm722_vm3, %v705_v24, %v639_v47  ;;  %v5942_v2 = vld [vmem:[%s6109_s25 + $0x6c] sm:$0xff]   ;;  %v8949_v47 = vshrl.u32 %v6469_v16, 16 }
  0xe9   : > { %v6773_v3 = vpop.permute.xlu1 %650  ;;  %v740_v46 = vsel %vm722_vm3, %v707_v8, %v641_v13  ;;  %v676_v14 = vsel %vm656_vm1, %v5942_v2, %v6522_v52  ;;  %v8957_v45 = vld [vmem:[#allocation5_spill] sm:$0xff]  ;;  %v8958_v24 = vld [vmem:[#allocation4_spill] sm:$0xff]  ;;  %v8961_v2 = vshrl.u32 %v6546_v10, 16 }
  0xea   : > { %v649_v32 = vpop.permute.xlu0 %648 }
  0xeb   : > { %1668 = vrot.lane.b32.xlu1 %v8947_v4, %s6054_s28 }
  0xec   : > { %1664 = vrot.lane.b32.xlu0 %v8948_v57, %s6054_s28 }
  0xed   : > { %v6792_v39 = vpop.permute.xlu1 %654  ;;  %5644 = vmatmul.mubr.msk.bf16.gmra.mxu0 %vm763_vm4, %v738_v40  ;;  %v8959_v40 = vld [vmem:[#allocation6_spill] sm:$0xff] }
  0xee   : > { %5647 = vmatprep.mubr.msk.bf16.mxu0 %vm763_vm4, %v740_v46  ;;  %v653_v36 = vpop.permute.xlu0 %652 }
  0xef   : > { %1596 = vrot.lane.b32.xlu1 %v6448_v59, %s6053_s27  ;;  %v709_v59 = vsel %vm689_vm2, %v676_v14, %v6665_v43  ;;  %v8962_v14 = vshrl.u32 %v8959_v40, 16 }
  0xf0   : > { %1592 = vrot.lane.b32.xlu0 %v6426_v27, %s6053_s27  ;;  %v711_v27 = vsel %vm689_vm2, %v678_v53, %v6675_v29  ;;  %v742_v56 = vsel %vm722_vm3, %v709_v59, %v643_v7  ;;  %v5944_v29 = vld [vmem:[%s6109_s25 + $0x84] sm:$0xff]   ;;  %v715_v7 = vsel %vm689_vm2, %v682_v1, %v6683_v60  ;;  %v8968_v1 = vld [vmem:[#allocation18_spill] sm:$0xff] }
  0xf1   : > { %v6801_v37 = vpop.permute.xlu1 %1498  ;;  %v744_v63 = vsel %vm722_vm3, %v711_v27, %v645_v51  ;;  %v748_v49 = vsel %vm722_vm3, %v715_v7, %v649_v32  ;;  %v8956_v32 = vshrl.u32 %v6485_v28, 16  ;;  %v8963_v59 = vld [vmem:[#allocation11_spill] sm:$0xff]  ;;  %v5861_v7 = vld [vmem:[%s6109_s25 + $0xc8] ss:$0 sps:$4 sm:$0x11]  }
  0xf2   : > { %v6806_v42 = vpop.permute.xlu0 %1496 }
  0xf3   : > { %1594 = vrot.lane.b32.xlu1 %v6444_v55, %s6053_s27  ;;  %v5946_v55 = vld [vmem:[%s6109_s25 + $0x9c] sm:$0xff]  }
  0xf4   : > { %1670 = vrot.lane.b32.xlu0 %v6508_v0, %s6054_s28  ;;  %v680_v0 = vsel %vm656_vm1, %v5944_v29, %v6559_v58  ;;  %v684_v60 = vsel %vm656_vm1, %v5946_v55, %v6581_v30  ;;  %v8951_v30 = vld [vmem:[#allocation7_spill] sm:$0xff]  ;;  %v5862_v55 = vld [vmem:[%s6109_s25 + $0x18] sm:$0xff]  }
  0xf5   : > { %v6820_v52 = vpop.permute.xlu1 %1502  ;;  %5648 = vmatmul.mubr.msk.bf16.gmra.mxu0 %vm763_vm4, %v742_v56  ;;  %v8965_v56 = vld [vmem:[#allocation9_spill] sm:$0xff] }
  0xf6   : > { %5651 = vmatprep.mubr.msk.bf16.mxu0 %vm763_vm4, %v744_v63  ;;  %v6825_v48 = vpop.permute.xlu0 %1500  ;;  %v8966_v63 = vld [vmem:[#allocation17_spill] sm:$0xff] }
  0xf7   : > { %1598 = vrot.lane.b32.xlu1 %v6469_v16, %s6053_s27 }
  0xf8   : > { %1674 = vrot.lane.b32.xlu0 %v6529_v9, %s6054_s28  ;;  %v713_v9 = vsel %vm689_vm2, %v680_v0, %v6673_v12  ;;  %v5860_v0 = vld [vmem:[%s6109_s25 + $0xc0] sm:$0xff]  }
  0xf9   : > { %v6831_v43 = vpop.permute.xlu1 %1506  ;;  %v746_v58 = vsel %vm722_vm3, %v713_v9, %v647_v6  ;;  %v8954_v6 = vld [vmem:[#allocation15_spill] sm:$0xff] }
  0xfa   : > { %v6836_v62 = vpop.permute.xlu0 %1504  ;;  %v688_v20 = vsel %vm656_vm1, %v5948_v22, %v8954_v6 }
  0xfb   : > { %1676 = vrot.lane.b32.xlu1 %v8949_v47, %s6054_s28  ;;  %v721_v26 = vsel %vm689_vm2, %v688_v20, %v6689_v41 }
  0xfc   : > { %1672 = vrot.lane.b32.xlu0 %v8950_v25, %s6054_s28  ;;  %v754_v44 = vsel %vm722_vm3, %v721_v26, %v6792_v39 }
  0xfd   : > { %v6852_v16 = vpop.permute.xlu1 %1510  ;;  %5652 = vmatmul.mubr.msk.bf16.gmra.mxu0 %vm763_vm4, %v746_v58  ;;  %v1635_v58 = vshll.u32 %v5860_v0, 16 }
  0xfe   : > { %5655 = vmatprep.mubr.msk.bf16.mxu0 %vm763_vm4, %v748_v49  ;;  %v6857_v17 = vpop.permute.xlu0 %1508  ;;  %v8970_v49 = vshrl.u32 %v8967_v31, 16 }
  0xff   : > { %1604 = vrot.lane.b32.xlu1 %v6492_v18, %s6053_s27  ;;  %v717_v18 = vsel %vm689_vm2, %v684_v60, %v6681_v15  ;;  %v8952_v15 = vld [vmem:[#allocation3_spill] sm:$0xff]  ;;  %v8971_v60 = vshrl.u32 %v8965_v56, 16 }
 0x100   : > { %1600 = vrot.lane.b32.xlu0 %v6462_v23, %s6053_s27  ;;  %v719_v23 = vsel %vm689_vm2, %v686_v38, %v6691_v33  ;;  %v750_v5 = vsel %vm722_vm3, %v717_v18, %v6773_v3  ;;  %v8953_v33 = vld [vmem:[#allocation10_spill] sm:$0xff]  ;;  %v8955_v3 = vshrl.u32 %v8952_v15, 16  ;;  %v1633_v38 = vshrl.u32 %v5860_v0, 16 }
 0x101   : > { %v6863_v12 = vpop.permute.xlu1 %1514  ;;  %v752_v35 = vsel %vm722_vm3, %v719_v23, %v653_v36  ;;  %v1637_v18 = vrot.slane %v1635_v58, 1  ;;  %v1640_v23 = vshll.u32 %v5861_v7, 16 }
 0x102   : > { %v6868_v13 = vpop.permute.xlu0 %1512 }
 0x103   : > { %1602 = vrot.lane.b32.xlu1 %v6485_v28, %s6053_s27  ;;  %v8960_v28 = vld [vmem:[#allocation13_spill] sm:$0xff]  ;;  %v1638_v6 = vor.u32 %v1637_v18, %v1633_v38  ;;  %v1642_v20 = vrot.slane %v1640_v23, 1  ;;  %v5866_v18 = vld [vmem:[%s6109_s25 + $0x24] sm:$0xff]  }
 0x104   : > { %1678 = vrot.lane.b32.xlu0 %v8951_v30, %s6054_s28 }
 0x105   : > { %v6883_v50 = vpop.permute.xlu1 %1518  ;;  %5656 = vmatmul.mubr.msk.bf16.gmra.mxu0 %vm763_vm4, %v750_v5  ;;  %v5864_v5 = vld [vmem:[%s6109_s25 + $0xc] sm:$0xff]  }
 0x106   : > { %5659 = vmatprep.mubr.msk.bf16.mxu0 %vm763_vm4, %v752_v35  ;;  %v6888_v11 = vpop.permute.xlu0 %1516  ;;  %v6990_v35 = vld [vmem:[%s6109_s25 + $0x20] ss:$0 sps:$4 sm:$0x11]   ;;  %v3505_v26 = vshll.u32 %v5864_v5, 16 }
 0x107   : > { %1606 = vrot.lane.b32.xlu1 %v8952_v15, %s6053_s27  ;;  %v3519_v15 = vshll.u32 %v5862_v55, 16 }
 0x108   : > { %1682 = vrot.lane.b32.xlu0 %v8953_v33, %s6054_s28  ;;  %v8974_v33 = vld [vmem:[#allocation14_spill] sm:$0xff] }
 0x109   : > { %v6894_v19 = vpop.permute.xlu1 %1522 }
 0x10a   : > { %v6899_v51 = vpop.permute.xlu0 %1520 }
 0x10b   : > { %1684 = vrot.lane.b32.xlu1 %v8955_v3, %s6054_s28  ;;  %v5865_v3 = vld [vmem:[%s6109_s25 + $0x14] ss:$0 sps:$4 sm:$0x11]  }
 0x10c   : > { %1680 = vrot.lane.b32.xlu0 %v8956_v32, %s6054_s28  ;;  %v8975_v32 = vld [vmem:[#allocation16_spill] sm:$0xff] }
 0x10d   : > { %v6911_v4 = vpop.permute.xlu1 %1526  ;;  %5660 = vmatmul.mubr.msk.bf16.gmra.mxu0 %vm763_vm4, %v754_v44 }
 0x10e   : > { %v6914_v54 = vpop.permute.xlu0 %1524 }
 0x10f   : > { %1612 = vrot.lane.b32.xlu1 %v8957_v45, %s6053_s27  ;;  %v3517_v45 = vshrl.u32 %v5862_v55, 16 }
 0x110   : > { %1608 = vrot.lane.b32.xlu0 %v8958_v24, %s6053_s27  ;;  %v3521_v24 = vrot.slane %v3519_v15, 1 }
 0x111   : > { %v6920_v41 = vpop.permute.xlu1 %1530 }
 0x112   : > { %v6922_v8 = vpop.permute.xlu0 %1528 }
 0x113   : > { %1610 = vrot.lane.b32.xlu1 %v8959_v40, %s6053_s27  ;;  %v3524_v40 = vshll.u32 %v6990_v35, 16 }
 0x114   : > { %1686 = vrot.lane.b32.xlu0 %v8960_v28, %s6054_s28  ;;  %v8976_v28 = vld [vmem:[#allocation19_spill] sm:$0xff] }
 0x115   : > { %v6928_v57 = vpop.permute.xlu1 %1534 }
 0x116   : > { %v6930_v39 = vpop.permute.xlu0 %1532 }
 0x117   : > { %1614 = vrot.lane.b32.xlu1 %v6546_v10, %s6053_s27 }
 0x118   : > { %1690 = vrot.lane.b32.xlu0 %v6609_v21, %s6054_s28  ;;  %v8964_v21 = vld [vmem:[#allocation8_spill] sm:$0xff] }
 0x119   : > { %v6936_v46 = vpop.permute.xlu1 %1538 }
 0x11a   : > { %v6938_v36 = vpop.permute.xlu0 %1536 }
 0x11b   : > { %1692 = vrot.lane.b32.xlu1 %v8961_v2, %s6054_s28 }
 0x11c   : > { %1688 = vrot.lane.b32.xlu0 %v8962_v14, %s6054_s28  ;;  %v1643_v14 = vsel %vm347_vm0, %v1638_v6, %v1642_v20  ;;  %v3514_v6 = vshrl.u32 %v5865_v3, 16  ;;  %v7026_v20 = vld [vmem:[%s6109_s25 + $0x2c] ss:$0 sps:$4 sm:$0x11]  }
 0x11d   : > { %v6946_v34 = vpop.permute.xlu1 %1542 }
 0x11e   : > { %v6948_v53 = vpop.permute.xlu0 %1540 }
 0x11f   : > { %1620 = vrot.lane.b32.xlu1 %v8963_v59, %s6053_s27  ;;  %v3503_v59 = vshrl.u32 %v5864_v5, 16 }
 0x120   : > { %1616 = vrot.lane.b32.xlu0 %v8964_v21, %s6053_s27  ;;  %v3507_v21 = vrot.slane %v3505_v26, 1  ;;  %v3533_v26 = vshll.u32 %v5866_v18, 16 }
 0x121   : > { %v6954_v27 = vpop.permute.xlu1 %1546 }
 0x122   : > { %v6956_v10 = vpop.permute.xlu0 %1544 }
 0x123   : > { %1618 = vrot.lane.b32.xlu1 %v8965_v56, %s6053_s27  ;;  %v3510_v56 = vshll.u32 %v5865_v3, 16  ;;  %v3538_v3 = vshll.u32 %v7026_v20, 16 }
 0x124   : > { %1694 = vrot.lane.b32.xlu0 %v8966_v63, %s6054_s28 }
 0x125   : > { %v6962_v29 = vpop.permute.xlu1 %1550 }
 0x126   : > { %v6965_v47 = vpop.permute.xlu0 %1548 }
 0x127   : > { %1622 = vrot.lane.b32.xlu1 %v8967_v31, %s6053_s27  ;;  %v3522_v31 = vor.u32 %v3521_v24, %v3517_v45  ;;  %v7029_v45 = vld [vmem:[%s6109_s25 + $0x18] sm:$0xff]  }
 0x128   : > { %1698 = vrot.lane.b32.xlu0 %v8968_v1, %s6054_s28  ;;  %v3526_v1 = vrot.slane %v3524_v40, 1 }
 0x129   : > { %v6971_v9 = vpop.permute.xlu1 %1554 }
 0x12a   : > { %8969 = vst [vmem:[#allocation7_spill] sm:$0xff] %v6971_v9  ;;  %v6974_v25 = vpop.permute.xlu0 %1552  ;;  %v3527_v23 = vsel %vm347_vm0, %v3522_v31, %v3526_v1 }
 0x12b   : > { %1700 = vrot.lane.b32.xlu1 %v8970_v49, %s6054_s28  ;;  %v3508_v49 = vor.u32 %v3507_v21, %v3503_v59  ;;  %v2603_v59 = vshll.u32 %v7029_v45, 16 }
 0x12c   : > { %1696 = vrot.lane.b32.xlu0 %v8971_v60, %s6054_s28  ;;  %v3512_v60 = vrot.slane %v3510_v56, 1  ;;  %v5870_v56 = vld [vmem:[%s6109_s25 + $0x20] ss:$0 sps:$4 sm:$0x11]  }
 0x12d   : > { %v6983_v61 = vpop.permute.xlu1 %1558 }
 0x12e   : > { %8972 = vst [vmem:[#allocation3_spill] sm:$0xff] %v6983_v61  ;;  %v6986_v30 = vpop.permute.xlu0 %1556  ;;  %v3513_v15 = vsel %vm347_vm0, %v3508_v49, %v3512_v60  ;;  %v3540_v49 = vrot.slane %v3538_v3, 1  ;;  %v5872_v60 = vld [vmem:[%s6109_s25 + $0x14] ss:$0 sps:$4 sm:$0x11]   ;;  %v5950_v3 = vld [vmem:[%s6109_s25] sm:$0xff]  }
 0x12f   : > { %8973 = vst [vmem:[#allocation10_spill] sm:$0xff] %v6986_v30  ;;  %1628 = vrot.lane.b32.xlu1 %v5860_v0, %s6053_s27  ;;  %v1644_v0 = vshrl.u32 %v5861_v7, 16  ;;  %v1711_v9 = vsel %vm656_vm1, %v5950_v3, %v6806_v42 }
 0x130   : > { %1624 = vrot.lane.b32.xlu0 %v8974_v33, %s6053_s27 }
 0x131   : > { %v6994_v22 = vpop.permute.xlu1 %1570 }
 0x132   : > { %v6997_v44 = vpop.permute.xlu0 %1568 }
 0x133   : > { %1626 = vrot.lane.b32.xlu1 %v8975_v32, %s6053_s27 }
 0x134   : > { %1702 = vrot.lane.b32.xlu0 %v8976_v28, %s6054_s28  ;;  %v3531_v28 = vshrl.u32 %v5866_v18, 16 }
 0x135   : > { %v7004_v2 = vpop.permute.xlu1 %1574 }
 0x136   : > { %v1573_v63 = vpop.permute.xlu0 %1572 }
 0x137   : > { %1630 = vrot.lane.b32.xlu1 %v5861_v7, %s6053_s27  ;;  %v8977_v7 = vshrl.u32 %v8975_v32, 16  ;;  %v5871_v32 = vld [vmem:[%s6109_s25 + $0xc] sm:$0xff]  }
 0x138   : > { %1706 = vrot.lane.b32.xlu0 %v1643_v14, %s6054_s28  ;;  %v3535_v14 = vrot.slane %v3533_v26, 1  ;;  %v2605_v26 = vrot.slane %v2603_v59, 1  ;;  %v7065_v59 = vld [vmem:[%s8886_s1 + $0x18] sm:$0xff]  }
 0x139   : > { %v7009_v58 = vpop.permute.xlu1 %1578  ;;  %5731 = vmatprep.subr.bf16.mxu1 %v7065_v59 }
 0x13a   : > { %v7011_v38 = vpop.permute.xlu0 %1576  ;;  %v3536_v1 = vor.u32 %v3535_v14, %v3531_v28  ;;  %v2589_v28 = vshrl.u32 %v5871_v32, 16 }
 0x13b   : > { %1708 = vrot.lane.b32.xlu1 %v1644_v0, %s6054_s28  ;;  %v2591_v0 = vshll.u32 %v5871_v32, 16 }
 0x13c   : > { %1704 = vrot.lane.b32.xlu0 %v8977_v7, %s6054_s28  ;;  %v5949_v7 = vld [vmem:[%s6109_s25 + $0xc] sm:$0xff]   ;;  %v7072_v42 = vsel %vm347_vm0, %v3536_v1, %v3540_v49 }
 0x13d   : > { %v7019_v5 = vpop.permute.xlu1 %1582  ;;  %v2593_v14 = vrot.slane %v2591_v0, 1 }
 0x13e   : > { %v7022_v33 = vpop.permute.xlu0 %1580 }
 0x13f   : > { %3730 = vrot.lane.b32.xlu1 %v3527_v23, %s6052_s26 }
 0x140   : > { %3726 = vrot.lane.b32.xlu0 %v3513_v15, %s6052_s26  ;;  %v1715_v15 = vsel %vm656_vm1, %v5949_v7, %v6825_v48  ;;  %v7060_v7 = vld [vmem:[%s6109_s25 + $0x30] sm:$0xff]  }
 0x141   : > { %v7032_v24 = vpop.permute.xlu1 %1586  ;;  %v1779_v30 = vsel %vm689_vm2, %v1715_v15, %v1573_v63  ;;  %v1775_v63 = vsel %vm689_vm2, %v1711_v9, %v6997_v44 }
 0x142   : > { %v7035_v40 = vpop.permute.xlu0 %1584 }
 0x143   : > { %3728 = vrot.lane.b32.xlu1 %v3514_v6, %s6052_s26  ;;  %v3528_v6 = vshrl.u32 %v6990_v35, 16 }
 0x144   : > { %3798 = vrot.lane.b32.xlu0 %v5862_v55, %s6053_s27  ;;  %v2601_v55 = vshrl.u32 %v7029_v45, 16 }
 0x145   : > { %v7041_v21 = vpop.permute.xlu1 %1590 }
 0x146   : > { %v7044_v31 = vpop.permute.xlu0 %1588  ;;  %v2606_v3 = vor.u32 %v2605_v26, %v2601_v55  ;;  %v3547_v26 = vshll.u32 %v7060_v7, 16 }
 0x147   : > { %3876 = vrot.lane.b32.xlu1 %v3527_v23, %s6054_s28  ;;  %v2608_v23 = vshll.u32 %v5870_v56, 16 }
 0x148   : > { %3802 = vrot.lane.b32.xlu0 %v5866_v18, %s6053_s27 }
 0x149   : > { %v1651_v61 = vpop.permute.xlu1 %1650  ;;  %v2610_v49 = vrot.slane %v2608_v23, 1 }
 0x14a   : > { %v1843_v48 = vsel %vm722_vm3, %v1779_v30, %v1651_v61  ;;  %v1647_v56 = vpop.permute.xlu0 %1646  ;;  %v2596_v61 = vshll.u32 %v5872_v60, 16  ;;  %v5951_v30 = vld [vmem:[%s6109_s25 + $0x14] ss:$0 sps:$4 sm:$0x11]   ;;  %v2594_v60 = vor.u32 %v2593_v14, %v2589_v28  ;;  %v5953_v28 = vld [vmem:[%s6109_s25 + $0x24] sm:$0xff]  }
 0x14b   : > { %v1914_v18 = vshll.u32 %v1843_v48, 16  ;;  %3800 = vrot.lane.b32.xlu1 %v6990_v35, %s6053_s27  ;;  %v1717_v32 = vsel %vm656_vm1, %v5951_v30, %v6820_v52  ;;  %v1839_v0 = vsel %vm722_vm3, %v1775_v63, %v1647_v56  ;;  %v5952_v52 = vld [vmem:[%s6109_s25 + $0x8] ss:$0 sps:$4 sm:$0x11]   ;;  %v1912_v14 = vshrl.u32 %v1843_v48, 16 }
 0x14c   : > { %v1781_v9 = vsel %vm689_vm2, %v1717_v32, %v7004_v2  ;;  %v1904_v44 = vshll.u32 %v1839_v0, 16  ;;  %3732 = vrot.lane.b32.xlu0 %v3528_v6, %s6052_s26  ;;  %v1713_v63 = vsel %vm656_vm1, %v5952_v52, %v6801_v37  ;;  %v2598_v23 = vrot.slane %v2596_v61, 1 }
 0x14d   : > { %v1653_v1 = vpop.permute.xlu1 %1652  ;;  %v1916_v56 = vrot.slane %v1914_v18, 1  ;;  %v1777_v2 = vsel %vm689_vm2, %v1713_v63, %v6994_v22  ;;  %v1723_v37 = vsel %vm656_vm1, %v5953_v28, %v6857_v17  ;;  %v5954_v63 = vld [vmem:[%s6109_s25 + $0x18] sm:$0xff]  }
 0x14e   : > { %v1845_v55 = vsel %vm722_vm3, %v1781_v9, %v1653_v1  ;;  %v1906_v30 = vrot.slane %v1904_v44, 1  ;;  %v1649_v15 = vpop.permute.xlu0 %1648  ;;  %v3545_v9 = vshrl.u32 %v7060_v7, 16  ;;  %v1787_v22 = vsel %vm689_vm2, %v1723_v37, %v7022_v33 }
 0x14f   : > { %v1918_v32 = vshll.u32 %v1845_v55, 16  ;;  %3804 = vrot.lane.b32.xlu1 %v7026_v20, %s6053_s27  ;;  %v1841_v18 = vsel %vm722_vm3, %v1777_v2, %v1649_v15  ;;  %v1902_v44 = vshrl.u32 %v1839_v0, 16  ;;  %v1719_v17 = vsel %vm656_vm1, %v5954_v63, %v6836_v62  ;;  %v7108_v55 = vld [vmem:[%s6109_s25 + $0x38] ss:$0 sps:$4 sm:$0x11]  }
 0x150   : > { %v1908_v52 = vshll.u32 %v1841_v18, 16  ;;  %3880 = vrot.lane.b32.xlu0 %v7072_v42, %s6054_s28  ;;  %v1917_v48 = vor.u32 %v1916_v56, %v1912_v14  ;;  %v3549_v2 = vrot.slane %v3547_v26, 1  ;;  %v1783_v33 = vsel %vm689_vm2, %v1719_v17, %v7011_v38  ;;  %v5955_v62 = vld [vmem:[%s6109_s25 + $0x2c] ss:$0 sps:$4 sm:$0x11]   ;;  %v7124_v38 = vld [vmem:[%s6109_s25 + $0x24] sm:$0xff]  }
 0x151   : > { %v1920_v1 = vrot.slane %v1918_v32, 1  ;;  %v1659_v61 = vpop.permute.xlu1 %1658  ;;  %v1907_v0 = vor.u32 %v1906_v30, %v1902_v44  ;;  %v8978_v18 = vshrl.u32 %v7026_v20, 16  ;;  %v1725_v56 = vsel %vm656_vm1, %v5955_v62, %v6852_v16 }
 0x152   : > { %v1851_v15 = vsel %vm722_vm3, %v1787_v22, %v1659_v61  ;;  %v1910_v32 = vrot.slane %v1908_v52, 1  ;;  %v1655_v37 = vpop.permute.xlu0 %1654  ;;  %v7121_v22 = vsel %vm347_vm0, %v2606_v3, %v2610_v49  ;;  %v1789_v30 = vsel %vm689_vm2, %v1725_v56, %v7019_v5 }
 0x153   : > { %v1934_v28 = vshll.u32 %v1851_v15, 16  ;;  %3882 = vrot.lane.b32.xlu1 %v8978_v18, %s6054_s28  ;;  %v1847_v14 = vsel %vm722_vm3, %v1783_v33, %v1655_v37  ;;  %v1921_v26 = vsel %vm347_vm0, %v1917_v48, %v1920_v1  ;;  %v2599_v61 = vsel %vm347_vm0, %v2594_v60, %v2598_v23  ;;  %v5956_v1 = vld [vmem:[%s6109_s25 + $0x20] ss:$0 sps:$4 sm:$0x11]  }
 0x154   : > { %v1924_v44 = vshll.u32 %v1847_v14, 16  ;;  %3878 = vrot.lane.b32.xlu0 %v3528_v6, %s6054_s28  ;;  %v1911_v52 = vsel %vm347_vm0, %v1907_v0, %v1910_v32  ;;  %v1721_v3 = vsel %vm656_vm1, %v5956_v1, %v6831_v43  ;;  %v3552_v63 = vshll.u32 %v7108_v55, 16  ;;  %v5957_v60 = vld [vmem:[%s6109_s25 + $0x3c] sm:$0xff]   ;;  %v5902_v32 = vld [vmem:[%s8886_s1 + $0x10] sm:$0xff]  }
 0x155   : > { %v1661_v16 = vpop.permute.xlu1 %1660  ;;  %v1936_v49 = vrot.slane %v1934_v28, 1  ;;  %5665 = vmatprep.mubr.msk.bf16.mxu1 %vm763_vm4, %v1911_v52  ;;  %v1785_v35 = vsel %vm689_vm2, %v1721_v3, %v7009_v58  ;;  %v3550_v43 = vor.u32 %v3549_v2, %v3545_v9  ;;  %v1731_v23 = vsel %vm656_vm1, %v5957_v60, %v6888_v11  ;;  %5697 = vmatprep.subr.bf16.mxu0 %v5902_v32 }
 0x156   : > { %v1853_v5 = vsel %vm722_vm3, %v1789_v30, %v1661_v16  ;;  %v1926_v6 = vrot.slane %v1924_v44, 1  ;;  %5666 = vmatmul.mubr.msk.bf16.vlgmr.msra.gmra.mxu1 %vm763_vm4, %v1921_v26  ;;  %v1657_v48 = vpop.permute.xlu0 %1656  ;;  %v1932_v33 = vshrl.u32 %v1851_v15, 16  ;;  %v2615_v58 = vshll.u32 %v7124_v38, 16  ;;  %v5958_v15 = vld [vmem:[%s6109_s25 + $0x30] sm:$0xff]   ;;  %5698 = vmatpush3.bf16.msra.mxu0 %v5902_v32 }
 0x157   : > { %v1938_v17 = vshll.u32 %v1853_v5, 16  ;;  %2782 = vrot.lane.b32.xlu1 %v7121_v22, %s6052_s26  ;;  %v1849_v0 = vsel %vm722_vm3, %v1785_v35, %v1657_v48  ;;  %5732 = vmatpush3.bf16.msra.mxu1 %v7065_v59  ;;  %v1795_v28 = vsel %vm689_vm2, %v1731_v23, %v7044_v31  ;;  %v1922_v9 = vshrl.u32 %v1847_v14, 16  ;;  %v5876_v26 = vld [vmem:[%s6109_s25 + $0x2c] ss:$0 sps:$4 sm:$0x11]  }
 0x158   : > { %v1928_v37 = vshll.u32 %v1849_v0, 16  ;;  %2780 = vrot.lane.b32.xlu0 %v2599_v61, %s6052_s26  ;;  %v1727_v18 = vsel %vm656_vm1, %v5958_v15, %v6868_v13  ;;  %v1937_v62 = vor.u32 %v1936_v49, %v1932_v33  ;;  %v3554_v56 = vrot.slane %v3552_v63, 1  ;;  %v5959_v16 = vld [vmem:[%s6109_s25 + $0x44] ss:$0 sps:$4 sm:$0x11]  }
 0x159   : > { %v1940_v2 = vrot.slane %v1938_v17, 1  ;;  %v1667_v11 = vpop.permute.xlu1 %1666  ;;  %v1791_v31 = vsel %vm689_vm2, %v1727_v18, %v7035_v40  ;;  %v1927_v14 = vor.u32 %v1926_v6, %v1922_v9  ;;  %v1733_v13 = vsel %vm656_vm1, %v5959_v16, %v6883_v50  ;;  %v5960_v35 = vld [vmem:[%s6109_s25 + $0x38] ss:$0 sps:$4 sm:$0x11]  }
 0x15a   : > { %v1859_v59 = vsel %vm722_vm3, %v1795_v28, %v1667_v11  ;;  %v1930_v30 = vrot.slane %v1928_v37, 1  ;;  %v1663_v52 = vpop.permute.xlu0 %1662  ;;  %v2613_v3 = vshrl.u32 %v7124_v38, 16  ;;  %v1797_v40 = vsel %vm689_vm2, %v1733_v13, %v7041_v21 }
 0x15b   : > { %v1954_v44 = vshll.u32 %v1859_v59, 16  ;;  %3734 = vrot.lane.b32.xlu1 %v7072_v42, %s6052_s26  ;;  %v1855_v61 = vsel %vm722_vm3, %v1791_v31, %v1663_v52  ;;  %v1941_v1 = vsel %vm347_vm0, %v1937_v62, %v1940_v2  ;;  %v2617_v63 = vrot.slane %v2615_v58, 1 }
 0x15c   : > { %v1944_v49 = vshll.u32 %v1855_v61, 16  ;;  %2817 = vrot.lane.b32.xlu0 %v7029_v45, %s6053_s27  ;;  %v1931_v42 = vsel %vm347_vm0, %v1927_v14, %v1930_v30  ;;  %v1729_v50 = vsel %vm656_vm1, %v5960_v35, %v6863_v12  ;;  %v2620_v48 = vshll.u32 %v5876_v26, 16 }
 0x15d   : > { %v1669_v5 = vpop.permute.xlu1 %1668  ;;  %v1956_v6 = vrot.slane %v1954_v44, 1  ;;  %5669 = vmatprep.mubr.msk.bf16.mxu1 %vm763_vm4, %v1931_v42  ;;  %v1793_v21 = vsel %vm689_vm2, %v1729_v50, %v7032_v24  ;;  %v1952_v33 = vshrl.u32 %v1859_v59, 16  ;;  %v1942_v0 = vshrl.u32 %v1855_v61, 16  ;;  %v5877_v24 = vld [vmem:[%s6109_s25 + $0x3c] sm:$0xff]  }
 0x15e   : > { %v1861_v17 = vsel %vm722_vm3, %v1797_v40, %v1669_v5  ;;  %v1946_v60 = vrot.slane %v1944_v49, 1  ;;  %5670 = vmatmul.mubr.msk.bf16.gmra.mxu1 %vm763_vm4, %v1941_v1  ;;  %v1665_v23 = vpop.permute.xlu0 %1664  ;;  %v3555_v2 = vsel %vm347_vm0, %v3550_v43, %v3554_v56  ;;  %v2618_v37 = vor.u32 %v2617_v63, %v2613_v3  ;;  %v5961_v43 = vld [vmem:[%s6109_s25 + $0x48] sm:$0xff]   ;;  %v5962_v1 = vld [vmem:[%s6109_s25 + $0x54] sm:$0xff]   ;;  %v5963_v5 = vld [vmem:[%s6109_s25 + $0x5c] ss:$0 sps:$4 sm:$0x11]  }
 0x15f   : > { %v1958_v45 = vshll.u32 %v1861_v17, 16  ;;  %2864 = vrot.lane.b32.xlu1 %v7121_v22, %s6054_s28  ;;  %v1857_v12 = vsel %vm722_vm3, %v1793_v21, %v1665_v23  ;;  %v1957_v9 = vor.u32 %v1956_v6, %v1952_v33  ;;  %v2622_v11 = vrot.slane %v2620_v48, 1  ;;  %v5880_v50 = vld [vmem:[%s6109_s25 + $0x38] ss:$0 sps:$4 sm:$0x11]  }
 0x160   : > { %v1948_v32 = vshll.u32 %v1857_v12, 16  ;;  %2819 = vrot.lane.b32.xlu0 %v7124_v38, %s6053_s27  ;;  %v1947_v15 = vor.u32 %v1946_v60, %v1942_v0  ;;  %v3561_v26 = vshll.u32 %v5877_v24, 16  ;;  %v1735_v56 = vsel %vm656_vm1, %v5961_v43, %v6899_v51  ;;  %v7213_v51 = vld [vmem:[%s6109_s25 + $0x30] sm:$0xff]  }
 0x161   : > { %v1960_v58 = vrot.slane %v1958_v45, 1  ;;  %v1597_v28 = vpop.permute.xlu1 %1596  ;;  %v7201_v31 = vsel %vm347_vm0, %v2618_v37, %v2622_v11  ;;  %v8979_v44 = vshrl.u32 %v7026_v20, 16  ;;  %v3559_v13 = vshrl.u32 %v5877_v24, 16  ;;  %v5964_v45 = vld [vmem:[%s6109_s25 + $0x50] ss:$0 sps:$4 sm:$0x11]  }
 0x162   : > { %v1950_v22 = vrot.slane %v1948_v32, 1  ;;  %v1593_v18 = vpop.permute.xlu0 %1592  ;;  %v3563_v61 = vrot.slane %v3561_v26, 1  ;;  %v1739_v3 = vsel %vm656_vm1, %v5962_v1, %v6914_v54  ;;  %v1741_v63 = vsel %vm656_vm1, %v5963_v5, %v6911_v4  ;;  %v5966_v5 = vld [vmem:[%s6109_s25 + $0x6c] sm:$0xff]  }
 0x163   : > { %3806 = vrot.lane.b32.xlu1 %v7060_v7, %s6053_s27  ;;  %v1961_v62 = vsel %vm347_vm0, %v1957_v9, %v1960_v58  ;;  %v7204_v7 = vld [vmem:[%s6109_s25 + $0x44] ss:$0 sps:$4 sm:$0x11]   ;;  %v1799_v14 = vsel %vm689_vm2, %v1735_v56, %v1593_v18  ;;  %v1803_v20 = vsel %vm689_vm2, %v1739_v3, %v1597_v28  ;;  %v2627_v6 = vshll.u32 %v7213_v51, 16 }
 0x164   : > { %3738 = vrot.lane.b32.xlu0 %v3555_v2, %s6052_s26  ;;  %v1951_v38 = vsel %vm347_vm0, %v1947_v15, %v1950_v22  ;;  %v3566_v40 = vshll.u32 %v7204_v7, 16  ;;  %v3556_v21 = vshrl.u32 %v7108_v55, 16  ;;  %v3564_v60 = vor.u32 %v3563_v61, %v3559_v13  ;;  %v5965_v13 = vld [vmem:[%s6109_s25 + $0x60] sm:$0xff]  }
 0x165   : > { %v1595_v59 = vpop.permute.xlu1 %1594  ;;  %5673 = vmatprep.mubr.msk.bf16.mxu1 %vm763_vm4, %v1951_v38  ;;  %v1737_v23 = vsel %vm656_vm1, %v5964_v45, %v6894_v19  ;;  %v2625_v12 = vshrl.u32 %v7213_v51, 16  ;;  %v2629_v37 = vrot.slane %v2627_v6, 1  ;;  %v2632_v11 = vshll.u32 %v5880_v50, 16 }
 0x166   : > { %5674 = vmatmul.mubr.msk.bf16.gmra.mxu1 %vm763_vm4, %v1961_v62  ;;  %v1671_v30 = vpop.permute.xlu0 %1670  ;;  %v3568_v33 = vrot.slane %v3566_v40, 1  ;;  %v1801_v0 = vsel %vm689_vm2, %v1737_v23, %v1595_v59  ;;  %v1743_v61 = vsel %vm656_vm1, %v5965_v13, %v6922_v8  ;;  %v5885_v13 = vld [vmem:[%s6109_s25 + $0x54] sm:$0xff]  }
 0x167   : > { %3736 = vrot.lane.b32.xlu1 %v8979_v44, %s6052_s26  ;;  %v1863_v52 = vsel %vm722_vm3, %v1799_v14, %v1671_v30  ;;  %v2630_v14 = vor.u32 %v2629_v37, %v2625_v12  ;;  %v2634_v30 = vrot.slane %v2632_v11, 1  ;;  %v7248_v44 = vld [vmem:[%s6109_s25 + $0x48] sm:$0xff]  }
 0x168   : > { %2866 = vrot.lane.b32.xlu0 %v7201_v31, %s6054_s28  ;;  %v1964_v49 = vshll.u32 %v1863_v52, 16  ;;  %v1962_v19 = vshrl.u32 %v1863_v52, 16  ;;  %v3569_v38 = vsel %vm347_vm0, %v3564_v60, %v3568_v33  ;;  %v3573_v60 = vshrl.u32 %v7248_v44, 16  ;;  %v5968_v12 = vld [vmem:[%s6109_s25 + $0x68] ss:$0 sps:$4 sm:$0x11]  }
 0x169   : > { %v1599_v16 = vpop.permute.xlu1 %1598 }
 0x16a   : > { %v1675_v42 = vpop.permute.xlu0 %1674  ;;  %v1805_v54 = vsel %vm689_vm2, %v1741_v63, %v1599_v16  ;;  %v1966_v58 = vrot.slane %v1964_v49, 1  ;;  %v3575_v49 = vshll.u32 %v7248_v44, 16  ;;  %v1747_v63 = vsel %vm656_vm1, %v5966_v5, %v6930_v39 }
 0x16b   : > { %3884 = vrot.lane.b32.xlu1 %v3555_v2, %s6054_s28  ;;  %v1867_v35 = vsel %vm722_vm3, %v1803_v20, %v1675_v42  ;;  %v2635_v20 = vsel %vm347_vm0, %v2630_v14, %v2634_v30  ;;  %v7266_v42 = vld [vmem:[%s6109_s25 + $0x50] ss:$0 sps:$4 sm:$0x11]  }
 0x16c   : > { %v1974_v17 = vshll.u32 %v1867_v35, 16  ;;  %3810 = vrot.lane.b32.xlu0 %v5877_v24, %s6053_s27  ;;  %v1972_v24 = vshrl.u32 %v1867_v35, 16  ;;  %v1967_v59 = vor.u32 %v1966_v58, %v1962_v19  ;;  %v5881_v35 = vld [vmem:[%s6109_s25 + $0x3c] sm:$0xff]   ;;  %v3577_v45 = vrot.slane %v3575_v49, 1 }
 0x16d   : > { %v1677_v48 = vpop.permute.xlu1 %1676  ;;  %v3580_v33 = vshll.u32 %v7266_v42, 16  ;;  %v5884_v58 = vld [vmem:[%s6109_s25 + $0x44] ss:$0 sps:$4 sm:$0x11]  }
 0x16e   : > { %v1869_v4 = vsel %vm722_vm3, %v1805_v54, %v1677_v48  ;;  %v1976_v32 = vrot.slane %v1974_v17, 1  ;;  %v1673_v9 = vpop.permute.xlu0 %1672  ;;  %v5967_v17 = vld [vmem:[%s6109_s25 + $0x74] ss:$0 sps:$4 sm:$0x11]   ;;  %v3578_v19 = vor.u32 %v3577_v45, %v3573_v60 }
 0x16f   : > { %v1978_v28 = vshll.u32 %v1869_v4, 16  ;;  %3808 = vrot.lane.b32.xlu1 %v7108_v55, %s6053_s27  ;;  %v1865_v2 = vsel %vm722_vm3, %v1801_v0, %v1673_v9  ;;  %v3570_v55 = vshrl.u32 %v7204_v7, 16  ;;  %v1749_v48 = vsel %vm656_vm1, %v5967_v17, %v6928_v57  ;;  %v7319_v17 = vld [vmem:[%s6109_s25 + $0x5c] ss:$0 sps:$4 sm:$0x11]  }
 0x170   : > { %v1968_v22 = vshll.u32 %v1865_v2, 16  ;;  %3740 = vrot.lane.b32.xlu0 %v3556_v21, %s6052_s26  ;;  %v1977_v62 = vor.u32 %v1976_v32, %v1972_v24  ;;  %v1745_v0 = vsel %vm656_vm1, %v5968_v12, %v6920_v41  ;;  %v2639_v32 = vshll.u32 %v5881_v35, 16  ;;  %v5971_v60 = vld [vmem:[%s6109_s25 + $0x8c] ss:$0 sps:$4 sm:$0x11]  }
 0x171   : > { %v1980_v15 = vrot.slane %v1978_v28, 1  ;;  %v1605_v18 = vpop.permute.xlu1 %1604  ;;  %v1757_v45 = vsel %vm656_vm1, %v5971_v60, %v6946_v34  ;;  %v7392_v60 = vld [vmem:[%s6109_s25 + $0x68] ss:$0 sps:$4 sm:$0x11]  }
 0x172   : > { %v1970_v26 = vrot.slane %v1968_v22, 1  ;;  %v1601_v43 = vpop.permute.xlu0 %1600  ;;  %v1811_v50 = vsel %vm689_vm2, %v1747_v63, %v1605_v18 }
 0x173   : > { %3812 = vrot.lane.b32.xlu1 %v7204_v7, %s6053_s27  ;;  %v1981_v56 = vsel %vm347_vm0, %v1977_v62, %v1980_v15  ;;  %v1807_v1 = vsel %vm689_vm2, %v1743_v61, %v1601_v43  ;;  %v3582_v62 = vrot.slane %v3580_v33, 1  ;;  %v2641_v43 = vrot.slane %v2639_v32, 1  ;;  %v5969_v61 = vld [vmem:[%s6109_s25 + $0x78] sm:$0xff]   ;;  %v5972_v7 = vld [vmem:[%s6109_s25 + $0x80] ss:$0 sps:$4 sm:$0x11]  }
 0x174   : > { %3888 = vrot.lane.b32.xlu0 %v3569_v38, %s6054_s28  ;;  %v1971_v52 = vsel %vm347_vm0, %v1967_v59, %v1970_v26  ;;  %v2637_v26 = vshrl.u32 %v5881_v35, 16 }
 0x175   : > { %v1603_v16 = vpop.permute.xlu1 %1602  ;;  %5677 = vmatprep.mubr.msk.bf16.mxu1 %vm763_vm4, %v1971_v52 }
 0x176   : > { %5678 = vmatmul.mubr.msk.bf16.gmra.mxu1 %vm763_vm4, %v1981_v56  ;;  %v1679_v3 = vpop.permute.xlu0 %1678  ;;  %v1809_v28 = vsel %vm689_vm2, %v1745_v0, %v1603_v16  ;;  %v2644_v56 = vshll.u32 %v5884_v58, 16  ;;  %v3587_v0 = vshrl.u32 %v5885_v13, 16  ;;  %v3594_v58 = vshll.u32 %v7319_v17, 16 }
 0x177   : > { %3890 = vrot.lane.b32.xlu1 %v3570_v55, %s6054_s28  ;;  %v1871_v40 = vsel %vm722_vm3, %v1807_v1, %v1679_v3  ;;  %v1751_v1 = vsel %vm656_vm1, %v5969_v61, %v6938_v36  ;;  %v3583_v3 = vsel %vm347_vm0, %v3578_v19, %v3582_v62  ;;  %v7309_v36 = vld [vmem:[%s6109_s25 + $0x48] sm:$0xff]   ;;  %v3584_v62 = vshrl.u32 %v7266_v42, 16  ;;  %v7358_v61 = vld [vmem:[%s6109_s25 + $0x54] sm:$0xff]  }
 0x178   : > { %3886 = vrot.lane.b32.xlu0 %v3556_v21, %s6054_s28  ;;  %v1984_v6 = vshll.u32 %v1871_v40, 16  ;;  %v1982_v15 = vshrl.u32 %v1871_v40, 16  ;;  %v2642_v40 = vor.u32 %v2641_v43, %v2637_v26  ;;  %v2649_v32 = vshrl.u32 %v7309_v36, 16 }
 0x179   : > { %v1607_v8 = vpop.permute.xlu1 %1606  ;;  %v3596_v43 = vrot.slane %v3594_v58, 1 }
 0x17a   : > { %v1683_v54 = vpop.permute.xlu0 %1682  ;;  %v1813_v39 = vsel %vm689_vm2, %v1749_v48, %v1607_v8  ;;  %v1986_v9 = vrot.slane %v1984_v6, 1 }
 0x17b   : > { %2786 = vrot.lane.b32.xlu1 %v2635_v20, %s6052_s26  ;;  %v1875_v21 = vsel %vm722_vm3, %v1811_v50, %v1683_v54  ;;  %v5970_v50 = vld [vmem:[%s6109_s25 + $0x84] sm:$0xff]  }
 0x17c   : > { %v1994_v23 = vshll.u32 %v1875_v21, 16  ;;  %2784 = vrot.lane.b32.xlu0 %v7201_v31, %s6052_s26  ;;  %v1992_v31 = vshrl.u32 %v1875_v21, 16  ;;  %v1987_v14 = vor.u32 %v1986_v9, %v1982_v15  ;;  %v1755_v6 = vsel %vm656_vm1, %v5970_v50, %v6948_v53 }
 0x17d   : > { %v1685_v4 = vpop.permute.xlu1 %1684 }
 0x17e   : > { %v1877_v57 = vsel %vm722_vm3, %v1813_v39, %v1685_v4  ;;  %v1996_v24 = vrot.slane %v1994_v23, 1  ;;  %v1681_v37 = vpop.permute.xlu0 %1680  ;;  %v5888_v39 = vld [vmem:[%s6109_s25 + $0x50] ss:$0 sps:$4 sm:$0x11]   ;;  %v2651_v23 = vshll.u32 %v7309_v36, 16 }
 0x17f   : > { %v1998_v2 = vshll.u32 %v1877_v57, 16  ;;  %3742 = vrot.lane.b32.xlu1 %v3569_v38, %s6052_s26  ;;  %v1873_v11 = vsel %vm722_vm3, %v1809_v28, %v1681_v37 }
 0x180   : > { %v1988_v18 = vshll.u32 %v1873_v11, 16  ;;  %2821 = vrot.lane.b32.xlu0 %v7213_v51, %s6053_s27  ;;  %v1997_v59 = vor.u32 %v1996_v24, %v1992_v31  ;;  %v2653_v19 = vrot.slane %v2651_v23, 1  ;;  %v5975_v23 = vld [vmem:[%s6109_s25 + $0xa4] ss:$0 sps:$4 sm:$0x11]  }
 0x181   : > { %v2000_v22 = vrot.slane %v1998_v2, 1  ;;  %v1613_v41 = vpop.permute.xlu1 %1612 }
 0x182   : > { %v1990_v38 = vrot.slane %v1988_v18, 1  ;;  %v1609_v30 = vpop.permute.xlu0 %1608 }
 0x183   : > { %2868 = vrot.lane.b32.xlu1 %v2635_v20, %s6054_s28  ;;  %v2001_v52 = vsel %vm347_vm0, %v1997_v59, %v2000_v22  ;;  %v2646_v20 = vrot.slane %v2644_v56, 1  ;;  %v1815_v49 = vsel %vm689_vm2, %v1751_v1, %v1609_v30  ;;  %v7346_v56 = vld [vmem:[%s6109_s25 + $0x60] sm:$0xff]  }
 0x184   : > { %2823 = vrot.lane.b32.xlu0 %v5881_v35, %s6053_s27  ;;  %v1991_v16 = vsel %vm347_vm0, %v1987_v14, %v1990_v38  ;;  %v3589_v35 = vshll.u32 %v5885_v13, 16 }
 0x185   : > { %v1611_v51 = vpop.permute.xlu1 %1610  ;;  %5681 = vmatprep.mubr.msk.bf16.mxu1 %vm763_vm4, %v1991_v16  ;;  %v7316_v54 = vsel %vm347_vm0, %v2642_v40, %v2646_v20  ;;  %v5973_v40 = vld [vmem:[%s6109_s25 + $0x90] sm:$0xff]  }
 0x186   : > { %5682 = vmatmul.mubr.msk.bf16.gmra.mxu1 %vm763_vm4, %v2001_v52  ;;  %v1687_v8 = vpop.permute.xlu0 %1686  ;;  %v3591_v57 = vrot.slane %v3589_v35, 1  ;;  %v7354_v52 = vld [vmem:[%s8887_s2] ss:$0 sm:$0xff]  ;;  %v1759_v20 = vsel %vm656_vm1, %v5973_v40, %v6956_v10 }
 0x187   : > { %3814 = vrot.lane.b32.xlu1 %v7248_v44, %s6053_s27  ;;  %v1879_v5 = vsel %vm722_vm3, %v1815_v49, %v1687_v8  ;;  %v1819_v44 = vsel %vm689_vm2, %v1755_v6, %v1613_v41  ;;  %v7370_v49 = vld [vmem:[%s8887_s2 + $0x1] ss:$0 sm:$0xff]  ;;  %v3598_v6 = vshrl.u32 %v7319_v17, 16 }
 0x188   : > { %3746 = vrot.lane.b32.xlu0 %v3583_v3, %s6052_s26  ;;  %v2004_v48 = vshll.u32 %v1879_v5, 16  ;;  %v2002_v15 = vshrl.u32 %v1879_v5, 16  ;;  %v3592_v26 = vor.u32 %v3591_v57, %v3587_v0  ;;  %v5976_v57 = vld [vmem:[%s6109_s25 + $0x9c] sm:$0xff]  }
 0x189   : > { %v1615_v63 = vpop.permute.xlu1 %1614 }
 0x18a   : > { %v1691_v21 = vpop.permute.xlu0 %1690  ;;  %v1821_v4 = vsel %vm689_vm2, %v1757_v45, %v1615_v63  ;;  %v2006_v9 = vrot.slane %v2004_v48, 1  ;;  %v7374_v5 = vsel %vm347_vm0, %v3592_v26, %v3596_v43  ;;  %v3603_v63 = vshll.u32 %v7346_v56, 16 }
 0x18b   : > { %3744 = vrot.lane.b32.xlu1 %v3570_v55, %s6052_s26  ;;  %v1883_v53 = vsel %vm722_vm3, %v1819_v44, %v1691_v21  ;;  %v1753_v55 = vsel %vm656_vm1, %v5972_v7, %v6936_v46  ;;  %v2656_v46 = vshll.u32 %v5888_v39, 16  ;;  %v2663_v45 = vshll.u32 %v7358_v61, 16 }
 0x18c   : > { %v2014_v33 = vshll.u32 %v1883_v53, 16  ;;  %2870 = vrot.lane.b32.xlu0 %v7316_v54, %s6054_s28  ;;  %v1817_v28 = vsel %vm689_vm2, %v1753_v55, %v1611_v51  ;;  %v2012_v31 = vshrl.u32 %v1883_v53, 16  ;;  %v2007_v14 = vor.u32 %v2006_v9, %v2002_v15  ;;  %v5974_v53 = vld [vmem:[%s6109_s25 + $0x98] ss:$0 sps:$4 sm:$0x11]  }
 0x18d   : > { %v1693_v12 = vpop.permute.xlu1 %1692  ;;  %v2654_v51 = vor.u32 %v2653_v19, %v2649_v32  ;;  %v1761_v39 = vsel %vm656_vm1, %v5974_v53, %v6954_v27  ;;  %v1763_v7 = vsel %vm656_vm1, %v5976_v57, %v6965_v47  ;;  %v3605_v58 = vrot.slane %v3603_v63, 1 }
 0x18e   : > { %v1885_v34 = vsel %vm722_vm3, %v1821_v4, %v1693_v12  ;;  %v2016_v24 = vrot.slane %v2014_v33, 1  ;;  %v1689_v37 = vpop.permute.xlu0 %1688  ;;  %v1765_v4 = vsel %vm656_vm1, %v5975_v23, %v6962_v29 }
 0x18f   : > { %v2018_v2 = vshll.u32 %v1885_v34, 16  ;;  %3892 = vrot.lane.b32.xlu1 %v3583_v3, %s6054_s28  ;;  %v1881_v11 = vsel %vm722_vm3, %v1817_v28, %v1689_v37  ;;  %v3601_v34 = vshrl.u32 %v7346_v56, 16  ;;  %v3608_v37 = vshll.u32 %v7392_v60, 16 }
 0x190   : > { %v2008_v18 = vshll.u32 %v1881_v11, 16  ;;  %3818 = vrot.lane.b32.xlu0 %v5885_v13, %s6053_s27  ;;  %v2017_v59 = vor.u32 %v2016_v24, %v2012_v31  ;;  %v2658_v13 = vrot.slane %v2656_v46, 1  ;;  %v2661_v31 = vshrl.u32 %v7358_v61, 16 }
 0x191   : > { %v2020_v22 = vrot.slane %v2018_v2, 1  ;;  %v1621_v41 = vpop.permute.xlu1 %1620  ;;  %v2665_v11 = vrot.slane %v2663_v45, 1 }
 0x192   : > { %v2010_v38 = vrot.slane %v2008_v18, 1  ;;  %v1617_v30 = vpop.permute.xlu0 %1616  ;;  %v7389_v21 = vsel %vm347_vm0, %v2654_v51, %v2658_v13  ;;  %v1827_v29 = vsel %vm689_vm2, %v1763_v7, %v1621_v41  ;;  %v3606_v7 = vor.u32 %v3605_v58, %v3601_v34 }
 0x193   : > { %3816 = vrot.lane.b32.xlu1 %v7266_v42, %s6053_s27  ;;  %v2021_v16 = vsel %vm347_vm0, %v2017_v59, %v2020_v22  ;;  %v1823_v35 = vsel %vm689_vm2, %v1759_v20, %v1617_v30  ;;  %v2666_v58 = vor.u32 %v2665_v11, %v2661_v31 }
 0x194   : > { %3748 = vrot.lane.b32.xlu0 %v3584_v62, %s6052_s26  ;;  %v2011_v1 = vsel %vm347_vm0, %v2007_v14, %v2010_v38  ;;  %v5892_v38 = vld [vmem:[%s6109_s25 + $0x5c] ss:$0 sps:$4 sm:$0x11]  }
 0x195   : > { %v1619_v3 = vpop.permute.xlu1 %1618  ;;  %v5633_v8 = vpop.f32.mrf.mxu0  ;;  %5685 = vmatprep.mubr.msk.bf16.mxu1 %vm763_vm4, %v2011_v1 }
 0x196   : > { %v963_v10 = vmul.f32 %v5633_v8, %v7354_v52  ;;  %5686 = vmatmul.mubr.msk.bf16.gmra.mxu1 %vm763_vm4, %v2021_v16  ;;  %v1695_v50 = vpop.permute.xlu0 %1694  ;;  %v1825_v19 = vsel %vm689_vm2, %v1761_v39, %v1619_v3  ;;  %v2668_v39 = vshll.u32 %v5892_v38, 16 }
 0x197   : > { %3820 = vrot.lane.b32.xlu1 %v7319_v17, %s6053_s27  ;;  %v7386_v44 = vsel %vm722_vm3, %v1823_v35, %v1695_v50  ;;  %v830_v48 = vpop.f32.mrf.mxu0 }
 0x198   : > { %v999_v33 = vadd.f32 %v7370_v49, %v963_v10  ;;  %v961_v12 = vmul.f32 %v7354_v52, %v830_v48  ;;  %3896 = vrot.lane.b32.xlu0 %v7374_v5, %s6054_s28  ;;  %v2024_v55 = vshll.u32 %v7386_v44, 16  ;;  %v2022_v30 = vshrl.u32 %v7386_v44, 16 }
 0x199   : > { %v1623_v0 = vpop.permute.xlu1 %1622  ;;  %v5634_v27 = vpop.f32.mrf.mxu0 }
 0x19a   : > { %v1031_v32 = vmax.f32 %v999_v33, 0.0  ;;  %v997_v28 = vadd.f32 %v7370_v49, %v961_v12  ;;  %v964_v9 = vmul.f32 %v5634_v27, %v7354_v52  ;;  %v1699_v24 = vpop.permute.xlu0 %1698  ;;  %v1829_v22 = vsel %vm689_vm2, %v1765_v4, %v1623_v0 }
 0x19b   : > { %3898 = vrot.lane.b32.xlu1 %v3598_v6, %s6054_s28  ;;  %v1891_v47 = vsel %vm722_vm3, %v1827_v29, %v1699_v24  ;;  %v833_v2 = vpop.f32.mrf.mxu0  ;;  %v2026_v41 = vrot.slane %v2024_v55, 1  ;;  %v3610_v55 = vrot.slane %v3608_v37, 1 }
 0x19c   : > { %1063 = vst.msk [vmem:[%s7420_s21 + $0x10] sm:$0xff] %vm689_vm2, %v1031_v32  ;;  %v1029_v46 = vmax.f32 %v997_v28, 0.0  ;;  %v1000_v15 = vadd.f32 %v7370_v49, %v964_v9  ;;  %3894 = vrot.lane.b32.xlu0 %v3584_v62, %s6054_s28  ;;  %v2034_v59 = vshll.u32 %v1891_v47, 16  ;;  %v962_v26 = vmul.f32 %v7354_v52, %v833_v2  ;;  %v5977_v9 = vld [vmem:[%s6109_s25 + $0xa8] sm:$0xff]  }
 0x19d   : > { %v1701_v18 = vpop.permute.xlu1 %1700  ;;  %v5637_v43 = vpop.f32.mrf.mxu0  ;;  %v2032_v62 = vshrl.u32 %v1891_v47, 16  ;;  %v2027_v44 = vor.u32 %v2026_v41, %v2022_v30  ;;  %v1767_v24 = vsel %vm656_vm1, %v5977_v9, %v6974_v25  ;;  %v2670_v47 = vrot.slane %v2668_v39, 1  ;;  %v5980_v30 = vld [vmem:[%s6109_s25 + $0xb4] sm:$0xff]  }
 0x19e   : > { %v1893_v14 = vsel %vm722_vm3, %v1829_v22, %v1701_v18  ;;  %1061 = vst.msk [vmem:[%s7420_s21] sm:$0xff] %vm689_vm2, %v1029_v46  ;;  %v1032_v16 = vmax.f32 %v1000_v15, 0.0  ;;  %v967_v51 = vmul.f32 %v5637_v43, %v7354_v52  ;;  %v1697_v42 = vpop.permute.xlu0 %1696  ;;  %v2036_v1 = vrot.slane %v2034_v59, 1  ;;  %v7477_v46 = vld [vmem:[%s6109_s25 + $0x6c] sm:$0xff]   ;;  %v8980_v22 = vld [vmem:[#allocation7_spill] sm:$0xff] }
 0x19f   : > { %v2038_v13 = vshll.u32 %v1893_v14, 16  ;;  %2790 = vrot.lane.b32.xlu1 %v7389_v21, %s6052_s26  ;;  %v998_v3 = vadd.f32 %v7370_v49, %v962_v26  ;;  %v1889_v40 = vsel %vm722_vm3, %v1825_v19, %v1697_v42  ;;  %v846_v20 = vpop.f32.mrf.mxu0  ;;  %v5978_v15 = vld [vmem:[%s6109_s25 + $0xb0] ss:$0 sps:$4 sm:$0x11]   ;;  %v3611_v26 = vsel %vm347_vm0, %v3606_v7, %v3610_v55  ;;  %v8981_v14 = vld [vmem:[#allocation3_spill] sm:$0xff] }
 0x1a0   : > { %1064 = vst.msk [vmem:[%s7420_s21 + $0x18] sm:$0xff] %vm689_vm2, %v1032_v16  ;;  %v1003_v8 = vadd.f32 %v7370_v49, %v967_v51  ;;  %v2028_v35 = vshll.u32 %v1889_v40, 16  ;;  %v965_v10 = vmul.f32 %v7354_v52, %v846_v20  ;;  %2788 = vrot.lane.b32.xlu0 %v7316_v54, %s6052_s26  ;;  %v2037_v48 = vor.u32 %v2036_v1, %v2032_v62  ;;  %v5979_v43 = vld [vmem:[%s6109_s25 + $0xbc] ss:$0 sps:$4 sm:$0x11]  }
 0x1a1   : > { %v2040_v63 = vrot.slane %v2038_v13, 1  ;;  %v1629_v50 = vpop.permute.xlu1 %1628  ;;  %v1030_v45 = vmax.f32 %v998_v3, 0.0  ;;  %v5638_v53 = vpop.f32.mrf.mxu0  ;;  %v1769_v18 = vsel %vm656_vm1, %v5978_v15, %v8980_v22  ;;  %v1773_v38 = vsel %vm656_vm1, %v5979_v43, %v8981_v14  ;;  %v8982_v16 = vld [vmem:[#allocation10_spill] sm:$0xff]  ;;  %v5896_v43 = vld [vmem:[%s6109_s25 + $0x68] ss:$0 sps:$4 sm:$0x11]  }
 0x1a2   : > { %v1035_v23 = vmax.f32 %v1003_v8, 0.0  ;;  %v2030_v4 = vrot.slane %v2028_v35, 1  ;;  %v1001_v33 = vadd.f32 %v7370_v49, %v965_v10  ;;  %v968_v12 = vmul.f32 %v5638_v53, %v7354_v52  ;;  %v1625_v0 = vpop.permute.xlu0 %1624 }
 0x1a3   : > { %3750 = vrot.lane.b32.xlu1 %v7374_v5, %s6052_s26  ;;  %1062 = vst.msk [vmem:[%s7420_s21 + $0x8] sm:$0xff] %vm689_vm2, %v1030_v45  ;;  %v849_v54 = vpop.f32.mrf.mxu0  ;;  %v2041_v57 = vsel %vm347_vm0, %v2037_v48, %v2040_v63  ;;  %v1771_v51 = vsel %vm656_vm1, %v5980_v30, %v8982_v16  ;;  %v7503_v20 = vsel %vm347_vm0, %v2666_v58, %v2670_v47  ;;  %v3615_v10 = vshrl.u32 %v7477_v46, 16 }
 0x1a4   : > { %1067 = vst.msk [vmem:[%s7420_s21 + $0x30] sm:$0xff] %vm689_vm2, %v1035_v23  ;;  %v1033_v27 = vmax.f32 %v1001_v33, 0.0  ;;  %v1004_v29 = vadd.f32 %v7370_v49, %v968_v12  ;;  %v966_v32 = vmul.f32 %v7354_v52, %v849_v54  ;;  %2825 = vrot.lane.b32.xlu0 %v7309_v36, %s6053_s27  ;;  %v2031_v5 = vsel %vm347_vm0, %v2027_v44, %v2030_v4 }
 0x1a5   : > { %v1627_v28 = vpop.permute.xlu1 %1626  ;;  %v5641_v34 = vpop.f32.mrf.mxu0  ;;  %5689 = vmatprep.mubr.msk.bf16.mxu1 %vm763_vm4, %v2031_v5  ;;  %v1831_v36 = vsel %vm689_vm2, %v1767_v24, %v1625_v0  ;;  %v1835_v1 = vsel %vm689_vm2, %v1771_v51, %v1629_v50  ;;  %v3617_v50 = vshll.u32 %v7477_v46, 16  ;;  %v7518_v0 = vld [vmem:[%s6109_s25 + $0x74] ss:$0 sps:$4 sm:$0x11]   ;;  %v7529_v24 = vld [vmem:[%s6109_s25 + $0x60] sm:$0xff]   ;;  %v3612_v51 = vshrl.u32 %v7392_v60, 16 }
 0x1a6   : > { %1065 = vst.msk [vmem:[%s7420_s21 + $0x20] sm:$0xff] %vm689_vm2, %v1033_v27  ;;  %v1036_v2 = vmax.f32 %v1004_v29, 0.0  ;;  %v1002_v37 = vadd.f32 %v7370_v49, %v966_v32  ;;  %v971_v19 = vmul.f32 %v5641_v34, %v7354_v52  ;;  %5690 = vmatmul.mubr.msk.bf16.gmra.mxu1 %vm763_vm4, %v2041_v57  ;;  %v1703_v25 = vpop.permute.xlu0 %1702  ;;  %v1833_v44 = vsel %vm689_vm2, %v1769_v18, %v1627_v28 }
 0x1a7   : > { %2872 = vrot.lane.b32.xlu1 %v7389_v21, %s6054_s28  ;;  %v7474_v31 = vsel %vm722_vm3, %v1831_v36, %v1703_v25  ;;  %v862_v11 = vpop.f32.mrf.mxu0  ;;  %v3619_v9 = vrot.slane %v3617_v50, 1  ;;  %v3622_v25 = vshll.u32 %v7518_v0, 16  ;;  %v2675_v14 = vshll.u32 %v7529_v24, 16 }
 0x1a8   : > { %1068 = vst.msk [vmem:[%s7420_s21 + $0x38] sm:$0xff] %vm689_vm2, %v1036_v2  ;;  %v1034_v41 = vmax.f32 %v1002_v37, 0.0  ;;  %v1007_v59 = vadd.f32 %v7370_v49, %v971_v19  ;;  %2827 = vrot.lane.b32.xlu0 %v7358_v61, %s6053_s27  ;;  %v2044_v13 = vshll.u32 %v7474_v31, 16  ;;  %v969_v42 = vmul.f32 %v7354_v52, %v862_v11 }
 0x1a9   : > { %v1631_v21 = vpop.permute.xlu1 %1630  ;;  %v5642_v62 = vpop.f32.mrf.mxu0  ;;  %v2042_v34 = vshrl.u32 %v7474_v31, 16  ;;  %v2680_v50 = vshll.u32 %v5896_v43, 16 }
 0x1aa   : > { %1066 = vst.msk [vmem:[%s7420_s21 + $0x28] sm:$0xff] %vm689_vm2, %v1034_v41  ;;  %v1039_v61 = vmax.f32 %v1007_v59, 0.0  ;;  %v972_v3 = vmul.f32 %v5642_v62, %v7354_v52  ;;  %v1707_v40 = vpop.permute.xlu0 %1706  ;;  %v1005_v8 = vadd.f32 %v7370_v49, %v969_v42  ;;  %v2046_v39 = vrot.slane %v2044_v13, 1 }
 0x1ab   : > { %3822 = vrot.lane.b32.xlu1 %v7346_v56, %s6053_s27  ;;  %v1899_v63 = vsel %vm722_vm3, %v1835_v1, %v1707_v40  ;;  %v865_v35 = vpop.f32.mrf.mxu0  ;;  %v1837_v56 = vsel %vm689_vm2, %v1773_v38, %v1631_v21  ;;  %v3620_v62 = vor.u32 %v3619_v9, %v3615_v10  ;;  %v3624_v1 = vrot.slane %v3622_v25, 1 }
 0x1ac   : > { %1071 = vst.msk [vmem:[%s7420_s21 + $0x50] sm:$0xff] %vm689_vm2, %v1039_v61  ;;  %v1008_v48 = vadd.f32 %v7370_v49, %v972_v3  ;;  %v2054_v45 = vshll.u32 %v1899_v63, 16  ;;  %3754 = vrot.lane.b32.xlu0 %v3611_v26, %s6052_s26  ;;  %v1037_v23 = vmax.f32 %v1005_v8, 0.0  ;;  %v970_v4 = vmul.f32 %v7354_v52, %v865_v35  ;;  %v7561_v61 = vld [vmem:[%s6109_s25 + $0x78] sm:$0xff]  }
 0x1ad   : > { %v1709_v53 = vpop.permute.xlu1 %1708  ;;  %v5645_v33 = vpop.f32.mrf.mxu0  ;;  %v2052_v29 = vshrl.u32 %v1899_v63, 16  ;;  %v2047_v31 = vor.u32 %v2046_v39, %v2042_v34  ;;  %v2673_v35 = vshrl.u32 %v7529_v24, 16  ;;  %v2677_v10 = vrot.slane %v2675_v14, 1 }
 0x1ae   : > { %v1901_v12 = vsel %vm722_vm3, %v1837_v56, %v1709_v53  ;;  %v1040_v54 = vmax.f32 %v1008_v48, 0.0  ;;  %v2056_v57 = vrot.slane %v2054_v45, 1  ;;  %v975_v7 = vmul.f32 %v5645_v33, %v7354_v52  ;;  %v1705_v27 = vpop.permute.xlu0 %1704  ;;  %1069 = vst.msk [vmem:[%s7420_s21 + $0x40] sm:$0xff] %vm689_vm2, %v1037_v23  ;;  %v7582_v23 = vld [vmem:[%s6109_s25 + $0x80] ss:$0 sps:$4 sm:$0x11]  }
 0x1af   : > { %v2058_v55 = vshll.u32 %v1901_v12, 16  ;;  %3752 = vrot.lane.b32.xlu1 %v3598_v6, %s6052_s26  ;;  %v1006_v32 = vadd.f32 %v7370_v49, %v970_v4  ;;  %v1897_v5 = vsel %vm722_vm3, %v1833_v44, %v1705_v27  ;;  %v878_v28 = vpop.f32.mrf.mxu0  ;;  %v7579_v39 = vsel %vm347_vm0, %v3620_v62, %v3624_v1 }
 0x1b0   : > { %1072 = vst.msk [vmem:[%s7420_s21 + $0x58] sm:$0xff] %vm689_vm2, %v1040_v54  ;;  %v1011_v58 = vadd.f32 %v7370_v49, %v975_v7  ;;  %v2048_v6 = vshll.u32 %v1897_v5, 16  ;;  %2874 = vrot.lane.b32.xlu0 %v7503_v20, %s6054_s28  ;;  %v2057_v2 = vor.u32 %v2056_v57, %v2052_v29  ;;  %v973_v37 = vmul.f32 %v7354_v52, %v878_v28 }
 0x1b1   : > { %v2060_v17 = vrot.slane %v2058_v55, 1  ;;  %v7537_v47 = vpop.permute.xlu1 %3730  ;;  %v1038_v36 = vmax.f32 %v1006_v32, 0.0  ;;  %v5646_v19 = vpop.f32.mrf.mxu0  ;;  %v3631_v4 = vshll.u32 %v7561_v61, 16  ;;  %v3626_v7 = vshrl.u32 %v7518_v0, 16  ;;  %v5981_v32 = vld [vmem:[%s6109_s25 + $0xc] sm:$0xff]  }
 0x1b2   : > { %v1043_v11 = vmax.f32 %v1011_v58, 0.0  ;;  %v2050_v15 = vrot.slane %v2048_v6, 1  ;;  %v976_v22 = vmul.f32 %v5646_v19, %v7354_v52  ;;  %v3727_v18 = vpop.permute.xlu0 %3726  ;;  %v1009_v41 = vadd.f32 %v7370_v49, %v973_v37 }
 0x1b3   : > { %3900 = vrot.lane.b32.xlu1 %v3611_v26, %s6054_s28  ;;  %1070 = vst.msk [vmem:[%s7420_s21 + $0x48] sm:$0xff] %vm689_vm2, %v1038_v36  ;;  %v881_v59 = vpop.f32.mrf.mxu0  ;;  %v2061_v21 = vsel %vm347_vm0, %v2057_v2, %v2060_v17  ;;  %v2678_v27 = vor.u32 %v2677_v10, %v2673_v35  ;;  %v2682_v29 = vrot.slane %v2680_v50, 1  ;;  %v3941_v5 = vsel %vm656_vm1, %v5981_v32, %v3727_v18  ;;  %v7601_v17 = vld [vmem:[%s6109_s25 + $0x6c] sm:$0xff]  }
 0x1b4   : > { %1075 = vst.msk [vmem:[%s7420_s21 + $0x70] sm:$0xff] %vm689_vm2, %v1043_v11  ;;  %v1012_v38 = vadd.f32 %v7370_v49, %v976_v22  ;;  %v974_v30 = vmul.f32 %v7354_v52, %v881_v59  ;;  %3826 = vrot.lane.b32.xlu0 %v7477_v46, %s6053_s27  ;;  %v2051_v26 = vsel %vm347_vm0, %v2047_v31, %v2050_v15  ;;  %v1041_v13 = vmax.f32 %v1009_v41, 0.0 }
 0x1b5   : > { %v7556_v16 = vpop.permute.xlu1 %3728  ;;  %v5649_v42 = vpop.f32.mrf.mxu0  ;;  %5693 = vmatprep.mubr.msk.bf16.mxu1 %vm763_vm4, %v2051_v26  ;;  %v3629_v36 = vshrl.u32 %v7561_v61, 16  ;;  %v3633_v37 = vrot.slane %v3631_v4, 1  ;;  %v3636_v19 = vshll.u32 %v7582_v23, 16  ;;  %v7617_v41 = vsel %vm347_vm0, %v2678_v27, %v2682_v29 }
 0x1b6   : > { %v1044_v3 = vmax.f32 %v1012_v38, 0.0  ;;  %v1010_v40 = vadd.f32 %v7370_v49, %v974_v30  ;;  %v979_v46 = vmul.f32 %v5649_v42, %v7354_v52  ;;  %5694 = vmatmul.mubr.msk.bf16.gmra.mxu1 %vm763_vm4, %v2061_v21  ;;  %v3799_v8 = vpop.permute.xlu0 %3798  ;;  %1073 = vst.msk [vmem:[%s7420_s21 + $0x60] sm:$0xff] %vm689_vm2, %v1041_v13  ;;  %v2687_v38 = vshll.u32 %v7601_v17, 16  ;;  %v5982_v30 = vld [vmem:[%s6109_s25 + $0x18] sm:$0xff]  }
 0x1b7   : > { %3824 = vrot.lane.b32.xlu1 %v7392_v60, %s6053_s27  ;;  %v894_v63 = vpop.f32.mrf.mxu0  ;;  %v4005_v6 = vsel %vm689_vm2, %v3941_v5, %v3799_v8  ;;  %v3945_v26 = vsel %vm656_vm1, %v5982_v30, %v7537_v47  ;;  %v7631_v62 = vor.u32 %v3633_v37, %v3629_v36  ;;  %v7633_v1 = vrot.slane %v3636_v19, 1  ;;  %v5983_v47 = vld [vmem:[%s6109_s25 + $0x14] ss:$0 sps:$4 sm:$0x11]  }
 0x1b8   : > { %1076 = vst.msk [vmem:[%s7420_s21 + $0x78] sm:$0xff] %vm689_vm2, %v1044_v3  ;;  %v1042_v44 = vmax.f32 %v1010_v40, 0.0  ;;  %v1015_v48 = vadd.f32 %v7370_v49, %v979_v46  ;;  %v977_v56 = vmul.f32 %v7354_v52, %v894_v63  ;;  %3756 = vrot.lane.b32.xlu0 %v3612_v51, %s6052_s26  ;;  %v3943_v8 = vsel %vm656_vm1, %v5983_v47, %v7556_v16  ;;  %v5984_v63 = vld [vmem:[%s6109_s25 + $0x20] ss:$0 sps:$4 sm:$0x11]   ;;  %v5903_v47 = vld [vmem:[%s6109_s25 + $0x84] sm:$0xff]  }
 0x1b9   : > { %v3877_v45 = vpop.permute.xlu1 %3876  ;;  %v5650_v53 = vpop.f32.mrf.mxu0 }
 0x1ba   : > { %1074 = vst.msk [vmem:[%s7420_s21 + $0x68] sm:$0xff] %vm689_vm2, %v1042_v44  ;;  %v1047_v33 = vmax.f32 %v1015_v48, 0.0  ;;  %v1013_v12 = vadd.f32 %v7370_v49, %v977_v56  ;;  %v980_v54 = vmul.f32 %v5650_v53, %v7354_v52  ;;  %v3803_v57 = vpop.permute.xlu0 %3802  ;;  %v7609_v31 = vsel %vm722_vm3, %v4005_v6, %v3877_v45 }
 0x1bb   : > { %3828 = vrot.lane.b32.xlu1 %v7518_v0, %s6053_s27  ;;  %v897_v55 = vpop.f32.mrf.mxu0  ;;  %v4134_v13 = vshll.u32 %v7609_v31, 16  ;;  %v4009_v60 = vsel %vm689_vm2, %v3945_v26, %v3803_v57  ;;  %v2685_v44 = vshrl.u32 %v7601_v17, 16  ;;  %v2689_v6 = vrot.slane %v2687_v38, 1 }
 0x1bc   : > { %1079 = vst.msk [vmem:[%s7420_s21 + $0x90] sm:$0xff] %vm689_vm2, %v1047_v33  ;;  %v1045_v28 = vmax.f32 %v1013_v12, 0.0  ;;  %v1016_v9 = vadd.f32 %v7370_v49, %v980_v54  ;;  %v978_v34 = vmul.f32 %v7354_v52, %v897_v55  ;;  %3904 = vrot.lane.b32.xlu0 %v7579_v39, %s6054_s28  ;;  %v5901_v55 = vld [vmem:[%s6109_s25 + $0x74] ss:$0 sps:$4 sm:$0x11]   ;;  %v3643_v0 = vshrl.u32 %v5903_v47, 16 }
 0x1bd   : > { %v3801_v58 = vpop.permute.xlu1 %3800  ;;  %v5653_v2 = vpop.f32.mrf.mxu0  ;;  %v4136_v4 = vrot.slane %v4134_v13, 1 }
 0x1be   : > { %1077 = vst.msk [vmem:[%s7420_s21 + $0x80] sm:$0xff] %vm689_vm2, %v1045_v28  ;;  %v1048_v25 = vmax.f32 %v1016_v9, 0.0  ;;  %v1014_v11 = vadd.f32 %v7370_v49, %v978_v34  ;;  %v983_v15 = vmul.f32 %v5653_v2, %v7354_v52  ;;  %v3733_v22 = vpop.permute.xlu0 %3732  ;;  %v4007_v33 = vsel %vm689_vm2, %v3943_v8, %v3801_v58 }
 0x1bf   : > { %3906 = vrot.lane.b32.xlu1 %v3626_v7, %s6054_s28  ;;  %v910_v18 = vpop.f32.mrf.mxu0  ;;  %v3947_v35 = vsel %vm656_vm1, %v5984_v63, %v3733_v22  ;;  %v4132_v2 = vshrl.u32 %v7609_v31, 16 }
 0x1c0   : > { %1080 = vst.msk [vmem:[%s7420_s21 + $0x98] sm:$0xff] %vm689_vm2, %v1048_v25  ;;  %v1046_v59 = vmax.f32 %v1014_v11, 0.0  ;;  %v1019_v21 = vadd.f32 %v7370_v49, %v983_v15  ;;  %v981_v43 = vmul.f32 %v7354_v52, %v910_v18  ;;  %3902 = vrot.lane.b32.xlu0 %v3612_v51, %s6054_s28  ;;  %v2692_v18 = vshll.u32 %v5901_v55, 16 }
 0x1c1   : > { %v3805_v14 = vpop.permute.xlu1 %3804  ;;  %v5654_v42 = vpop.f32.mrf.mxu0  ;;  %v4137_v31 = vor.u32 %v4136_v4, %v4132_v2  ;;  %v7716_v4 = vld [vmem:[%s6109_s25 + $0x8c] ss:$0 sps:$4 sm:$0x11]   ;;  %v5906_v2 = vld [vmem:[%s6109_s25 + $0x80] ss:$0 sps:$4 sm:$0x11]  }
 0x1c2   : > { %1078 = vst.msk [vmem:[%s7420_s21 + $0x88] sm:$0xff] %vm689_vm2, %v1046_v59  ;;  %v1051_v51 = vmax.f32 %v1019_v21, 0.0  ;;  %v1017_v3 = vadd.f32 %v7370_v49, %v981_v43  ;;  %v984_v40 = vmul.f32 %v5654_v42, %v7354_v52  ;;  %v3881_v46 = vpop.permute.xlu0 %3880  ;;  %v4011_v45 = vsel %vm689_vm2, %v3947_v35, %v3805_v14 }
 0x1c3   : > { %2794 = vrot.lane.b32.xlu1 %v7617_v41, %s6052_s26  ;;  %v4073_v10 = vsel %vm722_vm3, %v4009_v60, %v3881_v46  ;;  %v913_v50 = vpop.f32.mrf.mxu0  ;;  %v2694_v46 = vrot.slane %v2692_v18, 1 }
 0x1c4   : > { %1083 = vst.msk [vmem:[%s7420_s21 + $0xb0] sm:$0xff] %vm689_vm2, %v1051_v51  ;;  %v1049_v48 = vmax.f32 %v1017_v3, 0.0  ;;  %v1020_v56 = vadd.f32 %v7370_v49, %v984_v40  ;;  %v4144_v53 = vshll.u32 %v4073_v10, 16  ;;  %2792 = vrot.lane.b32.xlu0 %v7503_v20, %s6052_s26  ;;  %v982_v12 = vmul.f32 %v7354_v52, %v913_v50 }
 0x1c5   : > { %v3883_v16 = vpop.permute.xlu1 %3882  ;;  %v5657_v54 = vpop.f32.mrf.mxu0  ;;  %v4142_v20 = vshrl.u32 %v4073_v10, 16  ;;  %v3639_v3 = vsel %vm347_vm0, %v7631_v62, %v7633_v1  ;;  %v2690_v40 = vor.u32 %v2689_v6, %v2685_v44  ;;  %v5985_v10 = vld [vmem:[%s6109_s25 + $0xc] sm:$0xff]  }
 0x1c6   : > { %v4075_v57 = vsel %vm722_vm3, %v4011_v45, %v3883_v16  ;;  %1081 = vst.msk [vmem:[%s7420_s21 + $0xa0] sm:$0xff] %vm689_vm2, %v1049_v48  ;;  %v1052_v27 = vmax.f32 %v1020_v56, 0.0  ;;  %v4146_v29 = vrot.slane %v4144_v53, 1  ;;  %v987_v32 = vmul.f32 %v5657_v54, %v7354_v52  ;;  %v3879_v28 = vpop.permute.xlu0 %3878 }
 0x1c7   : > { %v4148_v5 = vshll.u32 %v4075_v57, 16  ;;  %3758 = vrot.lane.b32.xlu1 %v7579_v39, %s6052_s26  ;;  %v1018_v9 = vadd.f32 %v7370_v49, %v982_v12  ;;  %v4071_v34 = vsel %vm722_vm3, %v4007_v33, %v3879_v28  ;;  %v926_v58 = vpop.f32.mrf.mxu0  ;;  %v7713_v16 = vsel %vm347_vm0, %v2690_v40, %v2694_v46 }
 0x1c8   : > { %1084 = vst.msk [vmem:[%s7420_s21 + $0xb8] sm:$0xff] %vm689_vm2, %v1052_v27  ;;  %v1023_v36 = vadd.f32 %v7370_v49, %v987_v32  ;;  %v4138_v19 = vshll.u32 %v4071_v34, 16  ;;  %2829 = vrot.lane.b32.xlu0 %v7529_v24, %s6053_s27  ;;  %v4147_v25 = vor.u32 %v4146_v29, %v4142_v20  ;;  %v985_v15 = vmul.f32 %v7354_v52, %v926_v58  ;;  %v7727_v29 = vld [vmem:[%s6109_s25 + $0x78] sm:$0xff]  }
 0x1c9   : > { %v4150_v37 = vrot.slane %v4148_v5, 1  ;;  %v7672_v39 = vpop.permute.xlu1 %2782  ;;  %v1050_v11 = vmax.f32 %v1018_v9, 0.0  ;;  %v5658_v22 = vpop.f32.mrf.mxu0  ;;  %v3645_v33 = vshll.u32 %v5903_v47, 16  ;;  %v3650_v9 = vshll.u32 %v7716_v4, 16 }
 0x1ca   : > { %v1055_v59 = vmax.f32 %v1023_v36, 0.0  ;;  %v4140_v21 = vrot.slane %v4138_v19, 1  ;;  %v988_v43 = vmul.f32 %v5658_v22, %v7354_v52  ;;  %v2781_v14 = vpop.permute.xlu0 %2780  ;;  %v1021_v38 = vadd.f32 %v7370_v49, %v985_v15 }
 0x1cb   : > { %2876 = vrot.lane.b32.xlu1 %v7617_v41, %s6054_s28  ;;  %1082 = vst.msk [vmem:[%s7420_s21 + $0xa8] sm:$0xff] %vm689_vm2, %v1050_v11  ;;  %v4151_v24 = vsel %vm347_vm0, %v4147_v25, %v4150_v37  ;;  %v929_v30 = vpop.f32.mrf.mxu0  ;;  %v2897_v62 = vsel %vm656_vm1, %v5985_v10, %v2781_v14  ;;  %v3640_v19 = vshrl.u32 %v7582_v23, 16  ;;  %v5986_v25 = vld [vmem:[%s6109_s25 + $0x18] sm:$0xff]  }
 0x1cc   : > { %1087 = vst.msk [vmem:[%s7420_s21 + $0xd0] sm:$0xff] %vm689_vm2, %v1055_v59  ;;  %v1024_v26 = vadd.f32 %v7370_v49, %v988_v43  ;;  %v986_v13 = vmul.f32 %v7354_v52, %v929_v30  ;;  %2831 = vrot.lane.b32.xlu0 %v7601_v17, %s6053_s27  ;;  %v4141_v41 = vsel %vm347_vm0, %v4137_v31, %v4140_v21  ;;  %v1053_v60 = vmax.f32 %v1021_v38, 0.0 }
 0x1cd   : > { %v7689_v42 = vpop.permute.xlu1 %3734  ;;  %v5661_v51 = vpop.f32.mrf.mxu0  ;;  %5733 = vmatprep.mubr.msk.bf16.mxu1 %vm763_vm4, %v4141_v41  ;;  %v2899_v11 = vsel %vm656_vm1, %v5986_v25, %v7672_v39  ;;  %v2697_v59 = vshrl.u32 %v7727_v29, 16  ;;  %v2704_v43 = vshll.u32 %v5906_v2, 16  ;;  %v5987_v41 = vld [vmem:[%s6109_s25 + $0x24] sm:$0xff]  }
 0x1ce   : > { %v1056_v8 = vmax.f32 %v1024_v26, 0.0  ;;  %v1022_v17 = vadd.f32 %v7370_v49, %v986_v13  ;;  %v991_v63 = vmul.f32 %v5661_v51, %v7354_v52  ;;  %5734 = vmatmul.mubr.msk.bf16.vlgmr.msra.gmra.mxu1 %vm763_vm4, %v4151_v24  ;;  %v2818_v35 = vpop.permute.xlu0 %2817  ;;  %1085 = vst.msk [vmem:[%s7420_s21 + $0xc0] sm:$0xff] %vm689_vm2, %v1053_v60  ;;  %v7763_v26 = vld [vmem:[%s6109_s25 + $0x90] sm:$0xff]   ;;  %v3949_v60 = vsel %vm656_vm1, %v5987_v41, %v7689_v42 }
 0x1cf   : > { %3830 = vrot.lane.b32.xlu1 %v7561_v61, %s6053_s27  ;;  %v942_v1 = vpop.f32.mrf.mxu0  ;;  %v2929_v48 = vsel %vm689_vm2, %v2897_v62, %v2818_v35  ;;  %v2706_v30 = vrot.slane %v2704_v43, 1  ;;  %v5988_v42 = vld [vmem:[%s6109_s25 + $0x30] sm:$0xff]   ;;  %v5907_v35 = vld [vmem:[%s6109_s25 + $0x84] sm:$0xff]  }
 0x1d0   : > { %1088 = vst.msk [vmem:[%s7420_s21 + $0xd8] sm:$0xff] %vm689_vm2, %v1056_v8  ;;  %v1054_v50 = vmax.f32 %v1022_v17, 0.0  ;;  %v1027_v44 = vadd.f32 %v7370_v49, %v991_v63  ;;  %v989_v56 = vmul.f32 %v7354_v52, %v942_v1  ;;  %3762 = vrot.lane.b32.xlu0 %v3639_v3, %s6052_s26  ;;  %v7778_v17 = vld [vmem:[%s6109_s25 + $0x98] ss:$0 sps:$4 sm:$0x11]  }
 0x1d1   : > { %v2865_v61 = vpop.permute.xlu1 %2864  ;;  %v5662_v45 = vpop.f32.mrf.mxu0 }
 0x1d2   : > { %v2961_v53 = vsel %vm722_vm3, %v2929_v48, %v2865_v61  ;;  %1086 = vst.msk [vmem:[%s7420_s21 + $0xc8] sm:$0xff] %vm689_vm2, %v1054_v50  ;;  %v1059_v12 = vmax.f32 %v1027_v44, 0.0  ;;  %v1025_v54 = vadd.f32 %v7370_v49, %v989_v56  ;;  %v992_v57 = vmul.f32 %v5662_v45, %v7354_v52  ;;  %v2820_v55 = vpop.permute.xlu0 %2819  ;;  %v5989_v50 = vld [vmem:[%s6109_s25 + $0x38] ss:$0 sps:$4 sm:$0x11]  }
 0x1d3   : > { %3760 = vrot.lane.b32.xlu1 %v3626_v7, %s6052_s26  ;;  %5699 = vmatprep.mubr.msk.bf16.mxu0 %vm763_vm4, %v2961_v53  ;;  %v945_v27 = vpop.f32.mrf.mxu0  ;;  %v3647_v7 = vrot.slane %v3645_v33, 1  ;;  %v2931_v22 = vsel %vm689_vm2, %v2899_v11, %v2820_v55  ;;  %v3657_v56 = vshrl.u32 %v7763_v26, 16 }
 0x1d4   : > { %1091 = vst.msk [vmem:[%s7420_s21 + $0xf0] sm:$0xff] %vm689_vm2, %v1059_v12  ;;  %v1057_v32 = vmax.f32 %v1025_v54, 0.0  ;;  %v1028_v5 = vadd.f32 %v7370_v49, %v992_v57  ;;  %v990_v28 = vmul.f32 %v7354_v52, %v945_v27  ;;  %2878 = vrot.lane.b32.xlu0 %v7713_v16, %s6054_s28  ;;  %v2699_v52 = vshll.u32 %v7727_v29, 16  ;;  %v5990_v54 = vld [vmem:[%s6109_s25 + $0x2c] ss:$0 sps:$4 sm:$0x11]  }
 0x1d5   : > { %v3807_v20 = vpop.permute.xlu1 %3806  ;;  %v3648_v15 = vor.u32 %v3647_v7, %v3643_v0  ;;  %v3664_v12 = vshll.u32 %v7778_v17, 16  ;;  %v5910_v27 = vld [vmem:[%s6109_s25 + $0x8c] ss:$0 sps:$4 sm:$0x11]  }
 0x1d6   : > { %1089 = vst.msk [vmem:[%s7420_s21 + $0xe0] sm:$0xff] %vm689_vm2, %v1057_v32  ;;  %v1060_v34 = vmax.f32 %v1028_v5, 0.0  ;;  %v1026_v58 = vadd.f32 %v7370_v49, %v990_v28  ;;  %v3739_v6 = vpop.permute.xlu0 %3738  ;;  %v3652_v49 = vrot.slane %v3650_v9, 1  ;;  %v2701_v21 = vrot.slane %v2699_v52, 1 }
 0x1d7   : > { %3908 = vrot.lane.b32.xlu1 %v3639_v3, %s6054_s28  ;;  %v4013_v51 = vsel %vm689_vm2, %v3949_v60, %v3807_v20  ;;  %v3953_v63 = vsel %vm656_vm1, %v5988_v42, %v3739_v6  ;;  %v2711_v32 = vshll.u32 %v5907_v35, 16  ;;  %v2716_v11 = vshll.u32 %v5910_v27, 16 }
 0x1d8   : > { %1092 = vst.msk [vmem:[%s7420_s21 + $0xf8] sm:$0xff] %vm689_vm2, %v1060_v34  ;;  %v1058_v36 = vmax.f32 %v1026_v58, 0.0  ;;  %3834 = vrot.lane.b32.xlu0 %v5903_v47, %s6053_s27  ;;  %v3653_v14 = vsel %vm347_vm0, %v3648_v15, %v3652_v49  ;;  %v2702_v38 = vor.u32 %v2701_v21, %v2697_v59  ;;  %v3659_v47 = vshll.u32 %v7763_v26, 16 }
 0x1d9   : > { %v3737_v37 = vpop.permute.xlu1 %3736  ;;  %v2713_v25 = vrot.slane %v2711_v32, 1  ;;  %v2718_v43 = vrot.slane %v2716_v11, 1  ;;  %v7852_v32 = vld [vmem:[%s6109_s25 + $0xa8] sm:$0xff]   ;;  %v5995_v11 = vld [vmem:[%s6109_s25 + $0x50] ss:$0 sps:$4 sm:$0x11]  }
 0x1da   : > { %1090 = vst.msk [vmem:[%s7420_s21 + $0xe8] sm:$0xff] %vm689_vm2, %v1058_v36  ;;  %v2867_v18 = vpop.permute.xlu0 %2866  ;;  %v2707_v46 = vsel %vm347_vm0, %v2702_v38, %v2706_v30  ;;  %v3661_v61 = vrot.slane %v3659_v47, 1  ;;  %v3951_v57 = vsel %vm656_vm1, %v5990_v54, %v3737_v37  ;;  %v3666_v36 = vrot.slane %v3664_v12, 1 }
 0x1db   : > { %3832 = vrot.lane.b32.xlu1 %v7582_v23, %s6053_s27  ;;  %v2963_v31 = vsel %vm722_vm3, %v2931_v22, %v2867_v18  ;;  %v3654_v23 = vshrl.u32 %v7716_v4, 16 }
 0x1dc   : > { %3764 = vrot.lane.b32.xlu0 %v3640_v19, %s6052_s26  ;;  %5700 = vmatmul.mubr.msk.bf16.vlgmr.msra.gmra.mxu0 %vm763_vm4, %v2963_v31  ;;  %v3662_v34 = vor.u32 %v3661_v61, %v3657_v56 }
 0x1dd   : > { %v3885_v39 = vpop.permute.xlu1 %3884 }
 0x1de   : > { %v3811_v24 = vpop.permute.xlu0 %3810  ;;  %v4077_v40 = vsel %vm722_vm3, %v4013_v51, %v3885_v39  ;;  %v3667_v59 = vsel %vm347_vm0, %v3662_v34, %v3666_v36  ;;  %v5911_v39 = vld [vmem:[%s6109_s25 + $0x9c] sm:$0xff]   ;;  %v7821_v51 = vld [vmem:[%s6109_s25 + $0xa4] ss:$0 sps:$4 sm:$0x11]   ;;  %v3687_v34 = vshll.u32 %v7852_v32, 16 }
 0x1df   : > { %3836 = vrot.lane.b32.xlu1 %v7716_v4, %s6053_s27  ;;  %v4154_v10 = vshll.u32 %v4077_v40, 16  ;;  %v4017_v62 = vsel %vm689_vm2, %v3953_v63, %v3811_v24  ;;  %v4152_v58 = vshrl.u32 %v4077_v40, 16  ;;  %v5991_v24 = vld [vmem:[%s6109_s25 + $0x24] sm:$0xff]   ;;  %v3671_v47 = vshrl.u32 %v5911_v39, 16  ;;  %v5915_v36 = vld [vmem:[%s6109_s25 + $0x9c] sm:$0xff]  }
 0x1e0   : > { %3912 = vrot.lane.b32.xlu0 %v3653_v14, %s6054_s28  ;;  %v3678_v42 = vshll.u32 %v7821_v51, 16 }
 0x1e1   : > { %v3809_v13 = vpop.permute.xlu1 %3808  ;;  %v4156_v5 = vrot.slane %v4154_v10, 1  ;;  %v3668_v10 = vshrl.u32 %v7778_v17, 16 }
 0x1e2   : > { %v3741_v3 = vpop.permute.xlu0 %3740  ;;  %v4015_v28 = vsel %vm689_vm2, %v3951_v57, %v3809_v13 }
 0x1e3   : > { %3914 = vrot.lane.b32.xlu1 %v3654_v23, %s6054_s28  ;;  %v3955_v44 = vsel %vm656_vm1, %v5989_v50, %v3741_v3  ;;  %v4157_v15 = vor.u32 %v4156_v5, %v4152_v58  ;;  %v3673_v3 = vshll.u32 %v5911_v39, 16 }
 0x1e4   : > { %3910 = vrot.lane.b32.xlu0 %v3640_v19, %s6054_s28  ;;  %v2709_v19 = vshrl.u32 %v5907_v35, 16 }
 0x1e5   : > { %v3813_v8 = vpop.permute.xlu1 %3812 }
 0x1e6   : > { %v3889_v1 = vpop.permute.xlu0 %3888  ;;  %v4019_v45 = vsel %vm689_vm2, %v3955_v44, %v3813_v8  ;;  %v2714_v21 = vor.u32 %v2713_v25, %v2709_v19  ;;  %v3675_v8 = vrot.slane %v3673_v3, 1  ;;  %v3680_v44 = vrot.slane %v3678_v42, 1 }
 0x1e7   : > { %2798 = vrot.lane.b32.xlu1 %v2707_v46, %s6052_s26  ;;  %v4081_v48 = vsel %vm722_vm3, %v4017_v62, %v3889_v1  ;;  %v5992_v62 = vld [vmem:[%s6109_s25 + $0x30] sm:$0xff]  }
 0x1e8   : > { %v4164_v53 = vshll.u32 %v4081_v48, 16  ;;  %2796 = vrot.lane.b32.xlu0 %v7713_v16, %s6052_s26  ;;  %v4162_v9 = vshrl.u32 %v4081_v48, 16  ;;  %v7818_v60 = vsel %vm347_vm0, %v2714_v21, %v2718_v43  ;;  %v3676_v50 = vor.u32 %v3675_v8, %v3671_v47  ;;  %v5996_v43 = vld [vmem:[%s6109_s25 + $0x44] ss:$0 sps:$4 sm:$0x11]  }
 0x1e9   : > { %v3891_v33 = vpop.permute.xlu1 %3890 }
 0x1ea   : > { %v4083_v55 = vsel %vm722_vm3, %v4019_v45, %v3891_v33  ;;  %v4166_v20 = vrot.slane %v4164_v53, 1  ;;  %v3887_v7 = vpop.permute.xlu0 %3886  ;;  %v3681_v54 = vsel %vm347_vm0, %v3676_v50, %v3680_v44 }
 0x1eb   : > { %v4168_v0 = vshll.u32 %v4083_v55, 16  ;;  %3766 = vrot.lane.b32.xlu1 %v3653_v14, %s6052_s26  ;;  %v4079_v16 = vsel %vm722_vm3, %v4015_v28, %v3887_v7  ;;  %v5993_v28 = vld [vmem:[%s6109_s25 + $0x3c] sm:$0xff]  }
 0x1ec   : > { %v4158_v2 = vshll.u32 %v4079_v16, 16  ;;  %2833 = vrot.lane.b32.xlu0 %v7727_v29, %s6053_s27  ;;  %v4167_v37 = vor.u32 %v4166_v20, %v4162_v9 }
 0x1ed   : > { %v4170_v6 = vrot.slane %v4168_v0, 1  ;;  %v2787_v52 = vpop.permute.xlu1 %2786 }
 0x1ee   : > { %v4160_v49 = vrot.slane %v4158_v2, 1  ;;  %v2785_v22 = vpop.permute.xlu0 %2784  ;;  %v2903_v1 = vsel %vm656_vm1, %v5992_v62, %v2787_v52  ;;  %v5994_v2 = vld [vmem:[%s6109_s25 + $0x48] sm:$0xff]  }
 0x1ef   : > { %2880 = vrot.lane.b32.xlu1 %v2707_v46, %s6054_s28  ;;  %v4171_v18 = vsel %vm347_vm0, %v4167_v37, %v4170_v6  ;;  %v2901_v38 = vsel %vm656_vm1, %v5991_v24, %v2785_v22  ;;  %v7866_v6 = vld [vmem:[%s6109_s25 + $0xb0] ss:$0 sps:$4 sm:$0x11]   ;;  %v3685_v22 = vshrl.u32 %v7852_v32, 16 }
 0x1f0   : > { %2835 = vrot.lane.b32.xlu0 %v5907_v35, %s6053_s27  ;;  %v4161_v31 = vsel %vm347_vm0, %v4157_v15, %v4160_v49  ;;  %v5914_v35 = vld [vmem:[%s6109_s25 + $0x98] ss:$0 sps:$4 sm:$0x11]   ;;  %v3692_v21 = vshll.u32 %v7866_v6, 16 }
 0x1f1   : > { %v3743_v29 = vpop.permute.xlu1 %3742  ;;  %5737 = vmatprep.mubr.msk.bf16.mxu1 %vm763_vm4, %v4161_v31  ;;  %v2728_v33 = vshll.u32 %v5914_v35, 16  ;;  %v5918_v24 = vld [vmem:[%s6109_s25 + $0xa4] ss:$0 sps:$4 sm:$0x11]  }
 0x1f2   : > { %5738 = vmatmul.mubr.msk.bf16.gmra.mxu1 %vm763_vm4, %v4171_v18  ;;  %v2822_v14 = vpop.permute.xlu0 %2821  ;;  %v3957_v20 = vsel %vm656_vm1, %v5993_v28, %v3743_v29  ;;  %v3689_v18 = vrot.slane %v3687_v34, 1 }
 0x1f3   : > { %3838 = vrot.lane.b32.xlu1 %v7763_v26, %s6053_s27  ;;  %v2933_v30 = vsel %vm689_vm2, %v2901_v38, %v2822_v14  ;;  %v7828_v26 = vld [vmem:[%s6109_s25 + $0x90] sm:$0xff]   ;;  %v2730_v27 = vrot.slane %v2728_v33, 1  ;;  %v2735_v38 = vshll.u32 %v5915_v36, 16 }
 0x1f4   : > { %3770 = vrot.lane.b32.xlu0 %v3667_v59, %s6052_s26  ;;  %v2723_v4 = vshll.u32 %v7828_v26, 16  ;;  %v2721_v45 = vshrl.u32 %v7828_v26, 16  ;;  %v3690_v47 = vor.u32 %v3689_v18, %v3685_v22 }
 0x1f5   : > { %v2869_v13 = vpop.permute.xlu1 %2868  ;;  %v2737_v62 = vrot.slane %v2735_v38, 1 }
 0x1f6   : > { %v2965_v41 = vsel %vm722_vm3, %v2933_v30, %v2869_v13  ;;  %v2824_v40 = vpop.permute.xlu0 %2823  ;;  %v2725_v53 = vrot.slane %v2723_v4, 1  ;;  %v3694_v4 = vrot.slane %v3692_v21, 1 }
 0x1f7   : > { %3768 = vrot.lane.b32.xlu1 %v3654_v23, %s6052_s26  ;;  %5703 = vmatprep.mubr.msk.bf16.mxu0 %vm763_vm4, %v2965_v41  ;;  %v2935_v48 = vsel %vm689_vm2, %v2903_v1, %v2824_v40  ;;  %v2740_v1 = vshll.u32 %v5918_v24, 16 }
 0x1f8   : > { %2882 = vrot.lane.b32.xlu0 %v7818_v60, %s6054_s28  ;;  %v2726_v55 = vor.u32 %v2725_v53, %v2721_v45  ;;  %v5919_v45 = vld [vmem:[%s6109_s25 + $0xb4] sm:$0xff]   ;;  %v3695_v53 = vsel %vm347_vm0, %v3690_v47, %v3694_v4 }
 0x1f9   : > { %v3815_v46 = vpop.permute.xlu1 %3814  ;;  %v3699_v18 = vshrl.u32 %v5919_v45, 16 }
 0x1fa   : > { %v3747_v63 = vpop.permute.xlu0 %3746  ;;  %v4021_v0 = vsel %vm689_vm2, %v3957_v20, %v3815_v46  ;;  %v2731_v16 = vsel %vm347_vm0, %v2726_v55, %v2730_v27  ;;  %v5997_v55 = vld [vmem:[%s6109_s25 + $0x3c] sm:$0xff]  }
 0x1fb   : > { %3916 = vrot.lane.b32.xlu1 %v3667_v59, %s6054_s28  ;;  %v3961_v52 = vsel %vm656_vm1, %v5994_v2, %v3747_v63 }
 0x1fc   : > { %3842 = vrot.lane.b32.xlu0 %v5911_v39, %s6053_s27 }
 0x1fd   : > { %v3745_v23 = vpop.permute.xlu1 %3744 }
 0x1fe   : > { %v2871_v56 = vpop.permute.xlu0 %2870  ;;  %v3959_v39 = vsel %vm656_vm1, %v5996_v43, %v3745_v23 }
 0x1ff   : > { %3840 = vrot.lane.b32.xlu1 %v7778_v17, %s6053_s27  ;;  %v2967_v61 = vsel %vm722_vm3, %v2935_v48, %v2871_v56  ;;  %v3682_v17 = vshrl.u32 %v7821_v51, 16 }
 0x200   : > { %3772 = vrot.lane.b32.xlu0 %v3668_v10, %s6052_s26  ;;  %5704 = vmatmul.mubr.msk.bf16.gmra.mxu0 %vm763_vm4, %v2967_v61 }
 0x201   : > { %v3893_v12 = vpop.permute.xlu1 %3892 }
 0x202   : > { %v3819_v57 = vpop.permute.xlu0 %3818  ;;  %v4085_v9 = vsel %vm722_vm3, %v4021_v0, %v3893_v12  ;;  %v2742_v12 = vrot.slane %v2740_v1, 1 }
 0x203   : > { %3844 = vrot.lane.b32.xlu1 %v7821_v51, %s6053_s27  ;;  %v4174_v37 = vshll.u32 %v4085_v9, 16  ;;  %v4025_v19 = vsel %vm689_vm2, %v3961_v52, %v3819_v57  ;;  %v4172_v8 = vshrl.u32 %v4085_v9, 16  ;;  %v7915_v9 = vld [vmem:[%s6109_s25 + $0xbc] ss:$0 sps:$4 sm:$0x11]  }
 0x204   : > { %3920 = vrot.lane.b32.xlu0 %v3681_v54, %s6054_s28 }
 0x205   : > { %v3817_v5 = vpop.permute.xlu1 %3816  ;;  %v4176_v30 = vrot.slane %v4174_v37, 1 }
 0x206   : > { %v3749_v7 = vpop.permute.xlu0 %3748  ;;  %v4023_v13 = vsel %vm689_vm2, %v3959_v39, %v3817_v5  ;;  %v7909_v5 = vld [vmem:[%s8887_s2] ss:$0 sm:$0xff]  ;;  %v5922_v39 = vld [vmem:[%s6109_s25 + $0xb0] ss:$0 sps:$4 sm:$0x11]  }
 0x207   : > { %3922 = vrot.lane.b32.xlu1 %v3682_v17, %s6054_s28  ;;  %v3963_v15 = vsel %vm656_vm1, %v5995_v11, %v3749_v7  ;;  %v4177_v50 = vor.u32 %v4176_v30, %v4172_v8 }
 0x208   : > { %3918 = vrot.lane.b32.xlu0 %v3668_v10, %s6054_s28  ;;  %v2733_v10 = vshrl.u32 %v5915_v36, 16 }
 0x209   : > { %v3821_v58 = vpop.permute.xlu1 %3820 }
 0x20a   : > { %v3897_v25 = vpop.permute.xlu0 %3896  ;;  %v4027_v31 = vsel %vm689_vm2, %v3963_v15, %v3821_v58  ;;  %v2738_v33 = vor.u32 %v2737_v62, %v2733_v10 }
 0x20b   : > { %2802 = vrot.lane.b32.xlu1 %v2731_v16, %s6052_s26  ;;  %v4089_v49 = vsel %vm722_vm3, %v4025_v19, %v3897_v25  ;;  %v7933_v19 = vld [vmem:[%s6109_s25 + $0xa8] sm:$0xff]  }
 0x20c   : > { %v4184_v29 = vshll.u32 %v4089_v49, 16  ;;  %2800 = vrot.lane.b32.xlu0 %v7818_v60, %s6052_s26  ;;  %v4182_v46 = vshrl.u32 %v4089_v49, 16  ;;  %v7926_v52 = vsel %vm347_vm0, %v2738_v33, %v2742_v12  ;;  %v2745_v62 = vshrl.u32 %v7933_v19, 16 }
 0x20d   : > { %v3899_v59 = vpop.permute.xlu1 %3898 }
 0x20e   : > { %v4091_v14 = vsel %vm722_vm3, %v4027_v31, %v3899_v59  ;;  %v4186_v41 = vrot.slane %v4184_v29, 1  ;;  %v3895_v40 = vpop.permute.xlu0 %3894 }
 0x20f   : > { %v4188_v3 = vshll.u32 %v4091_v14, 16  ;;  %3774 = vrot.lane.b32.xlu1 %v3681_v54, %s6052_s26  ;;  %v4087_v60 = vsel %vm722_vm3, %v4023_v13, %v3895_v40  ;;  %v2747_v14 = vshll.u32 %v7933_v19, 16 }
 0x210   : > { %v4178_v63 = vshll.u32 %v4087_v60, 16  ;;  %2837 = vrot.lane.b32.xlu0 %v7828_v26, %s6053_s27  ;;  %v4187_v23 = vor.u32 %v4186_v41, %v4182_v46  ;;  %v6000_v60 = vld [vmem:[%s6109_s25 + $0x48] sm:$0xff]  }
 0x211   : > { %v4190_v42 = vrot.slane %v4188_v3, 1  ;;  %v7890_v35 = vpop.permute.xlu1 %2790  ;;  %v3696_v3 = vshrl.u32 %v7866_v6, 16  ;;  %v2749_v1 = vrot.slane %v2747_v14, 1  ;;  %v6002_v14 = vld [vmem:[%s6109_s25 + $0x60] sm:$0xff]  }
 0x212   : > { %v4180_v44 = vrot.slane %v4178_v63, 1  ;;  %v2789_v48 = vpop.permute.xlu0 %2788  ;;  %v2907_v47 = vsel %vm656_vm1, %v6000_v60, %v7890_v35 }
 0x213   : > { %2884 = vrot.lane.b32.xlu1 %v2731_v16, %s6054_s28  ;;  %v4191_v56 = vsel %vm347_vm0, %v4187_v23, %v4190_v42  ;;  %v2905_v27 = vsel %vm656_vm1, %v5997_v55, %v2789_v48  ;;  %v7920_v16 = vld [vmem:[%s8887_s2 + $0x1] ss:$0 sm:$0xff]  ;;  %v3710_v55 = vshrl.u32 %v7915_v9, 16 }
 0x214   : > { %2839 = vrot.lane.b32.xlu0 %v5915_v36, %s6053_s27  ;;  %v4181_v61 = vsel %vm347_vm0, %v4177_v50, %v4180_v44  ;;  %v2752_v50 = vshll.u32 %v5922_v39, 16 }
 0x215   : > { %v7896_v26 = vpop.permute.xlu1 %3750  ;;  %5741 = vmatprep.mubr.msk.bf16.mxu1 %vm763_vm4, %v4181_v61 }
 0x216   : > { %v5667_v54 = vpop.f32.mrf.mxu1  ;;  %5742 = vmatmul.mubr.msk.bf16.gmra.mxu1 %vm763_vm4, %v4191_v56  ;;  %v2826_v57 = vpop.permute.xlu0 %2825 }
 0x217   : > { %3846 = vrot.lane.b32.xlu1 %v7852_v32, %s6053_s27  ;;  %v2282_v28 = vmul.f32 %v7909_v5, %v5667_v54  ;;  %v2937_v20 = vsel %vm689_vm2, %v2905_v27, %v2826_v57  ;;  %v3701_v32 = vshll.u32 %v5919_v45, 16  ;;  %v2750_v27 = vor.u32 %v2749_v1, %v2745_v62 }
 0x218   : > { %v2153_v0 = vpop.f32.mrf.mxu1  ;;  %3778 = vrot.lane.b32.xlu0 %v3695_v53, %s6052_s26 }
 0x219   : > { %v2873_v7 = vpop.permute.xlu1 %2872  ;;  %v2314_v34 = vadd.f32 %v7920_v16, %v2282_v28  ;;  %v2280_v58 = vmul.f32 %v7909_v5, %v2153_v0  ;;  %v3703_v51 = vrot.slane %v3701_v32, 1  ;;  %v2754_v28 = vrot.slane %v2752_v50, 1 }
 0x21a   : > { %v2969_v2 = vsel %vm722_vm3, %v2937_v20, %v2873_v7  ;;  %v5668_v36 = vpop.f32.mrf.mxu1  ;;  %v2828_v37 = vpop.permute.xlu0 %2827 }
 0x21b   : > { %3776 = vrot.lane.b32.xlu1 %v3682_v17, %s6052_s26  ;;  %5707 = vmatprep.mubr.msk.bf16.mxu0 %vm763_vm4, %v2969_v2  ;;  %v2346_v25 = vmax.f32 %v2314_v34, 0.0  ;;  %v2312_v11 = vadd.f32 %v7920_v16, %v2280_v58  ;;  %v2283_v15 = vmul.f32 %v7909_v5, %v5668_v36  ;;  %v3706_v17 = vshll.u32 %v7915_v9, 16  ;;  %v7994_v58 = vld [vmem:[%s6109_s25 + $0xc0] sm:$0xff]   ;;  %v6001_v2 = vld [vmem:[%s6109_s25 + $0x54] sm:$0xff]  }
 0x21c   : > { %v2156_v49 = vpop.f32.mrf.mxu1  ;;  %2886 = vrot.lane.b32.xlu0 %v7926_v52, %s6054_s28  ;;  %v3704_v40 = vor.u32 %v3703_v51, %v3699_v18  ;;  %v2939_v4 = vsel %vm689_vm2, %v2907_v47, %v2828_v37  ;;  %v3965_v36 = vsel %vm656_vm1, %v6001_v2, %v7896_v26  ;;  %v8009_v26 = vsel %vm347_vm0, %v2750_v27, %v2754_v28 }
 0x21d   : > { %v7939_v22 = vpop.permute.xlu1 %3822  ;;  %5355 = vst.msk [vmem:[%s7420_s21 + $0x110] sm:$0xff] %vm689_vm2, %v2346_v25  ;;  %v2344_v31 = vmax.f32 %v2312_v11, 0.0  ;;  %v2315_v29 = vadd.f32 %v7920_v16, %v2283_v15  ;;  %v2281_v59 = vmul.f32 %v7909_v5, %v2156_v49  ;;  %v3708_v46 = vrot.slane %v3706_v17, 1 }
 0x21e   : > { %v5671_v21 = vpop.f32.mrf.mxu1  ;;  %v7946_v43 = vpop.permute.xlu0 %3754  ;;  %v4029_v15 = vsel %vm689_vm2, %v3965_v36, %v7939_v22  ;;  %v3715_v39 = vshll.u32 %v7994_v58, 16 }
 0x21f   : > { %3924 = vrot.lane.b32.xlu1 %v3695_v53, %s6054_s28  ;;  %5353 = vst.msk [vmem:[%s7420_s21 + $0x100] sm:$0xff] %vm689_vm2, %v2344_v31  ;;  %v2347_v24 = vmax.f32 %v2315_v29, 0.0  ;;  %v2313_v38 = vadd.f32 %v7920_v16, %v2281_v59  ;;  %v2286_v30 = vmul.f32 %v7909_v5, %v5671_v21  ;;  %v7982_v12 = vsel %vm347_vm0, %v3704_v40, %v3708_v46  ;;  %v8018_v21 = vld [vmem:[%s6109_s25 + $0xb4] sm:$0xff]  }
 0x220   : > { %v2169_v13 = vpop.f32.mrf.mxu1  ;;  %3850 = vrot.lane.b32.xlu0 %v5919_v45, %s6053_s27  ;;  %v3717_v50 = vrot.slane %v3715_v39, 1  ;;  %v2757_v27 = vshrl.u32 %v8018_v21, 16 }
 0x221   : > { %v7956_v41 = vpop.permute.xlu1 %3752  ;;  %5356 = vst.msk [vmem:[%s7420_s21 + $0x118] sm:$0xff] %vm689_vm2, %v2347_v24  ;;  %v2345_v8 = vmax.f32 %v2313_v38, 0.0  ;;  %v2318_v42 = vadd.f32 %v7920_v16, %v2286_v30  ;;  %v2284_v63 = vmul.f32 %v7909_v5, %v2169_v13  ;;  %v3969_v24 = vsel %vm656_vm1, %v6002_v14, %v7946_v43 }
 0x222   : > { %v5672_v23 = vpop.f32.mrf.mxu1  ;;  %v2875_v10 = vpop.permute.xlu0 %2874  ;;  %v3713_v43 = vshrl.u32 %v7994_v58, 16 }
 0x223   : > { %3848 = vrot.lane.b32.xlu1 %v7866_v6, %s6053_s27  ;;  %5354 = vst.msk [vmem:[%s7420_s21 + $0x108] sm:$0xff] %vm689_vm2, %v2345_v8  ;;  %v2350_v35 = vmax.f32 %v2318_v42, 0.0  ;;  %v2316_v44 = vadd.f32 %v7920_v16, %v2284_v63  ;;  %v2287_v48 = vmul.f32 %v7909_v5, %v5672_v23  ;;  %v2971_v56 = vsel %vm722_vm3, %v2939_v4, %v2875_v10  ;;  %v6003_v8 = vld [vmem:[%s6109_s25 + $0x68] ss:$0 sps:$4 sm:$0x11]  }
 0x224   : > { %v2172_v61 = vpop.f32.mrf.mxu1  ;;  %3780 = vrot.lane.b32.xlu0 %v3696_v3, %s6052_s26  ;;  %5708 = vmatmul.mubr.msk.bf16.gmra.mxu0 %vm763_vm4, %v2971_v56  ;;  %v5926_v23 = vld [vmem:[%s6109_s25 + $0xbc] ss:$0 sps:$4 sm:$0x11]  }
 0x225   : > { %v3901_v6 = vpop.permute.xlu1 %3900  ;;  %5359 = vst.msk [vmem:[%s7420_s21 + $0x130] sm:$0xff] %vm689_vm2, %v2350_v35  ;;  %v2348_v45 = vmax.f32 %v2316_v44, 0.0  ;;  %v2319_v53 = vadd.f32 %v7920_v16, %v2287_v48  ;;  %v2285_v33 = vmul.f32 %v7909_v5, %v2172_v61  ;;  %v2759_v35 = vshll.u32 %v8018_v21, 16  ;;  %v6004_v44 = vld [vmem:[%s6109_s25 + $0x5c] ss:$0 sps:$4 sm:$0x11]  }
 0x226   : > { %v5675_v54 = vpop.f32.mrf.mxu1  ;;  %v3827_v57 = vpop.permute.xlu0 %3826  ;;  %v4093_v51 = vsel %vm722_vm3, %v4029_v15, %v3901_v6  ;;  %v3967_v48 = vsel %vm656_vm1, %v6004_v44, %v7956_v41  ;;  %v2764_v28 = vshll.u32 %v5926_v23, 16 }
 0x227   : > { %3852 = vrot.lane.b32.xlu1 %v7915_v9, %s6053_s27  ;;  %5357 = vst.msk [vmem:[%s7420_s21 + $0x120] sm:$0xff] %vm689_vm2, %v2348_v45  ;;  %v2351_v20 = vmax.f32 %v2319_v53, 0.0  ;;  %v2317_v0 = vadd.f32 %v7920_v16, %v2285_v33  ;;  %v2290_v7 = vmul.f32 %v7909_v5, %v5675_v54  ;;  %v4194_v40 = vshll.u32 %v4093_v51, 16 }
 0x228   : > { %v2185_v32 = vpop.f32.mrf.mxu1  ;;  %3928 = vrot.lane.b32.xlu0 %v7982_v12, %s6054_s28  ;;  %v4033_v46 = vsel %vm689_vm2, %v3969_v24, %v3827_v57 }
 0x229   : > { %v3825_v34 = vpop.permute.xlu1 %3824  ;;  %5360 = vst.msk [vmem:[%s7420_s21 + $0x138] sm:$0xff] %vm689_vm2, %v2351_v20  ;;  %v2349_v37 = vmax.f32 %v2317_v0, 0.0  ;;  %v2322_v25 = vadd.f32 %v7920_v16, %v2290_v7  ;;  %v2288_v11 = vmul.f32 %v7909_v5, %v2185_v32  ;;  %v4196_v45 = vrot.slane %v4194_v40, 1 }
 0x22a   : > { %v5676_v49 = vpop.f32.mrf.mxu1  ;;  %v3757_v18 = vpop.permute.xlu0 %3756  ;;  %v4031_v53 = vsel %vm689_vm2, %v3967_v48, %v3825_v34  ;;  %v4192_v20 = vshrl.u32 %v4093_v51, 16  ;;  %v2761_v34 = vrot.slane %v2759_v35, 1  ;;  %v8103_v35 = vld [vmem:[%s6109_s25 + $0xc0] sm:$0xff]  }
 0x22b   : > { %3930 = vrot.lane.b32.xlu1 %v3710_v55, %s6054_s28  ;;  %5358 = vst.msk [vmem:[%s7420_s21 + $0x128] sm:$0xff] %vm689_vm2, %v2349_v37  ;;  %v2354_v17 = vmax.f32 %v2322_v25, 0.0  ;;  %v2320_v31 = vadd.f32 %v7920_v16, %v2288_v11  ;;  %v2291_v22 = vmul.f32 %v7909_v5, %v5676_v49  ;;  %v3971_v42 = vsel %vm656_vm1, %v6003_v8, %v3757_v18 }
 0x22c   : > { %v2188_v29 = vpop.f32.mrf.mxu1  ;;  %3926 = vrot.lane.b32.xlu0 %v3696_v3, %s6054_s28  ;;  %v8029_v3 = vld [vmem:[%s6109_s25 + $0xc8] ss:$0 sps:$4 sm:$0x11]   ;;  %v4197_v37 = vor.u32 %v4196_v45, %v4192_v20 }
 0x22d   : > { %v3829_v59 = vpop.permute.xlu1 %3828  ;;  %5363 = vst.msk [vmem:[%s7420_s21 + $0x150] sm:$0xff] %vm689_vm2, %v2354_v17  ;;  %v2352_v38 = vmax.f32 %v2320_v31, 0.0  ;;  %v2323_v30 = vadd.f32 %v7920_v16, %v2291_v22  ;;  %v2289_v13 = vmul.f32 %v7909_v5, %v2188_v29  ;;  %v3720_v6 = vshll.u32 %v8029_v3, 16 }
 0x22e   : > { %v3905_v60 = vpop.permute.xlu0 %3904  ;;  %v4035_v10 = vsel %vm689_vm2, %v3971_v42, %v3829_v59  ;;  %v2762_v22 = vor.u32 %v2761_v34, %v2757_v27  ;;  %v2766_v29 = vrot.slane %v2764_v28, 1  ;;  %v5927_v59 = vld [vmem:[%s6109_s25 + $0xcc] sm:$0xff]   ;;  %v2769_v34 = vshrl.u32 %v8103_v35, 16 }
 0x22f   : > { %2806 = vrot.lane.b32.xlu1 %v8009_v26, %s6052_s26  ;;  %5361 = vst.msk [vmem:[%s7420_s21 + $0x140] sm:$0xff] %vm689_vm2, %v2352_v38  ;;  %v2355_v47 = vmax.f32 %v2323_v30, 0.0  ;;  %v2321_v63 = vadd.f32 %v7920_v16, %v2289_v13  ;;  %v4097_v4 = vsel %vm722_vm3, %v4033_v46, %v3905_v60  ;;  %v3722_v36 = vrot.slane %v3720_v6, 1  ;;  %v6005_v13 = vld [vmem:[%s6109_s25 + $0x54] sm:$0xff]  }
 0x230   : > { %v4204_v62 = vshll.u32 %v4097_v4, 16  ;;  %2804 = vrot.lane.b32.xlu0 %v7926_v52, %s6052_s26  ;;  %v4202_v57 = vshrl.u32 %v4097_v4, 16  ;;  %v8088_v42 = vsel %vm347_vm0, %v2762_v22, %v2766_v29 }
 0x231   : > { %v3907_v1 = vpop.permute.xlu1 %3906  ;;  %5364 = vst.msk [vmem:[%s7420_s21 + $0x158] sm:$0xff] %vm689_vm2, %v2355_v47  ;;  %v2353_v56 = vmax.f32 %v2321_v63, 0.0  ;;  %v3865_v63 = vshll.u32 %v5927_v59, 16 }
 0x232   : > { %v4099_v61 = vsel %vm722_vm3, %v4035_v10, %v3907_v1  ;;  %v4206_v52 = vrot.slane %v4204_v62, 1  ;;  %v3903_v54 = vpop.permute.xlu0 %3902  ;;  %v8096_v1 = vld [vmem:[%s6109_s25 + $0xd4] ss:$0 sps:$4 sm:$0x11]  }
 0x233   : > { %v4208_v33 = vshll.u32 %v4099_v61, 16  ;;  %3782 = vrot.lane.b32.xlu1 %v7982_v12, %s6052_s26  ;;  %5362 = vst.msk [vmem:[%s7420_s21 + $0x148] sm:$0xff] %vm689_vm2, %v2353_v56  ;;  %v4095_v41 = vsel %vm722_vm3, %v4031_v53, %v3903_v54  ;;  %v3718_v12 = vor.u32 %v3717_v50, %v3713_v43  ;;  %v3863_v61 = vshrl.u32 %v5927_v59, 16  ;;  %v5930_v53 = vld [vmem:[%s6109_s25 + $0xc8] ss:$0 sps:$4 sm:$0x11]  }
 0x234   : > { %v4198_v7 = vshll.u32 %v4095_v41, 16  ;;  %2841 = vrot.lane.b32.xlu0 %v7933_v19, %s6053_s27  ;;  %v4207_v2 = vor.u32 %v4206_v52, %v4202_v57  ;;  %v3870_v6 = vshll.u32 %v8096_v1, 16  ;;  %v2771_v52 = vshll.u32 %v8103_v35, 16  ;;  %v6006_v57 = vld [vmem:[%s6109_s25 + $0x60] sm:$0xff]  }
 0x235   : > { %v4210_v0 = vrot.slane %v4208_v33, 1  ;;  %v8062_v32 = vpop.permute.xlu1 %2794  ;;  %v3723_v14 = vsel %vm347_vm0, %v3718_v12, %v3722_v36  ;;  %v3724_v54 = vshrl.u32 %v8029_v3, 16  ;;  %v2776_v12 = vshll.u32 %v5930_v53, 16  ;;  %v8132_v36 = vld [vmem:[%s6109_s25 + $0xcc] sm:$0xff]  }
 0x236   : > { %v4200_v25 = vrot.slane %v4198_v7, 1  ;;  %v5679_v11 = vpop.f32.mrf.mxu1  ;;  %v2793_v15 = vpop.permute.xlu0 %2792  ;;  %v2911_v41 = vsel %vm656_vm1, %v6006_v57, %v8062_v32  ;;  %v3872_v28 = vrot.slane %v3870_v6, 1  ;;  %v3874_v22 = vshrl.u32 %v8096_v1, 16  ;;  %v6009_v53 = vld [vmem:[%s6109_s25 + $0x80] ss:$0 sps:$4 sm:$0x11]  }
 0x237   : > { %2888 = vrot.lane.b32.xlu1 %v8009_v26, %s6054_s28  ;;  %v2294_v49 = vmul.f32 %v7909_v5, %v5679_v11  ;;  %v4211_v18 = vsel %vm347_vm0, %v4207_v2, %v4210_v0  ;;  %v2909_v40 = vsel %vm656_vm1, %v6005_v13, %v2793_v15  ;;  %v2773_v2 = vrot.slane %v2771_v52, 1 }
 0x238   : > { %v2201_v51 = vpop.f32.mrf.mxu1  ;;  %2843 = vrot.lane.b32.xlu0 %v8018_v21, %s6053_s27  ;;  %v4201_v17 = vsel %vm347_vm0, %v4197_v37, %v4200_v25 }
 0x239   : > { %v8071_v31 = vpop.permute.xlu1 %3758  ;;  %v2326_v39 = vadd.f32 %v7920_v16, %v2294_v49  ;;  %v2292_v26 = vmul.f32 %v7909_v5, %v2201_v51  ;;  %5745 = vmatprep.mubr.msk.bf16.mxu1 %vm763_vm4, %v4201_v17  ;;  %v2774_v29 = vor.u32 %v2773_v2, %v2769_v34 }
 0x23a   : > { %v5680_v24 = vpop.f32.mrf.mxu1  ;;  %5746 = vmatmul.mubr.msk.bf16.gmra.mxu1 %vm763_vm4, %v4211_v18  ;;  %v2830_v38 = vpop.permute.xlu0 %2829 }
 0x23b   : > { %3854 = vrot.lane.b32.xlu1 %v7994_v58, %s6053_s27  ;;  %v2358_v30 = vmax.f32 %v2326_v39, 0.0  ;;  %v2324_v46 = vadd.f32 %v7920_v16, %v2292_v26  ;;  %v2295_v60 = vmul.f32 %v7909_v5, %v5680_v24  ;;  %v2941_v43 = vsel %vm689_vm2, %v2909_v40, %v2830_v38  ;;  %v5932_v38 = vld [vmem:[%s6109_s25 + $0xd4] ss:$0 sps:$4 sm:$0x11]   ;;  %v6007_v40 = vld [vmem:[%s6109_s25 + $0x6c] sm:$0xff]  }
 0x23c   : > { %v2204_v47 = vpop.f32.mrf.mxu1  ;;  %3786 = vrot.lane.b32.xlu0 %v3723_v14, %s6052_s26  ;;  %v2855_v39 = vshll.u32 %v8132_v36, 16 }
 0x23d   : > { %v2877_v8 = vpop.permute.xlu1 %2876  ;;  %5367 = vst.msk [vmem:[%s7420_s21 + $0x170] sm:$0xff] %vm689_vm2, %v2358_v30  ;;  %v2356_v4 = vmax.f32 %v2324_v46, 0.0  ;;  %v2327_v23 = vadd.f32 %v7920_v16, %v2295_v60  ;;  %v2293_v10 = vmul.f32 %v7909_v5, %v2204_v47  ;;  %v3973_v46 = vsel %vm656_vm1, %v6007_v40, %v8071_v31 }
 0x23e   : > { %v2973_v62 = vsel %vm722_vm3, %v2941_v43, %v2877_v8  ;;  %v2832_v50 = vpop.permute.xlu0 %2831 }
 0x23f   : > { %3784 = vrot.lane.b32.xlu1 %v3710_v55, %s6052_s26  ;;  %5711 = vmatprep.mubr.msk.bf16.mxu0 %vm763_vm4, %v2973_v62  ;;  %5365 = vst.msk [vmem:[%s7420_s21 + $0x160] sm:$0xff] %vm689_vm2, %v2356_v4  ;;  %v2359_v44 = vmax.f32 %v2327_v23, 0.0  ;;  %v2325_v48 = vadd.f32 %v7920_v16, %v2293_v10  ;;  %v3867_v55 = vrot.slane %v3865_v63, 1  ;;  %v2943_v20 = vsel %vm689_vm2, %v2911_v41, %v2832_v50 }
 0x240   : > { %2890 = vrot.lane.b32.xlu0 %v8088_v42, %s6054_s28  ;;  %v2853_v23 = vshrl.u32 %v8132_v36, 16  ;;  %v2857_v10 = vrot.slane %v2855_v39, 1  ;;  %v2860_v50 = vshll.u32 %v5932_v38, 16 }
 0x241   : > { %v3831_v56 = vpop.permute.xlu1 %3830  ;;  %5368 = vst.msk [vmem:[%s7420_s21 + $0x178] sm:$0xff] %vm689_vm2, %v2359_v44  ;;  %v2357_v9 = vmax.f32 %v2325_v48, 0.0  ;;  %v3868_v27 = vor.u32 %v3867_v55, %v3863_v61  ;;  %v6008_v48 = vld [vmem:[%s6109_s25 + $0x78] sm:$0xff]  }
 0x242   : > { %v8113_v45 = vpop.permute.xlu0 %3762  ;;  %v4037_v8 = vsel %vm689_vm2, %v3973_v46, %v3831_v56  ;;  %v2858_v57 = vor.u32 %v2857_v10, %v2853_v23  ;;  %v2862_v41 = vrot.slane %v2860_v50, 1  ;;  %v6011_v10 = vld [vmem:[%s6109_s25 + $0x6c] sm:$0xff]  }
 0x243   : > { %3932 = vrot.lane.b32.xlu1 %v3723_v14, %s6054_s28  ;;  %5366 = vst.msk [vmem:[%s7420_s21 + $0x168] sm:$0xff] %vm689_vm2, %v2357_v9  ;;  %v3873_v18 = vsel %vm347_vm0, %v3868_v27, %v3872_v28  ;;  %v3977_v56 = vsel %vm656_vm1, %v6008_v48, %v8113_v45 }
 0x244   : > { %3858 = vrot.lane.b32.xlu0 %v5927_v59, %s6053_s27  ;;  %v2778_v59 = vrot.slane %v2776_v12, 1 }
 0x245   : > { %v8121_v33 = vpop.permute.xlu1 %3760 }
 0x246   : > { %v5683_v0 = vpop.f32.mrf.mxu1  ;;  %v2879_v7 = vpop.permute.xlu0 %2878  ;;  %v2779_v4 = vsel %vm347_vm0, %v2774_v29, %v2778_v59 }
 0x247   : > { %3856 = vrot.lane.b32.xlu1 %v8029_v3, %s6053_s27  ;;  %v2298_v37 = vmul.f32 %v7909_v5, %v5683_v0  ;;  %v2975_v25 = vsel %vm722_vm3, %v2943_v20, %v2879_v7  ;;  %v6010_v20 = vld [vmem:[%s6109_s25 + $0x74] ss:$0 sps:$4 sm:$0x11]  }
 0x248   : > { %v2217_v32 = vpop.f32.mrf.mxu1  ;;  %3788 = vrot.lane.b32.xlu0 %v3724_v54, %s6052_s26  ;;  %5712 = vmatmul.mubr.msk.bf16.gmra.mxu0 %vm763_vm4, %v2975_v25  ;;  %v3975_v0 = vsel %vm656_vm1, %v6010_v20, %v8121_v33 }
 0x249   : > { %v3909_v11 = vpop.permute.xlu1 %3908  ;;  %v2330_v15 = vadd.f32 %v7920_v16, %v2298_v37  ;;  %v2296_v49 = vmul.f32 %v7909_v5, %v2217_v32 }
 0x24a   : > { %v5684_v51 = vpop.f32.mrf.mxu1  ;;  %v3835_v17 = vpop.permute.xlu0 %3834  ;;  %v4101_v31 = vsel %vm722_vm3, %v4037_v8, %v3909_v11 }
 0x24b   : > { %3860 = vrot.lane.b32.xlu1 %v8096_v1, %s6053_s27  ;;  %v2362_v26 = vmax.f32 %v2330_v15, 0.0  ;;  %v2328_v14 = vadd.f32 %v7920_v16, %v2296_v49  ;;  %v2299_v24 = vmul.f32 %v7909_v5, %v5684_v51  ;;  %v4214_v61 = vshll.u32 %v4101_v31, 16 }
 0x24c   : > { %v2220_v30 = vpop.f32.mrf.mxu1  ;;  %3936 = vrot.lane.b32.xlu0 %v3873_v18, %s6054_s28  ;;  %v4041_v55 = vsel %vm689_vm2, %v3977_v56, %v3835_v17  ;;  %v2863_v49 = vsel %vm347_vm0, %v2858_v57, %v2862_v41  ;;  %v4212_v33 = vshrl.u32 %v4101_v31, 16 }
 0x24d   : > { %v3833_v13 = vpop.permute.xlu1 %3832  ;;  %5371 = vst.msk [vmem:[%s7420_s21 + $0x190] sm:$0xff] %vm689_vm2, %v2362_v26  ;;  %v2360_v60 = vmax.f32 %v2328_v14, 0.0  ;;  %v2331_v43 = vadd.f32 %v7920_v16, %v2299_v24  ;;  %v2297_v47 = vmul.f32 %v7909_v5, %v2220_v30  ;;  %v4216_v34 = vrot.slane %v4214_v61, 1 }
 0x24e   : > { %v3765_v63 = vpop.permute.xlu0 %3764  ;;  %v4039_v2 = vsel %vm689_vm2, %v3975_v0, %v3833_v13 }
 0x24f   : > { %3938 = vrot.lane.b32.xlu1 %v3874_v22, %s6054_s28  ;;  %5369 = vst.msk [vmem:[%s7420_s21 + $0x180] sm:$0xff] %vm689_vm2, %v2360_v60  ;;  %v2363_v62 = vmax.f32 %v2331_v43, 0.0  ;;  %v2329_v1 = vadd.f32 %v7920_v16, %v2297_v47  ;;  %v3979_v52 = vsel %vm656_vm1, %v6009_v53, %v3765_v63  ;;  %v4217_v39 = vor.u32 %v4216_v34, %v4212_v33  ;;  %v6013_v33 = vld [vmem:[%s6109_s25 + $0x84] sm:$0xff]  }
 0x250   : > { %3934 = vrot.lane.b32.xlu0 %v3724_v54, %s6054_s28 }
 0x251   : > { %v3837_v44 = vpop.permute.xlu1 %3836  ;;  %5372 = vst.msk [vmem:[%s7420_s21 + $0x198] sm:$0xff] %vm689_vm2, %v2363_v62  ;;  %v2361_v9 = vmax.f32 %v2329_v1, 0.0 }
 0x252   : > { %v3913_v6 = vpop.permute.xlu0 %3912  ;;  %v4043_v45 = vsel %vm689_vm2, %v3979_v52, %v3837_v44 }
 0x253   : > { %2810 = vrot.lane.b32.xlu1 %v2779_v4, %s6052_s26  ;;  %5370 = vst.msk [vmem:[%s7420_s21 + $0x188] sm:$0xff] %vm689_vm2, %v2361_v9  ;;  %v4105_v54 = vsel %vm722_vm3, %v4041_v55, %v3913_v6 }
 0x254   : > { %v4224_v27 = vshll.u32 %v4105_v54, 16  ;;  %2808 = vrot.lane.b32.xlu0 %v8088_v42, %s6052_s26  ;;  %v4222_v11 = vshrl.u32 %v4105_v54, 16  ;;  %v6012_v54 = vld [vmem:[%s6109_s25 + $0x78] sm:$0xff]  }
 0x255   : > { %v3915_v28 = vpop.permute.xlu1 %3914 }
 0x256   : > { %v4107_v7 = vsel %vm722_vm3, %v4043_v45, %v3915_v28  ;;  %v4226_v12 = vrot.slane %v4224_v27, 1  ;;  %v5687_v25 = vpop.f32.mrf.mxu1  ;;  %v3911_v32 = vpop.permute.xlu0 %3910 }
 0x257   : > { %v4228_v37 = vshll.u32 %v4107_v7, 16  ;;  %2847 = vrot.lane.b32.xlu1 %v8132_v36, %s6053_s27  ;;  %v2302_v42 = vmul.f32 %v7909_v5, %v5687_v25  ;;  %v4103_v15 = vsel %vm722_vm3, %v4039_v2, %v3911_v32 }
 0x258   : > { %v4218_v51 = vshll.u32 %v4103_v15, 16  ;;  %v2233_v17 = vpop.f32.mrf.mxu1  ;;  %2845 = vrot.lane.b32.xlu0 %v8103_v35, %s6053_s27  ;;  %v4227_v29 = vor.u32 %v4226_v12, %v4222_v11 }
 0x259   : > { %v4230_v18 = vrot.slane %v4228_v37, 1  ;;  %v2799_v22 = vpop.permute.xlu1 %2798  ;;  %v2334_v59 = vadd.f32 %v7920_v16, %v2302_v42  ;;  %v2300_v36 = vmul.f32 %v7909_v5, %v2233_v17 }
 0x25a   : > { %v4220_v26 = vrot.slane %v4218_v51, 1  ;;  %v5688_v14 = vpop.f32.mrf.mxu1  ;;  %v2797_v24 = vpop.permute.xlu0 %2796  ;;  %v2915_v57 = vsel %vm656_vm1, %v6012_v54, %v2799_v22 }
 0x25b   : > { %2894 = vrot.lane.b32.xlu1 %v2863_v49, %s6054_s28  ;;  %v2366_v38 = vmax.f32 %v2334_v59, 0.0  ;;  %v2332_v30 = vadd.f32 %v7920_v16, %v2300_v36  ;;  %v2303_v13 = vmul.f32 %v7909_v5, %v5688_v14  ;;  %v4231_v40 = vsel %vm347_vm0, %v4227_v29, %v4230_v18 }
 0x25c   : > { %v2236_v46 = vpop.f32.mrf.mxu1  ;;  %2892 = vrot.lane.b32.xlu0 %v2779_v4, %s6054_s28  ;;  %v4221_v60 = vsel %vm347_vm0, %v4217_v39, %v4220_v26  ;;  %v2913_v31 = vsel %vm656_vm1, %v6011_v10, %v2797_v24  ;;  %v6014_v39 = vld [vmem:[%s6109_s25 + $0x90] sm:$0xff]  }
 0x25d   : > { %v3767_v43 = vpop.permute.xlu1 %3766  ;;  %5375 = vst.msk [vmem:[%s7420_s21 + $0x1b0] sm:$0xff] %vm689_vm2, %v2366_v38  ;;  %v2364_v47 = vmax.f32 %v2332_v30, 0.0  ;;  %v2335_v8 = vadd.f32 %v7920_v16, %v2303_v13  ;;  %v2301_v63 = vmul.f32 %v7909_v5, %v2236_v46  ;;  %5749 = vmatprep.mubr.msk.bf16.mxu1 %vm763_vm4, %v4221_v60  ;;  %v6015_v13 = vld [vmem:[%s6109_s25 + $0x98] ss:$0 sps:$4 sm:$0x11]  }
 0x25e   : > { %5750 = vmatmul.mubr.msk.bf16.gmra.mxu1 %vm763_vm4, %v4231_v40  ;;  %v2834_v23 = vpop.permute.xlu0 %2833  ;;  %v3981_v18 = vsel %vm656_vm1, %v6013_v33, %v3767_v43  ;;  %v6016_v43 = vld [vmem:[%s6109_s25 + $0x8c] ss:$0 sps:$4 sm:$0x11]   ;;  %v6017_v33 = vld [vmem:[%s6109_s25 + $0x84] sm:$0xff]  }
 0x25f   : > { %5373 = vst.msk [vmem:[%s7420_s21 + $0x1a0] sm:$0xff] %vm689_vm2, %v2364_v47  ;;  %v2367_v4 = vmax.f32 %v2335_v8, 0.0  ;;  %v2333_v62 = vadd.f32 %v7920_v16, %v2301_v63  ;;  %v2945_v1 = vsel %vm689_vm2, %v2913_v31, %v2834_v23 }
 0x261   : > { %v2881_v50 = vpop.permute.xlu1 %2880  ;;  %5376 = vst.msk [vmem:[%s7420_s21 + $0x1b8] sm:$0xff] %vm689_vm2, %v2367_v4  ;;  %v2365_v44 = vmax.f32 %v2333_v62, 0.0 }
 0x262   : > { %v2977_v48 = vsel %vm722_vm3, %v2945_v1, %v2881_v50  ;;  %v2836_v56 = vpop.permute.xlu0 %2835 }
 0x263   : > { %5715 = vmatprep.mubr.msk.bf16.mxu0 %vm763_vm4, %v2977_v48  ;;  %5374 = vst.msk [vmem:[%s7420_s21 + $0x1a8] sm:$0xff] %vm689_vm2, %v2365_v44  ;;  %v2947_v27 = vsel %vm689_vm2, %v2915_v57, %v2836_v56 }
 0x265   : > { %v3839_v9 = vpop.permute.xlu1 %3838 }
 0x266   : > { %v5691_v61 = vpop.f32.mrf.mxu1  ;;  %v3771_v55 = vpop.permute.xlu0 %3770  ;;  %v4045_v17 = vsel %vm689_vm2, %v3981_v18, %v3839_v9 }
 0x267   : > { %v2306_v6 = vmul.f32 %v7909_v5, %v5691_v61  ;;  %v3985_v26 = vsel %vm656_vm1, %v6014_v39, %v3771_v55 }
 0x268   : > { %v2249_v53 = vpop.f32.mrf.mxu1 }
 0x269   : > { %v3769_v52 = vpop.permute.xlu1 %3768  ;;  %v2338_v41 = vadd.f32 %v7920_v16, %v2306_v6  ;;  %v2304_v45 = vmul.f32 %v7909_v5, %v2249_v53 }
 0x26a   : > { %v5692_v28 = vpop.f32.mrf.mxu1  ;;  %v2883_v20 = vpop.permute.xlu0 %2882  ;;  %v3983_v47 = vsel %vm656_vm1, %v6016_v43, %v3769_v52 }
 0x26b   : > { %v2370_v0 = vmax.f32 %v2338_v41, 0.0  ;;  %v2336_v7 = vadd.f32 %v7920_v16, %v2304_v45  ;;  %v2307_v34 = vmul.f32 %v7909_v5, %v5692_v28  ;;  %v2979_v2 = vsel %vm722_vm3, %v2947_v27, %v2883_v20 }
 0x26c   : > { %v2252_v12 = vpop.f32.mrf.mxu1  ;;  %5716 = vmatmul.mubr.msk.bf16.gmra.mxu0 %vm763_vm4, %v2979_v2 }
 0x26d   : > { %v3917_v37 = vpop.permute.xlu1 %3916  ;;  %5379 = vst.msk [vmem:[%s7420_s21 + $0x1d0] sm:$0xff] %vm689_vm2, %v2370_v0  ;;  %v2368_v25 = vmax.f32 %v2336_v7, 0.0  ;;  %v2339_v32 = vadd.f32 %v7920_v16, %v2307_v34  ;;  %v2305_v11 = vmul.f32 %v7909_v5, %v2252_v12 }
 0x26e   : > { %v3843_v42 = vpop.permute.xlu0 %3842  ;;  %v4109_v29 = vsel %vm722_vm3, %v4045_v17, %v3917_v37 }
 0x26f   : > { %5377 = vst.msk [vmem:[%s7420_s21 + $0x1c0] sm:$0xff] %vm689_vm2, %v2368_v25  ;;  %v2371_v15 = vmax.f32 %v2339_v32, 0.0  ;;  %v2337_v49 = vadd.f32 %v7920_v16, %v2305_v11  ;;  %v4234_v14 = vshll.u32 %v4109_v29, 16  ;;  %v4049_v24 = vsel %vm689_vm2, %v3985_v26, %v3843_v42  ;;  %v6018_v26 = vld [vmem:[%s6109_s25 + $0x90] sm:$0xff]  }
 0x270   : > { %v4232_v54 = vshrl.u32 %v4109_v29, 16 }
 0x271   : > { %v3841_v51 = vpop.permute.xlu1 %3840  ;;  %5380 = vst.msk [vmem:[%s7420_s21 + $0x1d8] sm:$0xff] %vm689_vm2, %v2371_v15  ;;  %v2369_v22 = vmax.f32 %v2337_v49, 0.0  ;;  %v4236_v10 = vrot.slane %v4234_v14, 1 }
 0x272   : > { %v3773_v59 = vpop.permute.xlu0 %3772  ;;  %v4047_v50 = vsel %vm689_vm2, %v3983_v47, %v3841_v51 }
 0x273   : > { %5378 = vst.msk [vmem:[%s7420_s21 + $0x1c8] sm:$0xff] %vm689_vm2, %v2369_v22  ;;  %v3987_v40 = vsel %vm656_vm1, %v6015_v13, %v3773_v59  ;;  %v4237_v34 = vor.u32 %v4236_v10, %v4232_v54  ;;  %v6020_v54 = vld [vmem:[%s6109_s25 + $0xa8] sm:$0xff]  }
 0x275   : > { %v3845_v36 = vpop.permute.xlu1 %3844 }
 0x276   : > { %v5695_v38 = vpop.f32.mrf.mxu1  ;;  %v3921_v30 = vpop.permute.xlu0 %3920  ;;  %v4051_v8 = vsel %vm689_vm2, %v3987_v40, %v3845_v36 }
 0x277   : > { %v2310_v46 = vmul.f32 %v7909_v5, %v5695_v38  ;;  %v4113_v60 = vsel %vm722_vm3, %v4049_v24, %v3921_v30 }
 0x278   : > { %v4244_v63 = vshll.u32 %v4113_v60, 16  ;;  %v2265_v23 = vpop.f32.mrf.mxu1  ;;  %v4242_v44 = vshrl.u32 %v4113_v60, 16 }
 0x279   : > { %v3923_v4 = vpop.permute.xlu1 %3922  ;;  %v2342_v31 = vadd.f32 %v7920_v16, %v2310_v46  ;;  %v2308_v62 = vmul.f32 %v7909_v5, %v2265_v23 }
 0x27a   : > { %v4115_v1 = vsel %vm722_vm3, %v4051_v8, %v3923_v4  ;;  %v4246_v48 = vrot.slane %v4244_v63, 1  ;;  %v5696_v9 = vpop.f32.mrf.mxu1  ;;  %v3919_v61 = vpop.permute.xlu0 %3918 }
 0x27b   : > { %v4248_v56 = vshll.u32 %v4115_v1, 16  ;;  %v2374_v55 = vmax.f32 %v2342_v31, 0.0  ;;  %v2340_v6 = vadd.f32 %v7920_v16, %v2308_v62  ;;  %v2311_v53 = vmul.f32 %v7909_v5, %v5696_v9  ;;  %v6019_v1 = vld [vmem:[%s6109_s25 + $0x9c] sm:$0xff]  }
 0x27c   : > { %v4111_v52 = vsel %vm722_vm3, %v4047_v50, %v3919_v61  ;;  %v2268_v45 = vpop.f32.mrf.mxu1  ;;  %v4247_v28 = vor.u32 %v4246_v48, %v4242_v44 }
 0x27d   : > { %v4250_v57 = vrot.slane %v4248_v56, 1  ;;  %v4238_v41 = vshll.u32 %v4111_v52, 16  ;;  %v2803_v27 = vpop.permute.xlu1 %2802  ;;  %5383 = vst.msk [vmem:[%s7420_s21 + $0x1f0] sm:$0xff] %vm689_vm2, %v2374_v55  ;;  %v2372_v20 = vmax.f32 %v2340_v6, 0.0  ;;  %v2343_v0 = vadd.f32 %v7920_v16, %v2311_v53 }
 0x27e   : > { %v2309_v7 = vmul.f32 %v7909_v5, %v2268_v45  ;;  %v2801_v12 = vpop.permute.xlu0 %2800  ;;  %v2919_v14 = vsel %vm656_vm1, %v6018_v26, %v2803_v27 }
 0x27f   : > { %v4240_v2 = vrot.slane %v4238_v41, 1  ;;  %5381 = vst.msk [vmem:[%s7420_s21 + $0x1e0] sm:$0xff] %vm689_vm2, %v2372_v20  ;;  %v2375_v37 = vmax.f32 %v2343_v0, 0.0  ;;  %v4251_v32 = vsel %vm347_vm0, %v4247_v28, %v4250_v57  ;;  %v2917_v18 = vsel %vm656_vm1, %v6017_v33, %v2801_v12  ;;  %v6021_v20 = vld [vmem:[%s6109_s25 + $0xb0] ss:$0 sps:$4 sm:$0x11]  }
 0x280   : > { %v2341_v25 = vadd.f32 %v7920_v16, %v2309_v7 }
 0x281   : > { %v4241_v11 = vsel %vm347_vm0, %v4237_v34, %v4240_v2  ;;  %v3775_v42 = vpop.permute.xlu1 %3774  ;;  %5384 = vst.msk [vmem:[%s7420_s21 + $0x1f8] sm:$0xff] %vm689_vm2, %v2375_v37 }
 0x282   : > { %v2373_v15 = vmax.f32 %v2341_v25, 0.0  ;;  %5753 = vmatprep.mubr.msk.bf16.mxu1 %vm763_vm4, %v4241_v11  ;;  %v2838_v49 = vpop.permute.xlu0 %2837  ;;  %v3989_v50 = vsel %vm656_vm1, %v6019_v1, %v3775_v42  ;;  %v6022_v25 = vld [vmem:[%s6109_s25 + $0xa4] ss:$0 sps:$4 sm:$0x11]  }
 0x283   : > { %5754 = vmatmul.mubr.msk.bf16.gmra.mxu1 %vm763_vm4, %v4251_v32  ;;  %v2949_v51 = vsel %vm689_vm2, %v2917_v18, %v2838_v49 }
 0x284   : > { %5382 = vst.msk [vmem:[%s7420_s21 + $0x1e8] sm:$0xff] %vm689_vm2, %v2373_v15 }
 0x285   : > { %v2885_v17 = vpop.permute.xlu1 %2884 }
 0x286   : > { %v2981_v22 = vsel %vm722_vm3, %v2949_v51, %v2885_v17  ;;  %v2840_v29 = vpop.permute.xlu0 %2839 }
 0x287   : > { %5719 = vmatprep.mubr.msk.bf16.mxu0 %vm763_vm4, %v2981_v22  ;;  %v2951_v24 = vsel %vm689_vm2, %v2919_v14, %v2840_v29 }
 0x289   : > { %v3847_v59 = vpop.permute.xlu1 %3846 }
 0x28a   : > { %v3779_v36 = vpop.permute.xlu0 %3778  ;;  %v4053_v9 = vsel %vm689_vm2, %v3989_v50, %v3847_v59 }
 0x28b   : > { %v3993_v57 = vsel %vm656_vm1, %v6020_v54, %v3779_v36 }
 0x28d   : > { %v3777_v39 = vpop.permute.xlu1 %3776 }
 0x28e   : > { %v5735_v38 = vpop.f32.mrf.mxu1  ;;  %v2887_v30 = vpop.permute.xlu0 %2886  ;;  %v3991_v32 = vsel %vm656_vm1, %v6022_v25, %v3777_v39 }
 0x28f   : > { %v4512_v13 = vmul.f32 %v7909_v5, %v5735_v38  ;;  %v2983_v40 = vsel %vm722_vm3, %v2951_v24, %v2887_v30 }
 0x290   : > { %5720 = vmatmul.mubr.msk.bf16.gmra.mxu0 %vm763_vm4, %v2983_v40  ;;  %v4383_v46 = vpop.f32.mrf.mxu1 }
 0x291   : > { %v3925_v60 = vpop.permute.xlu1 %3924  ;;  %v4544_v43 = vadd.f32 %v7920_v16, %v4512_v13  ;;  %v4510_v47 = vmul.f32 %v7909_v5, %v4383_v46 }
 0x292   : > { %v5736_v8 = vpop.f32.mrf.mxu1  ;;  %v3851_v63 = vpop.permute.xlu0 %3850  ;;  %v4117_v55 = vsel %vm722_vm3, %v4053_v9, %v3925_v60 }
 0x293   : > { %v4576_v23 = vmax.f32 %v4544_v43, 0.0  ;;  %v4542_v4 = vadd.f32 %v7920_v16, %v4510_v47  ;;  %v4513_v10 = vmul.f32 %v7909_v5, %v5736_v8  ;;  %v4254_v45 = vshll.u32 %v4117_v55, 16 }
 0x294   : > { %v4386_v31 = vpop.f32.mrf.mxu1  ;;  %v4057_v27 = vsel %vm689_vm2, %v3993_v57, %v3851_v63  ;;  %v4252_v39 = vshrl.u32 %v4117_v55, 16 }
 0x295   : > { %v3849_v62 = vpop.permute.xlu1 %3848  ;;  %5525 = vst.msk [vmem:[%s7420_s21 + $0x310] sm:$0xff] %vm689_vm2, %v4576_v23  ;;  %v4574_v44 = vmax.f32 %v4542_v4, 0.0  ;;  %v4545_v48 = vadd.f32 %v7920_v16, %v4513_v10  ;;  %v4511_v56 = vmul.f32 %v7909_v5, %v4386_v31  ;;  %v4256_v15 = vrot.slane %v4254_v45, 1 }
 0x296   : > { %v3781_v61 = vpop.permute.xlu0 %3780  ;;  %v4055_v49 = vsel %vm689_vm2, %v3991_v32, %v3849_v62 }
 0x297   : > { %5523 = vst.msk [vmem:[%s7420_s21 + $0x300] sm:$0xff] %vm689_vm2, %v4574_v44  ;;  %v4577_v6 = vmax.f32 %v4545_v48, 0.0  ;;  %v4543_v53 = vadd.f32 %v7920_v16, %v4511_v56  ;;  %v3995_v0 = vsel %vm656_vm1, %v6021_v20, %v3781_v61  ;;  %v4257_v60 = vor.u32 %v4256_v15, %v4252_v39 }
 0x299   : > { %v3853_v52 = vpop.permute.xlu1 %3852  ;;  %5526 = vst.msk [vmem:[%s7420_s21 + $0x318] sm:$0xff] %vm689_vm2, %v4577_v6  ;;  %v4575_v41 = vmax.f32 %v4543_v53, 0.0 }
 0x29a   : > { %v3929_v28 = vpop.permute.xlu0 %3928  ;;  %v4059_v34 = vsel %vm689_vm2, %v3995_v0, %v3853_v52 }
 0x29b   : > { %5524 = vst.msk [vmem:[%s7420_s21 + $0x308] sm:$0xff] %vm689_vm2, %v4575_v41  ;;  %v4121_v7 = vsel %vm722_vm3, %v4057_v27, %v3929_v28  ;;  %v8348_v27 = vld [vmem:[%s8887_s2] ss:$0 sm:$0xff] }
 0x29c   : > { %v4264_v2 = vshll.u32 %v4121_v7, 16  ;;  %v5701_v12 = vpop.f32.mrf.mxu0  ;;  %v4262_v22 = vshrl.u32 %v4121_v7, 16 }
 0x29d   : > { %v3931_v37 = vpop.permute.xlu1 %3930  ;;  %v3196_v11 = vmul.f32 %v7909_v5, %v5701_v12 }
 0x29e   : > { %v4123_v42 = vsel %vm722_vm3, %v4059_v34, %v3931_v37  ;;  %v4266_v33 = vrot.slane %v4264_v2, 1  ;;  %v3067_v51 = vpop.f32.mrf.mxu0  ;;  %v3927_v17 = vpop.permute.xlu0 %3926 }
 0x29f   : > { %v4268_v18 = vshll.u32 %v4123_v42, 16  ;;  %v3228_v29 = vadd.f32 %v7920_v16, %v3196_v11  ;;  %v3194_v59 = vmul.f32 %v7909_v5, %v3067_v51  ;;  %v4119_v36 = vsel %vm722_vm3, %v4055_v49, %v3927_v17  ;;  %v6026_v49 = vld [vmem:[%s6109_s25 + $0xb4] sm:$0xff]  }
 0x2a0   : > { %v4258_v14 = vshll.u32 %v4119_v36, 16  ;;  %v5702_v24 = vpop.f32.mrf.mxu0  ;;  %v4267_v30 = vor.u32 %v4266_v33, %v4262_v22 }
 0x2a1   : > { %v4270_v26 = vrot.slane %v4268_v18, 1  ;;  %v2807_v38 = vpop.permute.xlu1 %2806  ;;  %v3260_v13 = vmax.f32 %v3228_v29, 0.0  ;;  %v3226_v40 = vadd.f32 %v7920_v16, %v3194_v59  ;;  %v3197_v46 = vmul.f32 %v7909_v5, %v5702_v24 }
 0x2a2   : > { %v4260_v43 = vrot.slane %v4258_v14, 1  ;;  %v3070_v47 = vpop.f32.mrf.mxu0  ;;  %v2805_v8 = vpop.permute.xlu0 %2804  ;;  %v2923_v54 = vsel %vm656_vm1, %v7933_v19, %v2807_v38  ;;  %v8356_v19 = vld [vmem:[%s8887_s2 + $0x1] ss:$0 sm:$0xff] }
 0x2a3   : > { %5440 = vst.msk [vmem:[%s7420_s21 + $0x210] sm:$0xff] %vm689_vm2, %v3260_v13  ;;  %v3258_v63 = vmax.f32 %v3226_v40, 0.0  ;;  %v3229_v23 = vadd.f32 %v7920_v16, %v3197_v46  ;;  %v3195_v4 = vmul.f32 %v7909_v5, %v3070_v47  ;;  %v4271_v10 = vsel %vm347_vm0, %v4267_v30, %v4270_v26  ;;  %v6023_v5 = vld [vmem:[%s6109_s25 + $0x9c] sm:$0xff]  }
 0x2a4   : > { %v4261_v31 = vsel %vm347_vm0, %v4257_v60, %v4260_v43  ;;  %v2921_v56 = vsel %vm656_vm1, %v6023_v5, %v2805_v8 }
 0x2a5   : > { %v3783_v62 = vpop.permute.xlu1 %3782  ;;  %5438 = vst.msk [vmem:[%s7420_s21 + $0x200] sm:$0xff] %vm689_vm2, %v3258_v63  ;;  %v3261_v1 = vmax.f32 %v3229_v23, 0.0  ;;  %v3227_v50 = vadd.f32 %v7920_v16, %v3195_v4  ;;  %5757 = vmatprep.mubr.msk.bf16.mxu1 %vm763_vm4, %v4261_v31 }
 0x2a6   : > { %5758 = vmatmul.mubr.msk.bf16.gmra.mxu1 %vm763_vm4, %v4271_v10  ;;  %v2842_v44 = vpop.permute.xlu0 %2841  ;;  %v3997_v33 = vsel %vm656_vm1, %v6026_v49, %v3783_v62 }
 0x2a7   : > { %5441 = vst.msk [vmem:[%s7420_s21 + $0x218] sm:$0xff] %vm689_vm2, %v3261_v1  ;;  %v3259_v48 = vmax.f32 %v3227_v50, 0.0  ;;  %v2953_v9 = vsel %vm689_vm2, %v2921_v56, %v2842_v44 }
 0x2a9   : > { %v2889_v61 = vpop.permute.xlu1 %2888  ;;  %5439 = vst.msk [vmem:[%s7420_s21 + $0x208] sm:$0xff] %vm689_vm2, %v3259_v48 }
 0x2aa   : > { %v2985_v55 = vsel %vm722_vm3, %v2953_v9, %v2889_v61  ;;  %v2844_v6 = vpop.permute.xlu0 %2843 }
 0x2ab   : > { %5723 = vmatprep.mubr.msk.bf16.mxu0 %vm763_vm4, %v2985_v55  ;;  %v2955_v57 = vsel %vm689_vm2, %v2923_v54, %v2844_v6 }
 0x2ad   : > { %v3855_v16 = vpop.permute.xlu1 %3854 }
 0x2ae   : > { %v3787_v53 = vpop.permute.xlu0 %3786  ;;  %v4061_v22 = vsel %vm689_vm2, %v3997_v33, %v3855_v16 }
 0x2af   : > { %v4001_v14 = vsel %vm656_vm1, %v7994_v58, %v3787_v53  ;;  %v6027_v58 = vld [vmem:[%s6109_s25 + $0xbc] ss:$0 sps:$4 sm:$0x11]   ;;  %s5560_s25 = sshll.u32 (%p6100_p4), %s6088_s15, 8 }
 0x2b0   : > { %s8620_s6 = scalar_lea.vmem (%p6100_p4), %s8888_s3, %s5560_s25 }
 0x2b1   : > { %v3785_v52 = vpop.permute.xlu1 %3784 }
 0x2b2   : > { %v5739_v41 = vpop.f32.mrf.mxu1  ;;  %v2891_v45 = vpop.permute.xlu0 %2890  ;;  %v3999_v63 = vsel %vm656_vm1, %v6027_v58, %v3785_v52 }
 0x2b3   : > { %v4516_v28 = vmul.f32 %v8348_v27, %v5739_v41  ;;  %v2987_v20 = vsel %vm722_vm3, %v2955_v57, %v2891_v45 }
 0x2b4   : > { %5724 = vmatmul.mubr.msk.bf16.gmra.mxu0 %vm763_vm4, %v2987_v20  ;;  %v4399_v0 = vpop.f32.mrf.mxu1 }
 0x2b5   : > { %v3933_v7 = vpop.permute.xlu1 %3932  ;;  %v4548_v34 = vadd.f32 %v8356_v19, %v4516_v28  ;;  %v4514_v2 = vmul.f32 %v8348_v27, %v4399_v0 }
 0x2b6   : > { %v5740_v12 = vpop.f32.mrf.mxu1  ;;  %v3859_v37 = vpop.permute.xlu0 %3858  ;;  %v4125_v59 = vsel %vm722_vm3, %v4061_v22, %v3933_v7 }
 0x2b7   : > { %v4580_v25 = vmax.f32 %v4548_v34, 0.0  ;;  %v4546_v32 = vadd.f32 %v8356_v19, %v4514_v2  ;;  %v4517_v11 = vmul.f32 %v8348_v27, %v5740_v12  ;;  %v4274_v38 = vshll.u32 %v4125_v59, 16 }
 0x2b8   : > { %v4402_v42 = vpop.f32.mrf.mxu1  ;;  %v4065_v30 = vsel %vm689_vm2, %v4001_v14, %v3859_v37  ;;  %v4272_v9 = vshrl.u32 %v4125_v59, 16 }
 0x2b9   : > { %v3857_v15 = vpop.permute.xlu1 %3856  ;;  %5529 = vst.msk [vmem:[%s7420_s21 + $0x330] sm:$0xff] %vm689_vm2, %v4580_v25  ;;  %v4578_v18 = vmax.f32 %v4546_v32, 0.0  ;;  %v4549_v51 = vadd.f32 %v8356_v19, %v4517_v11  ;;  %v4515_v17 = vmul.f32 %v8348_v27, %v4402_v42  ;;  %v4276_v10 = vrot.slane %v4274_v38, 1 }
 0x2ba   : > { %v3789_v29 = vpop.permute.xlu0 %3788  ;;  %v4063_v31 = vsel %vm689_vm2, %v3999_v63, %v3857_v15 }
 0x2bb   : > { %5527 = vst.msk [vmem:[%s7420_s21 + $0x320] sm:$0xff] %vm689_vm2, %v4578_v18  ;;  %v4581_v36 = vmax.f32 %v4549_v51, 0.0  ;;  %v4547_v39 = vadd.f32 %v8356_v19, %v4515_v17  ;;  %v4003_v40 = vsel %vm656_vm1, %v8029_v3, %v3789_v29  ;;  %v4277_v41 = vor.u32 %v4276_v10, %v4272_v9 }
 0x2bd   : > { %v3861_v26 = vpop.permute.xlu1 %3860  ;;  %5530 = vst.msk [vmem:[%s7420_s21 + $0x338] sm:$0xff] %vm689_vm2, %v4581_v36  ;;  %v4579_v24 = vmax.f32 %v4547_v39, 0.0 }
 0x2be   : > { %v3937_v13 = vpop.permute.xlu0 %3936  ;;  %v4067_v60 = vsel %vm689_vm2, %v4003_v40, %v3861_v26 }
 0x2bf   : > { %5528 = vst.msk [vmem:[%s7420_s21 + $0x328] sm:$0xff] %vm689_vm2, %v4579_v24  ;;  %v4129_v46 = vsel %vm722_vm3, %v4065_v30, %v3937_v13 }
 0x2c0   : > { %v4284_v43 = vshll.u32 %v4129_v46, 16  ;;  %v5705_v47 = vpop.f32.mrf.mxu0  ;;  %v4282_v44 = vshrl.u32 %v4129_v46, 16 }
 0x2c1   : > { %v3939_v8 = vpop.permute.xlu1 %3938  ;;  %v3200_v23 = vmul.f32 %v8348_v27, %v5705_v47 }
 0x2c2   : > { %v4131_v4 = vsel %vm722_vm3, %v4067_v60, %v3939_v8  ;;  %v4286_v62 = vrot.slane %v4284_v43, 1  ;;  %v3083_v3 = vpop.f32.mrf.mxu0  ;;  %v3935_v50 = vpop.permute.xlu0 %3934 }
 0x2c3   : > { %v4288_v1 = vshll.u32 %v4131_v4, 16  ;;  %v3232_v48 = vadd.f32 %v8356_v19, %v3200_v23  ;;  %v3198_v5 = vmul.f32 %v8348_v27, %v3083_v3  ;;  %v4127_v56 = vsel %vm722_vm3, %v4063_v31, %v3935_v50 }
 0x2c4   : > { %v4278_v55 = vshll.u32 %v4127_v56, 16  ;;  %v5706_v6 = vpop.f32.mrf.mxu0  ;;  %v4287_v53 = vor.u32 %v4286_v62, %v4282_v44 }
 0x2c5   : > { %v4290_v61 = vrot.slane %v4288_v1, 1  ;;  %v2811_v16 = vpop.permute.xlu1 %2810  ;;  %v3264_v52 = vmax.f32 %v3232_v48, 0.0  ;;  %v3230_v54 = vadd.f32 %v8356_v19, %v3198_v5  ;;  %v3201_v57 = vmul.f32 %v8348_v27, %v5706_v6 }
 0x2c6   : > { %v4280_v45 = vrot.slane %v4278_v55, 1  ;;  %v3086_v28 = vpop.f32.mrf.mxu0  ;;  %v2809_v20 = vpop.permute.xlu0 %2808  ;;  %v2927_v15 = vsel %vm656_vm1, %v8103_v35, %v2811_v16 }
 0x2c7   : > { %5444 = vst.msk [vmem:[%s7420_s21 + $0x230] sm:$0xff] %vm689_vm2, %v3264_v52  ;;  %v3262_v0 = vmax.f32 %v3230_v54, 0.0  ;;  %v3233_v7 = vadd.f32 %v8356_v19, %v3201_v57  ;;  %v3199_v34 = vmul.f32 %v8348_v27, %v3086_v28  ;;  %v4291_v2 = vsel %vm347_vm0, %v4287_v53, %v4290_v61 }
 0x2c8   : > { %v4281_v12 = vsel %vm347_vm0, %v4277_v41, %v4280_v45  ;;  %v2925_v33 = vsel %vm656_vm1, %v8018_v21, %v2809_v20 }
 0x2c9   : > { %v2848_v37 = vpop.permute.xlu1 %2847  ;;  %5442 = vst.msk [vmem:[%s7420_s21 + $0x220] sm:$0xff] %vm689_vm2, %v3262_v0  ;;  %v3265_v25 = vmax.f32 %v3233_v7, 0.0  ;;  %v3231_v32 = vadd.f32 %v8356_v19, %v3199_v34  ;;  %5761 = vmatprep.mubr.msk.bf16.mxu1 %vm763_vm4, %v4281_v12 }
 0x2ca   : > { %5762 = vmatmul.mubr.msk.bf16.gmra.mxu1 %vm763_vm4, %v4291_v2  ;;  %v2846_v11 = vpop.permute.xlu0 %2845  ;;  %v2959_v18 = vsel %vm689_vm2, %v2927_v15, %v2848_v37 }
 0x2cb   : > { %5445 = vst.msk [vmem:[%s7420_s21 + $0x238] sm:$0xff] %vm689_vm2, %v3265_v25  ;;  %v3263_v42 = vmax.f32 %v3231_v32, 0.0  ;;  %v2957_v51 = vsel %vm689_vm2, %v2925_v33, %v2846_v11 }
 0x2cd   : > { %v2895_v49 = vpop.permute.xlu1 %2894  ;;  %5443 = vst.msk [vmem:[%s7420_s21 + $0x228] sm:$0xff] %vm689_vm2, %v3263_v42 }
 0x2ce   : > { %v2991_v17 = vsel %vm722_vm3, %v2959_v18, %v2895_v49  ;;  %v2893_v22 = vpop.permute.xlu0 %2892 }
 0x2cf   : > { %v2989_v29 = vsel %vm722_vm3, %v2957_v51, %v2893_v22 }
 0x2d0   : > { %5727 = vmatprep.mubr.msk.bf16.mxu0 %vm763_vm4, %v2989_v29 }
 0x2d1   : > { %5728 = vmatmul.mubr.msk.bf16.gmra.mxu0 %vm763_vm4, %v2991_v17 }
 0x2d6   : > { %v5743_v35 = vpop.f32.mrf.mxu1 }
 0x2d7   : > { %v4520_v59 = vmul.f32 %v8348_v27, %v5743_v35 }
 0x2d8   : > { %v4415_v21 = vpop.f32.mrf.mxu1 }
 0x2d9   : > { %v4552_v36 = vadd.f32 %v8356_v19, %v4520_v59  ;;  %v4518_v39 = vmul.f32 %v8348_v27, %v4415_v21 }
 0x2da   : > { %v5744_v26 = vpop.f32.mrf.mxu1 }
 0x2db   : > { %v4584_v14 = vmax.f32 %v4552_v36, 0.0  ;;  %v4550_v24 = vadd.f32 %v8356_v19, %v4518_v39  ;;  %v4521_v38 = vmul.f32 %v8348_v27, %v5744_v26 }
 0x2dc   : > { %v4418_v30 = vpop.f32.mrf.mxu1 }
 0x2dd   : > { %5533 = vst.msk [vmem:[%s7420_s21 + $0x350] sm:$0xff] %vm689_vm2, %v4584_v14  ;;  %v4582_v13 = vmax.f32 %v4550_v24, 0.0  ;;  %v4553_v40 = vadd.f32 %v8356_v19, %v4521_v38  ;;  %v4519_v46 = vmul.f32 %v8348_v27, %v4418_v30 }
 0x2df   : > { %5531 = vst.msk [vmem:[%s7420_s21 + $0x340] sm:$0xff] %vm689_vm2, %v4582_v13  ;;  %v4585_v60 = vmax.f32 %v4553_v40, 0.0  ;;  %v4551_v43 = vadd.f32 %v8356_v19, %v4519_v46 }
 0x2e1   : > { %5534 = vst.msk [vmem:[%s7420_s21 + $0x358] sm:$0xff] %vm689_vm2, %v4585_v60  ;;  %v4583_v47 = vmax.f32 %v4551_v43, 0.0 }
 0x2e3   : > { %5532 = vst.msk [vmem:[%s7420_s21 + $0x348] sm:$0xff] %vm689_vm2, %v4583_v47 }
 0x2e4   : > { %v5709_v8 = vpop.f32.mrf.mxu0 }
 0x2e5   : > { %v3204_v58 = vmul.f32 %v8348_v27, %v5709_v8 }
 0x2e6   : > { %v3099_v63 = vpop.f32.mrf.mxu0 }
 0x2e7   : > { %v3236_v23 = vadd.f32 %v8356_v19, %v3204_v58  ;;  %v3202_v4 = vmul.f32 %v8348_v27, %v3099_v63 }
 0x2e8   : > { %v5710_v10 = vpop.f32.mrf.mxu0 }
 0x2e9   : > { %v3268_v31 = vmax.f32 %v3236_v23, 0.0  ;;  %v3234_v62 = vadd.f32 %v8356_v19, %v3202_v4  ;;  %v3205_v1 = vmul.f32 %v8348_v27, %v5710_v10 }
 0x2ea   : > { %v3102_v3 = vpop.f32.mrf.mxu0 }
 0x2eb   : > { %5448 = vst.msk [vmem:[%s7420_s21 + $0x250] sm:$0xff] %vm689_vm2, %v3268_v31  ;;  %v3266_v50 = vmax.f32 %v3234_v62, 0.0  ;;  %v3237_v44 = vadd.f32 %v8356_v19, %v3205_v1  ;;  %v3203_v48 = vmul.f32 %v8348_v27, %v3102_v3 }
 0x2ed   : > { %5446 = vst.msk [vmem:[%s7420_s21 + $0x240] sm:$0xff] %vm689_vm2, %v3266_v50  ;;  %v3269_v5 = vmax.f32 %v3237_v44, 0.0  ;;  %v3235_v56 = vadd.f32 %v8356_v19, %v3203_v48 }
 0x2ef   : > { %5449 = vst.msk [vmem:[%s7420_s21 + $0x258] sm:$0xff] %vm689_vm2, %v3269_v5  ;;  %v3267_v9 = vmax.f32 %v3235_v56, 0.0 }
 0x2f1   : > { %5447 = vst.msk [vmem:[%s7420_s21 + $0x248] sm:$0xff] %vm689_vm2, %v3267_v9 }
 0x2fa   : > { %v5747_v61 = vpop.f32.mrf.mxu1 }
 0x2fb   : > { %v4524_v55 = vmul.f32 %v8348_v27, %v5747_v61 }
 0x2fc   : > { %v4431_v6 = vpop.f32.mrf.mxu1 }
 0x2fd   : > { %v4556_v16 = vadd.f32 %v8356_v19, %v4524_v55  ;;  %v4522_v53 = vmul.f32 %v8348_v27, %v4431_v6 }
 0x2fe   : > { %v5748_v52 = vpop.f32.mrf.mxu1 }
 0x2ff   : > { %v4588_v54 = vmax.f32 %v4556_v16, 0.0  ;;  %v4554_v57 = vadd.f32 %v8356_v19, %v4522_v53  ;;  %v4525_v41 = vmul.f32 %v8348_v27, %v5748_v52 }
 0x300   : > { %v4434_v45 = vpop.f32.mrf.mxu1 }
 0x301   : > { %5537 = vst.msk [vmem:[%s7420_s21 + $0x370] sm:$0xff] %vm689_vm2, %v4588_v54  ;;  %v4586_v28 = vmax.f32 %v4554_v57, 0.0  ;;  %v4557_v20 = vadd.f32 %v8356_v19, %v4525_v41  ;;  %v4523_v0 = vmul.f32 %v8348_v27, %v4434_v45 }
 0x303   : > { %5535 = vst.msk [vmem:[%s7420_s21 + $0x360] sm:$0xff] %vm689_vm2, %v4586_v28  ;;  %v4589_v7 = vmax.f32 %v4557_v20, 0.0  ;;  %v4555_v34 = vadd.f32 %v8356_v19, %v4523_v0 }
 0x305   : > { %5538 = vst.msk [vmem:[%s7420_s21 + $0x378] sm:$0xff] %vm689_vm2, %v4589_v7  ;;  %v4587_v2 = vmax.f32 %v4555_v34, 0.0 }
 0x307   : > { %5536 = vst.msk [vmem:[%s7420_s21 + $0x368] sm:$0xff] %vm689_vm2, %v4587_v2 }
 0x308   : > { %v5713_v12 = vpop.f32.mrf.mxu0 }
 0x309   : > { %v3208_v37 = vmul.f32 %v8348_v27, %v5713_v12 }
 0x30a   : > { %v3115_v25 = vpop.f32.mrf.mxu0 }
 0x30b   : > { %v3240_v32 = vadd.f32 %v8356_v19, %v3208_v37  ;;  %v3206_v11 = vmul.f32 %v8348_v27, %v3115_v25 }
 0x30c   : > { %v5714_v42 = vpop.f32.mrf.mxu0 }
 0x30d   : > { %v3272_v15 = vmax.f32 %v3240_v32, 0.0  ;;  %v3238_v49 = vadd.f32 %v8356_v19, %v3206_v11  ;;  %v3209_v33 = vmul.f32 %v8348_v27, %v5714_v42 }
 0x30e   : > { %v3118_v18 = vpop.f32.mrf.mxu0 }
 0x30f   : > { %5452 = vst.msk [vmem:[%s7420_s21 + $0x270] sm:$0xff] %vm689_vm2, %v3272_v15  ;;  %v3270_v51 = vmax.f32 %v3238_v49, 0.0  ;;  %v3241_v17 = vadd.f32 %v8356_v19, %v3209_v33  ;;  %v3207_v22 = vmul.f32 %v8348_v27, %v3118_v18 }
 0x311   : > { %5450 = vst.msk [vmem:[%s7420_s21 + $0x260] sm:$0xff] %vm689_vm2, %v3270_v51  ;;  %v3273_v29 = vmax.f32 %v3241_v17, 0.0  ;;  %v3239_v35 = vadd.f32 %v8356_v19, %v3207_v22 }
 0x313   : > { %5453 = vst.msk [vmem:[%s7420_s21 + $0x278] sm:$0xff] %vm689_vm2, %v3273_v29  ;;  %v3271_v59 = vmax.f32 %v3239_v35, 0.0 }
 0x315   : > { %5451 = vst.msk [vmem:[%s7420_s21 + $0x268] sm:$0xff] %vm689_vm2, %v3271_v59 }
 0x31e   : > { %v5751_v21 = vpop.f32.mrf.mxu1 }
 0x31f   : > { %v4528_v36 = vmul.f32 %v8348_v27, %v5751_v21 }
 0x320   : > { %v4447_v39 = vpop.f32.mrf.mxu1 }
 0x321   : > { %v4560_v26 = vadd.f32 %v8356_v19, %v4528_v36  ;;  %v4526_v14 = vmul.f32 %v8348_v27, %v4447_v39 }
 0x322   : > { %v5752_v24 = vpop.f32.mrf.mxu1 }
 0x323   : > { %v4592_v38 = vmax.f32 %v4560_v26, 0.0  ;;  %v4558_v30 = vadd.f32 %v8356_v19, %v4526_v14  ;;  %v4529_v13 = vmul.f32 %v8348_v27, %v5752_v24 }
 0x324   : > { %v4450_v40 = vpop.f32.mrf.mxu1 }
 0x325   : > { %5541 = vst.msk [vmem:[%s7420_s21 + $0x390] sm:$0xff] %vm689_vm2, %v4592_v38  ;;  %v4590_v46 = vmax.f32 %v4558_v30, 0.0  ;;  %v4561_v60 = vadd.f32 %v8356_v19, %v4529_v13  ;;  %v4527_v43 = vmul.f32 %v8348_v27, %v4450_v40 }
 0x327   : > { %5539 = vst.msk [vmem:[%s7420_s21 + $0x380] sm:$0xff] %vm689_vm2, %v4590_v46  ;;  %v4593_v47 = vmax.f32 %v4561_v60, 0.0  ;;  %v4559_v8 = vadd.f32 %v8356_v19, %v4527_v43 }
 0x329   : > { %5542 = vst.msk [vmem:[%s7420_s21 + $0x398] sm:$0xff] %vm689_vm2, %v4593_v47  ;;  %v4591_v58 = vmax.f32 %v4559_v8, 0.0 }
 0x32b   : > { %5540 = vst.msk [vmem:[%s7420_s21 + $0x388] sm:$0xff] %vm689_vm2, %v4591_v58 }
 0x32c   : > { %v5717_v63 = vpop.f32.mrf.mxu0 }
 0x32d   : > { %v3212_v23 = vmul.f32 %v8348_v27, %v5717_v63 }
 0x32e   : > { %v3131_v4 = vpop.f32.mrf.mxu0 }
 0x32f   : > { %v3244_v10 = vadd.f32 %v8356_v19, %v3212_v23  ;;  %v3210_v31 = vmul.f32 %v8348_v27, %v3131_v4 }
 0x330   : > { %v5718_v62 = vpop.f32.mrf.mxu0 }
 0x331   : > { %v3276_v1 = vmax.f32 %v3244_v10, 0.0  ;;  %v3242_v3 = vadd.f32 %v8356_v19, %v3210_v31  ;;  %v3213_v50 = vmul.f32 %v8348_v27, %v5718_v62 }
 0x332   : > { %v3134_v44 = vpop.f32.mrf.mxu0 }
 0x333   : > { %5456 = vst.msk [vmem:[%s7420_s21 + $0x290] sm:$0xff] %vm689_vm2, %v3276_v1  ;;  %v3274_v48 = vmax.f32 %v3242_v3, 0.0  ;;  %v3245_v5 = vadd.f32 %v8356_v19, %v3213_v50  ;;  %v3211_v56 = vmul.f32 %v8348_v27, %v3134_v44 }
 0x335   : > { %5454 = vst.msk [vmem:[%s7420_s21 + $0x280] sm:$0xff] %vm689_vm2, %v3274_v48  ;;  %v3277_v9 = vmax.f32 %v3245_v5, 0.0  ;;  %v3243_v61 = vadd.f32 %v8356_v19, %v3211_v56 }
 0x337   : > { %5457 = vst.msk [vmem:[%s7420_s21 + $0x298] sm:$0xff] %vm689_vm2, %v3277_v9  ;;  %v3275_v55 = vmax.f32 %v3243_v61, 0.0 }
 0x339   : > { %5455 = vst.msk [vmem:[%s7420_s21 + $0x288] sm:$0xff] %vm689_vm2, %v3275_v55 }
 0x343   : > { %v5755_v6 = vpop.f32.mrf.mxu1 }
 0x344   : > { %v4532_v16 = vmul.f32 %v8348_v27, %v5755_v6 }
 0x345   : > { %v4463_v53 = vpop.f32.mrf.mxu1 }
 0x346   : > { %v4564_v52 = vadd.f32 %v8356_v19, %v4532_v16  ;;  %v4530_v54 = vmul.f32 %v8348_v27, %v4463_v53 }
 0x347   : > { %v5756_v57 = vpop.f32.mrf.mxu1 }
 0x348   : > { %v4596_v41 = vmax.f32 %v4564_v52, 0.0  ;;  %v4562_v45 = vadd.f32 %v8356_v19, %v4530_v54  ;;  %v4533_v28 = vmul.f32 %v8348_v27, %v5756_v57 }
 0x349   : > { %v4466_v20 = vpop.f32.mrf.mxu1 }
 0x34a   : > { %5545 = vst.msk [vmem:[%s7420_s21 + $0x3b0] sm:$0xff] %vm689_vm2, %v4596_v41  ;;  %v4594_v0 = vmax.f32 %v4562_v45, 0.0  ;;  %v4565_v7 = vadd.f32 %v8356_v19, %v4533_v28  ;;  %v4531_v34 = vmul.f32 %v8348_v27, %v4466_v20 }
 0x34c   : > { %5543 = vst.msk [vmem:[%s7420_s21 + $0x3a0] sm:$0xff] %vm689_vm2, %v4594_v0  ;;  %v4597_v2 = vmax.f32 %v4565_v7, 0.0  ;;  %v4563_v12 = vadd.f32 %v8356_v19, %v4531_v34 }
 0x34e   : > { %5546 = vst.msk [vmem:[%s7420_s21 + $0x3b8] sm:$0xff] %vm689_vm2, %v4597_v2  ;;  %v4595_v37 = vmax.f32 %v4563_v12, 0.0 }
 0x350   : > { %5544 = vst.msk [vmem:[%s7420_s21 + $0x3a8] sm:$0xff] %vm689_vm2, %v4595_v37  ;;  %v5721_v25 = vpop.f32.mrf.mxu0 }
 0x351   : > { %v3216_v32 = vmul.f32 %v8348_v27, %v5721_v25 }
 0x352   : > { %v3147_v11 = vpop.f32.mrf.mxu0 }
 0x353   : > { %v3248_v42 = vadd.f32 %v8356_v19, %v3216_v32  ;;  %v3214_v15 = vmul.f32 %v8348_v27, %v3147_v11 }
 0x354   : > { %v5722_v49 = vpop.f32.mrf.mxu0 }
 0x355   : > { %v3280_v33 = vmax.f32 %v3248_v42, 0.0  ;;  %v3246_v18 = vadd.f32 %v8356_v19, %v3214_v15  ;;  %v3217_v51 = vmul.f32 %v8348_v27, %v5722_v49 }
 0x356   : > { %v3150_v17 = vpop.f32.mrf.mxu0 }
 0x357   : > { %5460 = vst.msk [vmem:[%s7420_s21 + $0x2b0] sm:$0xff] %vm689_vm2, %v3280_v33  ;;  %v3278_v22 = vmax.f32 %v3246_v18, 0.0  ;;  %v3249_v29 = vadd.f32 %v8356_v19, %v3217_v51  ;;  %v3215_v35 = vmul.f32 %v8348_v27, %v3150_v17 }
 0x359   : > { %5458 = vst.msk [vmem:[%s7420_s21 + $0x2a0] sm:$0xff] %vm689_vm2, %v3278_v22  ;;  %v3281_v59 = vmax.f32 %v3249_v29, 0.0  ;;  %v3247_v21 = vadd.f32 %v8356_v19, %v3215_v35 }
 0x35b   : > { %5461 = vst.msk [vmem:[%s7420_s21 + $0x2b8] sm:$0xff] %vm689_vm2, %v3281_v59  ;;  %v3279_v36 = vmax.f32 %v3247_v21, 0.0 }
 0x35d   : > { %5459 = vst.msk [vmem:[%s7420_s21 + $0x2a8] sm:$0xff] %vm689_vm2, %v3279_v36 }
 0x366   : > { %v5759_v39 = vpop.f32.mrf.mxu1 }
 0x367   : > { %v4536_v26 = vmul.f32 %v8348_v27, %v5759_v39 }
 0x368   : > { %v4479_v14 = vpop.f32.mrf.mxu1 }
 0x369   : > { %v4568_v24 = vadd.f32 %v8356_v19, %v4536_v26  ;;  %v4534_v38 = vmul.f32 %v8348_v27, %v4479_v14  ;;  %v4935_v14 = vld [vmem:[%s7420_s21 + $0x10] sm:$0xff] (%p6100_p4) }
 0x36a   : > { %v5760_v30 = vpop.f32.mrf.mxu1  ;;  %4936 = vst [vmem:[%s8620_s6 + $0x10] sm:$0xff] (%p6100_p4), %v4935_v14  ;;  %v5063_v14 = vld [vmem:[%s7420_s21 + $0x210] sm:$0xff] (%p6100_p4) }
 0x36b   : > { %v4600_v13 = vmax.f32 %v4568_v24, 0.0  ;;  %v4566_v40 = vadd.f32 %v8356_v19, %v4534_v38  ;;  %v4537_v46 = vmul.f32 %v8348_v27, %v5760_v30  ;;  %v4937_v24 = vld [vmem:[%s7420_s21 + $0x18] sm:$0xff] (%p6100_p4)  ;;  %v4939_v38 = vld [vmem:[%s7420_s21 + $0x20] sm:$0xff] (%p6100_p4)  ;;  %v4941_v30 = vld [vmem:[%s7420_s21 + $0x28] sm:$0xff] (%p6100_p4)  ;;  %5064 = vst [vmem:[%s8620_s6 + $0x410] sm:$0xff] (%p6100_p4), %v5063_v14 }
 0x36c   : > { %v4482_v60 = vpop.f32.mrf.mxu1  ;;  %4938 = vst [vmem:[%s8620_s6 + $0x18] sm:$0xff] (%p6100_p4), %v4937_v24  ;;  %4940 = vst [vmem:[%s8620_s6 + $0x20] sm:$0xff] (%p6100_p4), %v4939_v38  ;;  %v5065_v24 = vld [vmem:[%s7420_s21 + $0x218] sm:$0xff] (%p6100_p4)  ;;  %v5067_v38 = vld [vmem:[%s7420_s21 + $0x220] sm:$0xff] (%p6100_p4) }
 0x36d   : > { %5549 = vst.msk [vmem:[%s7420_s21 + $0x3d0] sm:$0xff] %vm689_vm2, %v4600_v13  ;;  %v4598_v43 = vmax.f32 %v4566_v40, 0.0  ;;  %v4569_v47 = vadd.f32 %v8356_v19, %v4537_v46  ;;  %v4535_v8 = vmul.f32 %v8348_v27, %v4482_v60  ;;  %4942 = vst [vmem:[%s8620_s6 + $0x28] sm:$0xff] (%p6100_p4), %v4941_v30  ;;  %v4943_v13 = vld [vmem:[%s7420_s21 + $0x30] sm:$0xff] (%p6100_p4)  ;;  %v4945_v40 = vld [vmem:[%s7420_s21 + $0x38] sm:$0xff] (%p6100_p4) }
 0x36e   : > { %v4947_v46 = vld [vmem:[%s7420_s21 + $0x40] sm:$0xff] (%p6100_p4)  ;;  %4944 = vst [vmem:[%s8620_s6 + $0x30] sm:$0xff] (%p6100_p4), %v4943_v13  ;;  %4946 = vst [vmem:[%s8620_s6 + $0x38] sm:$0xff] (%p6100_p4), %v4945_v40  ;;  %v4949_v60 = vld [vmem:[%s7420_s21 + $0x48] sm:$0xff] (%p6100_p4) }
 0x36f   : > { %5547 = vst.msk [vmem:[%s7420_s21 + $0x3c0] sm:$0xff] %vm689_vm2, %v4598_v43  ;;  %v4601_v58 = vmax.f32 %v4569_v47, 0.0  ;;  %v4567_v63 = vadd.f32 %v8356_v19, %v4535_v8  ;;  %4948 = vst [vmem:[%s8620_s6 + $0x40] sm:$0xff] (%p6100_p4), %v4947_v46  ;;  %v4951_v43 = vld [vmem:[%s7420_s21 + $0x50] sm:$0xff] (%p6100_p4)  ;;  %v4953_v47 = vld [vmem:[%s7420_s21 + $0x58] sm:$0xff] (%p6100_p4) }
 0x370   : > { %4950 = vst [vmem:[%s8620_s6 + $0x48] sm:$0xff] (%p6100_p4), %v4949_v60  ;;  %4952 = vst [vmem:[%s8620_s6 + $0x50] sm:$0xff] (%p6100_p4), %v4951_v43  ;;  %v4955_v8 = vld [vmem:[%s7420_s21 + $0x60] sm:$0xff] (%p6100_p4)  ;;  %v5069_v30 = vld [vmem:[%s7420_s21 + $0x228] sm:$0xff] (%p6100_p4) }
 0x371   : > { %5550 = vst.msk [vmem:[%s7420_s21 + $0x3d8] sm:$0xff] %vm689_vm2, %v4601_v58  ;;  %v4599_v23 = vmax.f32 %v4567_v63, 0.0  ;;  %4954 = vst [vmem:[%s8620_s6 + $0x58] sm:$0xff] (%p6100_p4), %v4953_v47  ;;  %v4957_v58 = vld [vmem:[%s7420_s21 + $0x68] sm:$0xff] (%p6100_p4)  ;;  %v4959_v63 = vld [vmem:[%s7420_s21 + $0x70] sm:$0xff] (%p6100_p4) }
 0x372   : > { %4956 = vst [vmem:[%s8620_s6 + $0x60] sm:$0xff] (%p6100_p4), %v4955_v8  ;;  %4958 = vst [vmem:[%s8620_s6 + $0x68] sm:$0xff] (%p6100_p4), %v4957_v58  ;;  %v5071_v13 = vld [vmem:[%s7420_s21 + $0x230] sm:$0xff] (%p6100_p4)  ;;  %v5073_v40 = vld [vmem:[%s7420_s21 + $0x238] sm:$0xff] (%p6100_p4) }
 0x373   : > { %5548 = vst.msk [vmem:[%s7420_s21 + $0x3c8] sm:$0xff] %vm689_vm2, %v4599_v23  ;;  %4960 = vst [vmem:[%s8620_s6 + $0x70] sm:$0xff] (%p6100_p4), %v4959_v63  ;;  %v4961_v23 = vld [vmem:[%s7420_s21 + $0x78] sm:$0xff] (%p6100_p4)  ;;  %v5075_v46 = vld [vmem:[%s7420_s21 + $0x240] sm:$0xff] (%p6100_p4) }
 0x374   : > { %v5725_v4 = vpop.f32.mrf.mxu0  ;;  %4962 = vst [vmem:[%s8620_s6 + $0x78] sm:$0xff] (%p6100_p4), %v4961_v23  ;;  %5066 = vst [vmem:[%s8620_s6 + $0x418] sm:$0xff] (%p6100_p4), %v5065_v24  ;;  %v5077_v60 = vld [vmem:[%s7420_s21 + $0x248] sm:$0xff] (%p6100_p4)  ;;  %v5079_v43 = vld [vmem:[%s7420_s21 + $0x250] sm:$0xff] (%p6100_p4) }
 0x375   : > { %v3220_v10 = vmul.f32 %v8348_v27, %v5725_v4  ;;  %v4963_v4 = vld [vmem:[%s7420_s21 + $0x80] sm:$0xff] (%p6100_p4)  ;;  %5068 = vst [vmem:[%s8620_s6 + $0x420] sm:$0xff] (%p6100_p4), %v5067_v38  ;;  %5070 = vst [vmem:[%s8620_s6 + $0x428] sm:$0xff] (%p6100_p4), %v5069_v30  ;;  %v5081_v47 = vld [vmem:[%s7420_s21 + $0x258] sm:$0xff] (%p6100_p4) }
 0x376   : > { %v3163_v31 = vpop.f32.mrf.mxu0  ;;  %4964 = vst [vmem:[%s8620_s6 + $0x80] sm:$0xff] (%p6100_p4), %v4963_v4  ;;  %5072 = vst [vmem:[%s8620_s6 + $0x430] sm:$0xff] (%p6100_p4), %v5071_v13  ;;  %v5083_v8 = vld [vmem:[%s7420_s21 + $0x260] sm:$0xff] (%p6100_p4)  ;;  %v5085_v58 = vld [vmem:[%s7420_s21 + $0x268] sm:$0xff] (%p6100_p4) }
 0x377   : > { %v3252_v62 = vadd.f32 %v8356_v19, %v3220_v10  ;;  %v3218_v1 = vmul.f32 %v8348_v27, %v3163_v31  ;;  %v4965_v10 = vld [vmem:[%s7420_s21 + $0x88] sm:$0xff] (%p6100_p4)  ;;  %v4967_v31 = vld [vmem:[%s7420_s21 + $0x90] sm:$0xff] (%p6100_p4)  ;;  %5074 = vst [vmem:[%s8620_s6 + $0x438] sm:$0xff] (%p6100_p4), %v5073_v40  ;;  %5076 = vst [vmem:[%s8620_s6 + $0x440] sm:$0xff] (%p6100_p4), %v5075_v46 }
 0x378   : > { %v5726_v3 = vpop.f32.mrf.mxu0  ;;  %4966 = vst [vmem:[%s8620_s6 + $0x88] sm:$0xff] (%p6100_p4), %v4965_v10  ;;  %4968 = vst [vmem:[%s8620_s6 + $0x90] sm:$0xff] (%p6100_p4), %v4967_v31  ;;  %v5087_v63 = vld [vmem:[%s7420_s21 + $0x270] sm:$0xff] (%p6100_p4)  ;;  %v5089_v23 = vld [vmem:[%s7420_s21 + $0x278] sm:$0xff] (%p6100_p4) }
 0x379   : > { %v3284_v50 = vmax.f32 %v3252_v62, 0.0  ;;  %v3250_v44 = vadd.f32 %v8356_v19, %v3218_v1  ;;  %v3221_v48 = vmul.f32 %v8348_v27, %v5726_v3  ;;  %v4969_v62 = vld [vmem:[%s7420_s21 + $0x98] sm:$0xff] (%p6100_p4)  ;;  %v4971_v1 = vld [vmem:[%s7420_s21 + $0xa0] sm:$0xff] (%p6100_p4)  ;;  %v4973_v3 = vld [vmem:[%s7420_s21 + $0xa8] sm:$0xff] (%p6100_p4)  ;;  %5078 = vst [vmem:[%s8620_s6 + $0x448] sm:$0xff] (%p6100_p4), %v5077_v60 }
 0x37a   : > { %v3166_v5 = vpop.f32.mrf.mxu0  ;;  %4970 = vst [vmem:[%s8620_s6 + $0x98] sm:$0xff] (%p6100_p4), %v4969_v62  ;;  %4972 = vst [vmem:[%s8620_s6 + $0xa0] sm:$0xff] (%p6100_p4), %v4971_v1  ;;  %v5091_v4 = vld [vmem:[%s7420_s21 + $0x280] sm:$0xff] (%p6100_p4)  ;;  %v5093_v10 = vld [vmem:[%s7420_s21 + $0x288] sm:$0xff] (%p6100_p4) }
 0x37b   : > { %5464 = vst.msk [vmem:[%s7420_s21 + $0x2d0] sm:$0xff] %vm689_vm2, %v3284_v50  ;;  %v3282_v56 = vmax.f32 %v3250_v44, 0.0  ;;  %v3253_v9 = vadd.f32 %v8356_v19, %v3221_v48  ;;  %v3219_v61 = vmul.f32 %v8348_v27, %v3166_v5  ;;  %v4975_v50 = vld [vmem:[%s7420_s21 + $0xb0] sm:$0xff] (%p6100_p4)  ;;  %v4977_v44 = vld [vmem:[%s7420_s21 + $0xb8] sm:$0xff] (%p6100_p4)  ;;  %4974 = vst [vmem:[%s8620_s6 + $0xa8] sm:$0xff] (%p6100_p4), %v4973_v3 }
 0x37c   : > { %4976 = vst [vmem:[%s8620_s6 + $0xb0] sm:$0xff] (%p6100_p4), %v4975_v50  ;;  %4978 = vst [vmem:[%s8620_s6 + $0xb8] sm:$0xff] (%p6100_p4), %v4977_v44  ;;  %v4979_v48 = vld [vmem:[%s7420_s21 + $0xc0] sm:$0xff] (%p6100_p4)  ;;  %v4981_v5 = vld [vmem:[%s7420_s21 + $0xc8] sm:$0xff] (%p6100_p4) }
 0x37d   : > { %5462 = vst.msk [vmem:[%s7420_s21 + $0x2c0] sm:$0xff] %vm689_vm2, %v3282_v56  ;;  %v3285_v55 = vmax.f32 %v3253_v9, 0.0  ;;  %v3251_v6 = vadd.f32 %v8356_v19, %v3219_v61  ;;  %v4983_v56 = vld [vmem:[%s7420_s21 + $0xd0] sm:$0xff] (%p6100_p4)  ;;  %4980 = vst [vmem:[%s8620_s6 + $0xc0] sm:$0xff] (%p6100_p4), %v4979_v48  ;;  %v4985_v9 = vld [vmem:[%s7420_s21 + $0xd8] sm:$0xff] (%p6100_p4) }
 0x37e   : > { %4982 = vst [vmem:[%s8620_s6 + $0xc8] sm:$0xff] (%p6100_p4), %v4981_v5  ;;  %4984 = vst [vmem:[%s8620_s6 + $0xd0] sm:$0xff] (%p6100_p4), %v4983_v56  ;;  %v4987_v61 = vld [vmem:[%s7420_s21 + $0xe0] sm:$0xff] (%p6100_p4)  ;;  %v5095_v31 = vld [vmem:[%s7420_s21 + $0x290] sm:$0xff] (%p6100_p4) }
 0x37f   : > { %5465 = vst.msk [vmem:[%s7420_s21 + $0x2d8] sm:$0xff] %vm689_vm2, %v3285_v55  ;;  %v3283_v16 = vmax.f32 %v3251_v6, 0.0  ;;  %v4989_v55 = vld [vmem:[%s7420_s21 + $0xe8] sm:$0xff] (%p6100_p4)  ;;  %4986 = vst [vmem:[%s8620_s6 + $0xd8] sm:$0xff] (%p6100_p4), %v4985_v9  ;;  %v4991_v6 = vld [vmem:[%s7420_s21 + $0xf0] sm:$0xff] (%p6100_p4) }
 0x380   : > { %4988 = vst [vmem:[%s8620_s6 + $0xe0] sm:$0xff] (%p6100_p4), %v4987_v61  ;;  %4990 = vst [vmem:[%s8620_s6 + $0xe8] sm:$0xff] (%p6100_p4), %v4989_v55  ;;  %v5097_v62 = vld [vmem:[%s7420_s21 + $0x298] sm:$0xff] (%p6100_p4)  ;;  %v5099_v1 = vld [vmem:[%s7420_s21 + $0x2a0] sm:$0xff] (%p6100_p4) }
 0x381   : > { %5463 = vst.msk [vmem:[%s7420_s21 + $0x2c8] sm:$0xff] %vm689_vm2, %v3283_v16  ;;  %v4993_v16 = vld [vmem:[%s7420_s21 + $0xf8] sm:$0xff] (%p6100_p4)  ;;  %4992 = vst [vmem:[%s8620_s6 + $0xf0] sm:$0xff] (%p6100_p4), %v4991_v6  ;;  %v5101_v3 = vld [vmem:[%s7420_s21 + $0x2a8] sm:$0xff] (%p6100_p4) }
 0x382   : > { %4994 = vst [vmem:[%s8620_s6 + $0xf8] sm:$0xff] (%p6100_p4), %v4993_v16  ;;  %5080 = vst [vmem:[%s8620_s6 + $0x450] sm:$0xff] (%p6100_p4), %v5079_v43  ;;  %v5103_v50 = vld [vmem:[%s7420_s21 + $0x2b0] sm:$0xff] (%p6100_p4)  ;;  %v5105_v44 = vld [vmem:[%s7420_s21 + $0x2b8] sm:$0xff] (%p6100_p4) }
 0x383   : > { %5082 = vst [vmem:[%s8620_s6 + $0x458] sm:$0xff] (%p6100_p4), %v5081_v47  ;;  %5084 = vst [vmem:[%s8620_s6 + $0x460] sm:$0xff] (%p6100_p4), %v5083_v8  ;;  %v5111_v56 = vld [vmem:[%s7420_s21 + $0x2d0] sm:$0xff] (%p6100_p4) }
 0x384   : > { %5086 = vst [vmem:[%s8620_s6 + $0x468] sm:$0xff] (%p6100_p4), %v5085_v58  ;;  %5088 = vst [vmem:[%s8620_s6 + $0x470] sm:$0xff] (%p6100_p4), %v5087_v63  ;;  %v5107_v48 = vld [vmem:[%s7420_s21 + $0x2c0] sm:$0xff] (%p6100_p4) }
 0x385   : > { %5090 = vst [vmem:[%s8620_s6 + $0x478] sm:$0xff] (%p6100_p4), %v5089_v23  ;;  %5092 = vst [vmem:[%s8620_s6 + $0x480] sm:$0xff] (%p6100_p4), %v5091_v4 }
 0x386   : > { %5094 = vst [vmem:[%s8620_s6 + $0x488] sm:$0xff] (%p6100_p4), %v5093_v10  ;;  %5096 = vst [vmem:[%s8620_s6 + $0x490] sm:$0xff] (%p6100_p4), %v5095_v31  ;;  %v5113_v9 = vld [vmem:[%s7420_s21 + $0x2d8] sm:$0xff] (%p6100_p4) }
 0x387   : > { %5098 = vst [vmem:[%s8620_s6 + $0x498] sm:$0xff] (%p6100_p4), %v5097_v62  ;;  %5100 = vst [vmem:[%s8620_s6 + $0x4a0] sm:$0xff] (%p6100_p4), %v5099_v1 }
 0x388   : > { %5102 = vst [vmem:[%s8620_s6 + $0x4a8] sm:$0xff] (%p6100_p4), %v5101_v3  ;;  %5104 = vst [vmem:[%s8620_s6 + $0x4b0] sm:$0xff] (%p6100_p4), %v5103_v50  ;;  %v5109_v5 = vld [vmem:[%s7420_s21 + $0x2c8] sm:$0xff] (%p6100_p4) }
 0x389   : > { %5106 = vst [vmem:[%s8620_s6 + $0x4b8] sm:$0xff] (%p6100_p4), %v5105_v44  ;;  %5108 = vst [vmem:[%s8620_s6 + $0x4c0] sm:$0xff] (%p6100_p4), %v5107_v48 }
 0x38a   : > { %v5763_v53 = vpop.f32.mrf.mxu1  ;;  %5110 = vst [vmem:[%s8620_s6 + $0x4c8] sm:$0xff] (%p6100_p4), %v5109_v5  ;;  %5112 = vst [vmem:[%s8620_s6 + $0x4d0] sm:$0xff] (%p6100_p4), %v5111_v56 }
 0x38b   : > { %v4540_v52 = vmul.f32 %v8348_v27, %v5763_v53  ;;  %v4995_v53 = vld [vmem:[%s7420_s21 + $0x100] sm:$0xff] (%p6100_p4)  ;;  %5114 = vst [vmem:[%s8620_s6 + $0x4d8] sm:$0xff] (%p6100_p4), %v5113_v9 }
 0x38c   : > { %v4495_v54 = vpop.f32.mrf.mxu1  ;;  %4996 = vst [vmem:[%s8620_s6 + $0x200] sm:$0xff] (%p6100_p4), %v4995_v53  ;;  %v5123_v53 = vld [vmem:[%s7420_s21 + $0x300] sm:$0xff] (%p6100_p4) }
 0x38d   : > { %v4572_v57 = vadd.f32 %v8356_v19, %v4540_v52  ;;  %v4538_v41 = vmul.f32 %v8348_v27, %v4495_v54  ;;  %v4997_v52 = vld [vmem:[%s7420_s21 + $0x108] sm:$0xff] (%p6100_p4)  ;;  %v4999_v54 = vld [vmem:[%s7420_s21 + $0x110] sm:$0xff] (%p6100_p4)  ;;  %5124 = vst [vmem:[%s8620_s6 + $0x600] sm:$0xff] (%p6100_p4), %v5123_v53 }
 0x38e   : > { %v5764_v45 = vpop.f32.mrf.mxu1  ;;  %4998 = vst [vmem:[%s8620_s6 + $0x208] sm:$0xff] (%p6100_p4), %v4997_v52  ;;  %5000 = vst [vmem:[%s8620_s6 + $0x210] sm:$0xff] (%p6100_p4), %v4999_v54  ;;  %v5125_v52 = vld [vmem:[%s7420_s21 + $0x308] sm:$0xff] (%p6100_p4)  ;;  %v5127_v54 = vld [vmem:[%s7420_s21 + $0x310] sm:$0xff] (%p6100_p4) }
 0x38f   : > { %v4604_v28 = vmax.f32 %v4572_v57, 0.0  ;;  %v4570_v20 = vadd.f32 %v8356_v19, %v4538_v41  ;;  %v4541_v0 = vmul.f32 %v8348_v27, %v5764_v45  ;;  %v5001_v57 = vld [vmem:[%s7420_s21 + $0x118] sm:$0xff] (%p6100_p4)  ;;  %v5003_v41 = vld [vmem:[%s7420_s21 + $0x120] sm:$0xff] (%p6100_p4)  ;;  %v5005_v45 = vld [vmem:[%s7420_s21 + $0x128] sm:$0xff] (%p6100_p4)  ;;  %5126 = vst [vmem:[%s8620_s6 + $0x608] sm:$0xff] (%p6100_p4), %v5125_v52 }
 0x390   : > { %v4498_v7 = vpop.f32.mrf.mxu1  ;;  %5002 = vst [vmem:[%s8620_s6 + $0x218] sm:$0xff] (%p6100_p4), %v5001_v57  ;;  %5004 = vst [vmem:[%s8620_s6 + $0x220] sm:$0xff] (%p6100_p4), %v5003_v41  ;;  %v5129_v57 = vld [vmem:[%s7420_s21 + $0x318] sm:$0xff] (%p6100_p4)  ;;  %v5131_v41 = vld [vmem:[%s7420_s21 + $0x320] sm:$0xff] (%p6100_p4) }
 0x391   : > { %5553 = vst.msk [vmem:[%s7420_s21 + $0x3f0] sm:$0xff] %vm689_vm2, %v4604_v28  ;;  %v4602_v34 = vmax.f32 %v4570_v20, 0.0  ;;  %v4573_v2 = vadd.f32 %v8356_v19, %v4541_v0  ;;  %v4539_v12 = vmul.f32 %v8348_v27, %v4498_v7  ;;  %v5729_v37 = vpop.f32.mrf.mxu0  ;;  %v5007_v28 = vld [vmem:[%s7420_s21 + $0x130] sm:$0xff] (%p6100_p4)  ;;  %5006 = vst [vmem:[%s8620_s6 + $0x228] sm:$0xff] (%p6100_p4), %v5005_v45  ;;  %v5009_v20 = vld [vmem:[%s7420_s21 + $0x138] sm:$0xff] (%p6100_p4) }
 0x392   : > { %v3224_v25 = vmul.f32 %v8348_v27, %v5729_v37  ;;  %5008 = vst [vmem:[%s8620_s6 + $0x230] sm:$0xff] (%p6100_p4), %v5007_v28  ;;  %v5011_v0 = vld [vmem:[%s7420_s21 + $0x140] sm:$0xff] (%p6100_p4)  ;;  %v5013_v7 = vld [vmem:[%s7420_s21 + $0x148] sm:$0xff] (%p6100_p4)  ;;  %5010 = vst [vmem:[%s8620_s6 + $0x238] sm:$0xff] (%p6100_p4), %v5009_v20 }
 0x393   : > { %5551 = vst.msk [vmem:[%s7420_s21 + $0x3e0] sm:$0xff] %vm689_vm2, %v4602_v34  ;;  %v4605_v32 = vmax.f32 %v4573_v2, 0.0  ;;  %v4571_v11 = vadd.f32 %v8356_v19, %v4539_v12  ;;  %v3179_v42 = vpop.f32.mrf.mxu0  ;;  %5012 = vst [vmem:[%s8620_s6 + $0x240] sm:$0xff] (%p6100_p4), %v5011_v0  ;;  %v5015_v34 = vld [vmem:[%s7420_s21 + $0x150] sm:$0xff] (%p6100_p4)  ;;  %v5017_v2 = vld [vmem:[%s7420_s21 + $0x158] sm:$0xff] (%p6100_p4) }
 0x394   : > { %v3256_v15 = vadd.f32 %v8356_v19, %v3224_v25  ;;  %v3222_v49 = vmul.f32 %v8348_v27, %v3179_v42  ;;  %5014 = vst [vmem:[%s8620_s6 + $0x248] sm:$0xff] (%p6100_p4), %v5013_v7  ;;  %v5019_v12 = vld [vmem:[%s7420_s21 + $0x160] sm:$0xff] (%p6100_p4)  ;;  %5016 = vst [vmem:[%s8620_s6 + $0x250] sm:$0xff] (%p6100_p4), %v5015_v34  ;;  %v5021_v37 = vld [vmem:[%s7420_s21 + $0x168] sm:$0xff] (%p6100_p4) }
 0x395   : > { %5554 = vst.msk [vmem:[%s7420_s21 + $0x3f8] sm:$0xff] %vm689_vm2, %v4605_v32  ;;  %v4603_v33 = vmax.f32 %v4571_v11, 0.0  ;;  %v5730_v18 = vpop.f32.mrf.mxu0  ;;  %5018 = vst [vmem:[%s8620_s6 + $0x258] sm:$0xff] (%p6100_p4), %v5017_v2  ;;  %v5023_v25 = vld [vmem:[%s7420_s21 + $0x170] sm:$0xff] (%p6100_p4)  ;;  %v5025_v32 = vld [vmem:[%s7420_s21 + $0x178] sm:$0xff] (%p6100_p4) }
 0x396   : > { %v3288_v51 = vmax.f32 %v3256_v15, 0.0  ;;  %v3254_v17 = vadd.f32 %v8356_v19, %v3222_v49  ;;  %v3225_v22 = vmul.f32 %v8348_v27, %v5730_v18  ;;  %5020 = vst [vmem:[%s8620_s6 + $0x260] sm:$0xff] (%p6100_p4), %v5019_v12  ;;  %5022 = vst [vmem:[%s8620_s6 + $0x268] sm:$0xff] (%p6100_p4), %v5021_v37  ;;  %v5027_v11 = vld [vmem:[%s7420_s21 + $0x180] sm:$0xff] (%p6100_p4)  ;;  %v5029_v42 = vld [vmem:[%s7420_s21 + $0x188] sm:$0xff] (%p6100_p4) }
 0x397   : > { %5552 = vst.msk [vmem:[%s7420_s21 + $0x3e8] sm:$0xff] %vm689_vm2, %v4603_v33  ;;  %v3182_v29 = vpop.f32.mrf.mxu0  ;;  %5024 = vst [vmem:[%s8620_s6 + $0x270] sm:$0xff] (%p6100_p4), %v5023_v25  ;;  %v5031_v15 = vld [vmem:[%s7420_s21 + $0x190] sm:$0xff] (%p6100_p4)  ;;  %v5033_v49 = vld [vmem:[%s7420_s21 + $0x198] sm:$0xff] (%p6100_p4) }
 0x398   : > { %5468 = vst.msk [vmem:[%s7420_s21 + $0x2f0] sm:$0xff] %vm689_vm2, %v3288_v51  ;;  %v3286_v35 = vmax.f32 %v3254_v17, 0.0  ;;  %v3257_v59 = vadd.f32 %v8356_v19, %v3225_v22  ;;  %v3223_v21 = vmul.f32 %v8348_v27, %v3182_v29  ;;  %v4931_v27 = vld [vmem:[%s7420_s21] sm:$0xff] (%p6100_p4)  ;;  %5026 = vst [vmem:[%s8620_s6 + $0x278] sm:$0xff] (%p6100_p4), %v5025_v32  ;;  %v5037_v18 = vld [vmem:[%s7420_s21 + $0x1a8] sm:$0xff] (%p6100_p4) }
 0x399   : > { %4932 = vst [vmem:[%s8620_s6] sm:$0xff] (%p6100_p4), %v4931_v27  ;;  %5028 = vst [vmem:[%s8620_s6 + $0x280] sm:$0xff] (%p6100_p4), %v5027_v11  ;;  %v5035_v33 = vld [vmem:[%s7420_s21 + $0x1a0] sm:$0xff] (%p6100_p4)  ;;  %v5039_v51 = vld [vmem:[%s7420_s21 + $0x1b0] sm:$0xff] (%p6100_p4) }
 0x39a   : > { %5466 = vst.msk [vmem:[%s7420_s21 + $0x2e0] sm:$0xff] %vm689_vm2, %v3286_v35  ;;  %v3289_v36 = vmax.f32 %v3257_v59, 0.0  ;;  %v3255_v39 = vadd.f32 %v8356_v19, %v3223_v21  ;;  %4645 = sbr.rel (!%p6100_p4) target bundleno = 950 (0x3b6), region = 36  ;;  %v4933_v19 = vld [vmem:[%s7420_s21 + $0x8] sm:$0xff] (%p6100_p4)  ;;  %5030 = vst [vmem:[%s8620_s6 + $0x288] sm:$0xff] (%p6100_p4), %v5029_v42  ;;  %v5041_v17 = vld [vmem:[%s7420_s21 + $0x1b8] sm:$0xff] (%p6100_p4) }
 0x39b   : > { %4934 = vst [vmem:[%s8620_s6 + $0x8] sm:$0xff] (%p6100_p4), %v4933_v19  ;;  %5032 = vst [vmem:[%s8620_s6 + $0x290] sm:$0xff] (%p6100_p4), %v5031_v15  ;;  %v5043_v22 = vld [vmem:[%s7420_s21 + $0x1c0] sm:$0xff] (%p6100_p4)  ;;  %v5045_v29 = vld [vmem:[%s7420_s21 + $0x1c8] sm:$0xff] (%p6100_p4) }
 0x39c   : > { %5469 = vst.msk [vmem:[%s7420_s21 + $0x2f8] sm:$0xff] %vm689_vm2, %v3289_v36  ;;  %v3287_v26 = vmax.f32 %v3255_v39, 0.0  ;;  %5034 = vst [vmem:[%s8620_s6 + $0x298] sm:$0xff] (%p6100_p4), %v5033_v49  ;;  %v5047_v35 = vld [vmem:[%s7420_s21 + $0x1d0] sm:$0xff] (%p6100_p4)  ;;  %v5049_v59 = vld [vmem:[%s7420_s21 + $0x1d8] sm:$0xff] (%p6100_p4) }
 0x39d   : > { %5036 = vst [vmem:[%s8620_s6 + $0x2a0] sm:$0xff] (%p6100_p4), %v5035_v33  ;;  %5038 = vst [vmem:[%s8620_s6 + $0x2a8] sm:$0xff] (%p6100_p4), %v5037_v18  ;;  %v5051_v21 = vld [vmem:[%s7420_s21 + $0x1e0] sm:$0xff] (%p6100_p4)  ;;  %v5053_v36 = vld [vmem:[%s7420_s21 + $0x1e8] sm:$0xff] (%p6100_p4) }
 0x39e   : > { %5467 = vst.msk [vmem:[%s7420_s21 + $0x2e8] sm:$0xff] %vm689_vm2, %v3287_v26  ;;  %5040 = vst [vmem:[%s8620_s6 + $0x2b0] sm:$0xff] (%p6100_p4), %v5039_v51  ;;  %v5055_v39 = vld [vmem:[%s7420_s21 + $0x1f0] sm:$0xff] (%p6100_p4)  ;;  %v5057_v26 = vld [vmem:[%s7420_s21 + $0x1f8] sm:$0xff] (%p6100_p4) }
 0x39f   : > { %5042 = vst [vmem:[%s8620_s6 + $0x2b8] sm:$0xff] %v5041_v17  ;;  %5044 = vst [vmem:[%s8620_s6 + $0x2c0] sm:$0xff] %v5043_v22  ;;  %v5059_v27 = vld [vmem:[%s7420_s21 + $0x200] sm:$0xff]  ;;  %v5061_v19 = vld [vmem:[%s7420_s21 + $0x208] sm:$0xff] }
 0x3a0   : > { %5046 = vst [vmem:[%s8620_s6 + $0x2c8] sm:$0xff] %v5045_v29  ;;  %5048 = vst [vmem:[%s8620_s6 + $0x2d0] sm:$0xff] %v5047_v35  ;;  %v5119_v6 = vld [vmem:[%s7420_s21 + $0x2f0] sm:$0xff]  ;;  %v5133_v45 = vld [vmem:[%s7420_s21 + $0x328] sm:$0xff] }
 0x3a1   : > { %5050 = vst [vmem:[%s8620_s6 + $0x2d8] sm:$0xff] %v5049_v59  ;;  %5052 = vst [vmem:[%s8620_s6 + $0x2e0] sm:$0xff] %v5051_v21  ;;  %v5115_v61 = vld [vmem:[%s7420_s21 + $0x2e0] sm:$0xff]  ;;  %v5135_v28 = vld [vmem:[%s7420_s21 + $0x330] sm:$0xff] }
 0x3a2   : > { %5054 = vst [vmem:[%s8620_s6 + $0x2e8] sm:$0xff] %v5053_v36  ;;  %5056 = vst [vmem:[%s8620_s6 + $0x2f0] sm:$0xff] %v5055_v39  ;;  %v5137_v20 = vld [vmem:[%s7420_s21 + $0x338] sm:$0xff]  ;;  %v5139_v0 = vld [vmem:[%s7420_s21 + $0x340] sm:$0xff] }
 0x3a3   : > { %5058 = vst [vmem:[%s8620_s6 + $0x2f8] sm:$0xff] %v5057_v26  ;;  %5060 = vst [vmem:[%s8620_s6 + $0x400] sm:$0xff] %v5059_v27  ;;  %v5121_v16 = vld [vmem:[%s7420_s21 + $0x2f8] sm:$0xff]  ;;  %v5141_v7 = vld [vmem:[%s7420_s21 + $0x348] sm:$0xff] }
 0x3a4   : > { %5062 = vst [vmem:[%s8620_s6 + $0x408] sm:$0xff] %v5061_v19  ;;  %5116 = vst [vmem:[%s8620_s6 + $0x4e0] sm:$0xff] %v5115_v61  ;;  %v5143_v34 = vld [vmem:[%s7420_s21 + $0x350] sm:$0xff]  ;;  %v5145_v2 = vld [vmem:[%s7420_s21 + $0x358] sm:$0xff] }
 0x3a5   : > { %v5117_v55 = vld [vmem:[%s7420_s21 + $0x2e8] sm:$0xff]  ;;  %5120 = vst [vmem:[%s8620_s6 + $0x4f0] sm:$0xff] %v5119_v6  ;;  %5122 = vst [vmem:[%s8620_s6 + $0x4f8] sm:$0xff] %v5121_v16  ;;  %v5147_v12 = vld [vmem:[%s7420_s21 + $0x360] sm:$0xff] }
 0x3a6   : > { %5118 = vst [vmem:[%s8620_s6 + $0x4e8] sm:$0xff] %v5117_v55  ;;  %5128 = vst [vmem:[%s8620_s6 + $0x610] sm:$0xff] %v5127_v54  ;;  %v5149_v37 = vld [vmem:[%s7420_s21 + $0x368] sm:$0xff]  ;;  %v5151_v25 = vld [vmem:[%s7420_s21 + $0x370] sm:$0xff] }
 0x3a7   : > { %5130 = vst [vmem:[%s8620_s6 + $0x618] sm:$0xff] %v5129_v57  ;;  %5132 = vst [vmem:[%s8620_s6 + $0x620] sm:$0xff] %v5131_v41  ;;  %v5153_v32 = vld [vmem:[%s7420_s21 + $0x378] sm:$0xff]  ;;  %v5155_v11 = vld [vmem:[%s7420_s21 + $0x380] sm:$0xff] }
 0x3a8   : > { %5134 = vst [vmem:[%s8620_s6 + $0x628] sm:$0xff] %v5133_v45  ;;  %5136 = vst [vmem:[%s8620_s6 + $0x630] sm:$0xff] %v5135_v28  ;;  %v5157_v42 = vld [vmem:[%s7420_s21 + $0x388] sm:$0xff]  ;;  %v5159_v15 = vld [vmem:[%s7420_s21 + $0x390] sm:$0xff] }
 0x3a9   : > { %5138 = vst [vmem:[%s8620_s6 + $0x638] sm:$0xff] %v5137_v20  ;;  %5140 = vst [vmem:[%s8620_s6 + $0x640] sm:$0xff] %v5139_v0  ;;  %v5161_v49 = vld [vmem:[%s7420_s21 + $0x398] sm:$0xff]  ;;  %v5163_v33 = vld [vmem:[%s7420_s21 + $0x3a0] sm:$0xff] }
 0x3aa   : > { %5142 = vst [vmem:[%s8620_s6 + $0x648] sm:$0xff] %v5141_v7  ;;  %5144 = vst [vmem:[%s8620_s6 + $0x650] sm:$0xff] %v5143_v34  ;;  %v5165_v18 = vld [vmem:[%s7420_s21 + $0x3a8] sm:$0xff]  ;;  %v5167_v51 = vld [vmem:[%s7420_s21 + $0x3b0] sm:$0xff] }
 0x3ab   : > { %5146 = vst [vmem:[%s8620_s6 + $0x658] sm:$0xff] %v5145_v2  ;;  %5148 = vst [vmem:[%s8620_s6 + $0x660] sm:$0xff] %v5147_v12  ;;  %v5169_v17 = vld [vmem:[%s7420_s21 + $0x3b8] sm:$0xff]  ;;  %v5171_v22 = vld [vmem:[%s7420_s21 + $0x3c0] sm:$0xff] }
 0x3ac   : > { %5150 = vst [vmem:[%s8620_s6 + $0x668] sm:$0xff] %v5149_v37  ;;  %5152 = vst [vmem:[%s8620_s6 + $0x670] sm:$0xff] %v5151_v25  ;;  %v5173_v29 = vld [vmem:[%s7420_s21 + $0x3c8] sm:$0xff]  ;;  %v5175_v35 = vld [vmem:[%s7420_s21 + $0x3d0] sm:$0xff] }
 0x3ad   : > { %5154 = vst [vmem:[%s8620_s6 + $0x678] sm:$0xff] %v5153_v32  ;;  %5156 = vst [vmem:[%s8620_s6 + $0x680] sm:$0xff] %v5155_v11  ;;  %v5177_v59 = vld [vmem:[%s7420_s21 + $0x3d8] sm:$0xff]  ;;  %v5179_v21 = vld [vmem:[%s7420_s21 + $0x3e0] sm:$0xff] }
 0x3ae   : > { %5158 = vst [vmem:[%s8620_s6 + $0x688] sm:$0xff] %v5157_v42  ;;  %5160 = vst [vmem:[%s8620_s6 + $0x690] sm:$0xff] %v5159_v15  ;;  %v5181_v36 = vld [vmem:[%s7420_s21 + $0x3e8] sm:$0xff]  ;;  %v5183_v39 = vld [vmem:[%s7420_s21 + $0x3f0] sm:$0xff] }
 0x3af   : > { %5162 = vst [vmem:[%s8620_s6 + $0x698] sm:$0xff] %v5161_v49  ;;  %5164 = vst [vmem:[%s8620_s6 + $0x6a0] sm:$0xff] %v5163_v33  ;;  %v5185_v26 = vld [vmem:[%s7420_s21 + $0x3f8] sm:$0xff] }
 0x3b0   : > { %5166 = vst [vmem:[%s8620_s6 + $0x6a8] sm:$0xff] %v5165_v18  ;;  %5168 = vst [vmem:[%s8620_s6 + $0x6b0] sm:$0xff] %v5167_v51 }
 0x3b1   : > { %5170 = vst [vmem:[%s8620_s6 + $0x6b8] sm:$0xff] %v5169_v17  ;;  %5172 = vst [vmem:[%s8620_s6 + $0x6c0] sm:$0xff] %v5171_v22 }
 0x3b2   : > { %5174 = vst [vmem:[%s8620_s6 + $0x6c8] sm:$0xff] %v5173_v29  ;;  %5176 = vst [vmem:[%s8620_s6 + $0x6d0] sm:$0xff] %v5175_v35 }
 0x3b3   : > { %5178 = vst [vmem:[%s8620_s6 + $0x6d8] sm:$0xff] %v5177_v59  ;;  %5180 = vst [vmem:[%s8620_s6 + $0x6e0] sm:$0xff] %v5179_v21 }
 0x3b4   : > { %5182 = vst [vmem:[%s8620_s6 + $0x6e8] sm:$0xff] %v5181_v36  ;;  %5184 = vst [vmem:[%s8620_s6 + $0x6f0] sm:$0xff] %v5183_v39 }
 0x3b5   : > { %5186 = vst [vmem:[%s8620_s6 + $0x6f8] sm:$0xff] %v5185_v26 }
 0x3b6 PF: > { %p10_p8 = scmp.ge.s32.totalorder %s6090_s16, 4   ;;  %s8983_s12 = smov %s6046_s13 }
 0x3b7   : > { %s8984_s13 = smov %s6098_s19  ;;  %s8985_s14 = smov %s6090_s16 }
 0x3b8   :  { %12 = sbr.rel (!%p10_p8) target bundleno = 2 (0x2), region = 106 }

</bundles_post_ra>
